<compile_context>
chip_gen: v5e
topology: v5e:2x2
jax: 0.10.0
libtpu: 0.0.40
codegen_flags: <defaults>
</compile_context>

<pallas_src>
import functools

import numpy as np
import jax
import jax.numpy as jnp
from jax.experimental import pallas as pl
from jax.experimental.pallas import tpu as pltpu

RGB_MEAN = np.array([0.4488, 0.4371, 0.4040], np.float32)   # common.MeanShift
PRELU_ALPHA = 0.25       # nn.PReLU default (see TODO above)
_LANE_PAD = 128          # aligned zero extension on each side of the lane axis
_PMAX = 2                # max conv padding in the net (5x5 -> pad 2)

# Static (dh, dw) tap-offset -> row index in the precomputed mask table.
_OFFSETS = [(dh, dw) for dh in range(-_PMAX, _PMAX + 1)
            for dw in range(-_PMAX, _PMAX + 1)]
_OFF2ROW = {o: i for i, o in enumerate(_OFFSETS)}


def _make_fused_kernel(H, W, B, n_feats, scale):
    """Builds the fused HSRCNN forward kernel, specialized to static shapes."""
    N = B * H * W            # lane axis length (batch folded into lanes)
    r = scale
    F = n_feats

    def ext(x):
        # Zero-extend the lane axis so shifted taps never slice out of bounds.
        c = x.shape[0]
        z = jnp.zeros((c, _LANE_PAD), jnp.float32)
        return jnp.concatenate([z, x, z], axis=1)             # (c, N + 2*_LANE_PAD)

    def tap(xe, masks, dh, dw):
        # out[:, b*HW + h*W + w] = x[:, b*HW + (h+dh)*W + (w+dw)], zeroed whenever
        # (h+dh, w+dw) falls outside the image (the mask also kills cross-image
        # bleed along the batched lane axis and row wrap).
        d = dh * W + dw
        sl = xe[:, _LANE_PAD + d:_LANE_PAD + d + N]
        if dh == 0 and dw == 0:
            return sl
        row = _OFF2ROW[(dh, dw)]
        return sl * masks[row:row + 1, :]                      # (1, N) bcast over rows

    def conv(x, w2, b2, K, masks):
        # K x K "same" conv as ONE MXU matmul over an in-VMEM im2col buffer.
        # x: (Cin, N)  w2: (Cout, K*K*Cin)  b2: (Cout, 1)  ->  (Cout, N)
        p = K // 2
        xe = ext(x)
        taps = [tap(xe, masks, kh - p, kw - p)
                for kh in range(K) for kw in range(K)]
        col = jnp.concatenate(taps, axis=0)                    # (K*K*Cin, N)
        return jnp.dot(w2, col, preferred_element_type=jnp.float32) + b2

    def prelu(v):
        return jnp.where(v >= 0.0, v, PRELU_ALPHA * v)

    def kernel(x_ref, m_ref,
               wh_ref, bh_ref, w1a_ref, b1a_ref, w1b_ref, b1b_ref,
               w2a_ref, b2a_ref, w2b_ref, b2b_ref,
               wu_ref, bu_ref, wo_ref, bo_ref,
               o_ref):
        masks = m_ref[...]                                     # (25, N)
        x = x_ref[...]                                         # (Cpad, N); sub_mean already applied

        # head: 3x3 conv (padded n_colors -> n_feats)
        h0 = conv(x, wh_ref[...], bh_ref[...], 3, masks)

        # body / res_block1 (5x5): relu(x + conv2(prelu(conv1(x))))
        y = prelu(conv(h0, w1a_ref[...], b1a_ref[...], 5, masks))
        y = jnp.maximum(h0 + conv(y, w1b_ref[...], b1b_ref[...], 5, masks), 0.0)

        # body / res_block2 (3x3): relu(conv2(prelu(conv1(y))) + y)
        z = prelu(conv(y, w2a_ref[...], b2a_ref[...], 3, masks))
        z = jnp.maximum(y + conv(z, w2b_ref[...], b2b_ref[...], 3, masks), 0.0)

        # global skip
        res = z + h0

        # tail upsample conv (3x3, n_feats -> n_feats*r*r); output channels are
        # pre-permuted (host side) to sub-position-major order: row s*F + c,
        # with s = i*r + j  <=>  PixelShuffle channel c*r*r + i*r + j.
        t = conv(res, wu_ref[...], bu_ref[...], 3, masks)      # (F*r*r, N)

        # Fused PixelShuffle(r) + final 3x3 conv (+ add_mean folded into bias):
        # evaluate the conv on the upsampled image directly in the pre-shuffle
        # domain, one im2col per output sub-position (i, j).
        sub_e = [ext(t[s * F:(s + 1) * F, :]) for s in range(r * r)]
        cols = []
        for i in range(r):
            for j in range(r):
                taps = []
                for dy in (-1, 0, 1):
                    qi = i + dy
                    a, i2 = qi // r, qi % r
                    for dx in (-1, 0, 1):
                        qj = j + dx
                        bsh, j2 = qj // r, qj % r
                        s = i2 * r + j2
                        taps.append(tap(sub_e[s], masks, a, bsh))
                cols.append(jnp.concatenate(taps, axis=0))     # (9*F, N)
        col_all = jnp.concatenate(cols, axis=1)                # (9*F, r*r*N), lane aligned
        out = jnp.dot(wo_ref[...], col_all,
                      preferred_element_type=jnp.float32) + bo_ref[...]
        o_ref[...] = out.astype(o_ref.dtype)                   # (cout_pad, r*r*N), full-vreg store

    return kernel


def _prep_conv(w, b):
    """HWIO conv weights -> (Cout, KH*KW*Cin) matmul weights and (Cout, 1) bias."""
    kh, kw, cin, cout = w.shape
    w2 = jnp.transpose(w, (3, 0, 1, 2)).reshape(cout, kh * kw * cin)
    return w2.astype(jnp.float32), b.reshape(cout, 1).astype(jnp.float32)


def _full_masks(H, W, B):
    """masks[row(dh,dw), b*HW + h*W + w] = 1.0 iff 0<=h+dh<H and 0<=w+dw<W."""
    hh = np.arange(H * W) // W
    ww = np.arange(H * W) % W
    rows = []
    for dh, dw in _OFFSETS:
        ok = ((hh + dh >= 0) & (hh + dh < H) &
              (ww + dw >= 0) & (ww + dw < W)).astype(np.float32)
        rows.append(np.tile(ok, B))
    return jnp.asarray(np.stack(rows, axis=0))                 # (25, B*H*W)


def hsrcnn_forward(x_nchw, params, *, rgb_range=1.0, scale=2):
    B, n_colors, H, W = x_nchw.shape
    HW = H * W
    N = B * HW
    r = scale
    n_feats = params["head"][0].shape[-1]
    assert N % 128 == 0, "lane-dense layout needs B*H*W to be a multiple of 128"
    assert n_feats % 8 == 0, "n_feats must be a multiple of 8 (sublane tile)"
    c_pad = ((n_colors + 7) // 8) * 8        # padded input channels (sublane tile)
    cout_pad = ((n_colors + 7) // 8) * 8     # padded output channels (full-vreg store)

    mean = jnp.asarray(RGB_MEAN[:n_colors] * rgb_range, jnp.float32)

    # Input repack (fused XLA elementwise/transpose): channels-first, batch folded
    # into the lane axis -> (c_pad, B*HW), sub_mean applied, channels zero-padded.
    x = x_nchw.astype(jnp.float32).reshape(B, n_colors, HW)
    x = x - mean.reshape(1, n_colors, 1)
    x = jnp.transpose(x, (1, 0, 2)).reshape(n_colors, N)
    x = jnp.pad(x, ((0, c_pad - n_colors), (0, 0)))

    # Weights -> matmul-ready 2D form (tiny, host side, folded into jit).
    wh, bh = params["head"]
    wh = jnp.pad(wh, ((0, 0), (0, 0), (0, c_pad - n_colors), (0, 0)))
    wh2, bh2 = _prep_conv(wh, bh)
    w1a2, b1a2 = _prep_conv(*params["rb1_c1"])
    w1b2, b1b2 = _prep_conv(*params["rb1_c2"])
    w2a2, b2a2 = _prep_conv(*params["rb2_c1"])
    w2b2, b2b2 = _prep_conv(*params["rb2_c2"])

    wu2, bu2 = _prep_conv(*params["tail_up"])
    # PixelShuffle fusion: permute tail_up output channels to sub-position-major
    # order (new row s*n_feats + c  <-  old row c*r*r + s, with s = i*r + j).
    perm = np.asarray([c * r * r + s for s in range(r * r) for c in range(n_feats)])
    wu2, bu2 = wu2[perm], bu2[perm]

    wo2, bo2 = _prep_conv(*params["tail_out"])
    bo2 = bo2 + mean.reshape(n_colors, 1)      # fold add_mean into the final bias
    wo2 = jnp.pad(wo2, ((0, cout_pad - n_colors), (0, 0)))   # pad Cout -> full sublane tile
    bo2 = jnp.pad(bo2, ((0, cout_pad - n_colors), (0, 0)))

    masks = _full_masks(H, W, B)
    weights = [wh2, bh2, w1a2, b1a2, w1b2, b1b2,
               w2a2, b2a2, w2b2, b2b2, wu2, bu2, wo2, bo2]

    kernel = _make_fused_kernel(H, W, B, n_feats, r)

    def whole(a):
        return pl.BlockSpec(a.shape, lambda i: (0,) * a.ndim)

    out = pl.pallas_call(
        kernel,
        out_shape=jax.ShapeDtypeStruct((cout_pad, r * r * N), jnp.float32),
        grid=(1,),
        in_specs=[whole(x), whole(masks)] + [whole(a) for a in weights],
        out_specs=pl.BlockSpec((cout_pad, r * r * N), lambda i: (0, 0)),
        compiler_params=pltpu.CompilerParams(dimension_semantics=("arbitrary",)),
    )(x, masks, *weights)

    # Host-side PixelShuffle lane interleave + NCHW output (one transpose/reshape),
    # then drop the zero-padded output channels.
    out = out.reshape(cout_pad, r, r, B, H, W)        # (c, i, j, b, h, w)
    out = jnp.transpose(out, (3, 0, 4, 1, 5, 2))      # (b, c, h, i, w, j)
    out = out.reshape(B, cout_pad, H * r, W * r)
    return out[:, :n_colors]


def init_params(key, n_colors=3, n_feats=8, scale=2):
    def conv_init(k, kh, kw, cin, cout):
        kw_, kb_ = jax.random.split(k)
        w = jax.random.normal(kw_, (kh, kw, cin, cout), jnp.float32) * 0.05
        b = jax.random.normal(kb_, (cout,), jnp.float32) * 0.01
        return w, b

    keys = jax.random.split(key, 7)
    return {
        "head":     conv_init(keys[0], 3, 3, n_colors, n_feats),
        "rb1_c1":   conv_init(keys[1], 5, 5, n_feats, n_feats),
        "rb1_c2":   conv_init(keys[2], 5, 5, n_feats, n_feats),
        "rb2_c1":   conv_init(keys[3], 3, 3, n_feats, n_feats),
        "rb2_c2":   conv_init(keys[4], 3, 3, n_feats, n_feats),
        "tail_up":  conv_init(keys[5], 3, 3, n_feats, n_feats * scale * scale),
        "tail_out": conv_init(keys[6], 3, 3, n_feats, n_colors),
    }


if __name__ == "__main__":
    key = jax.random.PRNGKey(0)
    kx, kp = jax.random.split(key)

    B, C, H, W = 2, 3, 16, 16      # args.n_colors = 3, small spatial size
    n_feats, scale, rgb_range = 8, 2, 1.0

    x = jax.random.uniform(kx, (B, C, H, W), dtype=jnp.float32)   # in [0, rgb_range)
    params = init_params(kp, n_colors=C, n_feats=n_feats, scale=scale)

    fwd = jax.jit(functools.partial(hsrcnn_forward, rgb_range=rgb_range, scale=scale))
    out = fwd(x, params)
    jax.block_until_ready(out)

    assert out.shape == (B, C, H * scale, W * scale), out.shape
    assert out.dtype == jnp.float32
    print("KERNEL_OK")
</pallas_src>

<mosaic_0001>
module attributes {stable_mosaic.version = 11 : i64} {
  func.func @kernel(%arg0: i32, %arg1: memref<8x512xf32, #tpu.memory_space<vmem>>, %arg2: memref<25x512xf32, #tpu.memory_space<vmem>>, %arg3: memref<8x72xf32, #tpu.memory_space<vmem>>, %arg4: memref<8x1xf32, #tpu.memory_space<vmem>>, %arg5: memref<8x200xf32, #tpu.memory_space<vmem>>, %arg6: memref<8x1xf32, #tpu.memory_space<vmem>>, %arg7: memref<8x200xf32, #tpu.memory_space<vmem>>, %arg8: memref<8x1xf32, #tpu.memory_space<vmem>>, %arg9: memref<8x72xf32, #tpu.memory_space<vmem>>, %arg10: memref<8x1xf32, #tpu.memory_space<vmem>>, %arg11: memref<8x72xf32, #tpu.memory_space<vmem>>, %arg12: memref<8x1xf32, #tpu.memory_space<vmem>>, %arg13: memref<32x72xf32, #tpu.memory_space<vmem>>, %arg14: memref<32x1xf32, #tpu.memory_space<vmem>>, %arg15: memref<8x72xf32, #tpu.memory_space<vmem>>, %arg16: memref<8x1xf32, #tpu.memory_space<vmem>>, %arg17: memref<8x2048xf32, #tpu.memory_space<vmem>>) attributes {dimension_semantics = [#tpu.dimension_semantics<arbitrary>], iteration_bounds = array<i64: 1>, scalar_prefetch = 0 : i64, scratch_operands = 0 : i64, tpu.core_type = #tpu.core_type<tc>, window_params = [{pipeline_mode = #tpu.pipeline_mode<synchronous>, transform_indices = @transform_0, window_bounds = array<i64: 8, 512>}, {pipeline_mode = #tpu.pipeline_mode<synchronous>, transform_indices = @transform_1, window_bounds = array<i64: 25, 512>}, {pipeline_mode = #tpu.pipeline_mode<synchronous>, transform_indices = @transform_2, window_bounds = array<i64: 8, 72>}, {pipeline_mode = #tpu.pipeline_mode<synchronous>, transform_indices = @transform_3, window_bounds = array<i64: 8, 1>}, {pipeline_mode = #tpu.pipeline_mode<synchronous>, transform_indices = @transform_4, window_bounds = array<i64: 8, 200>}, {pipeline_mode = #tpu.pipeline_mode<synchronous>, transform_indices = @transform_5, window_bounds = array<i64: 8, 1>}, {pipeline_mode = #tpu.pipeline_mode<synchronous>, transform_indices = @transform_6, window_bounds = array<i64: 8, 200>}, {pipeline_mode = #tpu.pipeline_mode<synchronous>, transform_indices = @transform_7, window_bounds = array<i64: 8, 1>}, {pipeline_mode = #tpu.pipeline_mode<synchronous>, transform_indices = @transform_8, window_bounds = array<i64: 8, 72>}, {pipeline_mode = #tpu.pipeline_mode<synchronous>, transform_indices = @transform_9, window_bounds = array<i64: 8, 1>}, {pipeline_mode = #tpu.pipeline_mode<synchronous>, transform_indices = @transform_10, window_bounds = array<i64: 8, 72>}, {pipeline_mode = #tpu.pipeline_mode<synchronous>, transform_indices = @transform_11, window_bounds = array<i64: 8, 1>}, {pipeline_mode = #tpu.pipeline_mode<synchronous>, transform_indices = @transform_12, window_bounds = array<i64: 32, 72>}, {pipeline_mode = #tpu.pipeline_mode<synchronous>, transform_indices = @transform_13, window_bounds = array<i64: 32, 1>}, {pipeline_mode = #tpu.pipeline_mode<synchronous>, transform_indices = @transform_14, window_bounds = array<i64: 8, 72>}, {pipeline_mode = #tpu.pipeline_mode<synchronous>, transform_indices = @transform_15, window_bounds = array<i64: 8, 1>}, {pipeline_mode = #tpu.pipeline_mode<synchronous>, transform_indices = @transform_16, window_bounds = array<i64: 8, 2048>}]} {
    %c0 = arith.constant 0 : index
    %c0_0 = arith.constant 0 : index
    %0 = vector.load %arg2[%c0, %c0_0] : memref<25x512xf32, #tpu.memory_space<vmem>>, vector<25x512xf32>
    %c0_1 = arith.constant 0 : index
    %c0_2 = arith.constant 0 : index
    %1 = vector.load %arg1[%c0_1, %c0_2] : memref<8x512xf32, #tpu.memory_space<vmem>>, vector<8x512xf32>
    %c0_3 = arith.constant 0 : index
    %c0_4 = arith.constant 0 : index
    %2 = vector.load %arg3[%c0_3, %c0_4] : memref<8x72xf32, #tpu.memory_space<vmem>>, vector<8x72xf32>
    %c0_5 = arith.constant 0 : index
    %c0_6 = arith.constant 0 : index
    %3 = vector.load %arg4[%c0_5, %c0_6] : memref<8x1xf32, #tpu.memory_space<vmem>>, vector<8x1xf32>
    %cst = arith.constant 0.000000e+00 : f32
    %4 = vector.broadcast %cst : f32 to vector<8x128xf32>
    %5 = tpu.concatenate %4, %1, %4 in 1 : vector<8x128xf32>, vector<8x512xf32>, vector<8x128xf32> -> vector<8x768xf32>
    %6 = vector.extract_strided_slice %5 {offsets = [0, 111], sizes = [8, 512], strides = [1, 1]} : vector<8x768xf32> to vector<8x512xf32>
    %7 = vector.extract_strided_slice %0 {offsets = [6, 0], sizes = [1, 512], strides = [1, 1]} : vector<25x512xf32> to vector<1x512xf32>
    %8 = vector.broadcast %7 : vector<1x512xf32> to vector<8x512xf32>
    %9 = arith.mulf %6, %8 : vector<8x512xf32>
    %10 = vector.extract_strided_slice %5 {offsets = [0, 112], sizes = [8, 512], strides = [1, 1]} : vector<8x768xf32> to vector<8x512xf32>
    %11 = vector.extract_strided_slice %0 {offsets = [7, 0], sizes = [1, 512], strides = [1, 1]} : vector<25x512xf32> to vector<1x512xf32>
    %12 = vector.broadcast %11 : vector<1x512xf32> to vector<8x512xf32>
    %13 = arith.mulf %10, %12 : vector<8x512xf32>
    %14 = vector.extract_strided_slice %5 {offsets = [0, 113], sizes = [8, 512], strides = [1, 1]} : vector<8x768xf32> to vector<8x512xf32>
    %15 = vector.extract_strided_slice %0 {offsets = [8, 0], sizes = [1, 512], strides = [1, 1]} : vector<25x512xf32> to vector<1x512xf32>
    %16 = vector.broadcast %15 : vector<1x512xf32> to vector<8x512xf32>
    %17 = arith.mulf %14, %16 : vector<8x512xf32>
    %18 = vector.extract_strided_slice %5 {offsets = [0, 127], sizes = [8, 512], strides = [1, 1]} : vector<8x768xf32> to vector<8x512xf32>
    %19 = vector.extract_strided_slice %0 {offsets = [11, 0], sizes = [1, 512], strides = [1, 1]} : vector<25x512xf32> to vector<1x512xf32>
    %20 = vector.broadcast %19 : vector<1x512xf32> to vector<8x512xf32>
    %21 = arith.mulf %18, %20 : vector<8x512xf32>
    %22 = vector.extract_strided_slice %5 {offsets = [0, 128], sizes = [8, 512], strides = [1, 1]} : vector<8x768xf32> to vector<8x512xf32>
    %23 = vector.extract_strided_slice %5 {offsets = [0, 129], sizes = [8, 512], strides = [1, 1]} : vector<8x768xf32> to vector<8x512xf32>
    %24 = vector.extract_strided_slice %0 {offsets = [13, 0], sizes = [1, 512], strides = [1, 1]} : vector<25x512xf32> to vector<1x512xf32>
    %25 = vector.broadcast %24 : vector<1x512xf32> to vector<8x512xf32>
    %26 = arith.mulf %23, %25 : vector<8x512xf32>
    %27 = vector.extract_strided_slice %5 {offsets = [0, 143], sizes = [8, 512], strides = [1, 1]} : vector<8x768xf32> to vector<8x512xf32>
    %28 = vector.extract_strided_slice %0 {offsets = [16, 0], sizes = [1, 512], strides = [1, 1]} : vector<25x512xf32> to vector<1x512xf32>
    %29 = vector.broadcast %28 : vector<1x512xf32> to vector<8x512xf32>
    %30 = arith.mulf %27, %29 : vector<8x512xf32>
    %31 = vector.extract_strided_slice %5 {offsets = [0, 144], sizes = [8, 512], strides = [1, 1]} : vector<8x768xf32> to vector<8x512xf32>
    %32 = vector.extract_strided_slice %0 {offsets = [17, 0], sizes = [1, 512], strides = [1, 1]} : vector<25x512xf32> to vector<1x512xf32>
    %33 = vector.broadcast %32 : vector<1x512xf32> to vector<8x512xf32>
    %34 = arith.mulf %31, %33 : vector<8x512xf32>
    %35 = vector.extract_strided_slice %5 {offsets = [0, 145], sizes = [8, 512], strides = [1, 1]} : vector<8x768xf32> to vector<8x512xf32>
    %36 = vector.extract_strided_slice %0 {offsets = [18, 0], sizes = [1, 512], strides = [1, 1]} : vector<25x512xf32> to vector<1x512xf32>
    %37 = vector.broadcast %36 : vector<1x512xf32> to vector<8x512xf32>
    %38 = arith.mulf %35, %37 : vector<8x512xf32>
    %39 = tpu.concatenate %9, %13, %17, %21, %22, %26, %30, %34, %38 in 0 : vector<8x512xf32>, vector<8x512xf32>, vector<8x512xf32>, vector<8x512xf32>, vector<8x512xf32>, vector<8x512xf32>, vector<8x512xf32>, vector<8x512xf32>, vector<8x512xf32> -> vector<72x512xf32>
    %cst_7 = arith.constant dense<0.000000e+00> : vector<8x512xf32>
    %40 = tpu.matmul %2, %39, %cst_7 {dimension_numbers = #tpu.dot_dimension_numbers<[1], [0], [0], [1], [0, 0, 1, 1], [], []>} : vector<8x72xf32>, vector<72x512xf32>, vector<8x512xf32> -> vector<8x512xf32>
    %41 = vector.broadcast %3 : vector<8x1xf32> to vector<8x512xf32>
    %42 = arith.addf %40, %41 : vector<8x512xf32>
    %c0_8 = arith.constant 0 : index
    %c0_9 = arith.constant 0 : index
    %43 = vector.load %arg5[%c0_8, %c0_9] : memref<8x200xf32, #tpu.memory_space<vmem>>, vector<8x200xf32>
    %c0_10 = arith.constant 0 : index
    %c0_11 = arith.constant 0 : index
    %44 = vector.load %arg6[%c0_10, %c0_11] : memref<8x1xf32, #tpu.memory_space<vmem>>, vector<8x1xf32>
    %cst_12 = arith.constant 0.000000e+00 : f32
    %45 = vector.broadcast %cst_12 : f32 to vector<8x128xf32>
    %46 = tpu.concatenate %45, %42, %45 in 1 : vector<8x128xf32>, vector<8x512xf32>, vector<8x128xf32> -> vector<8x768xf32>
    %47 = vector.extract_strided_slice %46 {offsets = [0, 94], sizes = [8, 512], strides = [1, 1]} : vector<8x768xf32> to vector<8x512xf32>
    %48 = vector.extract_strided_slice %0 {offsets = [0, 0], sizes = [1, 512], strides = [1, 1]} : vector<25x512xf32> to vector<1x512xf32>
    %49 = vector.broadcast %48 : vector<1x512xf32> to vector<8x512xf32>
    %50 = arith.mulf %47, %49 : vector<8x512xf32>
    %51 = vector.extract_strided_slice %46 {offsets = [0, 95], sizes = [8, 512], strides = [1, 1]} : vector<8x768xf32> to vector<8x512xf32>
    %52 = vector.extract_strided_slice %0 {offsets = [1, 0], sizes = [1, 512], strides = [1, 1]} : vector<25x512xf32> to vector<1x512xf32>
    %53 = vector.broadcast %52 : vector<1x512xf32> to vector<8x512xf32>
    %54 = arith.mulf %51, %53 : vector<8x512xf32>
    %55 = vector.extract_strided_slice %46 {offsets = [0, 96], sizes = [8, 512], strides = [1, 1]} : vector<8x768xf32> to vector<8x512xf32>
    %56 = vector.extract_strided_slice %0 {offsets = [2, 0], sizes = [1, 512], strides = [1, 1]} : vector<25x512xf32> to vector<1x512xf32>
    %57 = vector.broadcast %56 : vector<1x512xf32> to vector<8x512xf32>
    %58 = arith.mulf %55, %57 : vector<8x512xf32>
    %59 = vector.extract_strided_slice %46 {offsets = [0, 97], sizes = [8, 512], strides = [1, 1]} : vector<8x768xf32> to vector<8x512xf32>
    %60 = vector.extract_strided_slice %0 {offsets = [3, 0], sizes = [1, 512], strides = [1, 1]} : vector<25x512xf32> to vector<1x512xf32>
    %61 = vector.broadcast %60 : vector<1x512xf32> to vector<8x512xf32>
    %62 = arith.mulf %59, %61 : vector<8x512xf32>
    %63 = vector.extract_strided_slice %46 {offsets = [0, 98], sizes = [8, 512], strides = [1, 1]} : vector<8x768xf32> to vector<8x512xf32>
    %64 = vector.extract_strided_slice %0 {offsets = [4, 0], sizes = [1, 512], strides = [1, 1]} : vector<25x512xf32> to vector<1x512xf32>
    %65 = vector.broadcast %64 : vector<1x512xf32> to vector<8x512xf32>
    %66 = arith.mulf %63, %65 : vector<8x512xf32>
    %67 = vector.extract_strided_slice %46 {offsets = [0, 110], sizes = [8, 512], strides = [1, 1]} : vector<8x768xf32> to vector<8x512xf32>
    %68 = vector.extract_strided_slice %0 {offsets = [5, 0], sizes = [1, 512], strides = [1, 1]} : vector<25x512xf32> to vector<1x512xf32>
    %69 = vector.broadcast %68 : vector<1x512xf32> to vector<8x512xf32>
    %70 = arith.mulf %67, %69 : vector<8x512xf32>
    %71 = vector.extract_strided_slice %46 {offsets = [0, 111], sizes = [8, 512], strides = [1, 1]} : vector<8x768xf32> to vector<8x512xf32>
    %72 = vector.extract_strided_slice %0 {offsets = [6, 0], sizes = [1, 512], strides = [1, 1]} : vector<25x512xf32> to vector<1x512xf32>
    %73 = vector.broadcast %72 : vector<1x512xf32> to vector<8x512xf32>
    %74 = arith.mulf %71, %73 : vector<8x512xf32>
    %75 = vector.extract_strided_slice %46 {offsets = [0, 112], sizes = [8, 512], strides = [1, 1]} : vector<8x768xf32> to vector<8x512xf32>
    %76 = vector.extract_strided_slice %0 {offsets = [7, 0], sizes = [1, 512], strides = [1, 1]} : vector<25x512xf32> to vector<1x512xf32>
    %77 = vector.broadcast %76 : vector<1x512xf32> to vector<8x512xf32>
    %78 = arith.mulf %75, %77 : vector<8x512xf32>
    %79 = vector.extract_strided_slice %46 {offsets = [0, 113], sizes = [8, 512], strides = [1, 1]} : vector<8x768xf32> to vector<8x512xf32>
    %80 = vector.extract_strided_slice %0 {offsets = [8, 0], sizes = [1, 512], strides = [1, 1]} : vector<25x512xf32> to vector<1x512xf32>
    %81 = vector.broadcast %80 : vector<1x512xf32> to vector<8x512xf32>
    %82 = arith.mulf %79, %81 : vector<8x512xf32>
    %83 = vector.extract_strided_slice %46 {offsets = [0, 114], sizes = [8, 512], strides = [1, 1]} : vector<8x768xf32> to vector<8x512xf32>
    %84 = vector.extract_strided_slice %0 {offsets = [9, 0], sizes = [1, 512], strides = [1, 1]} : vector<25x512xf32> to vector<1x512xf32>
    %85 = vector.broadcast %84 : vector<1x512xf32> to vector<8x512xf32>
    %86 = arith.mulf %83, %85 : vector<8x512xf32>
    %87 = vector.extract_strided_slice %46 {offsets = [0, 126], sizes = [8, 512], strides = [1, 1]} : vector<8x768xf32> to vector<8x512xf32>
    %88 = vector.extract_strided_slice %0 {offsets = [10, 0], sizes = [1, 512], strides = [1, 1]} : vector<25x512xf32> to vector<1x512xf32>
    %89 = vector.broadcast %88 : vector<1x512xf32> to vector<8x512xf32>
    %90 = arith.mulf %87, %89 : vector<8x512xf32>
    %91 = vector.extract_strided_slice %46 {offsets = [0, 127], sizes = [8, 512], strides = [1, 1]} : vector<8x768xf32> to vector<8x512xf32>
    %92 = vector.extract_strided_slice %0 {offsets = [11, 0], sizes = [1, 512], strides = [1, 1]} : vector<25x512xf32> to vector<1x512xf32>
    %93 = vector.broadcast %92 : vector<1x512xf32> to vector<8x512xf32>
    %94 = arith.mulf %91, %93 : vector<8x512xf32>
    %95 = vector.extract_strided_slice %46 {offsets = [0, 128], sizes = [8, 512], strides = [1, 1]} : vector<8x768xf32> to vector<8x512xf32>
    %96 = vector.extract_strided_slice %46 {offsets = [0, 129], sizes = [8, 512], strides = [1, 1]} : vector<8x768xf32> to vector<8x512xf32>
    %97 = vector.extract_strided_slice %0 {offsets = [13, 0], sizes = [1, 512], strides = [1, 1]} : vector<25x512xf32> to vector<1x512xf32>
    %98 = vector.broadcast %97 : vector<1x512xf32> to vector<8x512xf32>
    %99 = arith.mulf %96, %98 : vector<8x512xf32>
    %100 = vector.extract_strided_slice %46 {offsets = [0, 130], sizes = [8, 512], strides = [1, 1]} : vector<8x768xf32> to vector<8x512xf32>
    %101 = vector.extract_strided_slice %0 {offsets = [14, 0], sizes = [1, 512], strides = [1, 1]} : vector<25x512xf32> to vector<1x512xf32>
    %102 = vector.broadcast %101 : vector<1x512xf32> to vector<8x512xf32>
    %103 = arith.mulf %100, %102 : vector<8x512xf32>
    %104 = vector.extract_strided_slice %46 {offsets = [0, 142], sizes = [8, 512], strides = [1, 1]} : vector<8x768xf32> to vector<8x512xf32>
    %105 = vector.extract_strided_slice %0 {offsets = [15, 0], sizes = [1, 512], strides = [1, 1]} : vector<25x512xf32> to vector<1x512xf32>
    %106 = vector.broadcast %105 : vector<1x512xf32> to vector<8x512xf32>
    %107 = arith.mulf %104, %106 : vector<8x512xf32>
    %108 = vector.extract_strided_slice %46 {offsets = [0, 143], sizes = [8, 512], strides = [1, 1]} : vector<8x768xf32> to vector<8x512xf32>
    %109 = vector.extract_strided_slice %0 {offsets = [16, 0], sizes = [1, 512], strides = [1, 1]} : vector<25x512xf32> to vector<1x512xf32>
    %110 = vector.broadcast %109 : vector<1x512xf32> to vector<8x512xf32>
    %111 = arith.mulf %108, %110 : vector<8x512xf32>
    %112 = vector.extract_strided_slice %46 {offsets = [0, 144], sizes = [8, 512], strides = [1, 1]} : vector<8x768xf32> to vector<8x512xf32>
    %113 = vector.extract_strided_slice %0 {offsets = [17, 0], sizes = [1, 512], strides = [1, 1]} : vector<25x512xf32> to vector<1x512xf32>
    %114 = vector.broadcast %113 : vector<1x512xf32> to vector<8x512xf32>
    %115 = arith.mulf %112, %114 : vector<8x512xf32>
    %116 = vector.extract_strided_slice %46 {offsets = [0, 145], sizes = [8, 512], strides = [1, 1]} : vector<8x768xf32> to vector<8x512xf32>
    %117 = vector.extract_strided_slice %0 {offsets = [18, 0], sizes = [1, 512], strides = [1, 1]} : vector<25x512xf32> to vector<1x512xf32>
    %118 = vector.broadcast %117 : vector<1x512xf32> to vector<8x512xf32>
    %119 = arith.mulf %116, %118 : vector<8x512xf32>
    %120 = vector.extract_strided_slice %46 {offsets = [0, 146], sizes = [8, 512], strides = [1, 1]} : vector<8x768xf32> to vector<8x512xf32>
    %121 = vector.extract_strided_slice %0 {offsets = [19, 0], sizes = [1, 512], strides = [1, 1]} : vector<25x512xf32> to vector<1x512xf32>
    %122 = vector.broadcast %121 : vector<1x512xf32> to vector<8x512xf32>
    %123 = arith.mulf %120, %122 : vector<8x512xf32>
    %124 = vector.extract_strided_slice %46 {offsets = [0, 158], sizes = [8, 512], strides = [1, 1]} : vector<8x768xf32> to vector<8x512xf32>
    %125 = vector.extract_strided_slice %0 {offsets = [20, 0], sizes = [1, 512], strides = [1, 1]} : vector<25x512xf32> to vector<1x512xf32>
    %126 = vector.broadcast %125 : vector<1x512xf32> to vector<8x512xf32>
    %127 = arith.mulf %124, %126 : vector<8x512xf32>
    %128 = vector.extract_strided_slice %46 {offsets = [0, 159], sizes = [8, 512], strides = [1, 1]} : vector<8x768xf32> to vector<8x512xf32>
    %129 = vector.extract_strided_slice %0 {offsets = [21, 0], sizes = [1, 512], strides = [1, 1]} : vector<25x512xf32> to vector<1x512xf32>
    %130 = vector.broadcast %129 : vector<1x512xf32> to vector<8x512xf32>
    %131 = arith.mulf %128, %130 : vector<8x512xf32>
    %132 = vector.extract_strided_slice %46 {offsets = [0, 160], sizes = [8, 512], strides = [1, 1]} : vector<8x768xf32> to vector<8x512xf32>
    %133 = vector.extract_strided_slice %0 {offsets = [22, 0], sizes = [1, 512], strides = [1, 1]} : vector<25x512xf32> to vector<1x512xf32>
    %134 = vector.broadcast %133 : vector<1x512xf32> to vector<8x512xf32>
    %135 = arith.mulf %132, %134 : vector<8x512xf32>
    %136 = vector.extract_strided_slice %46 {offsets = [0, 161], sizes = [8, 512], strides = [1, 1]} : vector<8x768xf32> to vector<8x512xf32>
    %137 = vector.extract_strided_slice %0 {offsets = [23, 0], sizes = [1, 512], strides = [1, 1]} : vector<25x512xf32> to vector<1x512xf32>
    %138 = vector.broadcast %137 : vector<1x512xf32> to vector<8x512xf32>
    %139 = arith.mulf %136, %138 : vector<8x512xf32>
    %140 = vector.extract_strided_slice %46 {offsets = [0, 162], sizes = [8, 512], strides = [1, 1]} : vector<8x768xf32> to vector<8x512xf32>
    %141 = vector.extract_strided_slice %0 {offsets = [24, 0], sizes = [1, 512], strides = [1, 1]} : vector<25x512xf32> to vector<1x512xf32>
    %142 = vector.broadcast %141 : vector<1x512xf32> to vector<8x512xf32>
    %143 = arith.mulf %140, %142 : vector<8x512xf32>
    %144 = tpu.concatenate %50, %54, %58, %62, %66, %70, %74, %78, %82, %86, %90, %94, %95, %99, %103, %107 in 0 : vector<8x512xf32>, vector<8x512xf32>, vector<8x512xf32>, vector<8x512xf32>, vector<8x512xf32>, vector<8x512xf32>, vector<8x512xf32>, vector<8x512xf32>, vector<8x512xf32>, vector<8x512xf32>, vector<8x512xf32>, vector<8x512xf32>, vector<8x512xf32>, vector<8x512xf32>, vector<8x512xf32>, vector<8x512xf32> -> vector<128x512xf32>
    %145 = tpu.concatenate %111, %115, %119, %123, %127, %131, %135, %139, %143 in 0 : vector<8x512xf32>, vector<8x512xf32>, vector<8x512xf32>, vector<8x512xf32>, vector<8x512xf32>, vector<8x512xf32>, vector<8x512xf32>, vector<8x512xf32>, vector<8x512xf32> -> vector<72x512xf32>
    %146 = tpu.concatenate %144, %145 in 0 : vector<128x512xf32>, vector<72x512xf32> -> vector<200x512xf32>
    %cst_13 = arith.constant dense<0.000000e+00> : vector<8x512xf32>
    %147 = tpu.matmul %43, %146, %cst_13 {dimension_numbers = #tpu.dot_dimension_numbers<[1], [0], [0], [1], [0, 0, 1, 1], [], []>} : vector<8x200xf32>, vector<200x512xf32>, vector<8x512xf32> -> vector<8x512xf32>
    %148 = vector.broadcast %44 : vector<8x1xf32> to vector<8x512xf32>
    %149 = arith.addf %147, %148 : vector<8x512xf32>
    %cst_14 = arith.constant 0.000000e+00 : f32
    %150 = vector.broadcast %cst_14 : f32 to vector<8x512xf32>
    %151 = arith.cmpf oge, %149, %150 : vector<8x512xf32>
    %cst_15 = arith.constant 2.500000e-01 : f32
    %152 = vector.broadcast %cst_15 : f32 to vector<8x512xf32>
    %153 = arith.mulf %152, %149 : vector<8x512xf32>
    %154 = arith.select %151, %149, %153 : vector<8x512xi1>, vector<8x512xf32>
    %c0_16 = arith.constant 0 : index
    %c0_17 = arith.constant 0 : index
    %155 = vector.load %arg7[%c0_16, %c0_17] : memref<8x200xf32, #tpu.memory_space<vmem>>, vector<8x200xf32>
    %c0_18 = arith.constant 0 : index
    %c0_19 = arith.constant 0 : index
    %156 = vector.load %arg8[%c0_18, %c0_19] : memref<8x1xf32, #tpu.memory_space<vmem>>, vector<8x1xf32>
    %cst_20 = arith.constant 0.000000e+00 : f32
    %157 = vector.broadcast %cst_20 : f32 to vector<8x128xf32>
    %158 = tpu.concatenate %157, %154, %157 in 1 : vector<8x128xf32>, vector<8x512xf32>, vector<8x128xf32> -> vector<8x768xf32>
    %159 = vector.extract_strided_slice %158 {offsets = [0, 94], sizes = [8, 512], strides = [1, 1]} : vector<8x768xf32> to vector<8x512xf32>
    %160 = vector.extract_strided_slice %0 {offsets = [0, 0], sizes = [1, 512], strides = [1, 1]} : vector<25x512xf32> to vector<1x512xf32>
    %161 = vector.broadcast %160 : vector<1x512xf32> to vector<8x512xf32>
    %162 = arith.mulf %159, %161 : vector<8x512xf32>
    %163 = vector.extract_strided_slice %158 {offsets = [0, 95], sizes = [8, 512], strides = [1, 1]} : vector<8x768xf32> to vector<8x512xf32>
    %164 = vector.extract_strided_slice %0 {offsets = [1, 0], sizes = [1, 512], strides = [1, 1]} : vector<25x512xf32> to vector<1x512xf32>
    %165 = vector.broadcast %164 : vector<1x512xf32> to vector<8x512xf32>
    %166 = arith.mulf %163, %165 : vector<8x512xf32>
    %167 = vector.extract_strided_slice %158 {offsets = [0, 96], sizes = [8, 512], strides = [1, 1]} : vector<8x768xf32> to vector<8x512xf32>
    %168 = vector.extract_strided_slice %0 {offsets = [2, 0], sizes = [1, 512], strides = [1, 1]} : vector<25x512xf32> to vector<1x512xf32>
    %169 = vector.broadcast %168 : vector<1x512xf32> to vector<8x512xf32>
    %170 = arith.mulf %167, %169 : vector<8x512xf32>
    %171 = vector.extract_strided_slice %158 {offsets = [0, 97], sizes = [8, 512], strides = [1, 1]} : vector<8x768xf32> to vector<8x512xf32>
    %172 = vector.extract_strided_slice %0 {offsets = [3, 0], sizes = [1, 512], strides = [1, 1]} : vector<25x512xf32> to vector<1x512xf32>
    %173 = vector.broadcast %172 : vector<1x512xf32> to vector<8x512xf32>
    %174 = arith.mulf %171, %173 : vector<8x512xf32>
    %175 = vector.extract_strided_slice %158 {offsets = [0, 98], sizes = [8, 512], strides = [1, 1]} : vector<8x768xf32> to vector<8x512xf32>
    %176 = vector.extract_strided_slice %0 {offsets = [4, 0], sizes = [1, 512], strides = [1, 1]} : vector<25x512xf32> to vector<1x512xf32>
    %177 = vector.broadcast %176 : vector<1x512xf32> to vector<8x512xf32>
    %178 = arith.mulf %175, %177 : vector<8x512xf32>
    %179 = vector.extract_strided_slice %158 {offsets = [0, 110], sizes = [8, 512], strides = [1, 1]} : vector<8x768xf32> to vector<8x512xf32>
    %180 = vector.extract_strided_slice %0 {offsets = [5, 0], sizes = [1, 512], strides = [1, 1]} : vector<25x512xf32> to vector<1x512xf32>
    %181 = vector.broadcast %180 : vector<1x512xf32> to vector<8x512xf32>
    %182 = arith.mulf %179, %181 : vector<8x512xf32>
    %183 = vector.extract_strided_slice %158 {offsets = [0, 111], sizes = [8, 512], strides = [1, 1]} : vector<8x768xf32> to vector<8x512xf32>
    %184 = vector.extract_strided_slice %0 {offsets = [6, 0], sizes = [1, 512], strides = [1, 1]} : vector<25x512xf32> to vector<1x512xf32>
    %185 = vector.broadcast %184 : vector<1x512xf32> to vector<8x512xf32>
    %186 = arith.mulf %183, %185 : vector<8x512xf32>
    %187 = vector.extract_strided_slice %158 {offsets = [0, 112], sizes = [8, 512], strides = [1, 1]} : vector<8x768xf32> to vector<8x512xf32>
    %188 = vector.extract_strided_slice %0 {offsets = [7, 0], sizes = [1, 512], strides = [1, 1]} : vector<25x512xf32> to vector<1x512xf32>
    %189 = vector.broadcast %188 : vector<1x512xf32> to vector<8x512xf32>
    %190 = arith.mulf %187, %189 : vector<8x512xf32>
    %191 = vector.extract_strided_slice %158 {offsets = [0, 113], sizes = [8, 512], strides = [1, 1]} : vector<8x768xf32> to vector<8x512xf32>
    %192 = vector.extract_strided_slice %0 {offsets = [8, 0], sizes = [1, 512], strides = [1, 1]} : vector<25x512xf32> to vector<1x512xf32>
    %193 = vector.broadcast %192 : vector<1x512xf32> to vector<8x512xf32>
    %194 = arith.mulf %191, %193 : vector<8x512xf32>
    %195 = vector.extract_strided_slice %158 {offsets = [0, 114], sizes = [8, 512], strides = [1, 1]} : vector<8x768xf32> to vector<8x512xf32>
    %196 = vector.extract_strided_slice %0 {offsets = [9, 0], sizes = [1, 512], strides = [1, 1]} : vector<25x512xf32> to vector<1x512xf32>
    %197 = vector.broadcast %196 : vector<1x512xf32> to vector<8x512xf32>
    %198 = arith.mulf %195, %197 : vector<8x512xf32>
    %199 = vector.extract_strided_slice %158 {offsets = [0, 126], sizes = [8, 512], strides = [1, 1]} : vector<8x768xf32> to vector<8x512xf32>
    %200 = vector.extract_strided_slice %0 {offsets = [10, 0], sizes = [1, 512], strides = [1, 1]} : vector<25x512xf32> to vector<1x512xf32>
    %201 = vector.broadcast %200 : vector<1x512xf32> to vector<8x512xf32>
    %202 = arith.mulf %199, %201 : vector<8x512xf32>
    %203 = vector.extract_strided_slice %158 {offsets = [0, 127], sizes = [8, 512], strides = [1, 1]} : vector<8x768xf32> to vector<8x512xf32>
    %204 = vector.extract_strided_slice %0 {offsets = [11, 0], sizes = [1, 512], strides = [1, 1]} : vector<25x512xf32> to vector<1x512xf32>
    %205 = vector.broadcast %204 : vector<1x512xf32> to vector<8x512xf32>
    %206 = arith.mulf %203, %205 : vector<8x512xf32>
    %207 = vector.extract_strided_slice %158 {offsets = [0, 128], sizes = [8, 512], strides = [1, 1]} : vector<8x768xf32> to vector<8x512xf32>
    %208 = vector.extract_strided_slice %158 {offsets = [0, 129], sizes = [8, 512], strides = [1, 1]} : vector<8x768xf32> to vector<8x512xf32>
    %209 = vector.extract_strided_slice %0 {offsets = [13, 0], sizes = [1, 512], strides = [1, 1]} : vector<25x512xf32> to vector<1x512xf32>
    %210 = vector.broadcast %209 : vector<1x512xf32> to vector<8x512xf32>
    %211 = arith.mulf %208, %210 : vector<8x512xf32>
    %212 = vector.extract_strided_slice %158 {offsets = [0, 130], sizes = [8, 512], strides = [1, 1]} : vector<8x768xf32> to vector<8x512xf32>
    %213 = vector.extract_strided_slice %0 {offsets = [14, 0], sizes = [1, 512], strides = [1, 1]} : vector<25x512xf32> to vector<1x512xf32>
    %214 = vector.broadcast %213 : vector<1x512xf32> to vector<8x512xf32>
    %215 = arith.mulf %212, %214 : vector<8x512xf32>
    %216 = vector.extract_strided_slice %158 {offsets = [0, 142], sizes = [8, 512], strides = [1, 1]} : vector<8x768xf32> to vector<8x512xf32>
    %217 = vector.extract_strided_slice %0 {offsets = [15, 0], sizes = [1, 512], strides = [1, 1]} : vector<25x512xf32> to vector<1x512xf32>
    %218 = vector.broadcast %217 : vector<1x512xf32> to vector<8x512xf32>
    %219 = arith.mulf %216, %218 : vector<8x512xf32>
    %220 = vector.extract_strided_slice %158 {offsets = [0, 143], sizes = [8, 512], strides = [1, 1]} : vector<8x768xf32> to vector<8x512xf32>
    %221 = vector.extract_strided_slice %0 {offsets = [16, 0], sizes = [1, 512], strides = [1, 1]} : vector<25x512xf32> to vector<1x512xf32>
    %222 = vector.broadcast %221 : vector<1x512xf32> to vector<8x512xf32>
    %223 = arith.mulf %220, %222 : vector<8x512xf32>
    %224 = vector.extract_strided_slice %158 {offsets = [0, 144], sizes = [8, 512], strides = [1, 1]} : vector<8x768xf32> to vector<8x512xf32>
    %225 = vector.extract_strided_slice %0 {offsets = [17, 0], sizes = [1, 512], strides = [1, 1]} : vector<25x512xf32> to vector<1x512xf32>
    %226 = vector.broadcast %225 : vector<1x512xf32> to vector<8x512xf32>
    %227 = arith.mulf %224, %226 : vector<8x512xf32>
    %228 = vector.extract_strided_slice %158 {offsets = [0, 145], sizes = [8, 512], strides = [1, 1]} : vector<8x768xf32> to vector<8x512xf32>
    %229 = vector.extract_strided_slice %0 {offsets = [18, 0], sizes = [1, 512], strides = [1, 1]} : vector<25x512xf32> to vector<1x512xf32>
    %230 = vector.broadcast %229 : vector<1x512xf32> to vector<8x512xf32>
    %231 = arith.mulf %228, %230 : vector<8x512xf32>
    %232 = vector.extract_strided_slice %158 {offsets = [0, 146], sizes = [8, 512], strides = [1, 1]} : vector<8x768xf32> to vector<8x512xf32>
    %233 = vector.extract_strided_slice %0 {offsets = [19, 0], sizes = [1, 512], strides = [1, 1]} : vector<25x512xf32> to vector<1x512xf32>
    %234 = vector.broadcast %233 : vector<1x512xf32> to vector<8x512xf32>
    %235 = arith.mulf %232, %234 : vector<8x512xf32>
    %236 = vector.extract_strided_slice %158 {offsets = [0, 158], sizes = [8, 512], strides = [1, 1]} : vector<8x768xf32> to vector<8x512xf32>
    %237 = vector.extract_strided_slice %0 {offsets = [20, 0], sizes = [1, 512], strides = [1, 1]} : vector<25x512xf32> to vector<1x512xf32>
    %238 = vector.broadcast %237 : vector<1x512xf32> to vector<8x512xf32>
    %239 = arith.mulf %236, %238 : vector<8x512xf32>
    %240 = vector.extract_strided_slice %158 {offsets = [0, 159], sizes = [8, 512], strides = [1, 1]} : vector<8x768xf32> to vector<8x512xf32>
    %241 = vector.extract_strided_slice %0 {offsets = [21, 0], sizes = [1, 512], strides = [1, 1]} : vector<25x512xf32> to vector<1x512xf32>
    %242 = vector.broadcast %241 : vector<1x512xf32> to vector<8x512xf32>
    %243 = arith.mulf %240, %242 : vector<8x512xf32>
    %244 = vector.extract_strided_slice %158 {offsets = [0, 160], sizes = [8, 512], strides = [1, 1]} : vector<8x768xf32> to vector<8x512xf32>
    %245 = vector.extract_strided_slice %0 {offsets = [22, 0], sizes = [1, 512], strides = [1, 1]} : vector<25x512xf32> to vector<1x512xf32>
    %246 = vector.broadcast %245 : vector<1x512xf32> to vector<8x512xf32>
    %247 = arith.mulf %244, %246 : vector<8x512xf32>
    %248 = vector.extract_strided_slice %158 {offsets = [0, 161], sizes = [8, 512], strides = [1, 1]} : vector<8x768xf32> to vector<8x512xf32>
    %249 = vector.extract_strided_slice %0 {offsets = [23, 0], sizes = [1, 512], strides = [1, 1]} : vector<25x512xf32> to vector<1x512xf32>
    %250 = vector.broadcast %249 : vector<1x512xf32> to vector<8x512xf32>
    %251 = arith.mulf %248, %250 : vector<8x512xf32>
    %252 = vector.extract_strided_slice %158 {offsets = [0, 162], sizes = [8, 512], strides = [1, 1]} : vector<8x768xf32> to vector<8x512xf32>
    %253 = vector.extract_strided_slice %0 {offsets = [24, 0], sizes = [1, 512], strides = [1, 1]} : vector<25x512xf32> to vector<1x512xf32>
    %254 = vector.broadcast %253 : vector<1x512xf32> to vector<8x512xf32>
    %255 = arith.mulf %252, %254 : vector<8x512xf32>
    %256 = tpu.concatenate %162, %166, %170, %174, %178, %182, %186, %190, %194, %198, %202, %206, %207, %211, %215, %219 in 0 : vector<8x512xf32>, vector<8x512xf32>, vector<8x512xf32>, vector<8x512xf32>, vector<8x512xf32>, vector<8x512xf32>, vector<8x512xf32>, vector<8x512xf32>, vector<8x512xf32>, vector<8x512xf32>, vector<8x512xf32>, vector<8x512xf32>, vector<8x512xf32>, vector<8x512xf32>, vector<8x512xf32>, vector<8x512xf32> -> vector<128x512xf32>
    %257 = tpu.concatenate %223, %227, %231, %235, %239, %243, %247, %251, %255 in 0 : vector<8x512xf32>, vector<8x512xf32>, vector<8x512xf32>, vector<8x512xf32>, vector<8x512xf32>, vector<8x512xf32>, vector<8x512xf32>, vector<8x512xf32>, vector<8x512xf32> -> vector<72x512xf32>
    %258 = tpu.concatenate %256, %257 in 0 : vector<128x512xf32>, vector<72x512xf32> -> vector<200x512xf32>
    %cst_21 = arith.constant dense<0.000000e+00> : vector<8x512xf32>
    %259 = tpu.matmul %155, %258, %cst_21 {dimension_numbers = #tpu.dot_dimension_numbers<[1], [0], [0], [1], [0, 0, 1, 1], [], []>} : vector<8x200xf32>, vector<200x512xf32>, vector<8x512xf32> -> vector<8x512xf32>
    %260 = vector.broadcast %156 : vector<8x1xf32> to vector<8x512xf32>
    %261 = arith.addf %259, %260 : vector<8x512xf32>
    %262 = arith.addf %42, %261 : vector<8x512xf32>
    %cst_22 = arith.constant 0.000000e+00 : f32
    %263 = vector.broadcast %cst_22 : f32 to vector<8x512xf32>
    %264 = arith.maximumf %262, %263 : vector<8x512xf32>
    %c0_23 = arith.constant 0 : index
    %c0_24 = arith.constant 0 : index
    %265 = vector.load %arg9[%c0_23, %c0_24] : memref<8x72xf32, #tpu.memory_space<vmem>>, vector<8x72xf32>
    %c0_25 = arith.constant 0 : index
    %c0_26 = arith.constant 0 : index
    %266 = vector.load %arg10[%c0_25, %c0_26] : memref<8x1xf32, #tpu.memory_space<vmem>>, vector<8x1xf32>
    %cst_27 = arith.constant 0.000000e+00 : f32
    %267 = vector.broadcast %cst_27 : f32 to vector<8x128xf32>
    %268 = tpu.concatenate %267, %264, %267 in 1 : vector<8x128xf32>, vector<8x512xf32>, vector<8x128xf32> -> vector<8x768xf32>
    %269 = vector.extract_strided_slice %268 {offsets = [0, 111], sizes = [8, 512], strides = [1, 1]} : vector<8x768xf32> to vector<8x512xf32>
    %270 = vector.extract_strided_slice %0 {offsets = [6, 0], sizes = [1, 512], strides = [1, 1]} : vector<25x512xf32> to vector<1x512xf32>
    %271 = vector.broadcast %270 : vector<1x512xf32> to vector<8x512xf32>
    %272 = arith.mulf %269, %271 : vector<8x512xf32>
    %273 = vector.extract_strided_slice %268 {offsets = [0, 112], sizes = [8, 512], strides = [1, 1]} : vector<8x768xf32> to vector<8x512xf32>
    %274 = vector.extract_strided_slice %0 {offsets = [7, 0], sizes = [1, 512], strides = [1, 1]} : vector<25x512xf32> to vector<1x512xf32>
    %275 = vector.broadcast %274 : vector<1x512xf32> to vector<8x512xf32>
    %276 = arith.mulf %273, %275 : vector<8x512xf32>
    %277 = vector.extract_strided_slice %268 {offsets = [0, 113], sizes = [8, 512], strides = [1, 1]} : vector<8x768xf32> to vector<8x512xf32>
    %278 = vector.extract_strided_slice %0 {offsets = [8, 0], sizes = [1, 512], strides = [1, 1]} : vector<25x512xf32> to vector<1x512xf32>
    %279 = vector.broadcast %278 : vector<1x512xf32> to vector<8x512xf32>
    %280 = arith.mulf %277, %279 : vector<8x512xf32>
    %281 = vector.extract_strided_slice %268 {offsets = [0, 127], sizes = [8, 512], strides = [1, 1]} : vector<8x768xf32> to vector<8x512xf32>
    %282 = vector.extract_strided_slice %0 {offsets = [11, 0], sizes = [1, 512], strides = [1, 1]} : vector<25x512xf32> to vector<1x512xf32>
    %283 = vector.broadcast %282 : vector<1x512xf32> to vector<8x512xf32>
    %284 = arith.mulf %281, %283 : vector<8x512xf32>
    %285 = vector.extract_strided_slice %268 {offsets = [0, 128], sizes = [8, 512], strides = [1, 1]} : vector<8x768xf32> to vector<8x512xf32>
    %286 = vector.extract_strided_slice %268 {offsets = [0, 129], sizes = [8, 512], strides = [1, 1]} : vector<8x768xf32> to vector<8x512xf32>
    %287 = vector.extract_strided_slice %0 {offsets = [13, 0], sizes = [1, 512], strides = [1, 1]} : vector<25x512xf32> to vector<1x512xf32>
    %288 = vector.broadcast %287 : vector<1x512xf32> to vector<8x512xf32>
    %289 = arith.mulf %286, %288 : vector<8x512xf32>
    %290 = vector.extract_strided_slice %268 {offsets = [0, 143], sizes = [8, 512], strides = [1, 1]} : vector<8x768xf32> to vector<8x512xf32>
    %291 = vector.extract_strided_slice %0 {offsets = [16, 0], sizes = [1, 512], strides = [1, 1]} : vector<25x512xf32> to vector<1x512xf32>
    %292 = vector.broadcast %291 : vector<1x512xf32> to vector<8x512xf32>
    %293 = arith.mulf %290, %292 : vector<8x512xf32>
    %294 = vector.extract_strided_slice %268 {offsets = [0, 144], sizes = [8, 512], strides = [1, 1]} : vector<8x768xf32> to vector<8x512xf32>
    %295 = vector.extract_strided_slice %0 {offsets = [17, 0], sizes = [1, 512], strides = [1, 1]} : vector<25x512xf32> to vector<1x512xf32>
    %296 = vector.broadcast %295 : vector<1x512xf32> to vector<8x512xf32>
    %297 = arith.mulf %294, %296 : vector<8x512xf32>
    %298 = vector.extract_strided_slice %268 {offsets = [0, 145], sizes = [8, 512], strides = [1, 1]} : vector<8x768xf32> to vector<8x512xf32>
    %299 = vector.extract_strided_slice %0 {offsets = [18, 0], sizes = [1, 512], strides = [1, 1]} : vector<25x512xf32> to vector<1x512xf32>
    %300 = vector.broadcast %299 : vector<1x512xf32> to vector<8x512xf32>
    %301 = arith.mulf %298, %300 : vector<8x512xf32>
    %302 = tpu.concatenate %272, %276, %280, %284, %285, %289, %293, %297, %301 in 0 : vector<8x512xf32>, vector<8x512xf32>, vector<8x512xf32>, vector<8x512xf32>, vector<8x512xf32>, vector<8x512xf32>, vector<8x512xf32>, vector<8x512xf32>, vector<8x512xf32> -> vector<72x512xf32>
    %cst_28 = arith.constant dense<0.000000e+00> : vector<8x512xf32>
    %303 = tpu.matmul %265, %302, %cst_28 {dimension_numbers = #tpu.dot_dimension_numbers<[1], [0], [0], [1], [0, 0, 1, 1], [], []>} : vector<8x72xf32>, vector<72x512xf32>, vector<8x512xf32> -> vector<8x512xf32>
    %304 = vector.broadcast %266 : vector<8x1xf32> to vector<8x512xf32>
    %305 = arith.addf %303, %304 : vector<8x512xf32>
    %cst_29 = arith.constant 0.000000e+00 : f32
    %306 = vector.broadcast %cst_29 : f32 to vector<8x512xf32>
    %307 = arith.cmpf oge, %305, %306 : vector<8x512xf32>
    %cst_30 = arith.constant 2.500000e-01 : f32
    %308 = vector.broadcast %cst_30 : f32 to vector<8x512xf32>
    %309 = arith.mulf %308, %305 : vector<8x512xf32>
    %310 = arith.select %307, %305, %309 : vector<8x512xi1>, vector<8x512xf32>
    %c0_31 = arith.constant 0 : index
    %c0_32 = arith.constant 0 : index
    %311 = vector.load %arg11[%c0_31, %c0_32] : memref<8x72xf32, #tpu.memory_space<vmem>>, vector<8x72xf32>
    %c0_33 = arith.constant 0 : index
    %c0_34 = arith.constant 0 : index
    %312 = vector.load %arg12[%c0_33, %c0_34] : memref<8x1xf32, #tpu.memory_space<vmem>>, vector<8x1xf32>
    %cst_35 = arith.constant 0.000000e+00 : f32
    %313 = vector.broadcast %cst_35 : f32 to vector<8x128xf32>
    %314 = tpu.concatenate %313, %310, %313 in 1 : vector<8x128xf32>, vector<8x512xf32>, vector<8x128xf32> -> vector<8x768xf32>
    %315 = vector.extract_strided_slice %314 {offsets = [0, 111], sizes = [8, 512], strides = [1, 1]} : vector<8x768xf32> to vector<8x512xf32>
    %316 = vector.extract_strided_slice %0 {offsets = [6, 0], sizes = [1, 512], strides = [1, 1]} : vector<25x512xf32> to vector<1x512xf32>
    %317 = vector.broadcast %316 : vector<1x512xf32> to vector<8x512xf32>
    %318 = arith.mulf %315, %317 : vector<8x512xf32>
    %319 = vector.extract_strided_slice %314 {offsets = [0, 112], sizes = [8, 512], strides = [1, 1]} : vector<8x768xf32> to vector<8x512xf32>
    %320 = vector.extract_strided_slice %0 {offsets = [7, 0], sizes = [1, 512], strides = [1, 1]} : vector<25x512xf32> to vector<1x512xf32>
    %321 = vector.broadcast %320 : vector<1x512xf32> to vector<8x512xf32>
    %322 = arith.mulf %319, %321 : vector<8x512xf32>
    %323 = vector.extract_strided_slice %314 {offsets = [0, 113], sizes = [8, 512], strides = [1, 1]} : vector<8x768xf32> to vector<8x512xf32>
    %324 = vector.extract_strided_slice %0 {offsets = [8, 0], sizes = [1, 512], strides = [1, 1]} : vector<25x512xf32> to vector<1x512xf32>
    %325 = vector.broadcast %324 : vector<1x512xf32> to vector<8x512xf32>
    %326 = arith.mulf %323, %325 : vector<8x512xf32>
    %327 = vector.extract_strided_slice %314 {offsets = [0, 127], sizes = [8, 512], strides = [1, 1]} : vector<8x768xf32> to vector<8x512xf32>
    %328 = vector.extract_strided_slice %0 {offsets = [11, 0], sizes = [1, 512], strides = [1, 1]} : vector<25x512xf32> to vector<1x512xf32>
    %329 = vector.broadcast %328 : vector<1x512xf32> to vector<8x512xf32>
    %330 = arith.mulf %327, %329 : vector<8x512xf32>
    %331 = vector.extract_strided_slice %314 {offsets = [0, 128], sizes = [8, 512], strides = [1, 1]} : vector<8x768xf32> to vector<8x512xf32>
    %332 = vector.extract_strided_slice %314 {offsets = [0, 129], sizes = [8, 512], strides = [1, 1]} : vector<8x768xf32> to vector<8x512xf32>
    %333 = vector.extract_strided_slice %0 {offsets = [13, 0], sizes = [1, 512], strides = [1, 1]} : vector<25x512xf32> to vector<1x512xf32>
    %334 = vector.broadcast %333 : vector<1x512xf32> to vector<8x512xf32>
    %335 = arith.mulf %332, %334 : vector<8x512xf32>
    %336 = vector.extract_strided_slice %314 {offsets = [0, 143], sizes = [8, 512], strides = [1, 1]} : vector<8x768xf32> to vector<8x512xf32>
    %337 = vector.extract_strided_slice %0 {offsets = [16, 0], sizes = [1, 512], strides = [1, 1]} : vector<25x512xf32> to vector<1x512xf32>
    %338 = vector.broadcast %337 : vector<1x512xf32> to vector<8x512xf32>
    %339 = arith.mulf %336, %338 : vector<8x512xf32>
    %340 = vector.extract_strided_slice %314 {offsets = [0, 144], sizes = [8, 512], strides = [1, 1]} : vector<8x768xf32> to vector<8x512xf32>
    %341 = vector.extract_strided_slice %0 {offsets = [17, 0], sizes = [1, 512], strides = [1, 1]} : vector<25x512xf32> to vector<1x512xf32>
    %342 = vector.broadcast %341 : vector<1x512xf32> to vector<8x512xf32>
    %343 = arith.mulf %340, %342 : vector<8x512xf32>
    %344 = vector.extract_strided_slice %314 {offsets = [0, 145], sizes = [8, 512], strides = [1, 1]} : vector<8x768xf32> to vector<8x512xf32>
    %345 = vector.extract_strided_slice %0 {offsets = [18, 0], sizes = [1, 512], strides = [1, 1]} : vector<25x512xf32> to vector<1x512xf32>
    %346 = vector.broadcast %345 : vector<1x512xf32> to vector<8x512xf32>
    %347 = arith.mulf %344, %346 : vector<8x512xf32>
    %348 = tpu.concatenate %318, %322, %326, %330, %331, %335, %339, %343, %347 in 0 : vector<8x512xf32>, vector<8x512xf32>, vector<8x512xf32>, vector<8x512xf32>, vector<8x512xf32>, vector<8x512xf32>, vector<8x512xf32>, vector<8x512xf32>, vector<8x512xf32> -> vector<72x512xf32>
    %cst_36 = arith.constant dense<0.000000e+00> : vector<8x512xf32>
    %349 = tpu.matmul %311, %348, %cst_36 {dimension_numbers = #tpu.dot_dimension_numbers<[1], [0], [0], [1], [0, 0, 1, 1], [], []>} : vector<8x72xf32>, vector<72x512xf32>, vector<8x512xf32> -> vector<8x512xf32>
    %350 = vector.broadcast %312 : vector<8x1xf32> to vector<8x512xf32>
    %351 = arith.addf %349, %350 : vector<8x512xf32>
    %352 = arith.addf %264, %351 : vector<8x512xf32>
    %cst_37 = arith.constant 0.000000e+00 : f32
    %353 = vector.broadcast %cst_37 : f32 to vector<8x512xf32>
    %354 = arith.maximumf %352, %353 : vector<8x512xf32>
    %355 = arith.addf %354, %42 : vector<8x512xf32>
    %c0_38 = arith.constant 0 : index
    %c0_39 = arith.constant 0 : index
    %356 = vector.load %arg13[%c0_38, %c0_39] : memref<32x72xf32, #tpu.memory_space<vmem>>, vector<32x72xf32>
    %c0_40 = arith.constant 0 : index
    %c0_41 = arith.constant 0 : index
    %357 = vector.load %arg14[%c0_40, %c0_41] : memref<32x1xf32, #tpu.memory_space<vmem>>, vector<32x1xf32>
    %cst_42 = arith.constant 0.000000e+00 : f32
    %358 = vector.broadcast %cst_42 : f32 to vector<8x128xf32>
    %359 = tpu.concatenate %358, %355, %358 in 1 : vector<8x128xf32>, vector<8x512xf32>, vector<8x128xf32> -> vector<8x768xf32>
    %360 = vector.extract_strided_slice %359 {offsets = [0, 111], sizes = [8, 512], strides = [1, 1]} : vector<8x768xf32> to vector<8x512xf32>
    %361 = vector.extract_strided_slice %0 {offsets = [6, 0], sizes = [1, 512], strides = [1, 1]} : vector<25x512xf32> to vector<1x512xf32>
    %362 = vector.broadcast %361 : vector<1x512xf32> to vector<8x512xf32>
    %363 = arith.mulf %360, %362 : vector<8x512xf32>
    %364 = vector.extract_strided_slice %359 {offsets = [0, 112], sizes = [8, 512], strides = [1, 1]} : vector<8x768xf32> to vector<8x512xf32>
    %365 = vector.extract_strided_slice %0 {offsets = [7, 0], sizes = [1, 512], strides = [1, 1]} : vector<25x512xf32> to vector<1x512xf32>
    %366 = vector.broadcast %365 : vector<1x512xf32> to vector<8x512xf32>
    %367 = arith.mulf %364, %366 : vector<8x512xf32>
    %368 = vector.extract_strided_slice %359 {offsets = [0, 113], sizes = [8, 512], strides = [1, 1]} : vector<8x768xf32> to vector<8x512xf32>
    %369 = vector.extract_strided_slice %0 {offsets = [8, 0], sizes = [1, 512], strides = [1, 1]} : vector<25x512xf32> to vector<1x512xf32>
    %370 = vector.broadcast %369 : vector<1x512xf32> to vector<8x512xf32>
    %371 = arith.mulf %368, %370 : vector<8x512xf32>
    %372 = vector.extract_strided_slice %359 {offsets = [0, 127], sizes = [8, 512], strides = [1, 1]} : vector<8x768xf32> to vector<8x512xf32>
    %373 = vector.extract_strided_slice %0 {offsets = [11, 0], sizes = [1, 512], strides = [1, 1]} : vector<25x512xf32> to vector<1x512xf32>
    %374 = vector.broadcast %373 : vector<1x512xf32> to vector<8x512xf32>
    %375 = arith.mulf %372, %374 : vector<8x512xf32>
    %376 = vector.extract_strided_slice %359 {offsets = [0, 128], sizes = [8, 512], strides = [1, 1]} : vector<8x768xf32> to vector<8x512xf32>
    %377 = vector.extract_strided_slice %359 {offsets = [0, 129], sizes = [8, 512], strides = [1, 1]} : vector<8x768xf32> to vector<8x512xf32>
    %378 = vector.extract_strided_slice %0 {offsets = [13, 0], sizes = [1, 512], strides = [1, 1]} : vector<25x512xf32> to vector<1x512xf32>
    %379 = vector.broadcast %378 : vector<1x512xf32> to vector<8x512xf32>
    %380 = arith.mulf %377, %379 : vector<8x512xf32>
    %381 = vector.extract_strided_slice %359 {offsets = [0, 143], sizes = [8, 512], strides = [1, 1]} : vector<8x768xf32> to vector<8x512xf32>
    %382 = vector.extract_strided_slice %0 {offsets = [16, 0], sizes = [1, 512], strides = [1, 1]} : vector<25x512xf32> to vector<1x512xf32>
    %383 = vector.broadcast %382 : vector<1x512xf32> to vector<8x512xf32>
    %384 = arith.mulf %381, %383 : vector<8x512xf32>
    %385 = vector.extract_strided_slice %359 {offsets = [0, 144], sizes = [8, 512], strides = [1, 1]} : vector<8x768xf32> to vector<8x512xf32>
    %386 = vector.extract_strided_slice %0 {offsets = [17, 0], sizes = [1, 512], strides = [1, 1]} : vector<25x512xf32> to vector<1x512xf32>
    %387 = vector.broadcast %386 : vector<1x512xf32> to vector<8x512xf32>
    %388 = arith.mulf %385, %387 : vector<8x512xf32>
    %389 = vector.extract_strided_slice %359 {offsets = [0, 145], sizes = [8, 512], strides = [1, 1]} : vector<8x768xf32> to vector<8x512xf32>
    %390 = vector.extract_strided_slice %0 {offsets = [18, 0], sizes = [1, 512], strides = [1, 1]} : vector<25x512xf32> to vector<1x512xf32>
    %391 = vector.broadcast %390 : vector<1x512xf32> to vector<8x512xf32>
    %392 = arith.mulf %389, %391 : vector<8x512xf32>
    %393 = tpu.concatenate %363, %367, %371, %375, %376, %380, %384, %388, %392 in 0 : vector<8x512xf32>, vector<8x512xf32>, vector<8x512xf32>, vector<8x512xf32>, vector<8x512xf32>, vector<8x512xf32>, vector<8x512xf32>, vector<8x512xf32>, vector<8x512xf32> -> vector<72x512xf32>
    %cst_43 = arith.constant dense<0.000000e+00> : vector<32x512xf32>
    %394 = tpu.matmul %356, %393, %cst_43 {dimension_numbers = #tpu.dot_dimension_numbers<[1], [0], [0], [1], [0, 0, 1, 1], [], []>} : vector<32x72xf32>, vector<72x512xf32>, vector<32x512xf32> -> vector<32x512xf32>
    %395 = vector.broadcast %357 : vector<32x1xf32> to vector<32x512xf32>
    %396 = arith.addf %394, %395 : vector<32x512xf32>
    %397 = vector.extract_strided_slice %396 {offsets = [0, 0], sizes = [8, 512], strides = [1, 1]} : vector<32x512xf32> to vector<8x512xf32>
    %cst_44 = arith.constant 0.000000e+00 : f32
    %398 = vector.broadcast %cst_44 : f32 to vector<8x128xf32>
    %399 = tpu.concatenate %398, %397, %398 in 1 : vector<8x128xf32>, vector<8x512xf32>, vector<8x128xf32> -> vector<8x768xf32>
    %400 = vector.extract_strided_slice %396 {offsets = [8, 0], sizes = [8, 512], strides = [1, 1]} : vector<32x512xf32> to vector<8x512xf32>
    %cst_45 = arith.constant 0.000000e+00 : f32
    %401 = vector.broadcast %cst_45 : f32 to vector<8x128xf32>
    %402 = tpu.concatenate %401, %400, %401 in 1 : vector<8x128xf32>, vector<8x512xf32>, vector<8x128xf32> -> vector<8x768xf32>
    %403 = vector.extract_strided_slice %396 {offsets = [16, 0], sizes = [8, 512], strides = [1, 1]} : vector<32x512xf32> to vector<8x512xf32>
    %cst_46 = arith.constant 0.000000e+00 : f32
    %404 = vector.broadcast %cst_46 : f32 to vector<8x128xf32>
    %405 = tpu.concatenate %404, %403, %404 in 1 : vector<8x128xf32>, vector<8x512xf32>, vector<8x128xf32> -> vector<8x768xf32>
    %406 = vector.extract_strided_slice %396 {offsets = [24, 0], sizes = [8, 512], strides = [1, 1]} : vector<32x512xf32> to vector<8x512xf32>
    %cst_47 = arith.constant 0.000000e+00 : f32
    %407 = vector.broadcast %cst_47 : f32 to vector<8x128xf32>
    %408 = tpu.concatenate %407, %406, %407 in 1 : vector<8x128xf32>, vector<8x512xf32>, vector<8x128xf32> -> vector<8x768xf32>
    %409 = vector.extract_strided_slice %408 {offsets = [0, 111], sizes = [8, 512], strides = [1, 1]} : vector<8x768xf32> to vector<8x512xf32>
    %410 = vector.extract_strided_slice %0 {offsets = [6, 0], sizes = [1, 512], strides = [1, 1]} : vector<25x512xf32> to vector<1x512xf32>
    %411 = vector.broadcast %410 : vector<1x512xf32> to vector<8x512xf32>
    %412 = arith.mulf %409, %411 : vector<8x512xf32>
    %413 = vector.extract_strided_slice %405 {offsets = [0, 112], sizes = [8, 512], strides = [1, 1]} : vector<8x768xf32> to vector<8x512xf32>
    %414 = vector.extract_strided_slice %0 {offsets = [7, 0], sizes = [1, 512], strides = [1, 1]} : vector<25x512xf32> to vector<1x512xf32>
    %415 = vector.broadcast %414 : vector<1x512xf32> to vector<8x512xf32>
    %416 = arith.mulf %413, %415 : vector<8x512xf32>
    %417 = vector.extract_strided_slice %408 {offsets = [0, 112], sizes = [8, 512], strides = [1, 1]} : vector<8x768xf32> to vector<8x512xf32>
    %418 = vector.extract_strided_slice %0 {offsets = [7, 0], sizes = [1, 512], strides = [1, 1]} : vector<25x512xf32> to vector<1x512xf32>
    %419 = vector.broadcast %418 : vector<1x512xf32> to vector<8x512xf32>
    %420 = arith.mulf %417, %419 : vector<8x512xf32>
    %421 = vector.extract_strided_slice %402 {offsets = [0, 127], sizes = [8, 512], strides = [1, 1]} : vector<8x768xf32> to vector<8x512xf32>
    %422 = vector.extract_strided_slice %0 {offsets = [11, 0], sizes = [1, 512], strides = [1, 1]} : vector<25x512xf32> to vector<1x512xf32>
    %423 = vector.broadcast %422 : vector<1x512xf32> to vector<8x512xf32>
    %424 = arith.mulf %421, %423 : vector<8x512xf32>
    %425 = vector.extract_strided_slice %399 {offsets = [0, 128], sizes = [8, 512], strides = [1, 1]} : vector<8x768xf32> to vector<8x512xf32>
    %426 = vector.extract_strided_slice %402 {offsets = [0, 128], sizes = [8, 512], strides = [1, 1]} : vector<8x768xf32> to vector<8x512xf32>
    %427 = vector.extract_strided_slice %408 {offsets = [0, 127], sizes = [8, 512], strides = [1, 1]} : vector<8x768xf32> to vector<8x512xf32>
    %428 = vector.extract_strided_slice %0 {offsets = [11, 0], sizes = [1, 512], strides = [1, 1]} : vector<25x512xf32> to vector<1x512xf32>
    %429 = vector.broadcast %428 : vector<1x512xf32> to vector<8x512xf32>
    %430 = arith.mulf %427, %429 : vector<8x512xf32>
    %431 = vector.extract_strided_slice %405 {offsets = [0, 128], sizes = [8, 512], strides = [1, 1]} : vector<8x768xf32> to vector<8x512xf32>
    %432 = vector.extract_strided_slice %408 {offsets = [0, 128], sizes = [8, 512], strides = [1, 1]} : vector<8x768xf32> to vector<8x512xf32>
    %433 = tpu.concatenate %412, %416, %420, %424, %425, %426, %430, %431, %432 in 0 : vector<8x512xf32>, vector<8x512xf32>, vector<8x512xf32>, vector<8x512xf32>, vector<8x512xf32>, vector<8x512xf32>, vector<8x512xf32>, vector<8x512xf32>, vector<8x512xf32> -> vector<72x512xf32>
    %434 = vector.extract_strided_slice %405 {offsets = [0, 112], sizes = [8, 512], strides = [1, 1]} : vector<8x768xf32> to vector<8x512xf32>
    %435 = vector.extract_strided_slice %0 {offsets = [7, 0], sizes = [1, 512], strides = [1, 1]} : vector<25x512xf32> to vector<1x512xf32>
    %436 = vector.broadcast %435 : vector<1x512xf32> to vector<8x512xf32>
    %437 = arith.mulf %434, %436 : vector<8x512xf32>
    %438 = vector.extract_strided_slice %408 {offsets = [0, 112], sizes = [8, 512], strides = [1, 1]} : vector<8x768xf32> to vector<8x512xf32>
    %439 = vector.extract_strided_slice %0 {offsets = [7, 0], sizes = [1, 512], strides = [1, 1]} : vector<25x512xf32> to vector<1x512xf32>
    %440 = vector.broadcast %439 : vector<1x512xf32> to vector<8x512xf32>
    %441 = arith.mulf %438, %440 : vector<8x512xf32>
    %442 = vector.extract_strided_slice %405 {offsets = [0, 113], sizes = [8, 512], strides = [1, 1]} : vector<8x768xf32> to vector<8x512xf32>
    %443 = vector.extract_strided_slice %0 {offsets = [8, 0], sizes = [1, 512], strides = [1, 1]} : vector<25x512xf32> to vector<1x512xf32>
    %444 = vector.broadcast %443 : vector<1x512xf32> to vector<8x512xf32>
    %445 = arith.mulf %442, %444 : vector<8x512xf32>
    %446 = vector.extract_strided_slice %399 {offsets = [0, 128], sizes = [8, 512], strides = [1, 1]} : vector<8x768xf32> to vector<8x512xf32>
    %447 = vector.extract_strided_slice %402 {offsets = [0, 128], sizes = [8, 512], strides = [1, 1]} : vector<8x768xf32> to vector<8x512xf32>
    %448 = vector.extract_strided_slice %399 {offsets = [0, 129], sizes = [8, 512], strides = [1, 1]} : vector<8x768xf32> to vector<8x512xf32>
    %449 = vector.extract_strided_slice %0 {offsets = [13, 0], sizes = [1, 512], strides = [1, 1]} : vector<25x512xf32> to vector<1x512xf32>
    %450 = vector.broadcast %449 : vector<1x512xf32> to vector<8x512xf32>
    %451 = arith.mulf %448, %450 : vector<8x512xf32>
    %452 = vector.extract_strided_slice %405 {offsets = [0, 128], sizes = [8, 512], strides = [1, 1]} : vector<8x768xf32> to vector<8x512xf32>
    %453 = vector.extract_strided_slice %408 {offsets = [0, 128], sizes = [8, 512], strides = [1, 1]} : vector<8x768xf32> to vector<8x512xf32>
    %454 = vector.extract_strided_slice %405 {offsets = [0, 129], sizes = [8, 512], strides = [1, 1]} : vector<8x768xf32> to vector<8x512xf32>
    %455 = vector.extract_strided_slice %0 {offsets = [13, 0], sizes = [1, 512], strides = [1, 1]} : vector<25x512xf32> to vector<1x512xf32>
    %456 = vector.broadcast %455 : vector<1x512xf32> to vector<8x512xf32>
    %457 = arith.mulf %454, %456 : vector<8x512xf32>
    %458 = tpu.concatenate %437, %441, %445, %446, %447, %451, %452, %453, %457 in 0 : vector<8x512xf32>, vector<8x512xf32>, vector<8x512xf32>, vector<8x512xf32>, vector<8x512xf32>, vector<8x512xf32>, vector<8x512xf32>, vector<8x512xf32>, vector<8x512xf32> -> vector<72x512xf32>
    %459 = vector.extract_strided_slice %402 {offsets = [0, 127], sizes = [8, 512], strides = [1, 1]} : vector<8x768xf32> to vector<8x512xf32>
    %460 = vector.extract_strided_slice %0 {offsets = [11, 0], sizes = [1, 512], strides = [1, 1]} : vector<25x512xf32> to vector<1x512xf32>
    %461 = vector.broadcast %460 : vector<1x512xf32> to vector<8x512xf32>
    %462 = arith.mulf %459, %461 : vector<8x512xf32>
    %463 = vector.extract_strided_slice %399 {offsets = [0, 128], sizes = [8, 512], strides = [1, 1]} : vector<8x768xf32> to vector<8x512xf32>
    %464 = vector.extract_strided_slice %402 {offsets = [0, 128], sizes = [8, 512], strides = [1, 1]} : vector<8x768xf32> to vector<8x512xf32>
    %465 = vector.extract_strided_slice %408 {offsets = [0, 127], sizes = [8, 512], strides = [1, 1]} : vector<8x768xf32> to vector<8x512xf32>
    %466 = vector.extract_strided_slice %0 {offsets = [11, 0], sizes = [1, 512], strides = [1, 1]} : vector<25x512xf32> to vector<1x512xf32>
    %467 = vector.broadcast %466 : vector<1x512xf32> to vector<8x512xf32>
    %468 = arith.mulf %465, %467 : vector<8x512xf32>
    %469 = vector.extract_strided_slice %405 {offsets = [0, 128], sizes = [8, 512], strides = [1, 1]} : vector<8x768xf32> to vector<8x512xf32>
    %470 = vector.extract_strided_slice %408 {offsets = [0, 128], sizes = [8, 512], strides = [1, 1]} : vector<8x768xf32> to vector<8x512xf32>
    %471 = vector.extract_strided_slice %402 {offsets = [0, 143], sizes = [8, 512], strides = [1, 1]} : vector<8x768xf32> to vector<8x512xf32>
    %472 = vector.extract_strided_slice %0 {offsets = [16, 0], sizes = [1, 512], strides = [1, 1]} : vector<25x512xf32> to vector<1x512xf32>
    %473 = vector.broadcast %472 : vector<1x512xf32> to vector<8x512xf32>
    %474 = arith.mulf %471, %473 : vector<8x512xf32>
    %475 = vector.extract_strided_slice %399 {offsets = [0, 144], sizes = [8, 512], strides = [1, 1]} : vector<8x768xf32> to vector<8x512xf32>
    %476 = vector.extract_strided_slice %0 {offsets = [17, 0], sizes = [1, 512], strides = [1, 1]} : vector<25x512xf32> to vector<1x512xf32>
    %477 = vector.broadcast %476 : vector<1x512xf32> to vector<8x512xf32>
    %478 = arith.mulf %475, %477 : vector<8x512xf32>
    %479 = vector.extract_strided_slice %402 {offsets = [0, 144], sizes = [8, 512], strides = [1, 1]} : vector<8x768xf32> to vector<8x512xf32>
    %480 = vector.extract_strided_slice %0 {offsets = [17, 0], sizes = [1, 512], strides = [1, 1]} : vector<25x512xf32> to vector<1x512xf32>
    %481 = vector.broadcast %480 : vector<1x512xf32> to vector<8x512xf32>
    %482 = arith.mulf %479, %481 : vector<8x512xf32>
    %483 = tpu.concatenate %462, %463, %464, %468, %469, %470, %474, %478, %482 in 0 : vector<8x512xf32>, vector<8x512xf32>, vector<8x512xf32>, vector<8x512xf32>, vector<8x512xf32>, vector<8x512xf32>, vector<8x512xf32>, vector<8x512xf32>, vector<8x512xf32> -> vector<72x512xf32>
    %484 = vector.extract_strided_slice %399 {offsets = [0, 128], sizes = [8, 512], strides = [1, 1]} : vector<8x768xf32> to vector<8x512xf32>
    %485 = vector.extract_strided_slice %402 {offsets = [0, 128], sizes = [8, 512], strides = [1, 1]} : vector<8x768xf32> to vector<8x512xf32>
    %486 = vector.extract_strided_slice %399 {offsets = [0, 129], sizes = [8, 512], strides = [1, 1]} : vector<8x768xf32> to vector<8x512xf32>
    %487 = vector.extract_strided_slice %0 {offsets = [13, 0], sizes = [1, 512], strides = [1, 1]} : vector<25x512xf32> to vector<1x512xf32>
    %488 = vector.broadcast %487 : vector<1x512xf32> to vector<8x512xf32>
    %489 = arith.mulf %486, %488 : vector<8x512xf32>
    %490 = vector.extract_strided_slice %405 {offsets = [0, 128], sizes = [8, 512], strides = [1, 1]} : vector<8x768xf32> to vector<8x512xf32>
    %491 = vector.extract_strided_slice %408 {offsets = [0, 128], sizes = [8, 512], strides = [1, 1]} : vector<8x768xf32> to vector<8x512xf32>
    %492 = vector.extract_strided_slice %405 {offsets = [0, 129], sizes = [8, 512], strides = [1, 1]} : vector<8x768xf32> to vector<8x512xf32>
    %493 = vector.extract_strided_slice %0 {offsets = [13, 0], sizes = [1, 512], strides = [1, 1]} : vector<25x512xf32> to vector<1x512xf32>
    %494 = vector.broadcast %493 : vector<1x512xf32> to vector<8x512xf32>
    %495 = arith.mulf %492, %494 : vector<8x512xf32>
    %496 = vector.extract_strided_slice %399 {offsets = [0, 144], sizes = [8, 512], strides = [1, 1]} : vector<8x768xf32> to vector<8x512xf32>
    %497 = vector.extract_strided_slice %0 {offsets = [17, 0], sizes = [1, 512], strides = [1, 1]} : vector<25x512xf32> to vector<1x512xf32>
    %498 = vector.broadcast %497 : vector<1x512xf32> to vector<8x512xf32>
    %499 = arith.mulf %496, %498 : vector<8x512xf32>
    %500 = vector.extract_strided_slice %402 {offsets = [0, 144], sizes = [8, 512], strides = [1, 1]} : vector<8x768xf32> to vector<8x512xf32>
    %501 = vector.extract_strided_slice %0 {offsets = [17, 0], sizes = [1, 512], strides = [1, 1]} : vector<25x512xf32> to vector<1x512xf32>
    %502 = vector.broadcast %501 : vector<1x512xf32> to vector<8x512xf32>
    %503 = arith.mulf %500, %502 : vector<8x512xf32>
    %504 = vector.extract_strided_slice %399 {offsets = [0, 145], sizes = [8, 512], strides = [1, 1]} : vector<8x768xf32> to vector<8x512xf32>
    %505 = vector.extract_strided_slice %0 {offsets = [18, 0], sizes = [1, 512], strides = [1, 1]} : vector<25x512xf32> to vector<1x512xf32>
    %506 = vector.broadcast %505 : vector<1x512xf32> to vector<8x512xf32>
    %507 = arith.mulf %504, %506 : vector<8x512xf32>
    %508 = tpu.concatenate %484, %485, %489, %490, %491, %495, %499, %503, %507 in 0 : vector<8x512xf32>, vector<8x512xf32>, vector<8x512xf32>, vector<8x512xf32>, vector<8x512xf32>, vector<8x512xf32>, vector<8x512xf32>, vector<8x512xf32>, vector<8x512xf32> -> vector<72x512xf32>
    %509 = tpu.concatenate %433, %458, %483, %508 in 1 : vector<72x512xf32>, vector<72x512xf32>, vector<72x512xf32>, vector<72x512xf32> -> vector<72x2048xf32>
    %c0_48 = arith.constant 0 : index
    %c0_49 = arith.constant 0 : index
    %510 = vector.load %arg15[%c0_48, %c0_49] : memref<8x72xf32, #tpu.memory_space<vmem>>, vector<8x72xf32>
    %cst_50 = arith.constant dense<0.000000e+00> : vector<8x2048xf32>
    %511 = tpu.matmul %510, %509, %cst_50 {dimension_numbers = #tpu.dot_dimension_numbers<[1], [0], [0], [1], [0, 0, 1, 1], [], []>} : vector<8x72xf32>, vector<72x2048xf32>, vector<8x2048xf32> -> vector<8x2048xf32>
    %c0_51 = arith.constant 0 : index
    %c0_52 = arith.constant 0 : index
    %512 = vector.load %arg16[%c0_51, %c0_52] : memref<8x1xf32, #tpu.memory_space<vmem>>, vector<8x1xf32>
    %513 = vector.broadcast %512 : vector<8x1xf32> to vector<8x2048xf32>
    %514 = arith.addf %511, %513 : vector<8x2048xf32>
    %c0_53 = arith.constant 0 : index
    %c0_54 = arith.constant 0 : index
    %515 = vector.load %arg17[%c0_53, %c0_54] : memref<8x2048xf32, #tpu.memory_space<vmem>>, vector<8x2048xf32>
    tpu.vector_store %arg17[%c0_53, %c0_54], %514 {strides = array<i32>} : memref<8x2048xf32, #tpu.memory_space<vmem>>, vector<8x2048xf32>,
    return
  }
  func.func @transform_0(%arg0: i32) -> (i32, i32) {
    %c0_i32 = arith.constant 0 : i32
    %c0_i32_0 = arith.constant 0 : i32
    %c0_i32_1 = arith.constant 0 : i32
    return %c0_i32, %c0_i32_0 : i32, i32
  }
  func.func @transform_1(%arg0: i32) -> (i32, i32) {
    %c0_i32 = arith.constant 0 : i32
    %c0_i32_0 = arith.constant 0 : i32
    %c0_i32_1 = arith.constant 0 : i32
    return %c0_i32, %c0_i32_0 : i32, i32
  }
  func.func @transform_2(%arg0: i32) -> (i32, i32) {
    %c0_i32 = arith.constant 0 : i32
    %c0_i32_0 = arith.constant 0 : i32
    %c0_i32_1 = arith.constant 0 : i32
    return %c0_i32, %c0_i32_0 : i32, i32
  }
  func.func @transform_3(%arg0: i32) -> (i32, i32) {
    %c0_i32 = arith.constant 0 : i32
    %c0_i32_0 = arith.constant 0 : i32
    %c0_i32_1 = arith.constant 0 : i32
    return %c0_i32, %c0_i32_0 : i32, i32
  }
  func.func @transform_4(%arg0: i32) -> (i32, i32) {
    %c0_i32 = arith.constant 0 : i32
    %c0_i32_0 = arith.constant 0 : i32
    %c0_i32_1 = arith.constant 0 : i32
    return %c0_i32, %c0_i32_0 : i32, i32
  }
  func.func @transform_5(%arg0: i32) -> (i32, i32) {
    %c0_i32 = arith.constant 0 : i32
    %c0_i32_0 = arith.constant 0 : i32
    %c0_i32_1 = arith.constant 0 : i32
    return %c0_i32, %c0_i32_0 : i32, i32
  }
  func.func @transform_6(%arg0: i32) -> (i32, i32) {
    %c0_i32 = arith.constant 0 : i32
    %c0_i32_0 = arith.constant 0 : i32
    %c0_i32_1 = arith.constant 0 : i32
    return %c0_i32, %c0_i32_0 : i32, i32
  }
  func.func @transform_7(%arg0: i32) -> (i32, i32) {
    %c0_i32 = arith.constant 0 : i32
    %c0_i32_0 = arith.constant 0 : i32
    %c0_i32_1 = arith.constant 0 : i32
    return %c0_i32, %c0_i32_0 : i32, i32
  }
  func.func @transform_8(%arg0: i32) -> (i32, i32) {
    %c0_i32 = arith.constant 0 : i32
    %c0_i32_0 = arith.constant 0 : i32
    %c0_i32_1 = arith.constant 0 : i32
    return %c0_i32, %c0_i32_0 : i32, i32
  }
  func.func @transform_9(%arg0: i32) -> (i32, i32) {
    %c0_i32 = arith.constant 0 : i32
    %c0_i32_0 = arith.constant 0 : i32
    %c0_i32_1 = arith.constant 0 : i32
    return %c0_i32, %c0_i32_0 : i32, i32
  }
  func.func @transform_10(%arg0: i32) -> (i32, i32) {
    %c0_i32 = arith.constant 0 : i32
    %c0_i32_0 = arith.constant 0 : i32
    %c0_i32_1 = arith.constant 0 : i32
    return %c0_i32, %c0_i32_0 : i32, i32
  }
  func.func @transform_11(%arg0: i32) -> (i32, i32) {
    %c0_i32 = arith.constant 0 : i32
    %c0_i32_0 = arith.constant 0 : i32
    %c0_i32_1 = arith.constant 0 : i32
    return %c0_i32, %c0_i32_0 : i32, i32
  }
  func.func @transform_12(%arg0: i32) -> (i32, i32) {
    %c0_i32 = arith.constant 0 : i32
    %c0_i32_0 = arith.constant 0 : i32
    %c0_i32_1 = arith.constant 0 : i32
    return %c0_i32, %c0_i32_0 : i32, i32
  }
  func.func @transform_13(%arg0: i32) -> (i32, i32) {
    %c0_i32 = arith.constant 0 : i32
    %c0_i32_0 = arith.constant 0 : i32
    %c0_i32_1 = arith.constant 0 : i32
    return %c0_i32, %c0_i32_0 : i32, i32
  }
  func.func @transform_14(%arg0: i32) -> (i32, i32) {
    %c0_i32 = arith.constant 0 : i32
    %c0_i32_0 = arith.constant 0 : i32
    %c0_i32_1 = arith.constant 0 : i32
    return %c0_i32, %c0_i32_0 : i32, i32
  }
  func.func @transform_15(%arg0: i32) -> (i32, i32) {
    %c0_i32 = arith.constant 0 : i32
    %c0_i32_0 = arith.constant 0 : i32
    %c0_i32_1 = arith.constant 0 : i32
    return %c0_i32, %c0_i32_0 : i32, i32
  }
  func.func @transform_16(%arg0: i32) -> (i32, i32) {
    %c0_i32 = arith.constant 0 : i32
    %c0_i32_0 = arith.constant 0 : i32
    %c0_i32_1 = arith.constant 0 : i32
    return %c0_i32, %c0_i32_0 : i32, i32
  }
}

</mosaic_0001>

<bundles_post_ra>
// kernel: hsrcnn_forward.1
= control target key start
LH: loop header
LB: loop body
LE: loop exit
PB: predicated region body
PF: predicated region fallthrough
CT: control target
= control target key end

     0   :  { %s9047_s26 = smov 111   ;;  %s9048_s27 = smov 112   ;;  %vm121_vm0 = vcmask 916480   ;;  %vm15865_vm1 = vcmask 924672   ;;  %vm181_vm2 = vcmask 1039360   ;;  %vm15762_vm3 = vcmask 7168   ;;  %s15637_s1 = inlined_call_operand.vmem [shape: f32[25,512], index: 1, kind: input, shape index: {}]   ;;  %s15638_s0 = inlined_call_operand.vmem [shape: f32[8,512], index: 0, kind: input, shape index: {}]   ;;  %s15639_s3 = inlined_call_operand.vmem [shape: f32[8,1], index: 3, kind: input, shape index: {}]   ;;  %s15640_s2 = inlined_call_operand.vmem [shape: f32[8,72], index: 2, kind: input, shape index: {}]   ;;  %s15641_s5 = inlined_call_operand.vmem [shape: f32[8,1], index: 5, kind: input, shape index: {}]   ;;  %s15642_s4 = inlined_call_operand.vmem [shape: f32[8,200], index: 4, kind: input, shape index: {}]   ;;  %s15643_s7 = inlined_call_operand.vmem [shape: f32[8,1], index: 7, kind: input, shape index: {}]   ;;  %s15644_s6 = inlined_call_operand.vmem [shape: f32[8,200], index: 6, kind: input, shape index: {}]   ;;  %s15645_s9 = inlined_call_operand.vmem [shape: f32[8,1], index: 9, kind: input, shape index: {}]   ;;  %s15646_s11 = inlined_call_operand.vmem [shape: f32[8,1], index: 11, kind: input, shape index: {}]   ;;  %s15647_s8 = inlined_call_operand.vmem [shape: f32[8,72], index: 8, kind: input, shape index: {}]   ;;  %s15648_s13 = inlined_call_operand.vmem [shape: f32[32,1], index: 13, kind: input, shape index: {}]   ;;  %s15649_s10 = inlined_call_operand.vmem [shape: f32[8,72], index: 10, kind: input, shape index: {}]   ;;  %s15650_s12 = inlined_call_operand.vmem [shape: f32[32,72], index: 12, kind: input, shape index: {}]   ;;  %s15651_s15 = inlined_call_operand.vmem [shape: f32[8,1], index: 15, kind: input, shape index: {}]   ;;  %s15652_s14 = inlined_call_operand.vmem [shape: f32[8,72], index: 14, kind: input, shape index: {}]   ;;  %s15653_s16 = inlined_call_operand.vmem [shape: f32[8,2048], index: 16, kind: output, shape index: {}]  }
   0x1   :  { %16150 = sst [smem:[#allocation153_spill]] %s15637_s1  ;;  %s15793_s19 = smov 113   ;;  %v9284_v42 = vld [vmem:[%s15638_s0] sm:$0xff]  ;;  %v9289_v43 = vld [vmem:[%s15638_s0 + $0x8] sm:$0xff]  ;;  %v9301_v47 = vld [vmem:[%s15638_s0 + $0x10] sm:$0xff]  ;;  %vm241_vm4 = vcmask 121856  }
   0x2   :  { %s16151_s23 = sld [smem:[#allocation153_spill]]  ;;  %s9050_s29 = smov 127   ;;  %v6341_v45 = vpack.i.bf16 %v9289_v43, %v9284_v42  ;;  %v9306_v48 = vld [vmem:[%s15638_s0 + $0x18] sm:$0xff]  ;;  %vm15776_vm5 = vcmask 130048   ;;  %vm15863_vm6 = vcmask 138240   ;;  %vm15870_vm7 = vcmask 908288  }
   0x3   :  { %s15732_s30 = smov 1   ;;  %s9052_s18 = smov 15   ;;  %v6346_v49 = vpack.i.bf16 %v9306_v48, %v9301_v47  ;;  %vm349_vm8 = vcmask 1031168   ;;  %vm403_vm9 = vcmask 900096   ;;  %vm423_vm10 = vcmask 785408  }
   0x4   :  { %s15734_s1 = smov 16   ;;  %s15736_s17 = smov 17   ;;  %vm443_vm11 = vcmask 777216   ;;  %vm15957_vm12 = vcmask 769024   ;;  %vm15954_vm13 = vcmask 588800   ;;  %vm931_vm14 = vcmask 932864  }
   0x5   :  { %s9055_s0 = smov 126   ;;  %s9057_s20 = smov 110   ;;  %vm830_vm15 = vcmask 793600  }
   0x6   :  { %s9058_s21 = smov 96   ;;  %s9059_s22 = smov 95  }
   0x7   :  { %s9060_s24 = smov 94   ;;  %s9063_s25 = smov 114  }
   0x8   :  { %v9168_v0 = vld [vmem:[%s16151_s23 + $0x10] sm:$0xff]  ;;  %v9173_v1 = vld [vmem:[%s16151_s23] sm:$0xff]  ;;  %v9184_v5 = vld [vmem:[%s16151_s23 + $0x18] sm:$0xff]  ;;  %s9064_s28 = smov 2  }
   0x9   :  { %v77_v2 = vperm.slane %v9168_v0, 6  ;;  %v105_v3 = vperm.slane %v9173_v1, 7  ;;  %v75_v4 = vperm.slane %v9173_v1, 6  ;;  %v9189_v6 = vld [vmem:[%s16151_s23 + $0x8] sm:$0xff]  ;;  %v78_v7 = vperm.slane %v9184_v5, 6  ;;  %v9200_v10 = vld [vmem:[%s16151_s23 + $0x20] sm:$0xff] }
   0xa   :  { %v106_v8 = vperm.slane %v9189_v6, 7  ;;  %v76_v9 = vperm.slane %v9189_v6, 6  ;;  %v108_v11 = vperm.slane %v9184_v5, 7  ;;  %v135_v12 = vperm.slane %v9200_v10, 0  ;;  %v9211_v14 = vld [vmem:[%s16151_s23 + $0x30] sm:$0xff]  ;;  %v9216_v15 = vld [vmem:[%s16151_s23 + $0x38] sm:$0xff] }
   0xb   :  { %87 = vrot.lane.b32.xlu1 %v77_v2, %s9047_s26  ;;  %113 = vrot.lane.b32.xlu2 %v105_v3, %s9048_s27  ;;  %v107_v13 = vperm.slane %v9168_v0, 7  ;;  %v9221_v16 = vld [vmem:[%s16151_s23 + $0x28] sm:$0xff]  ;;  %v137_v17 = vperm.slane %v9211_v14, 0  ;;  %v138_v18 = vperm.slane %v9216_v15, 0  ;;  %v167_v21 = vperm.slane %v9211_v14, 3  ;;  %v9244_v26 = vld [vmem:[%s16151_s23 + $0x40] sm:$0xff] }
   0xc   :  { %83 = vrot.lane.b32.xlu0 %v75_v4, %s9047_s26  ;;  %v136_v19 = vperm.slane %v9221_v16, 0  ;;  %v166_v20 = vperm.slane %v9221_v16, 3  ;;  %v165_v22 = vperm.slane %v9200_v10, 3  ;;  %v195_v23 = vperm.slane %v9200_v10, 5  ;;  %v9254_v30 = vld [vmem:[%s16151_s23 + $0x50] sm:$0xff]  ;;  %v9259_v31 = vld [vmem:[%s16151_s23 + $0x58] sm:$0xff] }
   0xd   :  { %v196_v24 = vperm.slane %v9221_v16, 5  ;;  %v168_v25 = vperm.slane %v9216_v15, 3  ;;  %v198_v27 = vperm.slane %v9216_v15, 5  ;;  %v225_v28 = vperm.slane %v9244_v26, 0  ;;  %v9264_v32 = vld [vmem:[%s16151_s23 + $0x48] sm:$0xff] }
   0xe   :  { %v197_v29 = vperm.slane %v9211_v14, 5  ;;  %v227_v33 = vperm.slane %v9254_v30, 0  ;;  %v228_v34 = vperm.slane %v9259_v31, 0  ;;  %v226_v35 = vperm.slane %v9264_v32, 0 }
   0xf   :  { %v256_v36 = vperm.slane %v9264_v32, 1  ;;  %v257_v37 = vperm.slane %v9254_v30, 1  ;;  %v255_v38 = vperm.slane %v9244_v26, 1  ;;  %v285_v39 = vperm.slane %v9244_v26, 2 }
  0x10   :  { %v286_v40 = vperm.slane %v9264_v32, 2  ;;  %v258_v41 = vperm.slane %v9259_v31, 1  ;;  %v288_v44 = vperm.slane %v9259_v31, 2  ;;  %v287_v46 = vperm.slane %v9254_v30, 2 }
  0x13   :  { %89 = vrot.lane.b32.xlu1 %v78_v7, %s9047_s26  ;;  %115 = vrot.lane.b32.xlu2 %v106_v8, %s9048_s27 }
  0x14   :  { %85 = vrot.lane.b32.xlu0 %v76_v9, %s9047_s26 }
  0x1b   :  { %119 = vrot.lane.b32.xlu1 %v108_v11, %s9048_s27  ;;  %143 = vrot.lane.b32.xlu2 %v135_v12, %s15793_s19 }
  0x1c   :  { %117 = vrot.lane.b32.xlu0 %v107_v13, %s9048_s27 }
  0x23   :  { %147 = vrot.lane.b32.xlu1 %v137_v17, %s15793_s19  ;;  %149 = vrot.lane.b32.xlu2 %v138_v18, %s15793_s19 }
  0x24   :  { %145 = vrot.lane.b32.xlu0 %v136_v19, %s15793_s19 }
  0x2b   :  { %175 = vrot.lane.b32.xlu1 %v166_v20, %s9050_s29  ;;  %177 = vrot.lane.b32.xlu2 %v167_v21, %s9050_s29 }
  0x2c   :  { %173 = vrot.lane.b32.xlu0 %v165_v22, %s9050_s29 }
  0x33   :  { %203 = vrot.lane.b32.xlu1 %v195_v23, %s15732_s30  ;;  %205 = vrot.lane.b32.xlu2 %v196_v24, %s15732_s30 }
  0x34   :  { %179 = vrot.lane.b32.xlu0 %v168_v25, %s9050_s29 }
  0x3b   :  { %209 = vrot.lane.b32.xlu1 %v198_v27, %s15732_s30  ;;  %233 = vrot.lane.b32.xlu2 %v225_v28, %s9052_s18 }
  0x3c   :  { %207 = vrot.lane.b32.xlu0 %v197_v29, %s15732_s30  ;;  %s9075_s30 = smov 109  }
  0x43   :  { %237 = vrot.lane.b32.xlu1 %v227_v33, %s9052_s18  ;;  %239 = vrot.lane.b32.xlu2 %v228_v34, %s9052_s18 }
  0x44   :  { %235 = vrot.lane.b32.xlu0 %v226_v35, %s9052_s18  ;;  %s9062_s18 = smov 98  }
  0x4b   :  { %265 = vrot.lane.b32.xlu1 %v256_v36, %s15734_s1  ;;  %267 = vrot.lane.b32.xlu2 %v257_v37, %s15734_s1 }
  0x4c   :  { %263 = vrot.lane.b32.xlu0 %v255_v38, %s15734_s1 }
  0x53   :  { %293 = vrot.lane.b32.xlu1 %v285_v39, %s15736_s17  ;;  %295 = vrot.lane.b32.xlu2 %v286_v40, %s15736_s17 }
  0x54   :  { %269 = vrot.lane.b32.xlu0 %v258_v41, %s15734_s1  ;;  %s9070_s1 = smov 33  }
  0x5b   :  { %299 = vrot.lane.b32.xlu1 %v288_v44, %s15736_s17  ;;  %6342 = vrot.lane.b32.xlu2 %v6341_v45, %s9047_s26 }
  0x5c   :  { %297 = vrot.lane.b32.xlu0 %v287_v46, %s15736_s17  ;;  %v9056_v46 = vmov 0  }
  0x5d   :  { %6431 = vset.pattern.permute.xlu1 %v9056_v46  ;;  %7222 = vset.pattern.permute.xlu0 %v9056_v46 }
  0x5e   :  { %7853 = vset.pattern.permute.xlu2 %v9056_v46 }
  0x64   :  { %6347 = vrot.lane.b32.xlu0 %v6346_v49, %s9047_s26 }
  0x65   :  { %v114_v50 = vpop.permute.xlu2 %113 }
  0x66   :  { %v9311_v51 = vmul.f32 0.0, %v114_v50 }
  0x68   :  { %16152 = vst [vmem:[#allocation2_spill] sm:$0xff] %v9311_v51 }
  0x6d   :  { %v116_v52 = vpop.permute.xlu2 %115 }
  0x6e   :  { %v9314_v53 = vsel %vm121_vm0, %v114_v50, %v116_v52 }
  0x6f   :  { %16153 = vst [vmem:[#allocation3_spill] sm:$0xff] %v9314_v53  ;;  %v131_v54 = vmul.f32 %v9314_v53, %v9284_v42 }
  0x71   :  { %v6356_v55 = vpack.i.bf16 %v131_v54, %v9311_v51 }
  0x73   :  { %6357 = vrot.lane.b32.xlu2 %v6356_v55, %s9050_s29 }
  0x75   :  { %v144_v58 = vpop.permute.xlu2 %143 }
  0x76   :  { %v9341_v8 = vmul.f32 0.0, %v144_v58 }
  0x78   :  { %16157 = vst [vmem:[#allocation7_spill] sm:$0xff] %v9341_v8 }
  0x7d   :  { %v9320_v56 = vpop.permute.xlu1 %87  ;;  %v9328_v61 = vpop.permute.xlu2 %149 }
  0x7e   :  { %v9322_v57 = vpop.permute.xlu0 %83  ;;  %16155 = vst [vmem:[#allocation5_spill] sm:$0xff] %v9328_v61  ;;  %v164_v4 = vmul.f32 %v9328_v61, %v9306_v48 }
  0x85   :  { %v9324_v59 = vpop.permute.xlu1 %89  ;;  %v9335_v3 = vpop.permute.xlu2 %177 }
  0x86   :  { %16154 = vst [vmem:[#allocation4_spill] sm:$0xff] %v9324_v59  ;;  %v9326_v60 = vpop.permute.xlu0 %85 }
  0x8d   :  { %v9330_v62 = vpop.permute.xlu1 %119  ;;  %v206_v18 = vpop.permute.xlu2 %205 }
  0x8e   :  { %16156 = vst [vmem:[#allocation6_spill] sm:$0xff] %v9330_v62  ;;  %v118_v63 = vpop.permute.xlu0 %117  ;;  %v134_v2 = vmul.f32 %v9330_v62, %v9306_v48 }
  0x8f   :  { %v9395_v49 = vsel %vm121_vm0, %v116_v52, %v118_v63  ;;  %v9399_v50 = vsel %vm121_vm0, %v118_v63, %v9330_v62 }
  0x90   :  { %328 = vrot.lane.b32.xlu1 %v134_v2, %s9050_s29  ;;  %16168 = vst [vmem:[#allocation18_spill] sm:$0xff] %v9395_v49  ;;  %v132_v52 = vmul.f32 %v9395_v49, %v9289_v43 }
  0x91   :  { %16169 = vst [vmem:[#allocation19_spill] sm:$0xff] %v9399_v50 }
  0x95   :  { %v9339_v7 = vpop.permute.xlu1 %147  ;;  %v9367_v27 = vpop.permute.xlu2 %233 }
  0x96   :  { %v146_v9 = vpop.permute.xlu0 %145  ;;  %16163 = vst [vmem:[#allocation13_spill] sm:$0xff] %v9367_v27 }
  0x97   :  { %v9344_v11 = vsel %vm15865_vm1, %v144_v58, %v146_v9  ;;  %v133_v58 = vmul.f32 %v9399_v50, %v9301_v47 }
  0x98   :  { %16158 = vst [vmem:[#allocation8_spill] sm:$0xff] %v9344_v11  ;;  %347 = vrot.lane.b32.xlu1 %v164_v4, %s9055_s0  ;;  %v161_v12 = vmul.f32 %v9344_v11, %v9284_v42 }
  0x9a   :  { %v6366_v13 = vpack.i.bf16 %v161_v12, %v9341_v8  ;;  %v250_v12 = vmul.f32 %v9367_v27, %v9284_v42 }
  0x9c   :  { %6367 = vrot.lane.b32.xlu2 %v6366_v13, %s9055_s0 }
  0x9d   :  { %v9351_v17 = vpop.permute.xlu1 %175  ;;  %v9401_v54 = vpop.permute.xlu2 %239 }
  0x9e   :  { %v174_v19 = vpop.permute.xlu0 %173 }
  0x9f   :  { %v9355_v20 = vsel %vm181_vm2, %v174_v19, %v9351_v17  ;;  %v9357_v21 = vmul.f32 0.0, %v174_v19 }
  0xa0   :  { %16159 = vst [vmem:[#allocation9_spill] sm:$0xff] %v9355_v20  ;;  %v191_v22 = vmul.f32 %v9355_v20, %v9284_v42 }
  0xa1   :  { %16160 = vst [vmem:[#allocation10_spill] sm:$0xff] %v9357_v21 }
  0xa2   :  { %v6376_v23 = vpack.i.bf16 %v191_v22, %v9357_v21  ;;  %v6361_v22 = vpack.i.bf16 %v133_v58, %v132_v52 }
  0xa4   :  { %6377 = vrot.lane.b32.xlu2 %v6376_v23, %s9048_s27 }
  0xa5   :  { %v9363_v24 = vpop.permute.xlu1 %203 }
  0xa6   :  { %16161 = vst [vmem:[#allocation11_spill] sm:$0xff] %v9363_v24  ;;  %v9365_v25 = vpop.permute.xlu0 %179  ;;  %v9373_v29 = vsel %vm15762_vm3, %v9363_v24, %v206_v18  ;;  %v220_v33 = vmul.f32 %v9363_v24, %v9284_v42 }
  0xa7   :  { %16162 = vst [vmem:[#allocation12_spill] sm:$0xff] %v9365_v25  ;;  %v194_v28 = vmul.f32 %v9365_v25, %v9306_v48  ;;  %v221_v34 = vmul.f32 %v9373_v29, %v9289_v43  ;;  %v9455_v58 = vsel %vm181_vm2, %v9335_v3, %v9365_v25  ;;  %v1087_v25 = vperm.slane %v9259_v31, 4 }
  0xa8   :  { %16164 = vst [vmem:[#allocation14_spill] sm:$0xff] %v9373_v29 }
  0xa9   :  { %367 = vrot.lane.b32.xlu1 %v194_v28, %s9048_s27  ;;  %v6386_v40 = vpack.i.bf16 %v221_v34, %v220_v33  ;;  %v9429_v33 = vsel %vm15865_vm1, %v9339_v7, %v9328_v61  ;;  %v9433_v34 = vsel %vm15865_vm1, %v146_v9, %v9339_v7  ;;  %16177 = vst [vmem:[#allocation27_spill] sm:$0xff] %v9455_v58 }
  0xaa   :  { %16173 = vst [vmem:[#allocation23_spill] sm:$0xff] %v9429_v33 }
  0xab   :  { %16174 = vst [vmem:[#allocation24_spill] sm:$0xff] %v9433_v34 }
  0xad   :  { %v210_v35 = vpop.permute.xlu1 %209 }
  0xae   :  { %v9380_v36 = vmul.f32 0.0, %v210_v35  ;;  %v208_v37 = vpop.permute.xlu0 %207 }
  0xaf   :  { %v9383_v38 = vsel %vm15762_vm3, %v206_v18, %v208_v37  ;;  %v9386_v39 = vsel %vm15762_vm3, %v208_v37, %v210_v35  ;;  %vm1100_vm3 = vcmask 244736  }
  0xb0   :  { %16165 = vst [vmem:[#allocation15_spill] sm:$0xff] %v9380_v36  ;;  %v6351_v41 = vpack.i.bf16 %v9311_v51, %v9380_v36  ;;  %v222_v44 = vmul.f32 %v9383_v38, %v9301_v47  ;;  %v223_v45 = vmul.f32 %v9386_v39, %v9306_v48 }
  0xb1   :  { %16166 = vst [vmem:[#allocation16_spill] sm:$0xff] %v9383_v38  ;;  %6387 = vrot.lane.b32.xlu1 %v6386_v40, %s9057_s20  ;;  %v268_v40 = vpop.permute.xlu2 %267  ;;  %v1116_v38 = vperm.slane %v9254_v30, 5 }
  0xb2   :  { %16167 = vst [vmem:[#allocation17_spill] sm:$0xff] %v9386_v39  ;;  %6352 = vrot.lane.b32.xlu0 %v6351_v41, %s9057_s20  ;;  %v6391_v55 = vpack.i.bf16 %v223_v45, %v222_v44  ;;  %v162_v41 = vmul.f32 %v9433_v34, %v9289_v43  ;;  %v163_v44 = vmul.f32 %v9429_v33, %v9301_v47  ;;  %v1117_v34 = vperm.slane %v9259_v31, 5 }
  0xb4   :  { %6392 = vrot.lane.b32.xlu2 %v6391_v55, %s9057_s20  ;;  %v6371_v55 = vpack.i.bf16 %v163_v44, %v162_v41 }
  0xb5   :  { %v238_v63 = vpop.permute.xlu1 %237 }
  0xb6   :  { %v9411_v2 = vsel %vm241_vm4, %v238_v63, %v9401_v54  ;;  %v236_v4 = vpop.permute.xlu0 %235 }
  0xb7   :  { %16170 = vst [vmem:[#allocation20_spill] sm:$0xff] %v9411_v2  ;;  %v9416_v13 = vsel %vm241_vm4, %v9367_v27, %v236_v4  ;;  %v9418_v18 = vsel %vm241_vm4, %v236_v4, %v238_v63  ;;  %v253_v19 = vmul.f32 %v9411_v2, %v9306_v48  ;;  %v9461_v4 = vsel %vm181_vm2, %v9351_v17, %v9335_v3 }
  0xb8   :  { %16171 = vst [vmem:[#allocation21_spill] sm:$0xff] %v9416_v13  ;;  %v251_v23 = vmul.f32 %v9416_v13, %v9289_v43  ;;  %v252_v28 = vmul.f32 %v9418_v18, %v9301_v47  ;;  %vm860_vm4 = vcmask 801792  }
  0xb9   :  { %16172 = vst [vmem:[#allocation22_spill] sm:$0xff] %v9418_v18 }
  0xba   :  { %6362 = vrot.lane.b32.xlu0 %v6361_v22, %s9050_s29  ;;  %v6396_v35 = vpack.i.bf16 %v251_v23, %v250_v12  ;;  %v6401_v37 = vpack.i.bf16 %v253_v19, %v252_v28  ;;  %16178 = vst [vmem:[#allocation28_spill] sm:$0xff] %v9461_v4  ;;  %v193_v19 = vmul.f32 %v9455_v58, %v9301_v47  ;;  %v296_v22 = vpop.permute.xlu2 %295 }
  0xbc   :  { %6397 = vrot.lane.b32.xlu1 %v6396_v35, %s9058_s21  ;;  %6402 = vrot.lane.b32.xlu2 %v6401_v37, %s9058_s21  ;;  %v192_v35 = vmul.f32 %v9461_v4, %v9289_v43 }
  0xbd   :  { %v266_v45 = vpop.permute.xlu1 %265 }
  0xbe   :  { %v9442_v7 = vpop.permute.xlu0 %263  ;;  %v9464_v12 = vsel %vm15776_vm5, %v266_v45, %v268_v40 }
  0xbf   :  { %16175 = vst [vmem:[#allocation25_spill] sm:$0xff] %v9442_v7  ;;  %v9446_v9 = vsel %vm15776_vm5, %v9442_v7, %v266_v45  ;;  %v280_v46 = vmul.f32 %v9442_v7, %v9284_v42  ;;  %v282_v37 = vmul.f32 %v9464_v12, %v9301_v47  ;;  %v6381_v45 = vpack.i.bf16 %v193_v19, %v192_v35 }
  0xc0   :  { %16176 = vst [vmem:[#allocation26_spill] sm:$0xff] %v9446_v9  ;;  %v281_v52 = vmul.f32 %v9446_v9, %v9289_v43  ;;  %v9498_v19 = vmul.f32 0.0, %v9401_v54 }
  0xc1   :  { %16179 = vst [vmem:[#allocation29_spill] sm:$0xff] %v9464_v12 }
  0xc2   :  { %6372 = vrot.lane.b32.xlu0 %v6371_v55, %s9055_s0  ;;  %v6406_v63 = vpack.i.bf16 %v281_v52, %v280_v46  ;;  %16185 = vst [vmem:[#allocation35_spill] sm:$0xff] %v9498_v19 }
  0xc4   :  { %6407 = vrot.lane.b32.xlu1 %v6406_v63, %s9059_s22 }
  0xc5   :  { %v9469_v23 = vpop.permute.xlu1 %293 }
  0xc6   :  { %16180 = vst [vmem:[#allocation30_spill] sm:$0xff] %v9469_v23  ;;  %v270_v28 = vpop.permute.xlu0 %269  ;;  %v9475_v3 = vsel %vm15863_vm6, %v9469_v23, %v296_v22  ;;  %v310_v17 = vmul.f32 %v9469_v23, %v9284_v42 }
  0xc7   :  { %16181 = vst [vmem:[#allocation31_spill] sm:$0xff] %v9475_v3  ;;  %v9482_v41 = vsel %vm15776_vm5, %v268_v40, %v270_v28  ;;  %v311_v44 = vmul.f32 %v9475_v3, %v9289_v43  ;;  %v9514_v54 = vmul.f32 0.0, %v270_v28  ;;  %vm1070_vm5 = vcmask 146432  }
  0xc8   :  { %16182 = vst [vmem:[#allocation32_spill] sm:$0xff] %v9482_v41  ;;  %v283_v46 = vmul.f32 %v9482_v41, %v9306_v48  ;;  %v1114_v41 = vperm.slane %v9244_v26, 5 }
  0xc9   :  { %v6421_v55 = vpack.i.bf16 %v311_v44, %v310_v17  ;;  %16187 = vst [vmem:[#allocation37_spill] sm:$0xff] %v9514_v54  ;;  %v6343_v44 = vpop.permute.xlu2 %6342 }
  0xca   :  { %6382 = vrot.lane.b32.xlu0 %v6381_v45, %s9048_s27  ;;  %v6411_v52 = vpack.i.bf16 %v283_v46, %v282_v37  ;;  %v74_v37 = vld [vmem:[%s15639_s3] sm:$0xff]  ;;  %v6345_v45 = vunpack.i.h.bf16 %v6343_v44  ;;  %v9518_v46 = vmul.f32 0.0, %v9322_v57  ;;  %s9061_s3 = smov 97  }
  0xcc   :  { %6422 = vrot.lane.b32.xlu1 %v6421_v55, %s9060_s24  ;;  %6412 = vrot.lane.b32.xlu2 %v6411_v52, %s9059_s22 }
  0xcd   :  { %v300_v63 = vpop.permute.xlu1 %299 }
  0xce   :  { %v298_v51 = vpop.permute.xlu0 %297 }
  0xcf   :  { %v9492_v40 = vsel %vm15863_vm6, %v296_v22, %v298_v51  ;;  %v9495_v18 = vsel %vm15863_vm6, %v298_v51, %v300_v63  ;;  %v9512_v51 = vsel %vm15870_vm7, %v9322_v57, %v9326_v60  ;;  %v9530_v57 = vmul.f32 0.0, %v300_v63 }
  0xd0   :  { %16183 = vst [vmem:[#allocation33_spill] sm:$0xff] %v9492_v40  ;;  %v312_v35 = vmul.f32 %v9492_v40, %v9301_v47  ;;  %v313_v17 = vmul.f32 %v9495_v18, %v9306_v48  ;;  %v101_v52 = vmul.f32 %v9512_v51, %v9284_v42  ;;  %v727_v42 = vperm.slane %v9173_v1, 0 }
  0xd1   :  { %16184 = vst [vmem:[#allocation34_spill] sm:$0xff] %v9495_v18 }
  0xd2   :  { %421 = vrot.lane.b32.xlu0 %v9498_v19, %s9058_s21  ;;  %v6426_v22 = vpack.i.bf16 %v313_v17, %v312_v35  ;;  %16186 = vst [vmem:[#allocation36_spill] sm:$0xff] %v9512_v51  ;;  %v6416_v19 = vpack.i.bf16 %v9357_v21, %v9514_v54 }
  0xd3   :  { %16188 = vst [vmem:[#allocation38_spill] sm:$0xff] %v9530_v57 }
  0xd4   :  { %470 = vperm.xlu1 %6431, %v74_v37   ;;  %6427 = vrot.lane.b32.xlu2 %v6426_v22, %s9060_s24  ;;  %v6432_v22 = vpack.i.bf16 %v101_v52, %v9518_v46  ;;  %v728_v52 = vperm.slane %v9189_v6, 0 }
  0xd6   :  { %v6348_v55 = vpop.permute.xlu0 %6347 }
  0xd7   :  { %v6350_v35 = vunpack.i.h.bf16 %v6348_v55  ;;  %v6349_v17 = vunpack.i.l.bf16 %v6348_v55  ;;  %v9536_v55 = vsel %vm15870_vm7, %v9326_v60, %v9320_v56  ;;  %v6344_v60 = vunpack.i.l.bf16 %v6343_v44 }
  0xd8   :  { %16189 = vst [vmem:[#allocation39_spill] sm:$0xff] %v9536_v55  ;;  %v729_v44 = vperm.slane %v9168_v0, 0 }
  0xd9   :  { %v386_v28 = vsel %vm15870_vm7, %v6345_v45, %v6349_v17  ;;  %v387_v13 = vsel %vm15870_vm7, %v6349_v17, %v6350_v35 }
  0xda   :  { %6417 = vrot.lane.b32.xlu0 %v6416_v19, %s9059_s22  ;;  %v6447_v37 = vpack.i.bf16 %v387_v13, %v386_v28  ;;  %v9541_v19 = vsel %vm15870_vm7, %v9320_v56, %v9324_v59  ;;  %v102_v13 = vmul.f32 %v9536_v55, %v9289_v43  ;;  %v730_v56 = vperm.slane %v9184_v5, 0 }
  0xdb   :  { %16190 = vst [vmem:[#allocation40_spill] sm:$0xff] %v9541_v19  ;;  %v103_v63 = vmul.f32 %v9541_v19, %v9301_v47  ;;  %v385_v28 = vsel %vm15870_vm7, %v6344_v60, %v6345_v45  ;;  %v756_v43 = vperm.slane %v9173_v1, 1  ;;  %v759_v47 = vperm.slane %v9184_v5, 1 }
  0xdc   :  { %6448 = vrot.lane.b32.xlu1 %v6447_v37, %s15736_s17  ;;  %6433 = vrot.lane.b32.xlu2 %v6432_v22, %s15736_s17  ;;  %v6442_v37 = vpack.i.bf16 %v385_v28, %v6344_v60  ;;  %v758_v22 = vperm.slane %v9168_v0, 1  ;;  %v786_v45 = vperm.slane %v9189_v6, 2  ;;  %v757_v60 = vperm.slane %v9189_v6, 1 }
  0xdd   :  { %v6437_v17 = vpack.i.bf16 %v103_v63, %v102_v13 }
  0xe2   :  { %461 = vrot.lane.b32.xlu0 %v9530_v57, %s9060_s24 }
  0xe4   :  { %735 = vrot.lane.b32.xlu1 %v727_v42, %s9060_s24  ;;  %737 = vrot.lane.b32.xlu2 %v728_v52, %s9060_s24  ;;  %v6358_v42 = vpop.permute.xlu2 %6357  ;;  %v787_v52 = vperm.slane %v9168_v0, 2 }
  0xe5   :  { %v6360_v13 = vunpack.i.h.bf16 %v6358_v42  ;;  %v9566_v63 = vunpack.i.l.bf16 %v6358_v42 }
  0xe7   :  { %16191 = vst [vmem:[#allocation41_spill] sm:$0xff] %v9566_v63 }
  0xea   :  { %6438 = vrot.lane.b32.xlu0 %v6437_v17, %s15736_s17  ;;  %v330_v17 = vsel %vm181_vm2, %v9566_v63, %v6360_v13 }
  0xec   :  { %741 = vrot.lane.b32.xlu1 %v730_v56, %s9060_s24  ;;  %764 = vrot.lane.b32.xlu2 %v756_v43, %s9059_s22  ;;  %v104_v56 = vmul.f32 %v9324_v59, %v9306_v48 }
  0xee   :  { %v6457_v28 = vpack.i.bf16 %v330_v17, %v104_v56 }
  0xf2   :  { %6443 = vrot.lane.b32.xlu0 %v6442_v37, %s15736_s17  ;;  %v785_v37 = vperm.slane %v9173_v1, 2 }
  0xf4   :  { %768 = vrot.lane.b32.xlu1 %v758_v22, %s9059_s22  ;;  %770 = vrot.lane.b32.xlu2 %v759_v47, %s9059_s22 }
  0xfa   :  { %739 = vrot.lane.b32.xlu0 %v729_v44, %s9060_s24  ;;  %v6368_v44 = vpop.permute.xlu2 %6367 }
  0xfb   :  { %v6370_v18 = vunpack.i.h.bf16 %v6368_v44  ;;  %v9588_v12 = vunpack.i.l.bf16 %v6368_v44 }
  0xfc   :  { %795 = vrot.lane.b32.xlu1 %v786_v45, %s9058_s21  ;;  %797 = vrot.lane.b32.xlu2 %v787_v52, %s9058_s21 }
  0xfd   :  { %16193 = vst [vmem:[#allocation43_spill] sm:$0xff] %v9588_v12 }
 0x102   :  { %766 = vrot.lane.b32.xlu0 %v757_v60, %s9059_s22  ;;  %v329_v43 = vpop.permute.xlu1 %328  ;;  %v6378_v52 = vpop.permute.xlu2 %6377 }
 0x104   :  { %6458 = vrot.lane.b32.xlu1 %v6457_v28, %s15736_s17 }
 0x10a   :  { %793 = vrot.lane.b32.xlu0 %v785_v37, %s9058_s21  ;;  %v348_v22 = vpop.permute.xlu1 %347 }
 0x10e   :  { %v6393_v28 = vpop.permute.xlu2 %6392 }
 0x116   :  { %v6403_v58 = vpop.permute.xlu2 %6402 }
 0x11b   :  { %v9580_v47 = vpop.permute.xlu1 %367 }
 0x123   :  { %v6388_v42 = vpop.permute.xlu1 %6387 }
 0x124   :  { %v6389_v45 = vunpack.i.l.bf16 %v6388_v42  ;;  %v9582_v21 = vpop.permute.xlu0 %6352 }
 0x125   :  { %16192 = vst [vmem:[#allocation42_spill] sm:$0xff] %v9582_v21 }
 0x126   :  { %v6452_v48 = vpack.i.bf16 %v6389_v45, %v6350_v35  ;;  %v6380_v35 = vunpack.i.h.bf16 %v6378_v52 }
 0x128   :  { %6453 = vrot.lane.b32.xlu2 %v6452_v48, %s15736_s17  ;;  %v9592_v48 = vunpack.i.l.bf16 %v6378_v52 }
 0x12a   :  { %16194 = vst [vmem:[#allocation44_spill] sm:$0xff] %v9592_v48 }
 0x12c   :  { %v6363_v60 = vpop.permute.xlu0 %6362 }
 0x12d   :  { %v6365_v17 = vunpack.i.h.bf16 %v6363_v60  ;;  %v6364_v56 = vunpack.i.l.bf16 %v6363_v60 }
 0x12f   :  { %v333_v63 = vsel %vm181_vm2, %v6365_v17, %v329_v43  ;;  %v331_v37 = vsel %vm181_vm2, %v6360_v13, %v6364_v56  ;;  %v332_v27 = vsel %vm181_vm2, %v6364_v56, %v6365_v17  ;;  %v350_v13 = vsel %vm349_vm8, %v9588_v12, %v6370_v18 }
 0x130   :  { %v6467_v2 = vpack.i.bf16 %v329_v43, %v333_v63  ;;  %v6462_v57 = vpack.i.bf16 %v332_v27, %v331_v37  ;;  %v369_v27 = vsel %vm121_vm0, %v9592_v48, %v6380_v35  ;;  %v6390_v17 = vunpack.i.h.bf16 %v6388_v42  ;;  %v6398_v37 = vpop.permute.xlu1 %6397 }
 0x131   :  { %v6482_v43 = vpack.i.bf16 %v369_v27, %v348_v22  ;;  %v6394_v56 = vunpack.i.l.bf16 %v6393_v28  ;;  %v6413_v27 = vpop.permute.xlu2 %6412 }
 0x132   :  { %6468 = vrot.lane.b32.xlu0 %v6467_v2, %s15736_s17  ;;  %6463 = vrot.lane.b32.xlu2 %v6462_v57, %s15736_s17 }
 0x134   :  { %v6373_v60 = vpop.permute.xlu0 %6372 }
 0x135   :  { %v6375_v9 = vunpack.i.h.bf16 %v6373_v60  ;;  %v6374_v54 = vunpack.i.l.bf16 %v6373_v60 }
 0x137   :  { %v351_v63 = vsel %vm349_vm8, %v6370_v18, %v6374_v54  ;;  %v352_v2 = vsel %vm349_vm8, %v6374_v54, %v6375_v9  ;;  %v353_v57 = vsel %vm349_vm8, %v6375_v9, %v348_v22  ;;  %v404_v18 = vsel %vm403_vm9, %v6389_v45, %v6390_v17 }
 0x138   :  { %v6472_v44 = vpack.i.bf16 %v351_v63, %v350_v13  ;;  %v6477_v52 = vpack.i.bf16 %v353_v57, %v352_v2  ;;  %v405_v9 = vsel %vm403_vm9, %v6390_v17, %v6394_v56  ;;  %v6405_v57 = vunpack.i.h.bf16 %v6403_v58 }
 0x139   :  { %v6497_v63 = vpack.i.bf16 %v405_v9, %v404_v18  ;;  %v6400_v45 = vunpack.i.h.bf16 %v6398_v37 }
 0x13a   :  { %6483 = vrot.lane.b32.xlu0 %v6482_v43, %s15736_s17  ;;  %6473 = vrot.lane.b32.xlu1 %v6472_v44, %s15736_s17  ;;  %v6404_v43 = vunpack.i.l.bf16 %v6403_v58  ;;  %v9612_v44 = vunpack.i.l.bf16 %v9582_v21  ;;  %v1054_v21 = vperm.slane %v9244_v26, 3 }
 0x13b   :  { %6478 = vrot.lane.b32.xlu2 %v6477_v52, %s15736_s17  ;;  %v6399_v52 = vunpack.i.l.bf16 %v6398_v37 }
 0x13c   :  { %v6383_v60 = vpop.permute.xlu0 %6382  ;;  %16195 = vst [vmem:[#allocation45_spill] sm:$0xff] %v9612_v44  ;;  %v426_v58 = vsel %vm423_vm10, %v6404_v43, %v6405_v57 }
 0x13d   :  { %v6385_v12 = vunpack.i.h.bf16 %v6383_v60  ;;  %v6384_v48 = vunpack.i.l.bf16 %v6383_v60  ;;  %v424_v37 = vsel %vm423_vm10, %v6399_v52, %v6400_v45 }
 0x13f   :  { %v370_v54 = vsel %vm121_vm0, %v6380_v35, %v6384_v48  ;;  %v371_v22 = vsel %vm121_vm0, %v6384_v48, %v6385_v12  ;;  %v372_v13 = vsel %vm121_vm0, %v6385_v12, %v9580_v47  ;;  %v6395_v35 = vunpack.i.h.bf16 %v6393_v28  ;;  %v6408_v48 = vpop.permute.xlu1 %6407 }
 0x140   :  { %v6487_v42 = vpack.i.bf16 %v371_v22, %v370_v54  ;;  %v6492_v2 = vpack.i.bf16 %v9580_v47, %v372_v13  ;;  %v425_v47 = vsel %vm423_vm10, %v6400_v45, %v6404_v43  ;;  %v6507_v54 = vpack.i.bf16 %v424_v37, %v6399_v52 }
 0x141   :  { %v407_v17 = vsel %vm403_vm9, %v6395_v35, %v9612_v44  ;;  %v406_v60 = vsel %vm403_vm9, %v6394_v56, %v6395_v35  ;;  %v6512_v18 = vpack.i.bf16 %v426_v58, %v425_v47  ;;  %v6415_v28 = vunpack.i.h.bf16 %v6413_v27 }
 0x142   :  { %6498 = vrot.lane.b32.xlu0 %v6497_v63, %s15736_s17  ;;  %6488 = vrot.lane.b32.xlu1 %v6487_v42, %s15736_s17  ;;  %v6502_v9 = vpack.i.bf16 %v407_v17, %v406_v60  ;;  %v6414_v22 = vunpack.i.l.bf16 %v6413_v27  ;;  %v6428_v42 = vpop.permute.xlu2 %6427  ;;  %v6410_v13 = vunpack.i.h.bf16 %v6408_v48  ;;  %v6409_v63 = vunpack.i.l.bf16 %v6408_v48 }
 0x143   :  { %6493 = vrot.lane.b32.xlu2 %v6492_v2, %s15736_s17  ;;  %v6430_v60 = vunpack.i.h.bf16 %v6428_v42  ;;  %v1013_v44 = vperm.slane %v9221_v16, 7 }
 0x144   :  { %v9617_v12 = vpop.permute.xlu0 %421  ;;  %v446_v27 = vsel %vm443_vm11, %v6414_v22, %v6415_v28  ;;  %v444_v52 = vsel %vm443_vm11, %v6409_v63, %v6410_v13  ;;  %v445_v35 = vsel %vm443_vm11, %v6410_v13, %v6414_v22 }
 0x145   :  { %16196 = vst [vmem:[#allocation46_spill] sm:$0xff] %v9617_v12  ;;  %v427_v56 = vsel %vm423_vm10, %v6405_v57, %v9617_v12  ;;  %v6522_v37 = vpack.i.bf16 %v445_v35, %v444_v52  ;;  %v814_v52 = vperm.slane %v9173_v1, 3  ;;  %v815_v35 = vperm.slane %v9189_v6, 3 }
 0x146   :  { %v6517_v58 = vpack.i.bf16 %v6409_v63, %v427_v56 }
 0x147   :  { %v6423_v48 = vpop.permute.xlu1 %6422 }
 0x148   :  { %v6424_v17 = vunpack.i.l.bf16 %v6423_v48 }
 0x14a   :  { %6513 = vrot.lane.b32.xlu0 %v6512_v18, %s15736_s17  ;;  %6503 = vrot.lane.b32.xlu1 %v6502_v9, %s15736_s17  ;;  %v6429_v18 = vunpack.i.l.bf16 %v6428_v42  ;;  %v6425_v9 = vunpack.i.h.bf16 %v6423_v48  ;;  %v9643_v57 = vpop.permute.xlu2 %6433 }
 0x14b   :  { %6508 = vrot.lane.b32.xlu2 %v6507_v54, %s15736_s17 }
 0x14c   :  { %v9628_v2 = vpop.permute.xlu0 %6417  ;;  %v464_v54 = vsel %vm15957_vm12, %v6424_v17, %v6425_v9  ;;  %v465_v22 = vsel %vm15957_vm12, %v6425_v9, %v6429_v18  ;;  %v466_v13 = vsel %vm15957_vm12, %v6429_v18, %v6430_v60  ;;  %v846_v18 = vperm.slane %v9168_v0, 4 }
 0x14d   :  { %16197 = vst [vmem:[#allocation47_spill] sm:$0xff] %v9628_v2  ;;  %v9631_v43 = vunpack.i.l.bf16 %v9628_v2  ;;  %v6532_v63 = vpack.i.bf16 %v464_v54, %v6424_v17  ;;  %v6537_v56 = vpack.i.bf16 %v466_v13, %v465_v22  ;;  %v847_v54 = vperm.slane %v9184_v5, 4 }
 0x14e   :  { %v874_v13 = vperm.slane %v9173_v1, 5 }
 0x14f   :  { %16198 = vst [vmem:[#allocation48_spill] sm:$0xff] %v9631_v43  ;;  %v447_v45 = vsel %vm443_vm11, %v6415_v28, %v9631_v43  ;;  %v9665_v17 = vpop.permute.xlu1 %470 }
 0x150   :  { %v6527_v47 = vpack.i.bf16 %v447_v45, %v446_v27  ;;  %v788_v45 = vperm.slane %v9184_v5, 2 }
 0x152   :  { %6528 = vrot.lane.b32.xlu0 %v6527_v47, %s15736_s17  ;;  %6518 = vrot.lane.b32.xlu1 %v6517_v58, %s15736_s17  ;;  %v9655_v27 = vpop.permute.xlu2 %737  ;;  %v816_v47 = vperm.slane %v9168_v0, 3  ;;  %v817_v58 = vperm.slane %v9184_v5, 3 }
 0x153   :  { %6523 = vrot.lane.b32.xlu2 %v6522_v37, %s15736_s17  ;;  %16200 = vst [vmem:[#allocation50_spill] sm:$0xff] %v9655_v27  ;;  %v844_v37 = vperm.slane %v9173_v1, 4  ;;  %v915_v1 = vperm.slane %v9200_v10, 1 }
 0x154   :  { %v9646_v28 = vpop.permute.xlu0 %461 }
 0x155   :  { %16199 = vst [vmem:[#allocation49_spill] sm:$0xff] %v9646_v28  ;;  %v467_v42 = vsel %vm15957_vm12, %v6430_v60, %v9646_v28  ;;  %v845_v60 = vperm.slane %v9189_v6, 4 }
 0x157   :  { %v9673_v22 = vpop.permute.xlu1 %6448 }
 0x15a   :  { %566 = vrot.lane.b32.xlu0 %v467_v42, %s15736_s17  ;;  %6533 = vrot.lane.b32.xlu1 %v6532_v63, %s15736_s17  ;;  %v9661_v48 = vpop.permute.xlu2 %764  ;;  %v875_v63 = vperm.slane %v9189_v6, 5  ;;  %v916_v6 = vperm.slane %v9221_v16, 1 }
 0x15b   :  { %6538 = vrot.lane.b32.xlu2 %v6537_v56, %s15736_s17  ;;  %v876_v56 = vperm.slane %v9168_v0, 5  ;;  %s9076_s17 = smov 108  }
 0x15c   :  { %v9677_v42 = vpop.permute.xlu0 %6438 }
 0x162   :  { %799 = vrot.lane.b32.xlu0 %v788_v45, %s9058_s21  ;;  %822 = vrot.lane.b32.xlu1 %v814_v52, %s9061_s3  ;;  %v9670_v9 = vpop.permute.xlu2 %770  ;;  %v9685_v52 = vpop.permute.xlu1 %735 }
 0x163   :  { %824 = vrot.lane.b32.xlu2 %v815_v35, %s9061_s3  ;;  %16201 = vst [vmem:[#allocation51_spill] sm:$0xff] %v9670_v9  ;;  %v877_v35 = vperm.slane %v9184_v5, 5 }
 0x164   :  { %16202 = vst [vmem:[#allocation52_spill] sm:$0xff] %v9685_v52  ;;  %v1085_v52 = vperm.slane %v9264_v32, 4 }
 0x16a   :  { %826 = vrot.lane.b32.xlu0 %v816_v47, %s9061_s3  ;;  %828 = vrot.lane.b32.xlu1 %v817_v58, %s9061_s3  ;;  %v9680_v45 = vpop.permute.xlu2 %797  ;;  %v9689_v47 = vpop.permute.xlu0 %6443  ;;  %s9065_s3 = smov 14  }
 0x16b   :  { %852 = vrot.lane.b32.xlu2 %v844_v37, %s9062_s18  ;;  %v9695_v58 = vpop.permute.xlu1 %741  ;;  %v917_v37 = vperm.slane %v9211_v14, 1 }
 0x16c   :  { %16203 = vst [vmem:[#allocation53_spill] sm:$0xff] %v9695_v58 }
 0x172   :  { %854 = vrot.lane.b32.xlu0 %v845_v60, %s9062_s18  ;;  %856 = vrot.lane.b32.xlu1 %v846_v18, %s9062_s18  ;;  %v918_v60 = vperm.slane %v9216_v15, 1  ;;  %v9699_v5 = vpop.permute.xlu0 %739  ;;  %v945_v18 = vperm.slane %v9200_v10, 2 }
 0x173   :  { %858 = vrot.lane.b32.xlu2 %v847_v54, %s9062_s18  ;;  %16204 = vst [vmem:[#allocation54_spill] sm:$0xff] %v9699_v5  ;;  %s9066_s18 = smov 18   ;;  %v1084_v5 = vperm.slane %v9244_v26, 4 }
 0x17a   :  { %882 = vrot.lane.b32.xlu0 %v874_v13, %s9057_s20  ;;  %884 = vrot.lane.b32.xlu1 %v875_v63, %s9057_s20  ;;  %v946_v13 = vperm.slane %v9221_v16, 2  ;;  %v947_v63 = vperm.slane %v9211_v14, 2 }
 0x17b   :  { %886 = vrot.lane.b32.xlu2 %v876_v56, %s9057_s20  ;;  %v9707_v56 = vpop.permute.xlu1 %768 }
 0x182   :  { %888 = vrot.lane.b32.xlu0 %v877_v35, %s9057_s20  ;;  %923 = vrot.lane.b32.xlu1 %v915_v1, %s9063_s25  ;;  %v9693_v0 = vpop.permute.xlu2 %6453  ;;  %v948_v35 = vperm.slane %v9216_v15, 2  ;;  %v9710_v1 = vpop.permute.xlu0 %766 }
 0x183   :  { %925 = vrot.lane.b32.xlu2 %v916_v6, %s9063_s25  ;;  %v9720_v28 = vpop.permute.xlu1 %795 }
 0x18a   :  { %927 = vrot.lane.b32.xlu0 %v917_v37, %s9063_s25  ;;  %929 = vrot.lane.b32.xlu1 %v918_v60, %s9063_s25  ;;  %v982_v37 = vperm.slane %v9200_v10, 6  ;;  %v983_v60 = vperm.slane %v9221_v16, 6  ;;  %v9722_v43 = vpop.permute.xlu0 %793  ;;  %s9067_s25 = smov 30  }
 0x18b   :  { %953 = vrot.lane.b32.xlu2 %v945_v18, %s9055_s0  ;;  %v984_v18 = vperm.slane %v9211_v14, 6  ;;  %v9729_v12 = vpop.permute.xlu1 %6458 }
 0x18c   :  { %v9703_v54 = vpop.permute.xlu2 %6463 }
 0x192   :  { %955 = vrot.lane.b32.xlu0 %v946_v13, %s9055_s0  ;;  %957 = vrot.lane.b32.xlu1 %v947_v63, %s9055_s0  ;;  %v985_v63 = vperm.slane %v9216_v15, 6 }
 0x193   :  { %959 = vrot.lane.b32.xlu2 %v948_v35, %s9055_s0  ;;  %v1012_v35 = vperm.slane %v9200_v10, 7 }
 0x195   :  { %v9715_v6 = vpop.permute.xlu2 %6478 }
 0x19a   :  { %990 = vrot.lane.b32.xlu0 %v982_v37, %s9064_s28  ;;  %992 = vrot.lane.b32.xlu1 %v983_v60, %s9064_s28  ;;  %v1014_v60 = vperm.slane %v9211_v14, 7  ;;  %v1057_v14 = vperm.slane %v9259_v31, 3 }
 0x19b   :  { %994 = vrot.lane.b32.xlu2 %v984_v18, %s9064_s28  ;;  %v1015_v18 = vperm.slane %v9216_v15, 7 }
 0x19d   :  { %v9724_v13 = vpop.permute.xlu2 %6493 }
 0x1a2   :  { %996 = vrot.lane.b32.xlu0 %v985_v63, %s9064_s28  ;;  %1020 = vrot.lane.b32.xlu1 %v1012_v35, %s9065_s3  ;;  %v1055_v63 = vperm.slane %v9264_v32, 3  ;;  %v1056_v35 = vperm.slane %v9254_v30, 3  ;;  %s9068_s28 = smov 31  }
 0x1a3   :  { %1022 = vrot.lane.b32.xlu2 %v1013_v44, %s9065_s3 }
 0x1a4   :  { %v9731_v2 = vpop.permute.xlu0 %6468 }
 0x1a5   :  { %v9733_v37 = vpop.permute.xlu2 %6508 }
 0x1aa   :  { %1024 = vrot.lane.b32.xlu0 %v1014_v60, %s9065_s3  ;;  %1026 = vrot.lane.b32.xlu1 %v1015_v18, %s9065_s3  ;;  %s9069_s3 = smov 32  }
 0x1ab   :  { %1062 = vrot.lane.b32.xlu2 %v1054_v21, %s9066_s18 }
 0x1ac   :  { %v9738_v10 = vpop.permute.xlu0 %6483  ;;  %v9740_v16 = vpop.permute.xlu1 %6473 }
 0x1ad   :  { %v9742_v44 = vpop.permute.xlu2 %6523 }
 0x1b2   :  { %1064 = vrot.lane.b32.xlu0 %v1055_v63, %s9066_s18  ;;  %1066 = vrot.lane.b32.xlu1 %v1056_v35, %s9066_s18  ;;  %v1086_v35 = vperm.slane %v9254_v30, 4 }
 0x1b3   :  { %1068 = vrot.lane.b32.xlu2 %v1057_v14, %s9066_s18  ;;  %s9078_s18 = smov 124  }
 0x1b4   :  { %v9747_v15 = vpop.permute.xlu0 %6498  ;;  %v9749_v60 = vpop.permute.xlu1 %6488 }
 0x1b5   :  { %v9751_v21 = vpop.permute.xlu2 %6538  ;;  %v16206_v31 = vunpack.i.h.bf16 %v9747_v15 }
 0x1b6   :  { %v6541_v18 = vunpack.i.h.bf16 %v9751_v21  ;;  %v15705_v58 = vunpack.i.l.bf16 %v9751_v21 }
 0x1b8   :  { %v602_v63 = vsel %vm15863_vm6, %v15705_v58, %v6541_v18  ;;  %v1115_v58 = vperm.slane %v9264_v32, 5 }
 0x1b9   :  { %691 = vmatpush.msra.mxu2 %v602_v63 }
 0x1ba   :  { %1092 = vrot.lane.b32.xlu0 %v1084_v5, %s9067_s25  ;;  %1094 = vrot.lane.b32.xlu1 %v1085_v52, %s9067_s25  ;;  %v6526_v52 = vunpack.i.h.bf16 %v9742_v44 }
 0x1bb   :  { %1096 = vrot.lane.b32.xlu2 %v1086_v35, %s9067_s25 }
 0x1bc   :  { %v9761_v14 = vpop.permute.xlu0 %6513  ;;  %v9763_v27 = vpop.permute.xlu1 %6503 }
 0x1bd   :  { %v15725_v40 = vunpack.i.h.bf16 %v9761_v14  ;;  %v15724_v35 = vunpack.i.l.bf16 %v9761_v14 }
 0x1c2   :  { %1098 = vrot.lane.b32.xlu0 %v1087_v25, %s9067_s25  ;;  %1122 = vrot.lane.b32.xlu1 %v1114_v41, %s9068_s28  ;;  %v15731_v25 = vunpack.i.h.bf16 %v9673_v22  ;;  %v15730_v41 = vunpack.i.l.bf16 %v9673_v22 }
 0x1c3   :  { %1124 = vrot.lane.b32.xlu2 %v1115_v58, %s9068_s28  ;;  %v594_v58 = vsel %vm15863_vm6, %v15724_v35, %v15725_v40  ;;  %v16205_v35 = vunpack.i.l.bf16 %v9763_v27  ;;  %v6495_v40 = vunpack.i.l.bf16 %v9724_v13 }
 0x1c4   :  { %v6529_v63 = vpop.permute.xlu0 %6528  ;;  %v9768_v33 = vpop.permute.xlu1 %6518  ;;  %v586_v39 = vsel %vm15863_vm6, %v15730_v41, %v15731_v25  ;;  %v1145_v25 = vperm.slane %v9264_v32, 6 }
 0x1c5   :  { %v6530_v5 = vunpack.i.l.bf16 %v6529_v63  ;;  %v6531_v59 = vunpack.i.h.bf16 %v6529_v63  ;;  %v6525_v63 = vunpack.i.l.bf16 %v9742_v44  ;;  %v6521_v41 = vunpack.i.h.bf16 %v9768_v33 }
 0x1c6   :  { %v6511_v44 = vunpack.i.h.bf16 %v9733_v37 }
 0x1c7   :  { %v598_v3 = vsel %vm15863_vm6, %v6526_v52, %v6530_v5  ;;  %v599_v32 = vsel %vm15863_vm6, %v6530_v5, %v6531_v59  ;;  %v596_v59 = vsel %vm15863_vm6, %v6521_v41, %v6525_v63  ;;  %v597_v5 = vsel %vm15863_vm6, %v6525_v63, %v6526_v52 }
 0x1c8   :  { %692 = vmatpush.msra.mxu2 %v598_v3  ;;  %v1144_v3 = vperm.slane %v9244_v26, 6  ;;  %v6456_v41 = vunpack.i.h.bf16 %v9693_v0  ;;  %v6496_v52 = vunpack.i.h.bf16 %v9724_v13 }
 0x1ca   :  { %1126 = vrot.lane.b32.xlu0 %v1116_v38, %s9068_s28  ;;  %1128 = vrot.lane.b32.xlu1 %v1117_v34, %s9068_s28  ;;  %v6491_v34 = vunpack.i.h.bf16 %v9749_v60  ;;  %v1146_v38 = vperm.slane %v9254_v30, 6  ;;  %s9071_s28 = smov 34  }
 0x1cb   :  { %693 = vmatpush.msra.mxu2 %v594_v58  ;;  %v590_v58 = vsel %vm15863_vm6, %v16206_v31, %v16205_v35  ;;  %1152 = vrot.lane.b32.xlu2 %v1144_v3, %s9069_s3  ;;  %v6480_v35 = vunpack.i.l.bf16 %v9715_v6  ;;  %v6520_v31 = vunpack.i.l.bf16 %v9768_v33  ;;  %v6510_v3 = vunpack.i.l.bf16 %v9733_v37 }
 0x1cc   :  { %v567_v61 = vpop.permute.xlu0 %566  ;;  %v6534_v50 = vpop.permute.xlu1 %6533  ;;  %v582_v30 = vsel %vm15863_vm6, %v6491_v34, %v6495_v40  ;;  %v6506_v33 = vunpack.i.h.bf16 %v9763_v27  ;;  %v6445_v37 = vunpack.i.l.bf16 %v9689_v47 }
 0x1cd   :  { %v6536_v29 = vunpack.i.h.bf16 %v6534_v50  ;;  %v6535_v24 = vunpack.i.l.bf16 %v6534_v50  ;;  %694 = vmatpush.msra.mxu2 %v590_v58  ;;  %v603_v26 = vsel %vm15863_vm6, %v6541_v18, %v567_v61  ;;  %v16207_v61 = vunpack.i.l.bf16 %v9751_v21 }
 0x1ce   :  { %711 = vmatpush.msra.mxu3 %v603_v26  ;;  %v6500_v21 = vunpack.i.l.bf16 %v9747_v15  ;;  %v6455_v58 = vunpack.i.l.bf16 %v9693_v0  ;;  %v6466_v26 = vunpack.i.h.bf16 %v9703_v54 }
 0x1cf   :  { %695 = vmatpush.msra.mxu2 %v586_v39  ;;  %v600_v50 = vsel %vm15863_vm6, %v6535_v24, %v6536_v29  ;;  %v601_v18 = vsel %vm15863_vm6, %v6536_v29, %v16207_v61  ;;  %v6440_v24 = vunpack.i.l.bf16 %v9677_v42  ;;  %v6446_v39 = vunpack.i.h.bf16 %v9689_v47 }
 0x1d0   :  { %651 = vmatpush.msra.mxu0 %v600_v50  ;;  %671 = vmatpush.msra.mxu1 %v601_v18  ;;  %v6470_v29 = vunpack.i.l.bf16 %v9731_v2  ;;  %v16208_v50 = vunpack.i.h.bf16 %v9715_v6  ;;  %v592_v18 = vsel %vm15863_vm6, %v6510_v3, %v6511_v44  ;;  %v588_v3 = vsel %vm15863_vm6, %v6456_v41, %v6500_v21 }
 0x1d1   :  { %696 = vmatpush.msra.mxu2 %v582_v30  ;;  %712 = vmatpush.msra.mxu3 %v599_v32  ;;  %v16211_v30 = vunpack.i.l.bf16 %v9761_v14 }
 0x1d2   :  { %1154 = vrot.lane.b32.xlu0 %v1145_v25, %s9069_s3  ;;  %1156 = vrot.lane.b32.xlu1 %v1146_v38, %s9069_s3  ;;  %v578_v47 = vsel %vm15863_vm6, %v6480_v35, %v16208_v50  ;;  %v16209_v25 = vunpack.i.h.bf16 %v9761_v14  ;;  %v574_v0 = vsel %vm15863_vm6, %v6466_v26, %v6470_v29  ;;  %v16213_v14 = vunpack.i.h.bf16 %v9747_v15 }
 0x1d3   :  { %652 = vmatpush.msra.mxu0 %v596_v59  ;;  %672 = vmatpush.msra.mxu1 %v597_v5  ;;  %v593_v32 = vsel %vm15863_vm6, %v6511_v44, %v16211_v30  ;;  %v16214_v5 = vunpack.i.h.bf16 %v9677_v42  ;;  %v16215_v15 = vunpack.i.h.bf16 %v9673_v22  ;;  %v584_v30 = vsel %vm15863_vm6, %v6445_v37, %v6446_v39 }
 0x1d4   :  { %v595_v38 = vsel %vm15863_vm6, %v16209_v25, %v6520_v31  ;;  %697 = vmatpush.msra.mxu2 %v578_v47  ;;  %v9842_v63 = vpop.permute.xlu0 %799  ;;  %v9844_v61 = vpop.permute.xlu1 %822  ;;  %v16212_v31 = vunpack.i.l.bf16 %v9763_v27  ;;  %v589_v44 = vsel %vm15863_vm6, %v6500_v21, %v16213_v14  ;;  %v9870_v27 = vld [vmem:[%s15640_s2] sm:$0xff]  ;;  %v16217_v14 = vunpack.i.h.bf16 %v9715_v6  ;;  %s9074_s2 = smov 80  }
 0x1d5   :  { %713 = vmatpush.msra.mxu3 %v595_v38  ;;  %16210 = vst [vmem:[#allocation55_spill] sm:$0xff] %v9842_v63  ;;  %653 = vmatpush.msra.mxu0 %v592_v18  ;;  %v570_v50 = vsel %vm15863_vm6, %v6440_v24, %v16214_v5  ;;  %v587_v21 = vsel %vm15863_vm6, %v16215_v15, %v6455_v58  ;;  %v9043_v47 = vld [vmem:[%s16151_s23 + $0x40] sm:$0xff]  ;;  %v9044_v38 = vld [vmem:[%s16151_s23 + $0x48] sm:$0xff]  ;;  %v6485_v18 = vunpack.i.l.bf16 %v9738_v10  ;;  %v9916_v15 = vunpack.i.l.bf16 %v9643_v57 }
 0x1d6   :  { %673 = vmatpush.msra.mxu1 %v593_v32  ;;  %v591_v59 = vsel %vm15863_vm6, %v16212_v31, %v6506_v33  ;;  %698 = vmatpush.msra.mxu2 %v574_v0  ;;  %v6490_v33 = vunpack.i.l.bf16 %v9749_v60  ;;  %v1174_v25 = vperm.slane %v9043_v47, 7  ;;  %v1175_v41 = vperm.slane %v9044_v38, 7 }
 0x1d7   :  { %714 = vmatpush.msra.mxu3 %v591_v59  ;;  %654 = vmatpush.msra.mxu0 %v588_v3  ;;  %v16216_v32 = vunpack.i.l.bf16 %v9673_v22  ;;  %v583_v0 = vsel %vm15863_vm6, %v6495_v40, %v6496_v52  ;;  %v6486_v31 = vunpack.i.h.bf16 %v9738_v10  ;;  %v6476_v59 = vunpack.i.h.bf16 %v9740_v16  ;;  %v9045_v22 = vld [vmem:[%s16151_s23 + $0x58] sm:$0xff]  ;;  %16219 = vst [vmem:[#allocation57_spill] sm:$0xff] %v9916_v15 }
 0x1d8   :  { %674 = vmatpush.msra.mxu1 %v589_v44  ;;  %699 = vmatpush.msra.mxu2 %v570_v50  ;;  %v6475_v3 = vunpack.i.l.bf16 %v9740_v16  ;;  %v1147_v37 = vperm.slane %v9045_v22, 6  ;;  %v6465_v40 = vunpack.i.l.bf16 %v9703_v54  ;;  %v581_v10 = vsel %vm15863_vm6, %v6490_v33, %v6491_v34  ;;  %v9046_v54 = vld [vmem:[%s16151_s23 + $0x50] sm:$0xff] }
 0x1d9   :  { %715 = vmatpush.msra.mxu3 %v587_v21  ;;  %v585_v58 = vsel %vm15863_vm6, %v6446_v39, %v16216_v32  ;;  %6258 = vmatmul.msk.f32.vlgmr.msra.gmra.mxu2 %vm15954_vm13, %v9870_v27  ;;  %v6471_v39 = vunpack.i.h.bf16 %v9731_v2  ;;  %v580_v13 = vsel %vm15863_vm6, %v6486_v31, %v6490_v33  ;;  %v6436_v16 = vunpack.i.h.bf16 %v9643_v57 }
 0x1da   :  { %655 = vmatpush.msra.mxu0 %v584_v30  ;;  %675 = vmatpush.msra.mxu1 %v585_v58  ;;  %v6460_v52 = vunpack.i.l.bf16 %v9729_v12  ;;  %v579_v44 = vsel %vm15863_vm6, %v16217_v14, %v6485_v18  ;;  %v6461_v60 = vunpack.i.h.bf16 %v9729_v12  ;;  %v576_v34 = vsel %vm15863_vm6, %v6475_v3, %v6476_v59 }
 0x1db   :  { %716 = vmatpush.msra.mxu3 %v583_v0  ;;  %1182 = vrot.lane.b32.xlu0 %v1174_v25, %s9070_s1  ;;  %v577_v33 = vsel %vm15863_vm6, %v6476_v59, %v6480_v35  ;;  %v575_v21 = vsel %vm15863_vm6, %v6470_v29, %v6471_v39  ;;  %v573_v12 = vsel %vm15863_vm6, %v6465_v40, %v6466_v26  ;;  %v16220_v6 = vunpack.i.h.bf16 %v9677_v42  ;;  %v9039_v29 = vld [vmem:[%s16151_s23 + $0x60] ss:$0 sm:$0xff]  ;;  %v9040_v42 = vld [vmem:[%s16151_s23 + $0x70] ss:$0 sm:$0xff] }
 0x1dc   :  { %1184 = vrot.lane.b32.xlu1 %v1175_v41, %s9070_s1  ;;  %656 = vmatpush.msra.mxu0 %v580_v13  ;;  %v9911_v5 = vpop.permute.xlu0 %826  ;;  %v9913_v50 = vpop.permute.xlu1 %828  ;;  %v572_v57 = vsel %vm15863_vm6, %v6461_v60, %v6465_v40  ;;  %v1177_v47 = vperm.slane %v9045_v22, 7  ;;  %v568_v2 = vsel %vm15863_vm6, %v9916_v15, %v6436_v16  ;;  %v1176_v26 = vperm.slane %v9046_v54, 7 }
 0x1dd   :  { %676 = vmatpush.msra.mxu1 %v581_v10  ;;  %16218 = vst [vmem:[#allocation56_spill] sm:$0xff] %v9913_v50  ;;  %717 = vmatpush.msra.mxu3 %v579_v44  ;;  %v571_v35 = vsel %vm15863_vm6, %v16220_v6, %v6460_v52  ;;  %v569_v25 = vsel %vm15863_vm6, %v6436_v16, %v6440_v24  ;;  %v9041_v24 = vld [vmem:[%s16151_s23 + $0x78] ss:$0 sm:$0xff]  ;;  %v9996_v10 = vpop.permute.xlu2 %824  ;;  %vm15934_vm6 = vcmask 760832  }
 0x1de   :  { %1158 = vrot.lane.b32.xlu2 %v1147_v37, %s9069_s3  ;;  %657 = vmatpush.msra.mxu0 %v576_v34  ;;  %s9077_s3 = smov 125  }
 0x1df   :  { %677 = vmatpush.msra.mxu1 %v577_v33  ;;  %718 = vmatpush.msra.mxu3 %v575_v21 }
 0x1e0   :  { %658 = vmatpush.msra.mxu0 %v572_v57 }
 0x1e1   :  { %678 = vmatpush.msra.mxu1 %v573_v12  ;;  %719 = vmatpush.msra.mxu3 %v571_v35 }
 0x1e2   :  { %6259 = vmatmul.msk.f32.vlgmr.msra.gmra.mxu3 %vm15954_vm13, %v9870_v27  ;;  %659 = vmatpush.msra.mxu0 %v568_v2 }
 0x1e3   :  { %679 = vmatpush.msra.mxu1 %v569_v25  ;;  %6256 = vmatmul.msk.f32.vlgmr.msra.gmra.mxu0 %vm15954_vm13, %v9870_v27 }
 0x1e4   :  { %6257 = vmatmul.msk.f32.vlgmr.msra.gmra.mxu1 %vm15954_vm13, %v9870_v27  ;;  %1188 = vrot.lane.b32.xlu0 %v1177_v47, %s9070_s1  ;;  %v9952_v38 = vpop.permute.xlu0 %854  ;;  %v9954_v41 = vpop.permute.xlu1 %856  ;;  %v9042_v27 = vld [vmem:[%s16151_s23 + $0x68] ss:$0 sm:$0xff]  ;;  %s9073_s23 = smov 92   ;;  %v10020_v47 = vsel %vm443_vm11, %v9661_v48, %v9710_v1 }
 0x1e5   :  { %1212 = vrot.lane.b32.xlu1 %v9039_v29, %s9071_s28  ;;  %v10002_v14 = vpop.permute.xlu2 %852  ;;  %16228 = vst [vmem:[#allocation65_spill] sm:$0xff] %v10020_v47  ;;  %v780_v29 = vmul.f32 0.0, %v9661_v48  ;;  %v10042_v48 = vsel %vm443_vm11, %v9710_v1, %v9707_v56  ;;  %v10060_v1 = vsel %vm443_vm11, %v9707_v56, %v9670_v9  ;;  %v10075_v56 = vsel %vm423_vm10, %v9720_v28, %v9680_v45 }
 0x1e6   :  { %1186 = vrot.lane.b32.xlu2 %v1176_v26, %s9070_s1  ;;  %s9072_s1 = smov 93   ;;  %16231 = vst [vmem:[#allocation68_spill] sm:$0xff] %v10042_v48 }
 0x1e7   :  { %16234 = vst [vmem:[#allocation71_spill] sm:$0xff] %v10060_v1 }
 0x1e8   :  { %16235 = vst [vmem:[#allocation72_spill] sm:$0xff] %v10075_v56 }
 0x1ec   :  { %1216 = vrot.lane.b32.xlu0 %v9040_v42, %s9071_s28  ;;  %v9968_v18 = vpop.permute.xlu0 %882  ;;  %v9970_v30 = vpop.permute.xlu1 %884 }
 0x1ed   :  { %1218 = vrot.lane.b32.xlu1 %v9041_v24, %s9071_s28  ;;  %v10004_v44 = vpop.permute.xlu2 %858 }
 0x1ee   :  { %1214 = vrot.lane.b32.xlu2 %v9042_v27, %s9071_s28  ;;  %16225 = vst [vmem:[#allocation62_spill] sm:$0xff] %v10004_v44 }
 0x1f4   :  { %v9974_v32 = vpop.permute.xlu0 %888  ;;  %v924_v58 = vpop.permute.xlu1 %923 }
 0x1f5   :  { %16221 = vst [vmem:[#allocation58_spill] sm:$0xff] %v9974_v32  ;;  %1470 = vrot.lane.b32.xlu1 %v9380_v36, %s9072_s1  ;;  %v10006_v60 = vpop.permute.xlu2 %886 }
 0x1fc   :  { %v9978_v0 = vpop.permute.xlu0 %927  ;;  %v9980_v31 = vpop.permute.xlu1 %929 }
 0x1fd   :  { %16222 = vst [vmem:[#allocation59_spill] sm:$0xff] %v9980_v31  ;;  %v10008_v34 = vpop.permute.xlu2 %925 }
 0x204   :  { %v9982_v59 = vpop.permute.xlu0 %955  ;;  %v9984_v3 = vpop.permute.xlu1 %957 }
 0x205   :  { %v954_v33 = vpop.permute.xlu2 %953 }
 0x20c   :  { %v9986_v22 = vpop.permute.xlu0 %990  ;;  %v9988_v37 = vpop.permute.xlu1 %992 }
 0x20d   :  { %16223 = vst [vmem:[#allocation60_spill] sm:$0xff] %v9986_v22  ;;  %v10010_v21 = vpop.permute.xlu2 %959 }
 0x20e   :  { %16226 = vst [vmem:[#allocation63_spill] sm:$0xff] %v10010_v21 }
 0x214   :  { %v9990_v39 = vpop.permute.xlu0 %996  ;;  %v9992_v40 = vpop.permute.xlu1 %1020 }
 0x215   :  { %16224 = vst [vmem:[#allocation61_spill] sm:$0xff] %v9992_v40  ;;  %v1011_v13 = vmul.f32 0.0, %v9990_v39  ;;  %v10012_v57 = vpop.permute.xlu2 %994 }
 0x217   :  { %1490 = vrot.lane.b32.xlu1 %v1011_v13, %s9073_s23 }
 0x21c   :  { %v9998_v16 = vpop.permute.xlu1 %1026 }
 0x21d   :  { %v1041_v52 = vmul.f32 0.0, %v9998_v16 }
 0x21f   :  { %1510 = vrot.lane.b32.xlu1 %v1041_v52, %s9074_s2 }
 0x224   :  { %v10032_v24 = vpop.permute.xlu1 %1066 }
 0x25c   :  { %v701_v54 = vpop.f32.mrf.mxu2 }
 0x25d   :  { %v10036_v52 = vadd.f32 %v701_v54, %v9665_v17  ;;  %v10062_v54 = vpop.permute.xlu2 %1022 }
 0x25f   :  { %16230 = vst [vmem:[#allocation67_spill] sm:$0xff] %v10036_v52 }
 0x260   :  { %v661_v12 = vpop.f32.mrf.mxu0 }
 0x261   :  { %v10015_v6 = vadd.f32 %v661_v12, %v9665_v17  ;;  %v681_v35 = vpop.f32.mrf.mxu1  ;;  %v10049_v12 = vsel %vm423_vm10, %v9722_v43, %v9720_v28 }
 0x262   :  { %v10023_v2 = vadd.f32 %v681_v35, %v9665_v17  ;;  %16232 = vst [vmem:[#allocation69_spill] sm:$0xff] %v10049_v12  ;;  %v10053_v35 = vsel %vm931_vm14, %v924_v58, %v10008_v34 }
 0x263   :  { %16227 = vst [vmem:[#allocation64_spill] sm:$0xff] %v10015_v6  ;;  %v911_v26 = vmul.f32 %v10015_v6, %v9344_v11  ;;  %v781_v25 = vmul.f32 %v10020_v47, %v10015_v6  ;;  %v16264_v11 = vld [vmem:[#allocation16_spill] sm:$0xff] }
 0x264   :  { %16229 = vst [vmem:[#allocation66_spill] sm:$0xff] %v10023_v2  ;;  %v6542_v42 = vpack.i.bf16 %v10023_v2, %v10015_v6  ;;  %v811_v28 = vmul.f32 %v10075_v56, %v10023_v2 }
 0x265   :  { %v6582_v27 = vpack.i.bf16 %v911_v26, %v9341_v8  ;;  %v6547_v13 = vpack.i.bf16 %v781_v25, %v780_v29  ;;  %16233 = vst [vmem:[#allocation70_spill] sm:$0xff] %v10053_v35  ;;  %v782_v29 = vmul.f32 %v10042_v48, %v10023_v2  ;;  %v941_v26 = vmul.f32 %v10053_v35, %v10015_v6  ;;  %v10077_v35 = vpop.permute.xlu1 %1094 }
 0x266   :  { %6543 = vrot.lane.b32.xlu0 %v6542_v42, %s9060_s24  ;;  %v810_v25 = vmul.f32 %v10049_v12, %v10015_v6  ;;  %v783_v42 = vmul.f32 %v10060_v1, %v10036_v52 }
 0x267   :  { %6583 = vrot.lane.b32.xlu1 %v6582_v27, %s9075_s30  ;;  %6548 = vrot.lane.b32.xlu2 %v6547_v13, %s9050_s29  ;;  %v809_v27 = vmul.f32 0.0, %v9722_v43  ;;  %v940_v13 = vmul.f32 0.0, %v924_v58  ;;  %v10084_v43 = vsel %vm830_vm15, %v9844_v61, %v9996_v10  ;;  %v10095_v58 = vsel %vm423_vm10, %v9680_v45, %v9842_v63 }
 0x268   :  { %v6627_v8 = vpack.i.bf16 %v783_v42, %v782_v29  ;;  %16236 = vst [vmem:[#allocation73_spill] sm:$0xff] %v10084_v43  ;;  %v840_v29 = vmul.f32 %v10084_v43, %v10015_v6  ;;  %v10104_v42 = vpop.permute.xlu2 %1062  ;;  %v10110_v45 = vsel %vm830_vm15, %v9996_v10, %v9911_v5 }
 0x269   :  { %v6587_v36 = vpack.i.bf16 %v941_v26, %v940_v13  ;;  %v6552_v15 = vpack.i.bf16 %v810_v25, %v809_v27  ;;  %16238 = vst [vmem:[#allocation75_spill] sm:$0xff] %v10095_v58  ;;  %v812_v26 = vmul.f32 %v10095_v58, %v10036_v52  ;;  %v839_v25 = vmul.f32 0.0, %v9844_v61  ;;  %v721_v58 = vpop.f32.mrf.mxu3 }
 0x26a   :  { %16239 = vst [vmem:[#allocation76_spill] sm:$0xff] %v10104_v42  ;;  %v10117_v61 = vsel %vm860_vm4, %v10002_v14, %v9952_v38 }
 0x26b   :  { %v6637_v27 = vpack.i.bf16 %v812_v26, %v811_v28  ;;  %v6557_v1 = vpack.i.bf16 %v840_v29, %v839_v25  ;;  %16240 = vst [vmem:[#allocation77_spill] sm:$0xff] %v10110_v45  ;;  %v10124_v28 = vsel %vm830_vm15, %v9911_v5, %v9913_v50  ;;  %v869_v26 = vmul.f32 0.0, %v10002_v14 }
 0x26c   :  { %16241 = vst [vmem:[#allocation78_spill] sm:$0xff] %v10117_v61  ;;  %v842_v29 = vmul.f32 %v10124_v28, %v10036_v52  ;;  %v10150_v14 = vsel %vm403_vm9, %v9968_v18, %v9970_v30  ;;  %vm998_vm15 = vcmask 15360  }
 0x26d   :  { %16242 = vst [vmem:[#allocation79_spill] sm:$0xff] %v10124_v28  ;;  %v10126_v10 = vpop.permute.xlu1 %1122 }
 0x26e   :  { %6628 = vrot.lane.b32.xlu0 %v6627_v8, %s9050_s29  ;;  %v10088_v8 = vsel %vm349_vm8, %v954_v33, %v9982_v59  ;;  %16243 = vst [vmem:[#allocation80_spill] sm:$0xff] %v10126_v10 }
 0x26f   :  { %6588 = vrot.lane.b32.xlu1 %v6587_v36, %s9076_s17  ;;  %6553 = vrot.lane.b32.xlu2 %v6552_v15, %s9055_s0  ;;  %16237 = vst [vmem:[#allocation74_spill] sm:$0xff] %v10088_v8  ;;  %v969_v36 = vmul.f32 0.0, %v954_v33  ;;  %v970_v15 = vmul.f32 %v10088_v8, %v10015_v6  ;;  %v841_v33 = vmul.f32 %v10110_v45, %v10023_v2  ;;  %v16263_v8 = vld [vmem:[#allocation24_spill] sm:$0xff] }
 0x270   :  { %16245 = vst [vmem:[#allocation82_spill] sm:$0xff] %v10150_v14 }
 0x271   :  { %v6592_v13 = vpack.i.bf16 %v970_v15, %v969_v36  ;;  %v974_v36 = vmul.f32 %v10015_v6, %v9355_v20  ;;  %v870_v15 = vmul.f32 %v10117_v61, %v10015_v6  ;;  %v6647_v25 = vpack.i.bf16 %v842_v29, %v841_v33  ;;  %v10152_v33 = vpop.permute.xlu0 %1024 }
 0x272   :  { %v10143_v20 = vsel %vm860_vm4, %v9952_v38, %v9954_v41  ;;  %v10159_v38 = vsel %vm860_vm4, %v9954_v41, %v10004_v44  ;;  %vm1028_vm4 = vcmask 113664  }
 0x273   :  { %16244 = vst [vmem:[#allocation81_spill] sm:$0xff] %v10143_v20  ;;  %v872_v29 = vmul.f32 %v10159_v38, %v10036_v52 }
 0x274   :  { %16246 = vst [vmem:[#allocation83_spill] sm:$0xff] %v10159_v38  ;;  %v904_v38 = vmul.f32 %v10023_v2, %v9536_v55  ;;  %v16327_v55 = vld [vmem:[#allocation35_spill] sm:$0xff] }
 0x276   :  { %6638 = vrot.lane.b32.xlu0 %v6637_v27, %s9055_s0  ;;  %v10137_v27 = vpop.permute.xlu2 %1068 }
 0x277   :  { %6593 = vrot.lane.b32.xlu1 %v6592_v13, %s9058_s21  ;;  %6558 = vrot.lane.b32.xlu2 %v6557_v1, %s9077_s3  ;;  %v975_v1 = vmul.f32 %v10023_v2, %v9461_v4  ;;  %v6562_v13 = vpack.i.bf16 %v870_v15, %v869_v26  ;;  %v899_v15 = vmul.f32 %v10150_v14, %v10015_v6  ;;  %v898_v26 = vmul.f32 0.0, %v9968_v18 }
 0x278   :  { %v912_v4 = vmul.f32 %v10023_v2, %v16263_v8  ;;  %v10333_v8 = vsel %vm1070_vm5, %v10032_v24, %v10137_v27 }
 0x279   :  { %v6597_v5 = vpack.i.bf16 %v975_v1, %v974_v36  ;;  %v871_v36 = vmul.f32 %v10143_v20, %v10023_v2  ;;  %v10162_v1 = vadd.f32 %v721_v58, %v9665_v17  ;;  %v6567_v28 = vpack.i.bf16 %v899_v15, %v898_v26  ;;  %v10194_v15 = vpop.permute.xlu0 %1064  ;;  %16269 = vst [vmem:[#allocation95_spill] sm:$0xff] %v10333_v8 }
 0x27a   :  { %v10177_v17 = vsel %vm403_vm9, %v9970_v30, %v10006_v60  ;;  %v10188_v58 = vsel %vm403_vm9, %v10006_v60, %v9974_v32  ;;  %v903_v30 = vmul.f32 %v10015_v6, %v9512_v51 }
 0x27b   :  { %16247 = vst [vmem:[#allocation84_spill] sm:$0xff] %v10162_v1  ;;  %v900_v18 = vmul.f32 %v10177_v17, %v10023_v2 }
 0x27c   :  { %16248 = vst [vmem:[#allocation85_spill] sm:$0xff] %v10177_v17  ;;  %v6572_v60 = vpack.i.bf16 %v903_v30, %v9518_v46  ;;  %v908_v46 = vmul.f32 %v10023_v2, %v9395_v49  ;;  %v1050_v30 = vmul.f32 %v10015_v6, %v9469_v23  ;;  %v16251_v23 = vld [vmem:[#allocation11_spill] sm:$0xff] }
 0x27d   :  { %16249 = vst [vmem:[#allocation86_spill] sm:$0xff] %v10188_v58 }
 0x27e   :  { %6648 = vrot.lane.b32.xlu0 %v6647_v25, %s9077_s3  ;;  %v10169_v25 = vpop.permute.xlu1 %1128  ;;  %v10179_v41 = vpop.permute.xlu2 %1096 }
 0x27f   :  { %6598 = vrot.lane.b32.xlu1 %v6597_v5, %s9059_s22  ;;  %6563 = vrot.lane.b32.xlu2 %v6562_v13, %s9078_s18  ;;  %v6657_v5 = vpack.i.bf16 %v872_v29, %v871_v36  ;;  %v6622_v13 = vpack.i.bf16 %v10162_v1, %v10036_v52  ;;  %v784_v36 = vmul.f32 %v9670_v9, %v10162_v1 }
 0x280   :  { %v901_v29 = vmul.f32 %v10188_v58, %v10036_v52  ;;  %v813_v58 = vmul.f32 %v9842_v63, %v10162_v1  ;;  %v910_v63 = vmul.f32 %v10162_v1, %v9330_v62 }
 0x282   :  { %v6662_v26 = vpack.i.bf16 %v901_v29, %v900_v18  ;;  %v907_v18 = vmul.f32 %v10015_v6, %v9314_v53  ;;  %v10220_v29 = vpop.permute.xlu0 %1092 }
 0x283   :  { %16250 = vst [vmem:[#allocation87_spill] sm:$0xff] %v10220_v29 }
 0x286   :  { %6658 = vrot.lane.b32.xlu0 %v6657_v5, %s9078_s18  ;;  %v10200_v5 = vpop.permute.xlu1 %1156  ;;  %v10208_v9 = vpop.permute.xlu2 %1124 }
 0x287   :  { %6623 = vrot.lane.b32.xlu1 %v6622_v13, %s9060_s24  ;;  %6568 = vrot.lane.b32.xlu2 %v6567_v28, %s9048_s27  ;;  %v1046_v28 = vmul.f32 %v10015_v6, %v9442_v7  ;;  %v978_v7 = vmul.f32 %v10015_v6, %v16251_v23 }
 0x289   :  { %v6632_v13 = vpack.i.bf16 %v1046_v28, %v784_v36  ;;  %v905_v36 = vmul.f32 %v10036_v52, %v9541_v19  ;;  %v843_v19 = vmul.f32 %v9913_v50, %v10162_v1  ;;  %v16256_v50 = vld [vmem:[#allocation5_spill] sm:$0xff] }
 0x28a   :  { %v10241_v62 = vpop.permute.xlu0 %1098  ;;  %v914_v23 = vmul.f32 %v10162_v1, %v16256_v50 }
 0x28b   :  { %v6672_v28 = vpack.i.bf16 %v905_v36, %v904_v38  ;;  %v16252_v38 = vld [vmem:[#allocation14_spill] sm:$0xff] }
 0x28e   :  { %6663 = vrot.lane.b32.xlu0 %v6662_v26, %s9048_s27  ;;  %v6642_v26 = vpack.i.bf16 %v1050_v30, %v813_v58  ;;  %v979_v58 = vmul.f32 %v10023_v2, %v16252_v38  ;;  %v10237_v36 = vpop.permute.xlu2 %1152  ;;  %v1079_v30 = vmul.f32 %v10104_v42, %v10015_v6 }
 0x28f   :  { %6633 = vrot.lane.b32.xlu1 %v6632_v13, %s9050_s29  ;;  %6573 = vrot.lane.b32.xlu2 %v6572_v60, %s9047_s26  ;;  %v6577_v13 = vpack.i.bf16 %v908_v46, %v907_v18  ;;  %v10223_v60 = vpop.permute.xlu1 %1184  ;;  %v16253_v18 = vld [vmem:[#allocation19_spill] sm:$0xff]  ;;  %16254 = vst [vmem:[#allocation88_spill] sm:$0xff] %v10237_v36 }
 0x290   :  { %v909_v46 = vmul.f32 %v10036_v52, %v16253_v18  ;;  %v10249_v18 = vsel %vm998_vm15, %v9986_v22, %v9988_v37 }
 0x291   :  { %16255 = vst [vmem:[#allocation89_spill] sm:$0xff] %v10249_v18 }
 0x292   :  { %v10273_v50 = vpop.permute.xlu0 %1126 }
 0x296   :  { %6673 = vrot.lane.b32.xlu0 %v6672_v28, %s9047_s26  ;;  %v6682_v28 = vpack.i.bf16 %v910_v63, %v909_v46 }
 0x297   :  { %6643 = vrot.lane.b32.xlu1 %v6642_v26, %s9055_s0  ;;  %6578 = vrot.lane.b32.xlu2 %v6577_v13, %s9057_s20  ;;  %v6652_v26 = vpack.i.bf16 %v1079_v30, %v843_v19  ;;  %v6602_v13 = vpack.i.bf16 %v979_v58, %v978_v7  ;;  %v10253_v63 = vpop.permute.xlu1 %1212  ;;  %v1007_v7 = vmul.f32 %v9986_v22, %v10015_v6  ;;  %v10261_v30 = vpop.permute.xlu2 %1158  ;;  %v16260_v22 = vld [vmem:[#allocation4_spill] sm:$0xff] }
 0x298   :  { %16257 = vst [vmem:[#allocation90_spill] sm:$0xff] %v10253_v63  ;;  %v1008_v19 = vmul.f32 %v10249_v18, %v10023_v2  ;;  %v1229_v58 = vmul.f32 %v10253_v63, %v10015_v6  ;;  %v906_v18 = vmul.f32 %v10162_v1, %v16260_v22  ;;  %v16261_v22 = vld [vmem:[#allocation17_spill] sm:$0xff] }
 0x29a   :  { %v6692_v46 = vpack.i.bf16 %v1229_v58, %v914_v23  ;;  %v902_v23 = vmul.f32 %v9974_v32, %v10162_v1  ;;  %v1037_v58 = vmul.f32 %v9992_v40, %v10015_v6 }
 0x29e   :  { %6683 = vrot.lane.b32.xlu0 %v6682_v28, %s9057_s20  ;;  %v873_v28 = vmul.f32 %v10004_v44, %v10162_v1  ;;  %v10288_v44 = vsel %vm1100_vm3, %v10220_v29, %v10077_v35 }
 0x29f   :  { %6653 = vrot.lane.b32.xlu1 %v6652_v26, %s9077_s3  ;;  %6603 = vrot.lane.b32.xlu2 %v6602_v13, %s9072_s1  ;;  %v6607_v26 = vpack.i.bf16 %v1008_v19, %v1007_v7  ;;  %v10271_v13 = vsel %vm1028_vm4, %v9992_v40, %v10062_v54  ;;  %v1139_v19 = vmul.f32 %v10126_v10, %v10015_v6  ;;  %v10291_v32 = vpop.permute.xlu2 %1186  ;;  %v16262_v40 = vld [vmem:[#allocation31_spill] sm:$0xff] }
 0x2a0   :  { %16258 = vst [vmem:[#allocation91_spill] sm:$0xff] %v10271_v13  ;;  %v1038_v7 = vmul.f32 %v10271_v13, %v10023_v2  ;;  %v1051_v13 = vmul.f32 %v10023_v2, %v16262_v40 }
 0x2a1   :  { %16259 = vst [vmem:[#allocation92_spill] sm:$0xff] %v10288_v44 }
 0x2a6   :  { %6693 = vrot.lane.b32.xlu0 %v6692_v46, %s9075_s30  ;;  %v944_v46 = vmul.f32 %v9980_v31, %v10162_v1 }
 0x2a7   :  { %1305 = vrot.lane.b32.xlu1 %v873_v28, %s9078_s18  ;;  %6608 = vrot.lane.b32.xlu2 %v6607_v26, %s9073_s23  ;;  %v6667_v28 = vpack.i.bf16 %v1139_v19, %v902_v23  ;;  %v6612_v26 = vpack.i.bf16 %v1038_v7, %v1037_v58  ;;  %v1109_v23 = vmul.f32 %v10220_v29, %v10015_v6  ;;  %v10301_v7 = vpop.permute.xlu0 %1154  ;;  %v10303_v19 = vpop.permute.xlu1 %1218 }
 0x2a8   :  { %v1110_v58 = vmul.f32 %v10288_v44, %v10023_v2  ;;  %v981_v29 = vmul.f32 %v10162_v1, %v16261_v22  ;;  %v10314_v44 = vpop.permute.xlu2 %1214 }
 0x2aa   :  { %v6617_v38 = vpack.i.bf16 %v1110_v58, %v1109_v23  ;;  %v16265_v23 = vld [vmem:[#allocation33_spill] sm:$0xff] }
 0x2ab   :  { %v1052_v58 = vmul.f32 %v10036_v52, %v16265_v23  ;;  %v10339_v23 = vsel %vm998_vm15, %v10012_v57, %v9990_v39  ;;  %v1083_v39 = vmul.f32 0.0, %v10137_v27 }
 0x2ac   :  { %16270 = vst [vmem:[#allocation96_spill] sm:$0xff] %v10339_v23 }
 0x2ad   :  { %v6737_v53 = vpack.i.bf16 %v1052_v58, %v1051_v13  ;;  %v10353_v13 = vsel %vm998_vm15, %v9988_v37, %v10012_v57  ;;  %vm1190_vm15 = vcmask 269312  }
 0x2ae   :  { %1399 = vrot.lane.b32.xlu0 %v944_v46, %s9076_s17  ;;  %v1169_v46 = vmul.f32 %v10237_v36, %v10015_v6  ;;  %16272 = vst [vmem:[#allocation98_spill] sm:$0xff] %v10353_v13  ;;  %v1009_v58 = vmul.f32 %v10353_v13, %v10036_v52  ;;  %v16287_v13 = vld [vmem:[#allocation27_spill] sm:$0xff] }
 0x2af   :  { %6668 = vrot.lane.b32.xlu1 %v6667_v28, %s9048_s27  ;;  %6613 = vrot.lane.b32.xlu2 %v6612_v26, %s9074_s2  ;;  %v973_v28 = vmul.f32 %v10010_v21, %v10162_v1  ;;  %v10328_v22 = vpop.permute.xlu1 %1470 }
 0x2b0   :  { %v6677_v26 = vpack.i.bf16 %v1169_v46, %v906_v18  ;;  %v980_v18 = vmul.f32 %v10036_v52, %v16264_v11  ;;  %v16266_v46 = vld [vmem:[#allocation23_spill] sm:$0xff]  ;;  %16268 = vst [vmem:[#allocation94_spill] sm:$0xff] %v10328_v22  ;;  %v10384_v11 = vsel %vm1028_vm4, %v10062_v54, %v10152_v33  ;;  %v10402_v54 = vsel %vm349_vm8, %v9984_v3, %v10010_v21 }
 0x2b1   :  { %16277 = vst [vmem:[#allocation103_spill] sm:$0xff] %v10384_v11 }
 0x2b2   :  { %16280 = vst [vmem:[#allocation106_spill] sm:$0xff] %v10402_v54 }
 0x2b6   :  { %1419 = vrot.lane.b32.xlu0 %v973_v28, %s9058_s21  ;;  %v10326_v28 = vpop.permute.xlu0 %1182 }
 0x2b7   :  { %6678 = vrot.lane.b32.xlu1 %v6677_v26, %s9047_s26  ;;  %6618 = vrot.lane.b32.xlu2 %v6617_v38, %s15793_s19  ;;  %v913_v38 = vmul.f32 %v10036_v52, %v16266_v46  ;;  %16267 = vst [vmem:[#allocation93_spill] sm:$0xff] %v10326_v28  ;;  %v6712_v26 = vpack.i.bf16 %v981_v29, %v980_v18 }
 0x2b8   :  { %v1010_v29 = vmul.f32 %v10339_v23, %v10162_v1  ;;  %v16288_v23 = vld [vmem:[#allocation37_spill] sm:$0xff] }
 0x2b9   :  { %v6687_v40 = vpack.i.bf16 %v913_v38, %v912_v4  ;;  %v10346_v4 = vsel %vm931_vm14, %v10008_v34, %v9978_v0  ;;  %v10365_v34 = vsel %vm931_vm14, %v9978_v0, %v9980_v31  ;;  %v10379_v0 = vsel %vm1028_vm4, %v10152_v33, %v9998_v16 }
 0x2ba   :  { %16271 = vst [vmem:[#allocation97_spill] sm:$0xff] %v10346_v4  ;;  %v943_v37 = vmul.f32 %v10365_v34, %v10036_v52  ;;  %v6717_v57 = vpack.i.bf16 %v1010_v29, %v1009_v58  ;;  %v10391_v29 = vsel %vm349_vm8, %v9982_v59, %v9984_v3  ;;  %v1039_v33 = vmul.f32 %v10384_v11, %v10036_v52 }
 0x2bb   :  { %16274 = vst [vmem:[#allocation100_spill] sm:$0xff] %v10365_v34  ;;  %v971_v16 = vmul.f32 %v10391_v29, %v10023_v2  ;;  %v972_v59 = vmul.f32 %v10402_v54, %v10036_v52  ;;  %v1113_v58 = vmul.f32 0.0, %v10241_v62  ;;  %vm1160_vm14 = vcmask 261120  }
 0x2bc   :  { %16276 = vst [vmem:[#allocation102_spill] sm:$0xff] %v10379_v0  ;;  %vm1287_vm4 = vcmask 1022976  }
 0x2bd   :  { %16278 = vst [vmem:[#allocation104_spill] sm:$0xff] %v10391_v29 }
 0x2be   :  { %6713 = vrot.lane.b32.xlu0 %v6712_v26, %s9072_s1  ;;  %v10371_v26 = vpop.permute.xlu1 %1490 }
 0x2bf   :  { %6738 = vrot.lane.b32.xlu1 %v6737_v53, %s9055_s0  ;;  %6688 = vrot.lane.b32.xlu2 %v6687_v40, %s9075_s30  ;;  %v1082_v53 = vmul.f32 %v10333_v8, %v10162_v1  ;;  %v942_v40 = vmul.f32 %v10346_v4, %v10023_v2  ;;  %16275 = vst [vmem:[#allocation101_spill] sm:$0xff] %v10371_v26  ;;  %v10373_v8 = vpop.permute.xlu0 %1188 }
 0x2c0   :  { %v10447_v21 = vsel %vm1190_vm15, %v10291_v32, %v10373_v8 }
 0x2c1   :  { %v10356_v18 = vpop.permute.xlu2 %6548  ;;  %v6752_v27 = vpack.i.bf16 %v1083_v39, %v1082_v53  ;;  %v6697_v38 = vpack.i.bf16 %v943_v37, %v942_v40  ;;  %v1040_v39 = vmul.f32 %v10379_v0, %v10162_v1  ;;  %v6702_v37 = vpack.i.bf16 %v972_v59, %v971_v16  ;;  %16290 = vst [vmem:[#allocation112_spill] sm:$0xff] %v10447_v21 }
 0x2c2   :  { %16273 = vst [vmem:[#allocation99_spill] sm:$0xff] %v10356_v18 }
 0x2c3   :  { %v6722_v40 = vpack.i.bf16 %v1040_v39, %v1039_v33  ;;  %v16284_v39 = vld [vmem:[#allocation32_spill] sm:$0xff] }
 0x2c4   :  { %v1049_v16 = vmul.f32 %v10162_v1, %v16284_v39  ;;  %v10442_v39 = vsel %vm1070_vm5, %v10104_v42, %v10194_v15 }
 0x2c5   :  { %16289 = vst [vmem:[#allocation111_spill] sm:$0xff] %v10442_v39 }
 0x2c6   :  { %6718 = vrot.lane.b32.xlu0 %v6717_v57, %s9073_s23  ;;  %v10412_v57 = vsel %vm1160_vm14, %v10237_v36, %v10301_v7  ;;  %v10417_v3 = vpop.permute.xlu1 %1510  ;;  %v6732_v11 = vpack.i.bf16 %v16288_v23, %v1049_v16  ;;  %v10460_v16 = vsel %vm1190_vm15, %v10223_v60, %v10291_v32 }
 0x2c7   :  { %6753 = vrot.lane.b32.xlu1 %v6752_v27, %s9077_s3  ;;  %6698 = vrot.lane.b32.xlu2 %v6697_v38, %s9076_s17  ;;  %16281 = vst [vmem:[#allocation107_spill] sm:$0xff] %v10412_v57  ;;  %v10422_v27 = vsel %vm1160_vm14, %v10301_v7, %v10200_v5  ;;  %v10424_v38 = vpop.permute.xlu0 %1216  ;;  %v1170_v59 = vmul.f32 %v10412_v57, %v10023_v2 }
 0x2c8   :  { %16282 = vst [vmem:[#allocation108_spill] sm:$0xff] %v10417_v3  ;;  %v976_v7 = vmul.f32 %v10036_v52, %v16287_v13  ;;  %v1201_v32 = vmul.f32 %v10460_v16, %v10036_v52 }
 0x2c9   :  { %v10395_v53 = vpop.permute.xlu2 %6553  ;;  %16283 = vst [vmem:[#allocation109_spill] sm:$0xff] %v10422_v27 }
 0x2ca   :  { %16279 = vst [vmem:[#allocation105_spill] sm:$0xff] %v10395_v53 }
 0x2cb   :  { %16292 = vst [vmem:[#allocation114_spill] sm:$0xff] %v10460_v16  ;;  %v10494_v16 = vsel %vm1100_vm3, %v10077_v35, %v10179_v41  ;;  %v16302_v35 = vld [vmem:[#allocation34_spill] sm:$0xff] }
 0x2cc   :  { %16299 = vst [vmem:[#allocation119_spill] sm:$0xff] %v10494_v16 }
 0x2ce   :  { %6723 = vrot.lane.b32.xlu0 %v6722_v40, %s9074_s2  ;;  %v16286_v40 = vld [vmem:[#allocation12_spill] sm:$0xff] }
 0x2cf   :  { %1585 = vrot.lane.b32.xlu1 %v1113_v58, %s15793_s19  ;;  %6703 = vrot.lane.b32.xlu2 %v6702_v37, %s9058_s21  ;;  %v977_v58 = vmul.f32 %v10162_v1, %v16286_v40  ;;  %v1171_v37 = vmul.f32 %v10422_v27, %v10036_v52  ;;  %v10453_v27 = vsel %vm1070_vm5, %v10194_v15, %v10032_v24  ;;  %v16295_v15 = vld [vmem:[#allocation26_spill] sm:$0xff]  ;;  %vm15958_vm5 = vcmask 277504  }
 0x2d0   :  { %16291 = vst [vmem:[#allocation113_spill] sm:$0xff] %v10453_v27  ;;  %v1202_v24 = vmul.f32 %v10447_v21, %v10162_v1  ;;  %v10483_v40 = vsel %vm1100_vm3, %v10179_v41, %v10241_v62  ;;  %v10488_v31 = vsel %vm15958_vm5, %v10424_v38, %v10303_v19  ;;  %v1053_v41 = vmul.f32 %v10162_v1, %v16302_v35 }
 0x2d1   :  { %v10428_v33 = vpop.permute.xlu2 %6558  ;;  %v6772_v0 = vpack.i.bf16 %v1171_v37, %v1170_v59  ;;  %v6707_v54 = vpack.i.bf16 %v977_v58, %v976_v7  ;;  %v1080_v58 = vmul.f32 %v10442_v39, %v10023_v2  ;;  %v16296_v7 = vld [vmem:[#allocation29_spill] sm:$0xff]  ;;  %16297 = vst [vmem:[#allocation117_spill] sm:$0xff] %v10483_v40  ;;  %vm1130_vm3 = vcmask 252928  }
 0x2d2   :  { %16285 = vst [vmem:[#allocation110_spill] sm:$0xff] %v10428_v33  ;;  %v1048_v23 = vmul.f32 %v10036_v52, %v16296_v7  ;;  %v6787_v21 = vpack.i.bf16 %v1202_v24, %v1201_v32  ;;  %v16304_v32 = vld [vmem:[#allocation38_spill] sm:$0xff]  ;;  %v10520_v7 = vsel %vm1130_vm3, %v10126_v10, %v10208_v9 }
 0x2d3   :  { %16298 = vst [vmem:[#allocation118_spill] sm:$0xff] %v10488_v31 }
 0x2d4   :  { %16305 = vst [vmem:[#allocation123_spill] sm:$0xff] %v10520_v7 }
 0x2d6   :  { %6733 = vrot.lane.b32.xlu0 %v6732_v11, %s9050_s29 }
 0x2d7   :  { %6773 = vrot.lane.b32.xlu1 %v6772_v0, %s9047_s26  ;;  %6708 = vrot.lane.b32.xlu2 %v6707_v54, %s9059_s22  ;;  %v1047_v0 = vmul.f32 %v10023_v2, %v16295_v15  ;;  %v1081_v54 = vmul.f32 %v10453_v27, %v10036_v52  ;;  %v16317_v27 = vld [vmem:[#allocation13_spill] sm:$0xff] }
 0x2d8   :  { %v10462_v59 = vpop.permute.xlu0 %6543  ;;  %v1042_v46 = vmul.f32 %v10015_v6, %v16317_v27 }
 0x2d9   :  { %v10466_v11 = vpop.permute.xlu1 %6583  ;;  %v10468_v37 = vpop.permute.xlu2 %6563  ;;  %v6747_v13 = vpack.i.bf16 %v1081_v54, %v1080_v58  ;;  %v6727_v34 = vpack.i.bf16 %v1048_v23, %v1047_v0  ;;  %v1112_v23 = vmul.f32 %v10483_v40, %v10162_v1  ;;  %v1233_v58 = vmul.f32 0.0, %v10303_v19 }
 0x2da   :  { %16293 = vst [vmem:[#allocation115_spill] sm:$0xff] %v10466_v11  ;;  %v10515_v54 = vsel %vm1130_vm3, %v10273_v50, %v10169_v25  ;;  %v6742_v40 = vpack.i.bf16 %v16304_v32, %v1053_v41  ;;  %v10553_v32 = vsel %vm1160_vm14, %v10200_v5, %v10261_v30  ;;  %vm15871_vm14 = vcmask 891904  }
 0x2db   :  { %16294 = vst [vmem:[#allocation116_spill] sm:$0xff] %v10468_v37  ;;  %v1172_v5 = vmul.f32 %v10553_v32, %v10162_v1 }
 0x2dc   :  { %16303 = vst [vmem:[#allocation122_spill] sm:$0xff] %v10515_v54 }
 0x2dd   :  { %16310 = vst [vmem:[#allocation128_spill] sm:$0xff] %v10553_v32 }
 0x2de   :  { %6748 = vrot.lane.b32.xlu0 %v6747_v13, %s9077_s3  ;;  %v1232_v13 = vmul.f32 %v10488_v31, %v10162_v1  ;;  %v1143_v31 = vmul.f32 0.0, %v10169_v25 }
 0x2df   :  { %6788 = vrot.lane.b32.xlu1 %v6787_v21, %s9057_s20  ;;  %6728 = vrot.lane.b32.xlu2 %v6727_v34, %s9050_s29  ;;  %v1111_v21 = vmul.f32 %v10494_v16, %v10036_v52 }
 0x2e0   :  { %v10498_v62 = vpop.permute.xlu0 %6628  ;;  %v6797_v19 = vpack.i.bf16 %v1233_v58, %v1232_v13  ;;  %v1142_v58 = vmul.f32 %v10515_v54, %v10162_v1 }
 0x2e1   :  { %v10503_v24 = vpop.permute.xlu1 %6588  ;;  %v10505_v0 = vpop.permute.xlu2 %6568  ;;  %v6757_v34 = vpack.i.bf16 %v1112_v23, %v1111_v21  ;;  %v10528_v23 = vsel %vm1130_vm3, %v10208_v9, %v10273_v50  ;;  %v726_v9 = vld [vmem:[%s15641_s5] sm:$0xff]  ;;  %v10548_v50 = vsel %vm1190_vm15, %v10326_v28, %v10223_v60  ;;  %s9079_s5 = smov 79   ;;  %vm1307_vm15 = vcmask 1014784  }
 0x2e2   :  { %16300 = vst [vmem:[#allocation120_spill] sm:$0xff] %v10503_v24  ;;  %v6767_v25 = vpack.i.bf16 %v1143_v31, %v1142_v58  ;;  %v1199_v58 = vmul.f32 %v10326_v28, %v10015_v6  ;;  %v1200_v60 = vmul.f32 %v10548_v50, %v10023_v2  ;;  %vm1401_vm3 = vcmask 883712  }
 0x2e3   :  { %16301 = vst [vmem:[#allocation121_spill] sm:$0xff] %v10505_v0 }
 0x2e4   :  { %16306 = vst [vmem:[#allocation124_spill] sm:$0xff] %v10528_v23 }
 0x2e5   :  { %16309 = vst [vmem:[#allocation127_spill] sm:$0xff] %v10548_v50 }
 0x2e6   :  { %6758 = vrot.lane.b32.xlu0 %v6757_v34, %s15793_s19  ;;  %v1140_v34 = vmul.f32 %v10520_v7, %v10023_v2 }
 0x2e7   :  { %6798 = vrot.lane.b32.xlu1 %v6797_v19, %s9075_s30  ;;  %6743 = vrot.lane.b32.xlu2 %v6742_v40, %s9055_s0  ;;  %v1141_v40 = vmul.f32 %v10528_v23, %v10036_v52 }
 0x2e8   :  { %v10530_v21 = vpop.permute.xlu0 %6638 }
 0x2e9   :  { %v10534_v13 = vpop.permute.xlu1 %6593  ;;  %v10536_v41 = vpop.permute.xlu2 %6573  ;;  %v6762_v19 = vpack.i.bf16 %v1141_v40, %v1140_v34  ;;  %v1173_v34 = vmul.f32 0.0, %v10261_v30  ;;  %v10579_v30 = vsel %vm15958_vm5, %v10314_v44, %v10424_v38  ;;  %v16315_v38 = vld [vmem:[#allocation20_spill] sm:$0xff] }
 0x2ea   :  { %16307 = vst [vmem:[#allocation125_spill] sm:$0xff] %v10534_v13 }
 0x2eb   :  { %16308 = vst [vmem:[#allocation126_spill] sm:$0xff] %v10536_v41 }
 0x2ec   :  { %16312 = vst [vmem:[#allocation130_spill] sm:$0xff] %v10579_v30 }
 0x2ee   :  { %6768 = vrot.lane.b32.xlu0 %v6767_v25, %s9048_s27  ;;  %v6782_v25 = vpack.i.bf16 %v1200_v60, %v1199_v58 }
 0x2ef   :  { %1800 = vperm.xlu1 %6431, %v726_v9   ;;  %6763 = vrot.lane.b32.xlu2 %v6762_v19, %s9048_s27  ;;  %v10573_v9 = vsel %vm15958_vm5, %v10253_v63, %v10314_v44  ;;  %v6777_v19 = vpack.i.bf16 %v1173_v34, %v1172_v5  ;;  %v1231_v34 = vmul.f32 %v10579_v30, %v10036_v52  ;;  %v16318_v30 = vld [vmem:[#allocation21_spill] sm:$0xff]  ;;  %v16321_v63 = vld [vmem:[#allocation52_spill] sm:$0xff] }
 0x2f0   :  { %v10557_v31 = vpop.permute.xlu0 %6648  ;;  %16311 = vst [vmem:[#allocation129_spill] sm:$0xff] %v10573_v9  ;;  %v1230_v58 = vmul.f32 %v10573_v9, %v10023_v2 }
 0x2f1   :  { %v10564_v40 = vpop.permute.xlu1 %6598  ;;  %v10566_v16 = vpop.permute.xlu2 %6578 }
 0x2f2   :  { %v6792_v5 = vpack.i.bf16 %v1231_v34, %v1230_v58  ;;  %v1043_v58 = vmul.f32 %v10023_v2, %v16318_v30 }
 0x2f6   :  { %6783 = vrot.lane.b32.xlu0 %v6782_v25, %s9057_s20  ;;  %v1203_v25 = vmul.f32 0.0, %v10373_v8  ;;  %v16319_v8 = vld [vmem:[#allocation22_spill] sm:$0xff] }
 0x2f7   :  { %6778 = vrot.lane.b32.xlu2 %v6777_v19, %s9047_s26  ;;  %v1045_v19 = vmul.f32 %v10162_v1, %v16315_v38  ;;  %v1044_v34 = vmul.f32 %v10036_v52, %v16319_v8  ;;  %v16320_v38 = vld [vmem:[#allocation50_spill] sm:$0xff] }
 0x2f8   :  { %v10582_v23 = vpop.permute.xlu0 %6658  ;;  %v10614_v28 = vsel %vm15957_vm12, %v16321_v63, %v16320_v38 }
 0x2f9   :  { %v10586_v60 = vpop.permute.xlu1 %6623  ;;  %v10588_v54 = vpop.permute.xlu2 %6603  ;;  %16322 = vst [vmem:[#allocation50_spill] sm:$0xff] %v10614_v28 }
 0x2fa   :  { %16313 = vst [vmem:[#allocation131_spill] sm:$0xff] %v10586_v60 }
 0x2fb   :  { %16314 = vst [vmem:[#allocation132_spill] sm:$0xff] %v10588_v54  ;;  %v15854_v54 = vunpack.i.l.bf16 %v10356_v18 }
 0x2fe   :  { %6793 = vrot.lane.b32.xlu0 %v6792_v5, %s9075_s30  ;;  %v6807_v5 = vpack.i.bf16 %v1045_v19, %v1044_v34  ;;  %v752_v19 = vmul.f32 %v10614_v28, %v10015_v6 }
 0x2ff   :  { %1642 = vrot.lane.b32.xlu2 %v1203_v25, %s9057_s20  ;;  %v6802_v25 = vpack.i.bf16 %v1043_v58, %v1042_v46  ;;  %v751_v46 = vmul.f32 0.0, %v16321_v63 }
 0x300   :  { %v10595_v44 = vpop.permute.xlu0 %6663 }
 0x301   :  { %v10599_v32 = vpop.permute.xlu1 %6633  ;;  %v10601_v35 = vpop.permute.xlu2 %6608  ;;  %v6812_v58 = vpack.i.bf16 %v752_v19, %v751_v46 }
 0x302   :  { %16316 = vst [vmem:[#allocation133_spill] sm:$0xff] %v10601_v35  ;;  %v6636_v4 = vunpack.i.h.bf16 %v10599_v32 }
 0x306   :  { %6808 = vrot.lane.b32.xlu0 %v6807_v5, %s9079_s5 }
 0x307   :  { %6803 = vrot.lane.b32.xlu2 %v6802_v25, %s9079_s5 }
 0x308   :  { %v10616_v9 = vpop.permute.xlu0 %6673 }
 0x309   :  { %v10618_v50 = vpop.permute.xlu1 %6643  ;;  %v10620_v27 = vpop.permute.xlu2 %6613 }
 0x30a   :  { %16323 = vst [vmem:[#allocation52_spill] sm:$0xff] %v10620_v27 }
 0x30f   :  { %6813 = vrot.lane.b32.xlu2 %v6812_v58, %s9071_s28 }
 0x310   :  { %v10626_v34 = vpop.permute.xlu0 %6683 }
 0x311   :  { %v10628_v5 = vpop.permute.xlu1 %6653  ;;  %v10630_v25 = vpop.permute.xlu2 %6618 }
 0x318   :  { %v10632_v8 = vpop.permute.xlu0 %6693 }
 0x319   :  { %v10634_v30 = vpop.permute.xlu1 %1305  ;;  %v10636_v10 = vpop.permute.xlu2 %6688 }
 0x320   :  { %v10638_v7 = vpop.permute.xlu0 %1399 }
 0x321   :  { %v10640_v6 = vpop.permute.xlu1 %6668  ;;  %v10642_v63 = vpop.permute.xlu2 %6698 }
 0x322   :  { %v6671_v12 = vunpack.i.h.bf16 %v10640_v6 }
 0x328   :  { %v10644_v19 = vpop.permute.xlu0 %1419 }
 0x329   :  { %v10646_v46 = vpop.permute.xlu1 %6678  ;;  %v10648_v58 = vpop.permute.xlu2 %6703 }
 0x330   :  { %v10650_v36 = vpop.permute.xlu0 %6713 }
 0x331   :  { %16324 = vst [vmem:[#allocation134_spill] sm:$0xff] %v10650_v36  ;;  %v10652_v57 = vpop.permute.xlu1 %6738  ;;  %v10654_v15 = vpop.permute.xlu2 %6708 }
 0x332   :  { %16325 = vst [vmem:[#allocation135_spill] sm:$0xff] %v10654_v15 }
 0x338   :  { %v10656_v42 = vpop.permute.xlu0 %6718 }
 0x339   :  { %16326 = vst [vmem:[#allocation136_spill] sm:$0xff] %v10656_v42  ;;  %v10658_v39 = vpop.permute.xlu1 %6753  ;;  %v6729_v29 = vpop.permute.xlu2 %6728 }
 0x33a   :  { %v6730_v49 = vunpack.i.l.bf16 %v6729_v29 }
 0x33c   :  { %v1531_v51 = vsel %vm181_vm2, %v6636_v4, %v6730_v49 }
 0x33d   :  { %v6822_v14 = vpack.i.bf16 %v1531_v51, %v16327_v55  ;;  %v6731_v55 = vunpack.i.h.bf16 %v6729_v29 }
 0x33f   :  { %6823 = vrot.lane.b32.xlu1 %v6822_v14, %s9079_s5  ;;  %v1532_v26 = vsel %vm181_vm2, %v6730_v49, %v6731_v55 }
 0x340   :  { %v10664_v61 = vpop.permute.xlu0 %6723 }
 0x341   :  { %16328 = vst [vmem:[#allocation137_spill] sm:$0xff] %v10664_v61  ;;  %v10666_v17 = vpop.permute.xlu1 %1585  ;;  %v6744_v20 = vpop.permute.xlu2 %6743 }
 0x342   :  { %16329 = vst [vmem:[#allocation138_spill] sm:$0xff] %v10666_v17  ;;  %v10688_v3 = vunpack.i.h.bf16 %v6744_v20  ;;  %v6745_v61 = vunpack.i.l.bf16 %v6744_v20  ;;  %v16332_v20 = vld [vmem:[#allocation54_spill] sm:$0xff] }
 0x344   :  { %16330 = vst [vmem:[#allocation139_spill] sm:$0xff] %v10688_v3 }
 0x348   :  { %v10668_v43 = vpop.permute.xlu0 %6733 }
 0x349   :  { %v10670_v45 = vpop.permute.xlu1 %6773  ;;  %v10672_v56 = vpop.permute.xlu2 %6763  ;;  %v6735_v4 = vunpack.i.l.bf16 %v10668_v43 }
 0x34a   :  { %v15837_v48 = vunpack.i.l.bf16 %v10672_v56  ;;  %v6775_v42 = vunpack.i.l.bf16 %v10670_v45 }
 0x34b   :  { %v1533_v27 = vsel %vm181_vm2, %v6731_v55, %v6735_v4  ;;  %v10709_v55 = vsel %vm15957_vm12, %v16320_v38, %v16332_v20 }
 0x34c   :  { %v1606_v51 = vsel %vm121_vm0, %v6671_v12, %v15837_v48  ;;  %v6852_v22 = vpack.i.bf16 %v1533_v27, %v1532_v26  ;;  %v15838_v12 = vunpack.i.h.bf16 %v10652_v57  ;;  %v1552_v48 = vsel %vm349_vm8, %v6745_v61, %v10688_v3  ;;  %16333 = vst [vmem:[#allocation54_spill] sm:$0xff] %v10709_v55 }
 0x34d   :  { %v6832_v14 = vpack.i.bf16 %v1606_v51, %v10666_v17  ;;  %v10712_v26 = vunpack.i.h.bf16 %v10658_v39  ;;  %v15848_v27 = vunpack.i.l.bf16 %v10658_v39 }
 0x34e   :  { %v1551_v29 = vsel %vm349_vm8, %v15838_v12, %v6745_v61  ;;  %v753_v61 = vmul.f32 %v10709_v55, %v10023_v2  ;;  %v16335_v12 = vld [vmem:[#allocation53_spill] sm:$0xff]  ;;  %v15855_v55 = vunpack.i.h.bf16 %v10670_v45 }
 0x34f   :  { %6833 = vrot.lane.b32.xlu2 %v6832_v14, %s9079_s5  ;;  %16334 = vst [vmem:[#allocation141_spill] sm:$0xff] %v10712_v26  ;;  %v10720_v60 = vsel %vm15957_vm12, %v16332_v20, %v16335_v12  ;;  %v1571_v38 = vsel %vm1287_vm4, %v15848_v27, %v10712_v26  ;;  %v6656_v20 = vunpack.i.h.bf16 %v10628_v5 }
 0x350   :  { %v10682_v47 = vpop.permute.xlu0 %6748  ;;  %16336 = vst [vmem:[#allocation142_spill] sm:$0xff] %v10720_v60 }
 0x351   :  { %v10684_v28 = vpop.permute.xlu1 %6788  ;;  %v15851_v2 = vunpack.i.l.bf16 %v10682_v47 }
 0x357   :  { %6853 = vrot.lane.b32.xlu2 %v6852_v22, %s9079_s5  ;;  %v6867_v22 = vpack.i.bf16 %v1552_v48, %v1551_v29  ;;  %v754_v48 = vmul.f32 %v10720_v60, %v10036_v52  ;;  %v1568_v52 = vsel %vm1287_vm4, %v6656_v20, %v15851_v2  ;;  %v10740_v60 = vpop.permute.xlu2 %6778  ;;  %v10753_v2 = vunpack.i.h.bf16 %v10668_v43 }
 0x358   :  { %v10692_v51 = vpop.permute.xlu0 %6758  ;;  %v6827_v20 = vpack.i.bf16 %v1568_v52, %v10688_v3  ;;  %v15859_v52 = vunpack.i.h.bf16 %v10684_v28  ;;  %v6790_v43 = vunpack.i.l.bf16 %v10684_v28  ;;  %v15861_v3 = vunpack.i.l.bf16 %v10395_v53 }
 0x359   :  { %v10694_v14 = vpop.permute.xlu1 %6798  ;;  %v6817_v29 = vpack.i.bf16 %v754_v48, %v753_v61  ;;  %v6681_v61 = vunpack.i.h.bf16 %v10646_v46  ;;  %16338 = vst [vmem:[#allocation144_spill] sm:$0xff] %v10753_v2 }
 0x35a   :  { %v10702_v49 = vunpack.i.h.bf16 %v10694_v14 }
 0x35b   :  { %v1625_v15 = vsel %vm15870_vm7, %v6681_v61, %v6775_v42  ;;  %v6551_v61 = vunpack.i.h.bf16 %v10356_v18 }
 0x35c   :  { %16331 = vst [vmem:[#allocation140_spill] sm:$0xff] %v10702_v49  ;;  %1759 = vrot.lane.b32.xlu0 %v10702_v49, %s9079_s5 }
 0x35f   :  { %6868 = vrot.lane.b32.xlu2 %v6867_v22, %s9079_s5  ;;  %v6877_v22 = vpack.i.bf16 %v10712_v26, %v1571_v38  ;;  %v1626_v38 = vsel %vm15870_vm7, %v6775_v42, %v15855_v55  ;;  %v10749_v26 = vunpack.i.h.bf16 %v10740_v60  ;;  %v1534_v42 = vsel %vm181_vm2, %v6735_v4, %v10753_v2 }
 0x360   :  { %v10723_v35 = vpop.permute.xlu0 %6768  ;;  %v6902_v36 = vpack.i.bf16 %v1626_v38, %v1625_v15  ;;  %v755_v15 = vmul.f32 %v16335_v12, %v10162_v1  ;;  %v6556_v38 = vunpack.i.h.bf16 %v10395_v53 }
 0x361   :  { %16337 = vst [vmem:[#allocation143_spill] sm:$0xff] %v10749_v26 }
 0x364   :  { %6818 = vrot.lane.b32.xlu0 %v6817_v29, %s9071_s28 }
 0x367   :  { %6878 = vrot.lane.b32.xlu2 %v6877_v22, %s9079_s5 }
 0x368   :  { %v6784_v48 = vpop.permute.xlu0 %6783 }
 0x369   :  { %v6786_v29 = vunpack.i.h.bf16 %v6784_v48  ;;  %v6785_v27 = vunpack.i.l.bf16 %v6784_v48 }
 0x36b   :  { %v1644_v22 = vsel %vm403_vm9, %v6785_v27, %v6786_v29  ;;  %v1249_v27 = vsel %vm181_vm2, %v15854_v54, %v6551_v61  ;;  %v6640_v54 = vunpack.i.l.bf16 %v10530_v21 }
 0x36c   :  { %6828 = vrot.lane.b32.xlu0 %v6827_v20, %s9079_s5  ;;  %v6837_v48 = vpack.i.bf16 %v1644_v22, %v10749_v26  ;;  %v1645_v20 = vsel %vm403_vm9, %v6786_v29, %v6790_v43  ;;  %v6857_v22 = vpack.i.bf16 %v10753_v2, %v1534_v42  ;;  %v6621_v29 = vunpack.i.h.bf16 %v10630_v25 }
 0x36d   :  { %v6620_v42 = vunpack.i.l.bf16 %v10630_v25  ;;  %v1269_v25 = vsel %vm349_vm8, %v6556_v38, %v6640_v54 }
 0x36e   :  { %6838 = vrot.lane.b32.xlu1 %v6837_v48, %s9079_s5  ;;  %v6842_v48 = vpack.i.bf16 %v1249_v27, %v755_v15  ;;  %v6800_v27 = vunpack.i.l.bf16 %v10694_v14 }
 0x36f   :  { %6903 = vrot.lane.b32.xlu2 %v6902_v36, %s9079_s5  ;;  %v1646_v36 = vsel %vm403_vm9, %v6790_v43, %v15859_v52  ;;  %v16339_v43 = vunpack.i.l.bf16 %v10692_v51  ;;  %v6740_v52 = vunpack.i.l.bf16 %v10652_v57 }
 0x370   :  { %v10774_v4 = vpop.permute.xlu0 %6793  ;;  %v6912_v55 = vpack.i.bf16 %v1646_v36, %v1645_v20  ;;  %v1587_v20 = vsel %vm15865_vm1, %v6620_v42, %v6621_v29 }
 0x371   :  { %v15860_v1 = vunpack.i.h.bf16 %v10774_v4 }
 0x373   :  { %v1665_v15 = vsel %vm15871_vm14, %v15860_v1, %v6800_v27  ;;  %v6631_v1 = vunpack.i.h.bf16 %v10498_v62 }
 0x374   :  { %6858 = vrot.lane.b32.xlu0 %v6857_v22, %s9079_s5  ;;  %v1588_v22 = vsel %vm15865_vm1, %v6621_v29, %v16339_v43  ;;  %v6770_v43 = vunpack.i.l.bf16 %v10723_v35  ;;  %v6766_v29 = vunpack.i.h.bf16 %v10672_v56 }
 0x375   :  { %v6882_v36 = vpack.i.bf16 %v1588_v22, %v1587_v20  ;;  %v6630_v22 = vunpack.i.l.bf16 %v10498_v62 }
 0x376   :  { %6843 = vrot.lane.b32.xlu1 %v6842_v48, %s9071_s28  ;;  %v1268_v48 = vsel %vm349_vm8, %v15861_v3, %v6556_v38  ;;  %v6646_v38 = vunpack.i.h.bf16 %v10618_v50  ;;  %v1608_v20 = vsel %vm121_vm0, %v6766_v29, %v6770_v43  ;;  %v6780_v3 = vunpack.i.l.bf16 %v10740_v60 }
 0x377   :  { %6913 = vrot.lane.b32.xlu2 %v6912_v55, %s9079_s5  ;;  %v1666_v55 = vsel %vm15871_vm14, %v6800_v27, %v10702_v49  ;;  %v6847_v14 = vpack.i.bf16 %v1269_v25, %v1268_v48  ;;  %v16340_v25 = vunpack.i.h.bf16 %v10652_v57  ;;  %v1250_v62 = vsel %vm181_vm2, %v6551_v61, %v6630_v22 }
 0x378   :  { %v6927_v42 = vpack.i.bf16 %v1666_v55, %v1665_v15  ;;  %v1549_v27 = vsel %vm349_vm8, %v6646_v38, %v6740_v52  ;;  %v16341_v15 = vunpack.i.l.bf16 %v10672_v56  ;;  %v1251_v55 = vsel %vm181_vm2, %v6630_v22, %v6631_v1 }
 0x379   :  { %v6751_v38 = vunpack.i.h.bf16 %v10682_v47  ;;  %v6932_v49 = vpack.i.bf16 %v1251_v55, %v1250_v62  ;;  %v6645_v57 = vunpack.i.l.bf16 %v10618_v50  ;;  %v16342_v56 = vunpack.i.h.bf16 %v10670_v45 }
 0x37a   :  { %v1607_v48 = vsel %vm121_vm0, %v16341_v15, %v6766_v29  ;;  %v1628_v61 = vsel %vm15870_vm7, %v6780_v3, %v10749_v26  ;;  %v6641_v60 = vunpack.i.h.bf16 %v10530_v21  ;;  %v16343_v29 = vunpack.i.l.bf16 %v10682_v47 }
 0x37b   :  { %v6761_v21 = vunpack.i.h.bf16 %v10692_v51  ;;  %v6655_v47 = vunpack.i.l.bf16 %v10628_v5 }
 0x37c   :  { %6883 = vrot.lane.b32.xlu0 %v6882_v36, %s9079_s5  ;;  %v1550_v36 = vsel %vm349_vm8, %v6740_v52, %v16340_v25  ;;  %v1627_v52 = vsel %vm15870_vm7, %v16342_v56, %v6780_v3  ;;  %v1569_v22 = vsel %vm1287_vm4, %v16343_v29, %v6751_v38  ;;  %v1270_v25 = vsel %vm349_vm8, %v6640_v54, %v6641_v60 }
 0x37d   :  { %v6907_v45 = vpack.i.bf16 %v1628_v61, %v1627_v52  ;;  %v6651_v54 = vunpack.i.h.bf16 %v10557_v31  ;;  %v1590_v55 = vsel %vm15865_vm1, %v6761_v21, %v10666_v17  ;;  %v10863_v56 = vunpack.i.h.bf16 %v10723_v35 }
 0x37e   :  { %6848 = vrot.lane.b32.xlu1 %v6847_v14, %s9071_s28  ;;  %v6892_v14 = vpack.i.bf16 %v1608_v20, %v1607_v48  ;;  %v16344_v20 = vunpack.i.l.bf16 %v10658_v39  ;;  %v16346_v39 = vunpack.i.h.bf16 %v10684_v28  ;;  %v16347_v48 = vunpack.i.l.bf16 %v10692_v51 }
 0x37f   :  { %6928 = vrot.lane.b32.xlu2 %v6927_v42, %s9079_s5  ;;  %v6862_v42 = vpack.i.bf16 %v1550_v36, %v1549_v27  ;;  %v1271_v27 = vsel %vm349_vm8, %v6641_v60, %v6645_v57  ;;  %v10841_v36 = vpop.permute.xlu2 %1642  ;;  %v1291_v5 = vsel %vm1287_vm4, %v6651_v54, %v6655_v47  ;;  %16348 = vst [vmem:[#allocation146_spill] sm:$0xff] %v10863_v56  ;;  %v6571_v61 = vunpack.i.h.bf16 %v10505_v0 }
 0x380   :  { %v1570_v50 = vsel %vm1287_vm4, %v6751_v38, %v16344_v20  ;;  %16345 = vst [vmem:[#allocation145_spill] sm:$0xff] %v10841_v36  ;;  %v1647_v15 = vsel %vm403_vm9, %v16346_v39, %v10841_v36  ;;  %v1589_v62 = vsel %vm15865_vm1, %v16347_v48, %v6761_v21  ;;  %v6957_v38 = vpack.i.bf16 %v6655_v47, %v1291_v5 }
 0x381   :  { %v6872_v3 = vpack.i.bf16 %v1570_v50, %v1569_v22  ;;  %v6887_v28 = vpack.i.bf16 %v1590_v55, %v1589_v62  ;;  %v15869_v60 = vunpack.i.l.bf16 %v10505_v0  ;;  %v6561_v22 = vunpack.i.h.bf16 %v10428_v33 }
 0x382   :  { %v15876_v20 = vunpack.i.l.bf16 %v10428_v33  ;;  %v16350_v39 = vunpack.i.h.bf16 %v10774_v4  ;;  %v6660_v55 = vunpack.i.l.bf16 %v10582_v23  ;;  %vm1492_vm1 = vcmask 752640  }
 0x383   :  { %v1327_v35 = vsel %vm121_vm0, %v15869_v60, %v6571_v61 }
 0x384   :  { %6893 = vrot.lane.b32.xlu0 %v6892_v14, %s9079_s5  ;;  %v6917_v14 = vpack.i.bf16 %v10841_v36, %v1647_v15  ;;  %v6972_v50 = vpack.i.bf16 %v1327_v35, %v10634_v30  ;;  %v1288_v21 = vsel %vm1287_vm4, %v15876_v20, %v6561_v22 }
 0x385   :  { %v6942_v62 = vpack.i.bf16 %v1288_v21, %v6645_v57  ;;  %v6665_v21 = vunpack.i.l.bf16 %v10595_v44 }
 0x386   :  { %6863 = vrot.lane.b32.xlu1 %v6862_v42, %s9079_s5  ;;  %v6635_v42 = vunpack.i.l.bf16 %v10599_v32  ;;  %v1609_v32 = vsel %vm121_vm0, %v6770_v43, %v10863_v56  ;;  %v6696_v43 = vunpack.i.h.bf16 %v10632_v8 }
 0x387   :  { %6933 = vrot.lane.b32.xlu2 %v6932_v49, %s9071_s28  ;;  %v6947_v49 = vpack.i.bf16 %v1271_v27, %v1270_v25  ;;  %v10867_v52 = vpop.permute.xlu2 %6803  ;;  %v6795_v27 = vunpack.i.l.bf16 %v10774_v4  ;;  %v6576_v25 = vunpack.i.h.bf16 %v10536_v41  ;;  %v15874_v4 = vunpack.i.l.bf16 %v10468_v37 }
 0x388   :  { %v1252_v51 = vsel %vm181_vm2, %v6631_v1, %v6635_v42  ;;  %v6897_v1 = vpack.i.bf16 %v10863_v56, %v1609_v32  ;;  %v6581_v32 = vunpack.i.h.bf16 %v10566_v16 }
 0x389   :  { %v6937_v29 = vpack.i.bf16 %v6635_v42, %v1252_v51  ;;  %v1663_v47 = vsel %vm15871_vm14, %v6696_v43, %v6795_v27  ;;  %v1664_v15 = vsel %vm15871_vm14, %v6795_v27, %v16350_v39  ;;  %v6566_v42 = vunpack.i.h.bf16 %v10468_v37 }
 0x38a   :  { %v6685_v51 = vunpack.i.l.bf16 %v10626_v34 }
 0x38b   :  { %v1309_v57 = vsel %vm1307_vm15, %v6566_v42, %v6660_v55  ;;  %v1308_v35 = vsel %vm1307_vm15, %v15874_v4, %v6566_v42 }
 0x38c   :  { %6908 = vrot.lane.b32.xlu0 %v6907_v45, %s9079_s5  ;;  %v6675_v45 = vunpack.i.l.bf16 %v10616_v9  ;;  %v1365_v27 = vsel %vm403_vm9, %v6581_v32, %v6685_v51  ;;  %v6962_v43 = vpack.i.bf16 %v1309_v57, %v1308_v35  ;;  %v6676_v57 = vunpack.i.h.bf16 %v10616_v9 }
 0x38e   :  { %6873 = vrot.lane.b32.xlu1 %v6872_v3, %s9079_s5  ;;  %v15864_v3 = vunpack.i.l.bf16 %v10536_v41  ;;  %v1346_v48 = vsel %vm15870_vm7, %v6576_v25, %v6675_v45 }
 0x38f   :  { %6948 = vrot.lane.b32.xlu2 %v6947_v49, %s9071_s28  ;;  %v10892_v49 = vpop.permute.xlu2 %6813 }
 0x390   :  { %16349 = vst [vmem:[#allocation147_spill] sm:$0xff] %v10892_v49  ;;  %v1345_v5 = vsel %vm15870_vm7, %v15864_v3, %v6576_v25  ;;  %v6666_v25 = vunpack.i.h.bf16 %v10595_v44  ;;  %v6695_v44 = vunpack.i.l.bf16 %v10632_v8  ;;  %v6670_v8 = vunpack.i.l.bf16 %v10640_v6 }
 0x394   :  { %6918 = vrot.lane.b32.xlu0 %v6917_v14, %s9079_s5  ;;  %v6922_v14 = vpack.i.bf16 %v1664_v15, %v1663_v47  ;;  %v6691_v15 = vunpack.i.h.bf16 %v10636_v10 }
 0x396   :  { %6888 = vrot.lane.b32.xlu1 %v6887_v28, %s9079_s5  ;;  %v6650_v28 = vunpack.i.l.bf16 %v10557_v31  ;;  %v1385_v42 = vsel %vm15871_vm14, %v6691_v15, %v6695_v44 }
 0x397   :  { %6958 = vrot.lane.b32.xlu2 %v6957_v38, %s9071_s28  ;;  %v6987_v38 = vpack.i.bf16 %v1346_v48, %v1345_v5  ;;  %v1328_v48 = vsel %vm121_vm0, %v6571_v61, %v6665_v21  ;;  %v6680_v61 = vunpack.i.l.bf16 %v10646_v46  ;;  %v1347_v46 = vsel %vm15870_vm7, %v6675_v45, %v6676_v57 }
 0x398   :  { %v1289_v31 = vsel %vm1287_vm4, %v6561_v22, %v6650_v28  ;;  %v6690_v22 = vunpack.i.l.bf16 %v10636_v10  ;;  %v6600_v45 = vunpack.i.l.bf16 %v10564_v40 }
 0x399   :  { %v1348_v35 = vsel %vm15870_vm7, %v6676_v57, %v6680_v61  ;;  %vm15933_vm7 = vcmask 654336  }
 0x39a   :  { %v1384_v10 = vsel %vm15871_vm14, %v6690_v22, %v6691_v15 }
 0x39c   :  { %6938 = vrot.lane.b32.xlu0 %v6937_v29, %s9071_s28  ;;  %v6580_v29 = vunpack.i.l.bf16 %v10566_v16 }
 0x39e   :  { %6898 = vrot.lane.b32.xlu1 %v6897_v1, %s9079_s5  ;;  %v1290_v1 = vsel %vm1287_vm4, %v6650_v28, %v6651_v54  ;;  %v1364_v47 = vsel %vm403_vm9, %v6580_v29, %v6581_v32  ;;  %v6661_v54 = vunpack.i.h.bf16 %v10582_v23  ;;  %v7017_v32 = vpack.i.bf16 %v1385_v42, %v1384_v10 }
 0x39f   :  { %6973 = vrot.lane.b32.xlu2 %v6972_v50, %s9071_s28  ;;  %v6952_v16 = vpack.i.bf16 %v1290_v1, %v1289_v31  ;;  %v7002_v39 = vpack.i.bf16 %v1365_v27, %v1364_v47  ;;  %v6992_v1 = vpack.i.bf16 %v1348_v35, %v1347_v46  ;;  %v6686_v27 = vunpack.i.h.bf16 %v10626_v34 }
 0x3a0   :  { %v1311_v5 = vsel %vm1307_vm15, %v6661_v54, %v10634_v30  ;;  %v1310_v23 = vsel %vm1307_vm15, %v6660_v55, %v6661_v54  ;;  %v6701_v30 = vunpack.i.h.bf16 %v10642_v63  ;;  %v1330_v55 = vsel %vm121_vm0, %v6666_v25, %v6670_v8 }
 0x3a1   :  { %v1366_v9 = vsel %vm403_vm9, %v6685_v51, %v6686_v27  ;;  %v6546_v42 = vunpack.i.h.bf16 %v10462_v59  ;;  %v6545_v10 = vunpack.i.l.bf16 %v10462_v59  ;;  %v6705_v46 = vunpack.i.l.bf16 %v10648_v58 }
 0x3a2   :  { %v1405_v6 = vsel %vm1401_vm3, %v6701_v30, %v10638_v7  ;;  %v7007_v34 = vpack.i.bf16 %v6686_v27, %v1366_v9  ;;  %v6700_v27 = vunpack.i.l.bf16 %v10642_v63 }
 0x3a4   :  { %6943 = vrot.lane.b32.xlu0 %v6942_v62, %s9071_s28  ;;  %v1329_v62 = vsel %vm121_vm0, %v6665_v21, %v6666_v25  ;;  %v7032_v21 = vpack.i.bf16 %v10638_v7, %v1405_v6  ;;  %v16352_v25 = vld [vmem:[#allocation42_spill] sm:$0xff] }
 0x3a5   :  { %v6977_v28 = vpack.i.bf16 %v1329_v62, %v1328_v48  ;;  %v15868_v47 = vunpack.i.h.bf16 %v16352_v25  ;;  %v6591_v48 = vunpack.i.h.bf16 %v10503_v24  ;;  %v15875_v62 = vunpack.i.l.bf16 %v10503_v24 }
 0x3a6   :  { %6923 = vrot.lane.b32.xlu1 %v6922_v14, %s9079_s5 }
 0x3a7   :  { %6988 = vrot.lane.b32.xlu2 %v6987_v38, %s9071_s28  ;;  %v6967_v38 = vpack.i.bf16 %v1311_v5, %v1310_v23  ;;  %v1363_v54 = vsel %vm403_vm9, %v15868_v47, %v6580_v29  ;;  %v10983_v29 = vpop.permute.xlu0 %6808  ;;  %v15866_v23 = vunpack.i.l.bf16 %v10466_v11 }
 0x3a8   :  { %v6997_v51 = vpack.i.bf16 %v1363_v54, %v6680_v61  ;;  %v1402_v61 = vsel %vm1401_vm3, %v15875_v62, %v6591_v48 }
 0x3a9   :  { %v10920_v50 = vpop.permute.xlu2 %6833 }
 0x3aa   :  { %16351 = vst [vmem:[#allocation148_spill] sm:$0xff] %v10920_v50 }
 0x3ac   :  { %6963 = vrot.lane.b32.xlu0 %v6962_v43, %s9071_s28  ;;  %v6982_v43 = vpack.i.bf16 %v6670_v8, %v1330_v55  ;;  %v1455_v8 = vsel %vm15957_vm12, %v6545_v10, %v6546_v42 }
 0x3ad   :  { %v7062_v6 = vpack.i.bf16 %v1455_v8, %v6545_v10  ;;  %v1404_v10 = vsel %vm1401_vm3, %v6700_v27, %v6701_v30  ;;  %v16358_v8 = vld [vmem:[#allocation135_spill] sm:$0xff]  ;;  %v6706_v30 = vunpack.i.h.bf16 %v10648_v58 }
 0x3ae   :  { %6953 = vrot.lane.b32.xlu1 %v6952_v16, %s9071_s28 }
 0x3af   :  { %7003 = vrot.lane.b32.xlu2 %v7002_v39, %s9071_s28  ;;  %v16354_v39 = vld [vmem:[#allocation47_spill] sm:$0xff] }
 0x3b0   :  { %v15867_v15 = vunpack.i.h.bf16 %v16354_v39 }
 0x3b1   :  { %v10937_v14 = vpop.permute.xlu2 %6853 }
 0x3b2   :  { %v1439_v7 = vsel %vm443_vm11, %v15867_v15, %v6600_v45 }
 0x3b3   :  { %v7047_v5 = vpack.i.bf16 %v1439_v7, %v10644_v19 }
 0x3b4   :  { %6978 = vrot.lane.b32.xlu0 %v6977_v28, %s9071_s28  ;;  %v6586_v28 = vunpack.i.h.bf16 %v10466_v11 }
 0x3b6   :  { %6968 = vrot.lane.b32.xlu1 %v6967_v38, %s9071_s28  ;;  %v1383_v38 = vsel %vm15871_vm14, %v6586_v28, %v6690_v22  ;;  %v1382_v35 = vsel %vm15871_vm14, %v15866_v23, %v6586_v28  ;;  %v15873_v22 = vunpack.i.l.bf16 %v10534_v13  ;;  %v16363_v23 = vld [vmem:[#allocation131_spill] sm:$0xff]  ;;  %vm1761_vm14 = vcmask 646144  }
 0x3b7   :  { %7018 = vrot.lane.b32.xlu2 %v7017_v32, %s9071_s28  ;;  %v7022_v32 = vpack.i.bf16 %v1402_v61, %v6695_v44  ;;  %v7012_v55 = vpack.i.bf16 %v1383_v38, %v1382_v35  ;;  %v6626_v15 = vunpack.i.h.bf16 %v16363_v23  ;;  %v6625_v47 = vunpack.i.l.bf16 %v16363_v23 }
 0x3b9   :  { %v10954_v31 = vpop.permute.xlu2 %6868  ;;  %v1457_v23 = vsel %vm15957_vm12, %v6625_v47, %v6626_v15 }
 0x3bc   :  { %6993 = vrot.lane.b32.xlu0 %v6992_v1, %s9071_s28  ;;  %v6596_v1 = vunpack.i.h.bf16 %v10534_v13 }
 0x3be   :  { %6983 = vrot.lane.b32.xlu1 %v6982_v43, %s9071_s28  ;;  %v16355_v43 = vld [vmem:[#allocation134_spill] sm:$0xff]  ;;  %v1422_v9 = vsel %vm423_vm10, %v6596_v1, %v6705_v46  ;;  %v1421_v63 = vsel %vm423_vm10, %v15873_v22, %v6596_v1  ;;  %v16359_v1 = vld [vmem:[#allocation136_spill] sm:$0xff] }
 0x3bf   :  { %7033 = vrot.lane.b32.xlu2 %v7032_v21, %s9071_s28  ;;  %v6715_v21 = vunpack.i.l.bf16 %v16355_v43  ;;  %v7037_v38 = vpack.i.bf16 %v1422_v9, %v1421_v63  ;;  %v6720_v3 = vunpack.i.l.bf16 %v16359_v1  ;;  %v6716_v59 = vunpack.i.h.bf16 %v16355_v43 }
 0x3c1   :  { %v10966_v16 = vpop.permute.xlu2 %6878 }
 0x3c2   :  { %16353 = vst [vmem:[#allocation149_spill] sm:$0xff] %v10966_v16 }
 0x3c4   :  { %7008 = vrot.lane.b32.xlu0 %v7007_v34, %s9071_s28  ;;  %v16357_v34 = vld [vmem:[#allocation132_spill] sm:$0xff] }
 0x3c5   :  { %v6606_v54 = vunpack.i.h.bf16 %v16357_v34  ;;  %v6605_v7 = vunpack.i.l.bf16 %v16357_v34 }
 0x3c6   :  { %6998 = vrot.lane.b32.xlu1 %v6997_v51, %s9071_s28  ;;  %v11014_v51 = vpop.permute.xlu1 %1800 }
 0x3c7   :  { %7048 = vrot.lane.b32.xlu2 %v7047_v5, %s9071_s28  ;;  %v1403_v5 = vsel %vm1401_vm3, %v6591_v48, %v6700_v27  ;;  %v1474_v61 = vsel %vm15934_vm6, %v6606_v54, %v6715_v21  ;;  %v1473_v35 = vsel %vm15934_vm6, %v6605_v7, %v6606_v54  ;;  %v6601_v48 = vunpack.i.h.bf16 %v10564_v40  ;;  %v16360_v54 = vld [vmem:[#allocation133_spill] sm:$0xff] }
 0x3c8   :  { %v6721_v27 = vunpack.i.h.bf16 %v16359_v1  ;;  %v7072_v43 = vpack.i.bf16 %v6605_v7, %v6626_v15 }
 0x3c9   :  { %v10993_v57 = vpop.permute.xlu2 %6903  ;;  %v1440_v58 = vsel %vm443_vm11, %v6600_v45, %v6601_v48  ;;  %v6711_v45 = vunpack.i.h.bf16 %v16358_v8 }
 0x3cc   :  { %7023 = vrot.lane.b32.xlu0 %v7022_v32, %s9071_s28  ;;  %v6710_v32 = vunpack.i.l.bf16 %v16358_v8 }
 0x3ce   :  { %7013 = vrot.lane.b32.xlu1 %v7012_v55, %s9071_s28  ;;  %v11008_v44 = vpop.permute.xlu0 %1759  ;;  %v7027_v55 = vpack.i.bf16 %v1404_v10, %v1403_v5  ;;  %v1441_v63 = vsel %vm443_vm11, %v6601_v48, %v6710_v32  ;;  %v11041_v5 = vpop.permute.xlu1 %6823  ;;  %v1424_v10 = vsel %vm423_vm10, %v6706_v30, %v10644_v19  ;;  %v16364_v19 = vld [vmem:[#allocation137_spill] sm:$0xff]  ;;  %v1442_v8 = vsel %vm443_vm11, %v6710_v32, %v6711_v45  ;;  %v16369_v32 = vld [vmem:[#allocation94_spill] sm:$0xff] }
 0x3cf   :  { %16356 = vst [vmem:[#allocation134_spill] sm:$0xff] %v11008_v44  ;;  %7063 = vrot.lane.b32.xlu2 %v7062_v6, %s9071_s28  ;;  %v7077_v6 = vpack.i.bf16 %v1474_v61, %v1473_v35  ;;  %v1423_v61 = vsel %vm423_vm10, %v6705_v46, %v6706_v30  ;;  %v7052_v1 = vpack.i.bf16 %v1441_v63, %v1440_v58  ;;  %v6726_v60 = vunpack.i.h.bf16 %v16364_v19 }
 0x3d0   :  { %16361 = vst [vmem:[#allocation132_spill] sm:$0xff] %v11041_v5  ;;  %v7042_v40 = vpack.i.bf16 %v1424_v10, %v1423_v61  ;;  %v6725_v46 = vunpack.i.l.bf16 %v16364_v19  ;;  %v16367_v10 = vld [vmem:[#allocation108_spill] sm:$0xff] }
 0x3d1   :  { %v11021_v28 = vpop.permute.xlu2 %6913  ;;  %v1516_v61 = vsel %vm15933_vm7, %v6726_v60, %v16367_v10 }
 0x3d4   :  { %7038 = vrot.lane.b32.xlu0 %v7037_v38, %s9071_s28  ;;  %v6611_v38 = vunpack.i.h.bf16 %v16360_v54 }
 0x3d6   :  { %7028 = vrot.lane.b32.xlu1 %v7027_v55, %s9071_s28  ;;  %v11036_v9 = vpop.permute.xlu0 %6818  ;;  %v1494_v55 = vsel %vm1492_vm1, %v6611_v38, %v6720_v3 }
 0x3d7   :  { %7078 = vrot.lane.b32.xlu2 %v7077_v6, %s9071_s28  ;;  %v1495_v6 = vsel %vm1492_vm1, %v6720_v3, %v6721_v27  ;;  %v1456_v3 = vsel %vm15957_vm12, %v6546_v42, %v6625_v47  ;;  %v7057_v42 = vpack.i.bf16 %v6711_v45, %v1442_v8  ;;  %v6811_v45 = vunpack.i.h.bf16 %v10983_v29 }
 0x3d8   :  { %v7092_v48 = vpack.i.bf16 %v1495_v6, %v1494_v55  ;;  %v1515_v55 = vsel %vm15933_vm7, %v6725_v46, %v6726_v60  ;;  %v7067_v6 = vpack.i.bf16 %v1457_v23, %v1456_v3  ;;  %v1475_v60 = vsel %vm15934_vm6, %v6715_v21, %v6716_v59 }
 0x3d9   :  { %v11049_v35 = vpop.permute.xlu2 %6928  ;;  %v7107_v47 = vpack.i.bf16 %v1516_v61, %v1515_v55  ;;  %v6826_v3 = vunpack.i.h.bf16 %v11041_v5  ;;  %v6610_v21 = vunpack.i.l.bf16 %v16360_v54  ;;  %v6806_v54 = vunpack.i.h.bf16 %v10867_v52 }
 0x3da   :  { %16362 = vst [vmem:[#allocation135_spill] sm:$0xff] %v11049_v35 }
 0x3db   :  { %v1493_v15 = vsel %vm1492_vm1, %v6610_v21, %v6611_v38 }
 0x3dc   :  { %7053 = vrot.lane.b32.xlu0 %v7052_v1, %s9071_s28  ;;  %v15872_v1 = vunpack.i.l.bf16 %v11041_v5 }
 0x3de   :  { %7043 = vrot.lane.b32.xlu1 %v7042_v40, %s9071_s28  ;;  %v11060_v30 = vpop.permute.xlu0 %6828  ;;  %v1765_v8 = vsel %vm1761_vm14, %v6811_v45, %v15872_v1 }
 0x3df   :  { %16365 = vst [vmem:[#allocation136_spill] sm:$0xff] %v11060_v30  ;;  %7093 = vrot.lane.b32.xlu2 %v7092_v48, %s9071_s28  ;;  %v1476_v48 = vsel %vm15934_vm6, %v6716_v59, %v16369_v32  ;;  %v7122_v55 = vpack.i.bf16 %v6826_v3, %v1765_v8  ;;  %v16370_v59 = vld [vmem:[#allocation101_spill] sm:$0xff]  ;;  %v7087_v8 = vpack.i.bf16 %v1493_v15, %v6610_v21  ;;  %v6856_v21 = vunpack.i.h.bf16 %v10937_v14 }
 0x3e0   :  { %v11067_v63 = vpop.permute.xlu1 %6838  ;;  %v7082_v61 = vpack.i.bf16 %v1476_v48, %v1475_v60  ;;  %v6805_v60 = vunpack.i.l.bf16 %v10867_v52  ;;  %v6855_v15 = vunpack.i.l.bf16 %v10937_v14 }
 0x3e1   :  { %16366 = vst [vmem:[#allocation133_spill] sm:$0xff] %v11067_v63  ;;  %v11070_v58 = vpop.permute.xlu2 %6933 }
 0x3e4   :  { %7068 = vrot.lane.b32.xlu0 %v7067_v6, %s9071_s28 }
 0x3e6   :  { %7058 = vrot.lane.b32.xlu1 %v7057_v42, %s9071_s28  ;;  %v11079_v40 = vpop.permute.xlu0 %6858  ;;  %v1496_v42 = vsel %vm1492_vm1, %v6721_v27, %v16370_v59 }
 0x3e7   :  { %16368 = vst [vmem:[#allocation131_spill] sm:$0xff] %v11079_v40  ;;  %7108 = vrot.lane.b32.xlu2 %v7107_v47, %s9071_s28  ;;  %v16371_v47 = vld [vmem:[#allocation52_spill] sm:$0xff] }
 0x3e8   :  { %v11088_v19 = vpop.permute.xlu1 %6843  ;;  %v6615_v1 = vunpack.i.l.bf16 %v16371_v47 }
 0x3e9   :  { %v11091_v23 = vpop.permute.xlu2 %6948 }
 0x3ea   :  { %v7097_v7 = vpack.i.bf16 %v6615_v1, %v1496_v42 }
 0x3ec   :  { %7083 = vrot.lane.b32.xlu0 %v7082_v61, %s9071_s28  ;;  %v6616_v61 = vunpack.i.h.bf16 %v16371_v47  ;;  %v6810_v47 = vunpack.i.l.bf16 %v10983_v29 }
 0x3ee   :  { %7073 = vrot.lane.b32.xlu1 %v7072_v43, %s9071_s28  ;;  %v11101_v6 = vpop.permute.xlu0 %6883  ;;  %v1762_v43 = vsel %vm1761_vm14, %v6805_v60, %v6806_v54  ;;  %v1514_v38 = vsel %vm15933_vm7, %v6616_v61, %v6725_v46  ;;  %v1513_v52 = vsel %vm15933_vm7, %v6615_v1, %v6616_v61  ;;  %v1766_v1 = vsel %vm1761_vm14, %v6826_v3, %v6855_v15 }
 0x3ef   :  { %7123 = vrot.lane.b32.xlu2 %v7122_v55, %s9071_s28  ;;  %v7112_v62 = vpack.i.bf16 %v1762_v43, %v6805_v60  ;;  %v7102_v20 = vpack.i.bf16 %v1514_v38, %v1513_v52  ;;  %v1767_v60 = vsel %vm1761_vm14, %v6855_v15, %v6856_v21  ;;  %v1763_v14 = vsel %vm1761_vm14, %v6806_v54, %v6810_v47 }
 0x3f0   :  { %v11107_v48 = vpop.permute.xlu1 %6848  ;;  %v1764_v61 = vsel %vm1761_vm14, %v6810_v47, %v6811_v45  ;;  %v6860_v3 = vunpack.i.l.bf16 %v11079_v40  ;;  %v15879_v45 = vunpack.i.h.bf16 %v11079_v40 }
 0x3f1   :  { %v11110_v34 = vpop.permute.xlu2 %6958  ;;  %v7117_v52 = vpack.i.bf16 %v1764_v61, %v1763_v14 }
 0x3f2   :  { %v1769_v61 = vsel %vm1761_vm14, %v6860_v3, %v15879_v45  ;;  %v6885_v45 = vunpack.i.l.bf16 %v11101_v6 }
 0x3f4   :  { %7098 = vrot.lane.b32.xlu0 %v7097_v7, %s9071_s28 }
 0x3f6   :  { %7088 = vrot.lane.b32.xlu1 %v7087_v8, %s9071_s28  ;;  %v11116_v27 = vpop.permute.xlu0 %6893 }
 0x3f8   :  { %v6864_v55 = vpop.permute.xlu1 %6863 }
 0x3f9   :  { %v6866_v22 = vunpack.i.h.bf16 %v6864_v55  ;;  %v6865_v42 = vunpack.i.l.bf16 %v6864_v55  ;;  %v11121_v4 = vpop.permute.xlu2 %6973 }
 0x3fa   :  { %v6976_v44 = vunpack.i.h.bf16 %v11121_v4 }
 0x3fb   :  { %v1770_v7 = vsel %vm1761_vm14, %v6865_v42, %v6866_v22 }
 0x3fc   :  { %v7137_v8 = vpack.i.bf16 %v1770_v7, %v6865_v42  ;;  %7113 = vrot.lane.b32.xlu0 %v7112_v62, %s9071_s28  ;;  %v6831_v62 = vunpack.i.h.bf16 %v11060_v30  ;;  %v6871_v42 = vunpack.i.h.bf16 %v10954_v31  ;;  %v6870_v7 = vunpack.i.l.bf16 %v10954_v31 }
 0x3fe   :  { %7103 = vrot.lane.b32.xlu1 %v7102_v20, %s9071_s28  ;;  %7138 = vrot.lane.b32.xlu2 %v7137_v8, %s9071_s28  ;;  %v11131_v46 = vpop.permute.xlu0 %6908  ;;  %v7127_v20 = vpack.i.bf16 %v1767_v60, %v1766_v1  ;;  %v1771_v1 = vsel %vm1761_vm14, %v6866_v22, %v6870_v7  ;;  %v1772_v31 = vsel %vm1761_vm14, %v6870_v7, %v6871_v42  ;;  %v15878_v7 = vunpack.i.h.bf16 %v10966_v16 }
 0x3ff   :  { %v1768_v60 = vsel %vm1761_vm14, %v6856_v21, %v6860_v3  ;;  %v6880_v21 = vunpack.i.l.bf16 %v10966_v16  ;;  %v15880_v3 = vunpack.i.l.bf16 %v11060_v30 }
 0x400   :  { %v6874_v43 = vpop.permute.xlu1 %6873  ;;  %v7132_v40 = vpack.i.bf16 %v1769_v61, %v1768_v60  ;;  %v6896_v61 = vunpack.i.h.bf16 %v11116_v27 }
 0x401   :  { %v6876_v29 = vunpack.i.h.bf16 %v6874_v43  ;;  %v11137_v55 = vpop.permute.xlu2 %6988  ;;  %v6875_v38 = vunpack.i.l.bf16 %v6874_v43  ;;  %v6886_v43 = vunpack.i.h.bf16 %v11101_v6  ;;  %v1773_v60 = vsel %vm1761_vm14, %v6871_v42, %v15880_v3 }
 0x402   :  { %v15883_v42 = vunpack.i.l.bf16 %v10920_v50  ;;  %v6911_v3 = vunpack.i.h.bf16 %v11131_v46 }
 0x403   :  { %v1774_v15 = vsel %vm1761_vm14, %v6831_v62, %v6875_v38  ;;  %v1775_v54 = vsel %vm1761_vm14, %v6875_v38, %v6876_v29 }
 0x404   :  { %7128 = vrot.lane.b32.xlu0 %v7127_v20, %s9071_s28  ;;  %v7152_v47 = vpack.i.bf16 %v1775_v54, %v1774_v15  ;;  %v7142_v15 = vpack.i.bf16 %v1772_v31, %v1771_v1  ;;  %v1776_v1 = vsel %vm1761_vm14, %v6876_v29, %v6880_v21  ;;  %v1777_v31 = vsel %vm1761_vm14, %v6880_v21, %v15878_v7 }
 0x405   :  { %v7157_v29 = vpack.i.bf16 %v1777_v31, %v1776_v1  ;;  %v15886_v31 = vunpack.i.l.bf16 %v11067_v63 }
 0x406   :  { %7118 = vrot.lane.b32.xlu1 %v7117_v52, %s9071_s28  ;;  %v11148_v8 = vpop.permute.xlu0 %6918  ;;  %7153 = vrot.lane.b32.xlu2 %v7152_v47, %s9071_s28 }
 0x407   :  { %16372 = vst [vmem:[#allocation137_spill] sm:$0xff] %v11148_v8 }
 0x408   :  { %v6889_v14 = vpop.permute.xlu1 %6888 }
 0x409   :  { %v6891_v38 = vunpack.i.h.bf16 %v6889_v14  ;;  %v6890_v20 = vunpack.i.l.bf16 %v6889_v14  ;;  %v11158_v52 = vpop.permute.xlu2 %7003 }
 0x40b   :  { %v1779_v22 = vsel %vm1761_vm14, %v6886_v43, %v6890_v20  ;;  %v1780_v54 = vsel %vm1761_vm14, %v6890_v20, %v6891_v38  ;;  %v1781_v1 = vsel %vm1761_vm14, %v6891_v38, %v15883_v42  ;;  %v6905_v38 = vunpack.i.l.bf16 %v10993_v57 }
 0x40c   :  { %7143 = vrot.lane.b32.xlu0 %v7142_v15, %s9071_s28  ;;  %v7167_v47 = vpack.i.bf16 %v1780_v54, %v1779_v22 }
 0x40e   :  { %7133 = vrot.lane.b32.xlu1 %v7132_v40, %s9071_s28  ;;  %v11167_v14 = vpop.permute.xlu0 %6938  ;;  %7168 = vrot.lane.b32.xlu2 %v7167_v47, %s9071_s28  ;;  %v7147_v47 = vpack.i.bf16 %v6831_v62, %v1773_v60  ;;  %v6836_v62 = vunpack.i.h.bf16 %v10920_v50 }
 0x410   :  { %v11174_v20 = vpop.permute.xlu1 %6898 }
 0x411   :  { %16373 = vst [vmem:[#allocation52_spill] sm:$0xff] %v11174_v20  ;;  %v15882_v40 = vunpack.i.h.bf16 %v11174_v20  ;;  %v6900_v15 = vunpack.i.l.bf16 %v11174_v20  ;;  %v11182_v22 = vpop.permute.xlu2 %7018 }
 0x413   :  { %v1784_v54 = vsel %vm1761_vm14, %v6896_v61, %v6900_v15  ;;  %v1785_v21 = vsel %vm1761_vm14, %v6900_v15, %v15882_v40  ;;  %v1778_v15 = vsel %vm1761_vm14, %v6885_v45, %v6886_v43  ;;  %v6895_v40 = vunpack.i.l.bf16 %v11116_v27 }
 0x414   :  { %7158 = vrot.lane.b32.xlu0 %v7157_v29, %s9071_s28  ;;  %v7182_v7 = vpack.i.bf16 %v1785_v21, %v1784_v54  ;;  %v1789_v29 = vsel %vm1761_vm14, %v6911_v3, %v15886_v31  ;;  %v7172_v54 = vpack.i.bf16 %v6836_v62, %v1781_v1  ;;  %v6906_v21 = vunpack.i.h.bf16 %v10993_v57 }
 0x415   :  { %v1782_v57 = vsel %vm1761_vm14, %v6836_v62, %v6895_v40 }
 0x416   :  { %7148 = vrot.lane.b32.xlu1 %v7147_v47, %s9071_s28  ;;  %v11193_v16 = vpop.permute.xlu0 %6943  ;;  %7183 = vrot.lane.b32.xlu2 %v7182_v7, %s9071_s28  ;;  %v6841_v7 = vunpack.i.h.bf16 %v11067_v63  ;;  %v7162_v47 = vpack.i.bf16 %v1778_v15, %v6885_v45  ;;  %v1786_v1 = vsel %vm1761_vm14, %v6905_v38, %v6906_v21  ;;  %v1783_v45 = vsel %vm1761_vm14, %v6895_v40, %v6896_v61 }
 0x417   :  { %v7187_v27 = vpack.i.bf16 %v1786_v1, %v6905_v38 }
 0x418   :  { %v6924_v60 = vpop.permute.xlu1 %6923  ;;  %v7197_v42 = vpack.i.bf16 %v6841_v7, %v1789_v29 }
 0x419   :  { %v11202_v6 = vpop.permute.xlu2 %7033  ;;  %v6926_v43 = vunpack.i.h.bf16 %v6924_v60  ;;  %v6925_v20 = vunpack.i.l.bf16 %v6924_v60  ;;  %v7177_v60 = vpack.i.bf16 %v1783_v45, %v1782_v57  ;;  %v15889_v45 = vunpack.i.h.bf16 %v11049_v35 }
 0x41b   :  { %v1794_v29 = vsel %vm1761_vm14, %v6925_v20, %v6926_v43 }
 0x41c   :  { %7173 = vrot.lane.b32.xlu0 %v7172_v54, %s9071_s28  ;;  %v6916_v54 = vunpack.i.h.bf16 %v11021_v28  ;;  %v7212_v63 = vpack.i.bf16 %v1794_v29, %v6925_v20 }
 0x41e   :  { %7163 = vrot.lane.b32.xlu1 %v7162_v47, %s9071_s28  ;;  %v11213_v50 = vpop.permute.xlu0 %6963  ;;  %7198 = vrot.lane.b32.xlu2 %v7197_v42, %s9071_s28  ;;  %v6915_v47 = vunpack.i.l.bf16 %v11021_v28  ;;  %v6910_v42 = vunpack.i.l.bf16 %v11131_v46 }
 0x420   :  { %v11217_v31 = vpop.permute.xlu1 %6953  ;;  %v1790_v61 = vsel %vm1761_vm14, %v6841_v7, %v6915_v47  ;;  %v1791_v38 = vsel %vm1761_vm14, %v6915_v47, %v6916_v54  ;;  %v1787_v1 = vsel %vm1761_vm14, %v6906_v21, %v6910_v42  ;;  %v1788_v57 = vsel %vm1761_vm14, %v6910_v42, %v6911_v3 }
 0x421   :  { %v11221_v15 = vpop.permute.xlu2 %7048  ;;  %v7202_v46 = vpack.i.bf16 %v1791_v38, %v1790_v61  ;;  %v7192_v20 = vpack.i.bf16 %v1788_v57, %v1787_v1  ;;  %v6930_v7 = vunpack.i.l.bf16 %v11049_v35 }
 0x423   :  { %v1795_v3 = vsel %vm1761_vm14, %v6926_v43, %v6930_v7 }
 0x424   :  { %7188 = vrot.lane.b32.xlu0 %v7187_v27, %s9071_s28  ;;  %v6920_v27 = vunpack.i.l.bf16 %v11148_v8 }
 0x426   :  { %7178 = vrot.lane.b32.xlu1 %v7177_v60, %s9071_s28  ;;  %v11229_v62 = vpop.permute.xlu0 %6978  ;;  %7213 = vrot.lane.b32.xlu2 %v7212_v63, %s9071_s28  ;;  %v15888_v63 = vunpack.i.h.bf16 %v11148_v8  ;;  %v1796_v60 = vsel %vm1761_vm14, %v6930_v7, %v15889_v45  ;;  %v1792_v47 = vsel %vm1761_vm14, %v6916_v54, %v6920_v27 }
 0x427   :  { %v7217_v38 = vpack.i.bf16 %v1796_v60, %v1795_v3 }
 0x428   :  { %v11233_v40 = vpop.permute.xlu1 %6968  ;;  %v1793_v42 = vsel %vm1761_vm14, %v6920_v27, %v15888_v63 }
 0x429   :  { %v11238_v28 = vpop.permute.xlu2 %7063  ;;  %v7207_v1 = vpack.i.bf16 %v1793_v42, %v1792_v47 }
 0x42a   :  { %v7066_v37 = vunpack.i.h.bf16 %v11238_v28  ;;  %v7065_v24 = vunpack.i.l.bf16 %v11238_v28 }
 0x42c   :  { %7203 = vrot.lane.b32.xlu0 %v7202_v46, %s9071_s28 }
 0x42e   :  { %7193 = vrot.lane.b32.xlu1 %v7192_v20, %s9071_s28  ;;  %v11246_v29 = vpop.permute.xlu0 %6993 }
 0x430   :  { %v11249_v21 = vpop.permute.xlu1 %6983 }
 0x431   :  { %v11258_v61 = vpop.permute.xlu2 %7078 }
 0x432   :  { %v7080_v25 = vunpack.i.l.bf16 %v11258_v61 }
 0x434   :  { %7218 = vrot.lane.b32.xlu0 %v7217_v38, %s9071_s28 }
 0x436   :  { %7208 = vrot.lane.b32.xlu1 %v7207_v1, %s9071_s28  ;;  %v11262_v43 = vpop.permute.xlu0 %7008 }
 0x438   :  { %v11264_v57 = vpop.permute.xlu1 %6998 }
 0x439   :  { %v11266_v46 = vpop.permute.xlu2 %7093 }
 0x43a   :  { %v15910_v59 = vunpack.i.l.bf16 %v11266_v46 }
 0x43e   :  { %v11268_v20 = vpop.permute.xlu0 %7023 }
 0x440   :  { %v11270_v54 = vpop.permute.xlu1 %7013 }
 0x441   :  { %v11272_v7 = vpop.permute.xlu2 %7108  ;;  %v7016_v12 = vunpack.i.h.bf16 %v11270_v54 }
 0x446   :  { %v11274_v27 = vpop.permute.xlu0 %7038 }
 0x448   :  { %v11276_v3 = vpop.permute.xlu1 %7028 }
 0x449   :  { %v11280_v47 = vpop.permute.xlu2 %7123 }
 0x44e   :  { %v11278_v60 = vpop.permute.xlu0 %7053 }
 0x450   :  { %v11282_v42 = vpop.permute.xlu1 %7043 }
 0x456   :  { %v11284_v38 = vpop.permute.xlu0 %7068 }
 0x458   :  { %v11286_v1 = vpop.permute.xlu1 %7058  ;;  %v11288_v63 = vpop.permute.xlu2 %7138 }
 0x45e   :  { %v11290_v45 = vpop.permute.xlu0 %7083 }
 0x460   :  { %v11292_v8 = vpop.permute.xlu1 %7073  ;;  %v11294_v30 = vpop.permute.xlu2 %7153 }
 0x461   :  { %v7076_v0 = vunpack.i.h.bf16 %v11292_v8 }
 0x463   :  { %v2110_v28 = vsel %vm15958_vm5, %v7076_v0, %v7080_v25  ;;  %v16376_v0 = vunpack.i.l.bf16 %v11284_v38 }
 0x466   :  { %v11296_v5 = vpop.permute.xlu0 %7098 }
 0x467   :  { %v7101_v56 = vunpack.i.h.bf16 %v11296_v5 }
 0x468   :  { %v7089_v10 = vpop.permute.xlu1 %7088  ;;  %v11298_v32 = vpop.permute.xlu2 %7168 }
 0x469   :  { %v7091_v17 = vunpack.i.h.bf16 %v7089_v10  ;;  %v7090_v2 = vunpack.i.l.bf16 %v7089_v10 }
 0x46b   :  { %v2114_v33 = vsel %vm15958_vm5, %v7090_v2, %v7091_v17  ;;  %v2115_v18 = vsel %vm15958_vm5, %v7091_v17, %v15910_v59  ;;  %v7051_v2 = vunpack.i.h.bf16 %v11221_v15  ;;  %v2106_v17 = vsel %vm15958_vm5, %v7065_v24, %v7066_v37 }
 0x46c   :  { %v7026_v59 = vunpack.i.h.bf16 %v11268_v20 }
 0x46e   :  { %v11300_v36 = vpop.permute.xlu0 %7113 }
 0x470   :  { %v11303_v26 = vpop.permute.xlu1 %7103  ;;  %v11307_v39 = vpop.permute.xlu2 %7183 }
 0x471   :  { %v15909_v41 = vunpack.i.h.bf16 %v11303_v26  ;;  %v7105_v11 = vunpack.i.l.bf16 %v11303_v26 }
 0x473   :  { %v2118_v13 = vsel %vm15958_vm5, %v7101_v56, %v7105_v11  ;;  %v2119_v10 = vsel %vm15958_vm5, %v7105_v11, %v15909_v41  ;;  %v7055_v41 = vunpack.i.l.bf16 %v11278_v60 }
 0x474   :  { %2261 = vmatpush.msrb.mxu0 %v2118_v13  ;;  %2301 = vmatpush.msrb.mxu2 %v2119_v10  ;;  %v16374_v13 = vunpack.i.h.bf16 %v11258_v61 }
 0x475   :  { %v2102_v24 = vsel %vm15958_vm5, %v7051_v2, %v7055_v41 }
 0x476   :  { %2262 = vmatpush.msrb.mxu0 %v2114_v33  ;;  %2302 = vmatpush.msrb.mxu2 %v2115_v18  ;;  %v11324_v56 = vpop.permute.xlu0 %7128  ;;  %v2111_v10 = vsel %vm15958_vm5, %v7080_v25, %v16374_v13  ;;  %v7041_v18 = vunpack.i.h.bf16 %v11274_v27  ;;  %v7040_v33 = vunpack.i.l.bf16 %v11274_v27  ;;  %v2107_v25 = vsel %vm15958_vm5, %v7066_v37, %v16376_v0 }
 0x477   :  { %v7015_v37 = vunpack.i.l.bf16 %v11270_v54  ;;  %v16378_v0 = vunpack.i.l.bf16 %v11282_v42  ;;  %v7005_v13 = vunpack.i.l.bf16 %v11158_v52 }
 0x478   :  { %v11333_v53 = vpop.permute.xlu1 %7118  ;;  %2263 = vmatpush.msrb.mxu0 %v2110_v28  ;;  %2303 = vmatpush.msrb.mxu2 %v2111_v10  ;;  %v11339_v11 = vpop.permute.xlu2 %7198  ;;  %v7030_v28 = vunpack.i.l.bf16 %v11276_v3  ;;  %v16377_v10 = vunpack.i.h.bf16 %v11278_v60 }
 0x479   :  { %16375 = vst [vmem:[#allocation150_spill] sm:$0xff] %v11339_v11 }
 0x47a   :  { %2264 = vmatpush.msrb.mxu0 %v2106_v17  ;;  %2304 = vmatpush.msrb.mxu2 %v2107_v25  ;;  %v2103_v27 = vsel %vm15958_vm5, %v7055_v41, %v16377_v10  ;;  %v2098_v17 = vsel %vm15958_vm5, %v7040_v33, %v7041_v18  ;;  %v2099_v25 = vsel %vm15958_vm5, %v7041_v18, %v16378_v0  ;;  %v7001_v10 = vunpack.i.h.bf16 %v11264_v57 }
 0x47b   :  { %v2094_v54 = vsel %vm15958_vm5, %v7026_v59, %v7030_v28  ;;  %v16379_v33 = vunpack.i.h.bf16 %v11276_v3  ;;  %v6991_v18 = vunpack.i.h.bf16 %v11137_v55  ;;  %v6990_v0 = vunpack.i.l.bf16 %v11137_v55 }
 0x47c   :  { %2265 = vmatpush.msrb.mxu0 %v2102_v24  ;;  %2305 = vmatpush.msrb.mxu2 %v2103_v27  ;;  %v2090_v24 = vsel %vm15958_vm5, %v7015_v37, %v7016_v12  ;;  %v16380_v59 = vunpack.i.l.bf16 %v11182_v22  ;;  %v16382_v55 = vunpack.i.l.bf16 %v11246_v29 }
 0x47d   :  { %v2095_v27 = vsel %vm15958_vm5, %v7030_v28, %v16379_v33 }
 0x47e   :  { %2266 = vmatpush.msrb.mxu0 %v2098_v17  ;;  %2306 = vmatpush.msrb.mxu2 %v2099_v25  ;;  %v11359_v41 = vpop.permute.xlu0 %7143  ;;  %v2091_v35 = vsel %vm15958_vm5, %v7016_v12, %v16380_v59  ;;  %v16381_v25 = vunpack.i.h.bf16 %v11158_v52  ;;  %v6965_v59 = vunpack.i.l.bf16 %v11213_v50 }
 0x480   :  { %2267 = vmatpush.msrb.mxu0 %v2094_v54  ;;  %2307 = vmatpush.msrb.mxu2 %v2095_v27  ;;  %v11369_v17 = vpop.permute.xlu1 %7133  ;;  %v11372_v2 = vpop.permute.xlu2 %7213  ;;  %v6980_v54 = vunpack.i.l.bf16 %v11229_v62  ;;  %v2086_v27 = vsel %vm15958_vm5, %v7001_v10, %v7005_v13  ;;  %v2087_v37 = vsel %vm15958_vm5, %v7005_v13, %v16381_v25  ;;  %v15915_v10 = vunpack.i.l.bf16 %v11233_v40 }
 0x481   :  { %v15914_v28 = vunpack.i.h.bf16 %v11372_v2  ;;  %v7215_v33 = vunpack.i.l.bf16 %v11372_v2  ;;  %v2083_v13 = vsel %vm15958_vm5, %v6991_v18, %v16382_v55  ;;  %v6946_v55 = vunpack.i.h.bf16 %v11193_v16 }
 0x482   :  { %2268 = vmatpush.msrb.mxu0 %v2090_v24  ;;  %2308 = vmatpush.msrb.mxu2 %v2091_v35  ;;  %v2082_v35 = vsel %vm15958_vm5, %v6990_v0, %v6991_v18  ;;  %v6966_v24 = vunpack.i.h.bf16 %v11213_v50  ;;  %v2078_v0 = vsel %vm15958_vm5, %v6976_v44, %v6980_v54  ;;  %v6850_v18 = vunpack.i.l.bf16 %v11107_v48 }
 0x483   :  { %v2154_v12 = vsel %vm15958_vm5, %v7215_v33, %v15914_v28  ;;  %v15916_v33 = vunpack.i.h.bf16 %v11217_v31  ;;  %v15919_v28 = vunpack.i.h.bf16 %v11070_v58 }
 0x484   :  { %2269 = vmatpush.msrb.mxu0 %v2086_v27  ;;  %2309 = vmatpush.msrb.mxu2 %v2087_v37  ;;  %v6955_v27 = vunpack.i.l.bf16 %v11217_v31  ;;  %v16383_v37 = vunpack.i.h.bf16 %v11229_v62  ;;  %v2075_v44 = vsel %vm15958_vm5, %v6966_v24, %v15915_v10  ;;  %v15918_v10 = vunpack.i.l.bf16 %v11036_v9 }
 0x485   :  { %2288 = vmatpush.msrb.mxu1 %v2154_v12  ;;  %v6851_v12 = vunpack.i.h.bf16 %v11107_v48  ;;  %v15920_v48 = vunpack.i.l.bf16 %v11091_v23 }
 0x486   :  { %2270 = vmatpush.msrb.mxu0 %v2082_v35  ;;  %2310 = vmatpush.msrb.mxu2 %v2083_v13  ;;  %v11397_v25 = vpop.permute.xlu0 %7158  ;;  %v2079_v50 = vsel %vm15958_vm5, %v6980_v54, %v16383_v37  ;;  %v2074_v13 = vsel %vm15958_vm5, %v6965_v59, %v6966_v24  ;;  %v6935_v54 = vunpack.i.l.bf16 %v11070_v58  ;;  %v2070_v37 = vsel %vm15958_vm5, %v6946_v55, %v6955_v27 }
 0x487   :  { %v2071_v59 = vsel %vm15958_vm5, %v6955_v27, %v15916_v33  ;;  %v15917_v24 = vunpack.i.l.bf16 %v10892_v49  ;;  %v7111_v27 = vunpack.i.h.bf16 %v11272_v7  ;;  %v15926_v33 = vunpack.i.l.bf16 %v11272_v7 }
 0x488   :  { %2271 = vmatpush.msrb.mxu0 %v2078_v0  ;;  %2311 = vmatpush.msrb.mxu2 %v2079_v50  ;;  %v11408_v35 = vpop.permute.xlu1 %7148  ;;  %v6846_v0 = vunpack.i.h.bf16 %v11088_v19  ;;  %v6816_v50 = vunpack.i.h.bf16 %v10892_v49 }
 0x489   :  { %16384 = vst [vmem:[#allocation151_spill] sm:$0xff] %v11408_v35 }
 0x48a   :  { %2272 = vmatpush.msrb.mxu0 %v2074_v13  ;;  %2312 = vmatpush.msrb.mxu2 %v2075_v44  ;;  %v2066_v13 = vsel %vm15958_vm5, %v6850_v18, %v6851_v12  ;;  %v2067_v44 = vsel %vm15958_vm5, %v6851_v12, %v15920_v48  ;;  %v11440_v12 = vld [vmem:[%s15642_s4] sm:$0xff]  ;;  %v7100_v18 = vunpack.i.l.bf16 %v11296_v5  ;;  %v2121_v5 = vsel %vm15958_vm5, %v15926_v33, %v7111_v27 }
 0x48b   :  { %v7050_v48 = vunpack.i.l.bf16 %v11221_v15 }
 0x48c   :  { %2273 = vmatpush.msrb.mxu0 %v2070_v37  ;;  %2313 = vmatpush.msrb.mxu2 %v2071_v59  ;;  %v2062_v37 = vsel %vm15958_vm5, %v6846_v0, %v6935_v54  ;;  %v2063_v59 = vsel %vm15958_vm5, %v6935_v54, %v15919_v28  ;;  %v2059_v0 = vsel %vm15958_vm5, %v6816_v50, %v15918_v10  ;;  %v15921_v54 = vunpack.i.h.bf16 %v11266_v46 }
 0x48d   :  { %v7061_v10 = vunpack.i.h.bf16 %v11286_v1  ;;  %v15924_v28 = vunpack.i.l.bf16 %v11286_v1 }
 0x48e   :  { %2274 = vmatpush.msrb.mxu0 %v2066_v13  ;;  %2314 = vmatpush.msrb.mxu2 %v2067_v44  ;;  %v11429_v55 = vpop.permute.xlu0 %7173  ;;  %v2058_v13 = vsel %vm15958_vm5, %v15917_v24, %v6816_v50  ;;  %v7086_v44 = vunpack.i.h.bf16 %v11290_v45  ;;  %v7075_v50 = vunpack.i.l.bf16 %v11292_v8  ;;  %v15922_v24 = vunpack.i.h.bf16 %v11284_v38 }
 0x48f   :  { %16385 = vst [vmem:[#allocation152_spill] sm:$0xff] %v11429_v55  ;;  %v15925_v8 = vunpack.i.h.bf16 %v11282_v42  ;;  %v7176_v33 = vunpack.i.h.bf16 %v11429_v55 }
 0x490   :  { %2275 = vmatpush.msrb.mxu0 %v2062_v37  ;;  %2315 = vmatpush.msrb.mxu2 %v2063_v59  ;;  %v15923_v37 = vunpack.i.l.bf16 %v11290_v45  ;;  %v11452_v59 = vpop.permute.xlu1 %7163 }
 0x492   :  { %2276 = vmatpush.msrb.mxu0 %v2058_v13  ;;  %2316 = vmatpush.msrb.mxu2 %v2059_v0  ;;  %v2117_v13 = vsel %vm15958_vm5, %v15921_v54, %v7100_v18  ;;  %v2113_v27 = vsel %vm15958_vm5, %v15923_v37, %v7086_v44  ;;  %v2109_v18 = vsel %vm15958_vm5, %v15922_v24, %v7075_v50  ;;  %v7025_v44 = vunpack.i.l.bf16 %v11268_v20 }
 0x493   :  { %2277 = vmatmul.f32.vlgmr.msrb.gmra.mxu0 %v11440_v12  ;;  %2317 = vmatmul.f32.vlgmr.msrb.gmra.mxu2 %v11440_v12  ;;  %v2105_v54 = vsel %vm15958_vm5, %v15924_v28, %v7061_v10  ;;  %v2101_v50 = vsel %vm15958_vm5, %v15925_v8, %v7050_v48  ;;  %v15929_v24 = vunpack.i.h.bf16 %v11182_v22  ;;  %v7011_v37 = vunpack.i.h.bf16 %v11262_v43 }
 0x494   :  { %2381 = vmatpush.msra.mxu0 %v2121_v5  ;;  %v7036_v5 = vunpack.i.h.bf16 %v11202_v6  ;;  %v7201_v20 = vunpack.i.h.bf16 %v11339_v11  ;;  %v7000_v8 = vunpack.i.l.bf16 %v11264_v57 }
 0x496   :  { %2382 = vmatpush.msra.mxu0 %v2117_v13  ;;  %v11463_v0 = vpop.permute.xlu0 %7188  ;;  %v15927_v13 = vunpack.i.l.bf16 %v11202_v6 }
 0x497   :  { %v7190_v28 = vunpack.i.l.bf16 %v11463_v0 }
 0x498   :  { %2383 = vmatpush.msra.mxu0 %v2113_v27  ;;  %v11482_v27 = vpop.permute.xlu1 %7178  ;;  %v2097_v10 = vsel %vm15958_vm5, %v15927_v13, %v7036_v5  ;;  %v6986_v13 = vunpack.i.h.bf16 %v11249_v21  ;;  %v6961_v5 = vunpack.i.h.bf16 %v11110_v34 }
 0x499   :  { %v16389_v49 = vunpack.i.l.bf16 %v11482_v27 }
 0x49a   :  { %2384 = vmatpush.msra.mxu0 %v2109_v18 }
 0x49c   :  { %2385 = vmatpush.msra.mxu0 %v2105_v54  ;;  %v2142_v54 = vsel %vm15958_vm5, %v7176_v33, %v16389_v49 }
 0x49e   :  { %2386 = vmatpush.msra.mxu0 %v2101_v50  ;;  %v11490_v15 = vpop.permute.xlu0 %7203  ;;  %v2093_v50 = vsel %vm15958_vm5, %v15929_v24, %v7025_v44  ;;  %v7165_v44 = vunpack.i.l.bf16 %v11452_v59 }
 0x49f   :  { %v7205_v48 = vunpack.i.l.bf16 %v11490_v15 }
 0x4a0   :  { %2387 = vmatpush.msra.mxu0 %v2097_v10  ;;  %v16386_v10 = vunpack.i.l.bf16 %v11262_v43 }
 0x4a1   :  { %v2150_v18 = vsel %vm15958_vm5, %v7201_v20, %v7205_v48  ;;  %v16387_v20 = vunpack.i.h.bf16 %v11463_v0 }
 0x4a2   :  { %2388 = vmatpush.msra.mxu0 %v2093_v50  ;;  %2289 = vmatpush.msrb.mxu1 %v2150_v18  ;;  %v2089_v57 = vsel %vm15958_vm5, %v16386_v10, %v7011_v37  ;;  %v7151_v50 = vunpack.i.h.bf16 %v11408_v35  ;;  %v16388_v37 = vunpack.i.h.bf16 %v11246_v29  ;;  %v11536_v35 = vpop.permute.xlu1 %7193 }
 0x4a3   :  { %v2146_v24 = vsel %vm15958_vm5, %v7190_v28, %v16387_v20  ;;  %v6975_v28 = vunpack.i.l.bf16 %v11121_v4  ;;  %v16391_v4 = vunpack.i.h.bf16 %v11452_v59  ;;  %v7206_v20 = vunpack.i.h.bf16 %v11490_v15 }
 0x4a4   :  { %2389 = vmatpush.msra.mxu0 %v2089_v57  ;;  %2290 = vmatpush.msrb.mxu1 %v2146_v24  ;;  %v2085_v10 = vsel %vm15958_vm5, %v16388_v37, %v7000_v8  ;;  %v16390_v57 = vunpack.i.l.bf16 %v11249_v21  ;;  %v7140_v8 = vunpack.i.l.bf16 %v11288_v63  ;;  %v7155_v37 = vunpack.i.l.bf16 %v11294_v30 }
 0x4a5   :  { %v2138_v33 = vsel %vm15958_vm5, %v7165_v44, %v16391_v4  ;;  %v16394_v44 = vunpack.i.h.bf16 %v11372_v2  ;;  %v7115_v2 = vunpack.i.l.bf16 %v11300_v36 }
 0x4a6   :  { %2390 = vmatpush.msra.mxu0 %v2085_v10  ;;  %v11529_v24 = vpop.permute.xlu0 %7218  ;;  %2291 = vmatpush.msrb.mxu1 %v2142_v54  ;;  %v2081_v18 = vsel %vm15958_vm5, %v16390_v57, %v6986_v13  ;;  %v6945_v54 = vunpack.i.l.bf16 %v11193_v16  ;;  %v7130_v13 = vunpack.i.l.bf16 %v11324_v56  ;;  %v16392_v57 = vunpack.i.h.bf16 %v11233_v40 }
 0x4a7   :  { %v2134_v49 = vsel %vm15958_vm5, %v7151_v50, %v7155_v37  ;;  %v16393_v11 = vunpack.i.l.bf16 %v11529_v24  ;;  %v6941_v16 = vunpack.i.h.bf16 %v11167_v14  ;;  %v7126_v50 = vunpack.i.h.bf16 %v11280_v47 }
 0x4a8   :  { %2391 = vmatpush.msra.mxu0 %v2081_v18  ;;  %2292 = vmatpush.msrb.mxu1 %v2138_v33  ;;  %v2077_v55 = vsel %vm15958_vm5, %v16392_v57, %v6975_v28  ;;  %v7195_v18 = vunpack.i.l.bf16 %v11536_v35  ;;  %v16395_v33 = vunpack.i.l.bf16 %v11110_v34  ;;  %v7116_v57 = vunpack.i.h.bf16 %v11300_v36 }
 0x4a9   :  { %v2155_v4 = vsel %vm15958_vm5, %v16394_v44, %v16393_v11  ;;  %v16396_v11 = vunpack.i.h.bf16 %v11288_v63  ;;  %v7181_v10 = vunpack.i.h.bf16 %v11482_v27 }
 0x4aa   :  { %2392 = vmatpush.msra.mxu0 %v2077_v55  ;;  %2293 = vmatpush.msrb.mxu1 %v2134_v49  ;;  %v2073_v28 = vsel %vm15958_vm5, %v16395_v33, %v6961_v5  ;;  %v2151_v55 = vsel %vm15958_vm5, %v7205_v48, %v7206_v20  ;;  %v6845_v5 = vunpack.i.l.bf16 %v11088_v19  ;;  %v16397_v49 = vunpack.i.h.bf16 %v11091_v23  ;;  %v11584_v48 = vld [vmem:[%s15642_s4 + $0x8] sm:$0xff] }
 0x4ab   :  { %2328 = vmatpush.msrb.mxu3 %v2155_v4  ;;  %v2130_v44 = vsel %vm15958_vm5, %v7140_v8, %v16396_v11  ;;  %v2126_v4 = vsel %vm15958_vm5, %v7126_v50, %v7130_v13  ;;  %v16398_v8 = vunpack.i.h.bf16 %v11463_v0  ;;  %v6821_v19 = vunpack.i.h.bf16 %v11036_v9 }
 0x4ac   :  { %2393 = vmatpush.msra.mxu0 %v2073_v28  ;;  %2294 = vmatpush.msrb.mxu1 %v2130_v44  ;;  %v2069_v36 = vsel %vm15958_vm5, %v16397_v49, %v6945_v54  ;;  %v16399_v54 = vunpack.i.l.bf16 %v11167_v14  ;;  %v2122_v50 = vsel %vm15958_vm5, %v7115_v2, %v7116_v57  ;;  %v7156_v11 = vunpack.i.h.bf16 %v11294_v30 }
 0x4ad   :  { %2329 = vmatpush.msrb.mxu3 %v2151_v55  ;;  %v2147_v33 = vsel %vm15958_vm5, %v16398_v8, %v7195_v18  ;;  %v7170_v0 = vunpack.i.l.bf16 %v11298_v32  ;;  %v16400_v44 = vunpack.i.l.bf16 %v11482_v27  ;;  %v2061_v49 = vsel %vm15958_vm5, %v6821_v19, %v6845_v5 }
 0x4ae   :  { %2394 = vmatpush.msra.mxu0 %v2069_v36  ;;  %2295 = vmatpush.msrb.mxu1 %v2126_v4  ;;  %v2065_v28 = vsel %vm15958_vm5, %v16399_v54, %v6941_v16  ;;  %v16401_v16 = vunpack.i.l.bf16 %v11272_v7  ;;  %v16402_v2 = vunpack.i.h.bf16 %v11303_v26  ;;  %v7145_v4 = vunpack.i.l.bf16 %v11359_v41 }
 0x4af   :  { %2330 = vmatpush.msrb.mxu3 %v2147_v33  ;;  %v2143_v55 = vsel %vm15958_vm5, %v16400_v44, %v7181_v10  ;;  %v16403_v8 = vunpack.i.h.bf16 %v11452_v59  ;;  %v16404_v5 = vunpack.i.h.bf16 %v11266_v46  ;;  %v16405_v54 = vunpack.i.l.bf16 %v11266_v46 }
 0x4b0   :  { %2395 = vmatpush.msra.mxu0 %v2065_v28  ;;  %2296 = vmatpush.msrb.mxu1 %v2122_v50  ;;  %v2120_v36 = vsel %vm15958_vm5, %v16402_v2, %v16401_v16  ;;  %v7131_v26 = vunpack.i.h.bf16 %v11324_v56  ;;  %v2135_v28 = vsel %vm15958_vm5, %v7155_v37, %v7156_v11  ;;  %v16406_v59 = vunpack.i.l.bf16 %v11290_v45  ;;  %v11631_v56 = vpop.permute.xlu1 %7208 }
 0x4b1   :  { %2331 = vmatpush.msrb.mxu3 %v2143_v55  ;;  %6260 = vmatmul.msk.f32.vlgmr.msrb.gmra.mxu1 %vm15954_vm13, %v11584_v48  ;;  %v2139_v33 = vsel %vm15958_vm5, %v16403_v8, %v7170_v0  ;;  %v2116_v7 = vsel %vm15958_vm5, %v16405_v54, %v16404_v5  ;;  %v16407_v50 = vunpack.i.h.bf16 %v11258_v61  ;;  %v7120_v55 = vunpack.i.l.bf16 %v11333_v53 }
 0x4b2   :  { %2396 = vmatpush.msra.mxu0 %v2061_v49  ;;  %2341 = vmatpush.msra.mxu1 %v2120_v36  ;;  %v16408_v46 = vunpack.i.h.bf16 %v11288_v63  ;;  %v16409_v16 = vunpack.i.h.bf16 %v11284_v38  ;;  %v16410_v37 = vunpack.i.l.bf16 %v11284_v38  ;;  %v7221_v61 = vunpack.i.h.bf16 %v11529_v24 }
 0x4b3   :  { %2397 = vmatmul.f32.vlgmr.msra.gmra.mxu0 %v11440_v12  ;;  %2332 = vmatpush.msrb.mxu3 %v2139_v33  ;;  %v2112_v44 = vsel %vm15958_vm5, %v16407_v50, %v16406_v59  ;;  %v2127_v2 = vsel %vm15958_vm5, %v7130_v13, %v7131_v26  ;;  %v16411_v36 = vunpack.i.l.bf16 %v11286_v1  ;;  %v16412_v63 = vunpack.i.h.bf16 %v11278_v60 }
 0x4b4   :  { %2342 = vmatpush.msra.mxu1 %v2116_v7  ;;  %v2131_v49 = vsel %vm15958_vm5, %v16408_v46, %v7145_v4  ;;  %v2108_v45 = vsel %vm15958_vm5, %v16410_v37, %v16409_v16  ;;  %v7210_v33 = vunpack.i.l.bf16 %v11631_v56  ;;  %v2123_v5 = vsel %vm15958_vm5, %v7116_v57, %v7120_v55 }
 0x4b5   :  { %2333 = vmatpush.msrb.mxu3 %v2135_v28  ;;  %v2104_v8 = vsel %vm15958_vm5, %v16412_v63, %v16411_v36  ;;  %v16413_v38 = vunpack.i.h.bf16 %v11282_v42  ;;  %v16414_v54 = vunpack.i.l.bf16 %v11282_v42  ;;  %v7196_v13 = vunpack.i.h.bf16 %v11536_v35 }
 0x4b6   :  { %2343 = vmatpush.msra.mxu1 %v2112_v44  ;;  %v16415_v60 = vunpack.i.l.bf16 %v11529_v24  ;;  %v16416_v57 = vunpack.i.l.bf16 %v11202_v6  ;;  %v16417_v28 = vunpack.i.h.bf16 %v11276_v3  ;;  %v2152_v59 = vsel %vm15958_vm5, %v7206_v20, %v7210_v33 }
 0x4b7   :  { %2334 = vmatpush.msrb.mxu3 %v2131_v49  ;;  %v2100_v7 = vsel %vm15958_vm5, %v16414_v54, %v16413_v38  ;;  %v16418_v50 = vunpack.i.h.bf16 %v11182_v22  ;;  %v16419_v44 = vunpack.i.l.bf16 %v11182_v22  ;;  %v7171_v6 = vunpack.i.h.bf16 %v11298_v32 }
 0x4b8   :  { %2344 = vmatpush.msra.mxu1 %v2108_v45  ;;  %v2156_v1 = vsel %vm15958_vm5, %v16415_v60, %v7221_v61  ;;  %v2096_v42 = vsel %vm15958_vm5, %v16417_v28, %v16416_v57  ;;  %v7185_v3 = vunpack.i.l.bf16 %v11307_v39  ;;  %v2148_v15 = vsel %vm15958_vm5, %v7195_v18, %v7196_v13 }
 0x4b9   :  { %2335 = vmatpush.msrb.mxu3 %v2127_v2  ;;  %v2092_v46 = vsel %vm15958_vm5, %v16419_v44, %v16418_v50  ;;  %v16420_v20 = vunpack.i.l.bf16 %v11262_v43  ;;  %v16421_v49 = vunpack.i.h.bf16 %v11158_v52  ;;  %v7160_v16 = vunpack.i.l.bf16 %v11397_v25  ;;  %v16436_v50 = vld [vmem:[#allocation134_spill] sm:$0xff]  ;;  %v16437_v44 = vld [vmem:[#allocation135_spill] sm:$0xff] }
 0x4ba   :  { %2345 = vmatpush.msra.mxu1 %v2104_v8  ;;  %v2144_v37 = vsel %vm15958_vm5, %v7181_v10, %v7185_v3  ;;  %v16422_v45 = vunpack.i.h.bf16 %v11246_v29  ;;  %v16423_v18 = vunpack.i.l.bf16 %v11246_v29  ;;  %v7146_v52 = vunpack.i.h.bf16 %v11359_v41 }
 0x4bb   :  { %2336 = vmatpush.msrb.mxu3 %v2123_v5  ;;  %v2088_v22 = vsel %vm15958_vm5, %v16421_v49, %v16420_v20  ;;  %v2140_v2 = vsel %vm15958_vm5, %v7170_v0, %v7171_v6  ;;  %v16424_v36 = vunpack.i.l.bf16 %v11249_v21  ;;  %v16425_v27 = vunpack.i.h.bf16 %v11229_v62 }
 0x4bc   :  { %6261 = vmatmul.msk.f32.vlgmr.msrb.gmra.mxu3 %vm15954_vm13, %v11584_v48  ;;  %2346 = vmatpush.msra.mxu1 %v2100_v7  ;;  %v2084_v43 = vsel %vm15958_vm5, %v16423_v18, %v16422_v45  ;;  %v7135_v63 = vunpack.i.l.bf16 %v11369_v17  ;;  %v2136_v29 = vsel %vm15958_vm5, %v7156_v11, %v7160_v16  ;;  %v16426_v8 = vunpack.i.h.bf16 %v11233_v40 }
 0x4bd   :  { %2368 = vmatpush.msra.mxu3 %v2156_v1  ;;  %v2080_v10 = vsel %vm15958_vm5, %v16425_v27, %v16424_v36  ;;  %v16427_v0 = vunpack.i.l.bf16 %v11233_v40  ;;  %v7121_v62 = vunpack.i.h.bf16 %v11333_v53  ;;  %v2132_v5 = vsel %vm15958_vm5, %v7145_v4, %v7146_v52  ;;  %v16440_v27 = vld [vmem:[#allocation68_spill] sm:$0xff] }
 0x4be   :  { %2347 = vmatpush.msra.mxu1 %v2096_v42  ;;  %v16428_v38 = vunpack.i.l.bf16 %v11110_v34  ;;  %v16429_v30 = vunpack.i.h.bf16 %v11217_v31  ;;  %v2128_v40 = vsel %vm15958_vm5, %v7131_v26, %v7135_v63  ;;  %v16430_v54 = vunpack.i.h.bf16 %v11091_v23 }
 0x4bf   :  { %2369 = vmatpush.msra.mxu3 %v2152_v59  ;;  %v2076_v21 = vsel %vm15958_vm5, %v16427_v0, %v16426_v8  ;;  %v16431_v7 = vunpack.i.l.bf16 %v11091_v23  ;;  %v2124_v34 = vsel %vm15958_vm5, %v7120_v55, %v7121_v62  ;;  %v16432_v31 = vunpack.i.l.bf16 %v11167_v14  ;;  %v2435_v14 = vld [vmem:[%s15643_s7] sm:$0xff]  ;;  %v16442_v0 = vld [vmem:[#allocation72_spill] sm:$0xff]  ;;  %s16479_s7 = smov 113  }
 0x4c0   :  { %2348 = vmatpush.msra.mxu1 %v2092_v46  ;;  %v2072_v11 = vsel %vm15958_vm5, %v16429_v30, %v16428_v38  ;;  %v16433_v4 = vunpack.i.h.bf16 %v11070_v58  ;;  %v16434_v23 = vunpack.i.l.bf16 %v11036_v9  ;;  %3013 = vperm.xlu0 %7222, %v2435_v14   ;;  %v16435_v9 = vld [vmem:[#allocation50_spill] sm:$0xff]  ;;  %v16443_v30 = vld [vmem:[#allocation77_spill] sm:$0xff]  ;;  %v7161_v24 = vunpack.i.h.bf16 %v11397_v25 }
 0x4c1   :  { %2370 = vmatpush.msra.mxu3 %v2148_v15  ;;  %v2068_v60 = vsel %vm15958_vm5, %v16431_v7, %v16430_v54  ;;  %v16445_v7 = vld [vmem:[#allocation81_spill] sm:$0xff] }
 0x4c2   :  { %2349 = vmatpush.msra.mxu1 %v2088_v22  ;;  %v2064_v1 = vsel %vm15958_vm5, %v16433_v4, %v16432_v31  ;;  %v2060_v26 = vsel %vm15958_vm5, %v16434_v23, %v6821_v19  ;;  %v2137_v35 = vsel %vm15958_vm5, %v7160_v16, %v7161_v24  ;;  %v16498_v24 = vld [vmem:[#allocation83_spill] sm:$0xff] }
 0x4c3   :  { %2371 = vmatpush.msra.mxu3 %v2144_v37 }
 0x4c4   :  { %2350 = vmatpush.msra.mxu1 %v2084_v43  ;;  %v16439_v43 = vld [vmem:[#allocation65_spill] sm:$0xff] }
 0x4c5   :  { %2372 = vmatpush.msra.mxu3 %v2140_v2 }
 0x4c6   :  { %2351 = vmatpush.msra.mxu1 %v2080_v10 }
 0x4c7   :  { %2373 = vmatpush.msra.mxu3 %v2136_v29  ;;  %v16441_v29 = vld [vmem:[#allocation69_spill] sm:$0xff] }
 0x4c8   :  { %2352 = vmatpush.msra.mxu1 %v2076_v21 }
 0x4c9   :  { %2374 = vmatpush.msra.mxu3 %v2132_v5 }
 0x4ca   :  { %2353 = vmatpush.msra.mxu1 %v2072_v11 }
 0x4cb   :  { %2375 = vmatpush.msra.mxu3 %v2128_v40  ;;  %v16444_v40 = vld [vmem:[#allocation73_spill] sm:$0xff] }
 0x4cc   :  { %2354 = vmatpush.msra.mxu1 %v2068_v60 }
 0x4cd   :  { %2376 = vmatpush.msra.mxu3 %v2124_v34  ;;  %v16446_v34 = vld [vmem:[#allocation85_spill] sm:$0xff] }
 0x4ce   :  { %6262 = vmatmul.msk.f32.vlgmr.msra.gmra.mxu3 %vm15954_vm13, %v11584_v48  ;;  %2355 = vmatpush.msra.mxu1 %v2064_v1  ;;  %v16447_v1 = vld [vmem:[#allocation78_spill] sm:$0xff] }
 0x4d0   :  { %2356 = vmatpush.msra.mxu1 %v2060_v26  ;;  %v16448_v26 = vld [vmem:[#allocation82_spill] sm:$0xff] }
 0x4d1   :  { %2357 = vmatmul.f32.vlgmr.msra.gmra.mxu1 %v11440_v12  ;;  %v16438_v12 = vunpack.i.h.bf16 %v16437_v44 }
 0x4d3   :  { %v1797_v46 = vsel %vm1761_vm14, %v16438_v12, %v16436_v50  ;;  %v16452_v12 = vld [vmem:[#allocation24_spill] sm:$0xff] }
 0x510   :  { %v2278_v58 = vpop.f32.mrf.mxu0 }
 0x511   :  { %v2279_v55 = vadd.f32 %v2278_v58, %v11014_v51 }
 0x516   :  { %v2318_v20 = vpop.f32.mrf.mxu2 }
 0x517   :  { %v2319_v49 = vadd.f32 %v2318_v20, %v11014_v51  ;;  %v16453_v20 = vld [vmem:[#allocation3_spill] sm:$0xff] }
 0x52e   :  { %v2298_v57 = vpop.f32.mrf.mxu1 }
 0x52f   :  { %v2299_v28 = vadd.f32 %v2298_v57, %v2279_v55  ;;  %v16449_v57 = vld [vmem:[#allocation39_spill] sm:$0xff] }
 0x531   :  { %vm2421_vm7 = vcmp.ge.f32.partialorder %v2299_v28, 0.0  ;;  %v2425_v42 = vmul.f32 0.25, %v2299_v28 }
 0x533   :  { %v11755_v59 = vsel %vm2421_vm7, %v2299_v28, %v2425_v42  ;;  %v16450_v42 = vld [vmem:[#allocation36_spill] sm:$0xff] }
 0x534   :  { %v2436_v19 = vmul.f32 %v11755_v59, %v16435_v9  ;;  %v2440_v2 = vmul.f32 %v11755_v59, %v16439_v43  ;;  %v2444_v8 = vmul.f32 %v11755_v59, %v16441_v29  ;;  %v2448_v54 = vmul.f32 %v11755_v59, %v16444_v40  ;;  %v16457_v29 = vld [vmem:[#allocation104_spill] sm:$0xff] }
 0x535   :  { %v2452_v23 = vmul.f32 %v11755_v59, %v16447_v1  ;;  %v2456_v14 = vmul.f32 %v11755_v59, %v16448_v26  ;;  %v2460_v9 = vmul.f32 %v11755_v59, %v16450_v42  ;;  %v16463_v1 = vld [vmem:[#allocation14_spill] sm:$0xff]  ;;  %v16464_v26 = vld [vmem:[#allocation89_spill] sm:$0xff] }
 0x536   :  { %v7223_v15 = vpack.i.bf16 %v2436_v19, %v1797_v46  ;;  %v16451_v19 = vld [vmem:[#allocation18_spill] sm:$0xff] }
 0x538   :  { %7224 = vrot.lane.b32.xlu1 %v7223_v15, %s9071_s28 }
 0x53f   :  { %v2338_v22 = vpop.f32.mrf.mxu3 }
 0x540   :  { %v2339_v37 = vadd.f32 %v2338_v22, %v2319_v49  ;;  %v2464_v49 = vmul.f32 %v11755_v59, %v16453_v20  ;;  %v16454_v22 = vld [vmem:[#allocation8_spill] sm:$0xff] }
 0x542   :  { %vm2422_vm6 = vcmp.ge.f32.partialorder %v2339_v37, 0.0  ;;  %v2426_v45 = vmul.f32 0.25, %v2339_v37 }
 0x544   :  { %v11765_v18 = vsel %vm2422_vm6, %v2339_v37, %v2426_v45  ;;  %v2468_v37 = vmul.f32 %v11755_v59, %v16454_v22 }
 0x545   :  { %v7228_v36 = vpack.i.bf16 %v11765_v18, %v11755_v59  ;;  %v2441_v10 = vmul.f32 %v11765_v18, %v16440_v27  ;;  %v2445_v21 = vmul.f32 %v11765_v18, %v16442_v0  ;;  %v2449_v11 = vmul.f32 %v11765_v18, %v16443_v30  ;;  %v16456_v27 = vld [vmem:[#allocation70_spill] sm:$0xff]  ;;  %v16458_v0 = vld [vmem:[#allocation28_spill] sm:$0xff] }
 0x546   :  { %v2453_v60 = vmul.f32 %v11765_v18, %v16445_v7  ;;  %v2457_v31 = vmul.f32 %v11765_v18, %v16446_v34  ;;  %v2461_v28 = vmul.f32 %v11765_v18, %v16449_v57  ;;  %v2465_v44 = vmul.f32 %v11765_v18, %v16451_v19 }
 0x547   :  { %7229 = vrot.lane.b32.xlu0 %v7228_v36, %s9060_s24  ;;  %v7233_v5 = vpack.i.bf16 %v2441_v10, %v2440_v2  ;;  %v7238_v38 = vpack.i.bf16 %v2445_v21, %v2444_v8  ;;  %v7243_v4 = vpack.i.bf16 %v2449_v11, %v2448_v54  ;;  %v2469_v46 = vmul.f32 %v11765_v18, %v16452_v12  ;;  %v16455_v2 = vld [vmem:[#allocation97_spill] sm:$0xff]  ;;  %v16568_v12 = vld [vmem:[#allocation144_spill] sm:$0xff] }
 0x548   :  { %v7248_v58 = vpack.i.bf16 %v2453_v60, %v2452_v23  ;;  %v7253_v55 = vpack.i.bf16 %v2457_v31, %v2456_v14  ;;  %v7258_v15 = vpack.i.bf16 %v2461_v28, %v2460_v9  ;;  %v7263_v45 = vpack.i.bf16 %v2465_v44, %v2464_v49  ;;  %v16460_v11 = vld [vmem:[#allocation9_spill] sm:$0xff]  ;;  %v16461_v60 = vld [vmem:[#allocation91_spill] sm:$0xff]  ;;  %v16466_v9 = vld [vmem:[#allocation60_spill] sm:$0xff] }
 0x549   :  { %7234 = vrot.lane.b32.xlu2 %v7233_v5, %s9050_s29  ;;  %7239 = vrot.lane.b32.xlu1 %v7238_v38, %s9055_s0  ;;  %v7268_v43 = vpack.i.bf16 %v2469_v46, %v2468_v37  ;;  %v2473_v36 = vmul.f32 %v11765_v18, %v16455_v2  ;;  %v2472_v10 = vmul.f32 %v11755_v59, %v16456_v27  ;;  %v16459_v38 = vld [vmem:[#allocation74_spill] sm:$0xff]  ;;  %v16462_v31 = vld [vmem:[#allocation61_spill] sm:$0xff]  ;;  %v16467_v49 = vld [vmem:[#allocation111_spill] sm:$0xff] }
 0x54a   :  { %v2477_v8 = vmul.f32 %v11765_v18, %v16457_v29  ;;  %v2481_v21 = vmul.f32 %v11765_v18, %v16458_v0  ;;  %v2476_v30 = vmul.f32 %v11755_v59, %v16459_v38  ;;  %v2480_v40 = vmul.f32 %v11755_v59, %v16460_v11  ;;  %v16469_v2 = vld [vmem:[#allocation26_spill] sm:$0xff]  ;;  %v16470_v27 = vld [vmem:[#allocation31_spill] sm:$0xff] }
 0x54b   :  { %v7273_v5 = vpack.i.bf16 %v2473_v36, %v2472_v10  ;;  %v2493_v34 = vmul.f32 %v11765_v18, %v16461_v60  ;;  %v2485_v23 = vmul.f32 %v11765_v18, %v16463_v1  ;;  %v2489_v14 = vmul.f32 %v11765_v18, %v16464_v26  ;;  %v16474_v60 = vld [vmem:[#allocation88_spill] sm:$0xff] }
 0x54c   :  { %v7278_v54 = vpack.i.bf16 %v2477_v8, %v2476_v30  ;;  %v7283_v7 = vpack.i.bf16 %v2481_v21, %v2480_v40  ;;  %v2488_v44 = vmul.f32 %v11755_v59, %v16466_v9  ;;  %v2509_v37 = vmul.f32 %v11765_v18, %v16467_v49  ;;  %v16471_v8 = vld [vmem:[#allocation25_spill] sm:$0xff]  ;;  %v16478_v9 = vld [vmem:[#allocation80_spill] sm:$0xff] }
 0x54d   :  { %v2501_v36 = vmul.f32 %v11765_v18, %v16469_v2  ;;  %v2505_v10 = vmul.f32 %v11765_v18, %v16470_v27  ;;  %v2500_v21 = vmul.f32 %v11755_v59, %v16471_v8  ;;  %v16480_v49 = vld [vmem:[#allocation21_spill] sm:$0xff] }
 0x54e   :  { %v2358_v25 = vpop.f32.mrf.mxu1  ;;  %v16551_v27 = vld [vmem:[#allocation101_spill] sm:$0xff] }
 0x54f   :  { %7244 = vrot.lane.b32.xlu0 %v7243_v4, %s9077_s3  ;;  %v2492_v4 = vmul.f32 %v11755_v59, %v16462_v31  ;;  %v7303_v30 = vpack.i.bf16 %v2501_v36, %v2500_v21  ;;  %v16475_v31 = vld [vmem:[#allocation92_spill] sm:$0xff]  ;;  %v16482_v36 = vld [vmem:[#allocation127_spill] sm:$0xff]  ;;  %v2359_v41 = vadd.f32 %v2358_v25, %v11014_v51 }
 0x551   :  { %7249 = vrot.lane.b32.xlu2 %v7248_v58, %s9078_s18  ;;  %7254 = vrot.lane.b32.xlu1 %v7253_v55, %s9048_s27  ;;  %v7298_v58 = vpack.i.bf16 %v2493_v34, %v2492_v4  ;;  %v16465_v55 = vld [vmem:[#allocation11_spill] sm:$0xff]  ;;  %v2520_v34 = vmul.f32 %v11755_v59, %v16474_v60  ;;  %v2513_v4 = vmul.f32 %v11765_v18, %v16475_v31 }
 0x552   :  { %v2484_v28 = vmul.f32 %v11755_v59, %v16465_v55 }
 0x554   :  { %v7288_v46 = vpack.i.bf16 %v2485_v23, %v2484_v28  ;;  %v16476_v23 = vld [vmem:[#allocation123_spill] sm:$0xff] }
 0x555   :  { %v2517_v26 = vmul.f32 %v11765_v18, %v16476_v23 }
 0x557   :  { %7259 = vrot.lane.b32.xlu0 %v7258_v15, %s9047_s26  ;;  %v7293_v15 = vpack.i.bf16 %v2489_v14, %v2488_v44  ;;  %v2516_v44 = vmul.f32 %v11755_v59, %v16478_v9  ;;  %v16487_v9 = vld [vmem:[#allocation152_spill] sm:$0xff] }
 0x559   :  { %7264 = vrot.lane.b32.xlu2 %v7263_v45, %s9057_s20  ;;  %7269 = vrot.lane.b32.xlu1 %v7268_v43, %s9075_s30  ;;  %v16468_v45 = vld [vmem:[#allocation76_spill] sm:$0xff] }
 0x55a   :  { %v2508_v43 = vmul.f32 %v11755_v59, %v16468_v45  ;;  %v16481_v45 = vld [vmem:[#allocation13_spill] sm:$0xff] }
 0x55c   :  { %v7313_v29 = vpack.i.bf16 %v2509_v37, %v2508_v43  ;;  %v2497_v37 = vmul.f32 %v11765_v18, %v16480_v49  ;;  %v2496_v43 = vmul.f32 %v11755_v59, %v16481_v45 }
 0x55f   :  { %7274 = vrot.lane.b32.xlu0 %v7273_v5, %s9076_s17  ;;  %v16472_v5 = vld [vmem:[#allocation30_spill] sm:$0xff] }
 0x560   :  { %v2504_v38 = vmul.f32 %v11755_v59, %v16472_v5 }
 0x561   :  { %7279 = vrot.lane.b32.xlu2 %v7278_v54, %s9058_s21  ;;  %7284 = vrot.lane.b32.xlu1 %v7283_v7, %s9059_s22  ;;  %v16473_v54 = vld [vmem:[#allocation107_spill] sm:$0xff] }
 0x562   :  { %v7308_v40 = vpack.i.bf16 %v2505_v10, %v2504_v38  ;;  %v2521_v7 = vmul.f32 %v11765_v18, %v16473_v54  ;;  %v2525_v10 = vmul.f32 %v11765_v18, %v16482_v36  ;;  %v7343_v38 = vpack.i.bf16 %v2497_v37, %v2496_v43  ;;  %v16485_v54 = vld [vmem:[#allocation90_spill] sm:$0xff] }
 0x564   :  { %v7328_v14 = vpack.i.bf16 %v2521_v7, %v2520_v34  ;;  %v2528_v7 = vmul.f32 %v11755_v59, %v16485_v54 }
 0x567   :  { %7299 = vrot.lane.b32.xlu0 %v7298_v58, %s9074_s2  ;;  %v16477_v58 = vld [vmem:[#allocation87_spill] sm:$0xff] }
 0x568   :  { %v2512_v28 = vmul.f32 %v11755_v59, %v16477_v58 }
 0x569   :  { %7289 = vrot.lane.b32.xlu2 %v7288_v46, %s9072_s1  ;;  %7294 = vrot.lane.b32.xlu1 %v7293_v15, %s9073_s23  ;;  %v7323_v15 = vpack.i.bf16 %v2517_v26, %v2516_v44  ;;  %v7175_v44 = vunpack.i.l.bf16 %v16487_v9 }
 0x56a   :  { %v7318_v46 = vpack.i.bf16 %v2513_v4, %v2512_v28  ;;  %v7211_v4 = vunpack.i.h.bf16 %v11631_v56 }
 0x56b   :  { %v2141_v56 = vsel %vm15958_vm5, %v7171_v6, %v7175_v44  ;;  %v16497_v44 = vld [vmem:[#allocation86_spill] sm:$0xff] }
 0x56c   :  { %v2153_v28 = vsel %vm15958_vm5, %v7210_v33, %v7211_v4  ;;  %v7136_v33 = vunpack.i.h.bf16 %v11369_v17 }
 0x56e   :  { %v2129_v32 = vsel %vm15958_vm5, %v7135_v63, %v7136_v33 }
 0x56f   :  { %7314 = vrot.lane.b32.xlu0 %v7313_v29, %s9077_s3  ;;  %v16483_v29 = vld [vmem:[#allocation129_spill] sm:$0xff] }
 0x570   :  { %v2529_v21 = vmul.f32 %v11765_v18, %v16483_v29 }
 0x571   :  { %7304 = vrot.lane.b32.xlu2 %v7303_v30, %s9050_s29  ;;  %7309 = vrot.lane.b32.xlu1 %v7308_v40, %s9055_s0  ;;  %v16484_v30 = vld [vmem:[#allocation93_spill] sm:$0xff] }
 0x572   :  { %v2524_v40 = vmul.f32 %v11755_v59, %v16484_v30  ;;  %v7338_v34 = vpack.i.bf16 %v2529_v21, %v2528_v7  ;;  %v7186_v59 = vunpack.i.h.bf16 %v11307_v39  ;;  %v16490_v21 = vld [vmem:[#allocation55_spill] sm:$0xff] }
 0x573   :  { %v16491_v30 = vld [vmem:[#allocation71_spill] sm:$0xff] }
 0x574   :  { %v7333_v60 = vpack.i.bf16 %v2525_v10, %v2524_v40  ;;  %v16489_v10 = vld [vmem:[#allocation75_spill] sm:$0xff] }
 0x575   :  { %v16492_v40 = vld [vmem:[#allocation51_spill] sm:$0xff] }
 0x577   :  { %7329 = vrot.lane.b32.xlu0 %v7328_v14, %s9047_s26  ;;  %v16486_v14 = vld [vmem:[#allocation150_spill] sm:$0xff] }
 0x578   :  { %v7200_v58 = vunpack.i.l.bf16 %v16486_v14 }
 0x579   :  { %7319 = vrot.lane.b32.xlu2 %v7318_v46, %s16479_s7  ;;  %7324 = vrot.lane.b32.xlu1 %v7323_v15, %s9048_s27  ;;  %v16488_v15 = vld [vmem:[#allocation151_spill] sm:$0xff] }
 0x57a   :  { %v2149_v46 = vsel %vm15958_vm5, %v7196_v13, %v7200_v58  ;;  %v7150_v37 = vunpack.i.l.bf16 %v16488_v15  ;;  %v7125_v13 = vunpack.i.l.bf16 %v11280_v47  ;;  %v16496_v58 = vld [vmem:[#allocation62_spill] sm:$0xff] }
 0x57c   :  { %v2133_v39 = vsel %vm15958_vm5, %v7146_v52, %v7150_v37  ;;  %v2125_v6 = vsel %vm15958_vm5, %v7121_v62, %v7125_v13  ;;  %v2398_v52 = vpop.f32.mrf.mxu0  ;;  %v16501_v13 = vld [vmem:[#allocation5_spill] sm:$0xff] }
 0x57d   :  { %v2399_v17 = vadd.f32 %v2398_v52, %v11014_v51 }
 0x57f   :  { %7344 = vrot.lane.b32.xlu0 %v7343_v38, %s9079_s5 }
 0x581   :  { %7334 = vrot.lane.b32.xlu2 %v7333_v60, %s9057_s20  ;;  %7339 = vrot.lane.b32.xlu1 %v7338_v34, %s9075_s30  ;;  %v16493_v34 = vld [vmem:[#allocation56_spill] sm:$0xff] }
 0x5aa   :  { %v11885_v31 = vpop.permute.xlu1 %7224 }
 0x5ab   :  { %v7226_v23 = vunpack.i.l.bf16 %v11885_v31 }
 0x5ad   :  { %v2157_v26 = vsel %vm15958_vm5, %v7221_v61, %v7226_v23  ;;  %v2145_v61 = vsel %vm15958_vm5, %v7185_v3, %v7186_v59  ;;  %v2378_v3 = vpop.f32.mrf.mxu3  ;;  %v16494_v23 = vld [vmem:[#allocation79_spill] sm:$0xff]  ;;  %v16495_v59 = vld [vmem:[#allocation58_spill] sm:$0xff] }
 0x5ae   :  { %2408 = vmatpush.msra.mxu2 %v2157_v26  ;;  %v2379_v16 = vadd.f32 %v2378_v3, %v2359_v41  ;;  %v11967_v41 = vpop.permute.xlu2 %7234 }
 0x5b0   :  { %2409 = vmatpush.msra.mxu2 %v2153_v28  ;;  %v2427_v47 = vmul.f32 0.25, %v2379_v16  ;;  %vm2423_vm6 = vcmp.ge.f32.partialorder %v2379_v16, 0.0 }
 0x5b2   :  { %2410 = vmatpush.msra.mxu2 %v2149_v46  ;;  %v11927_v36 = vsel %vm2423_vm6, %v2379_v16, %v2427_v47  ;;  %v16503_v16 = vld [vmem:[#allocation23_spill] sm:$0xff]  ;;  %vm16560_vm6 = vcmask 891904  }
 0x5b3   :  { %v2442_v51 = vmul.f32 %v11927_v36, %v16491_v30  ;;  %v2450_v26 = vmul.f32 %v11927_v36, %v16494_v23  ;;  %v2458_v46 = vmul.f32 %v11927_v36, %v16497_v44  ;;  %v2470_v52 = vmul.f32 %v11927_v36, %v16503_v16  ;;  %v16504_v47 = vld [vmem:[#allocation19_spill] sm:$0xff]  ;;  %v16514_v44 = vld [vmem:[#allocation96_spill] sm:$0xff] }
 0x5b4   :  { %2411 = vmatpush.msra.mxu2 %v2145_v61  ;;  %v2454_v61 = vmul.f32 %v11927_v36, %v16498_v24  ;;  %v16508_v30 = vld [vmem:[#allocation63_spill] sm:$0xff]  ;;  %v16515_v24 = vld [vmem:[#allocation17_spill] sm:$0xff] }
 0x5b6   :  { %2412 = vmatpush.msra.mxu2 %v2141_v56  ;;  %v16499_v56 = vld [vmem:[#allocation4_spill] sm:$0xff] }
 0x5b8   :  { %2413 = vmatpush.msra.mxu2 %v2137_v35  ;;  %v16500_v35 = vld [vmem:[#allocation40_spill] sm:$0xff] }
 0x5ba   :  { %2414 = vmatpush.msra.mxu2 %v2133_v39  ;;  %v2462_v39 = vmul.f32 %v11927_v36, %v16500_v35 }
 0x5bc   :  { %2415 = vmatpush.msra.mxu2 %v2129_v32 }
 0x5be   :  { %2416 = vmatpush.msra.mxu2 %v2125_v6  ;;  %v16502_v6 = vld [vmem:[#allocation6_spill] sm:$0xff] }
 0x5bf   :  { %6263 = vmatmul.msk.f32.vlgmr.msra.gmra.mxu2 %vm15954_vm13, %v11584_v48  ;;  %v2446_v48 = vmul.f32 %v11927_v36, %v16489_v10  ;;  %vm16566_vm13 = vcmask 908288  }
 0x642   :  { %v2418_v63 = vpop.f32.mrf.mxu2 }
 0x643   :  { %v2419_v43 = vadd.f32 %v2418_v63, %v2399_v17  ;;  %v2466_v17 = vmul.f32 %v11927_v36, %v16504_v47 }
 0x645   :  { %vm2424_vm7 = vcmp.ge.f32.partialorder %v2419_v43, 0.0  ;;  %v2428_v53 = vmul.f32 0.25, %v2419_v43 }
 0x647   :  { %v11929_v62 = vsel %vm2424_vm7, %v2419_v43, %v2428_v53  ;;  %v16505_v53 = vld [vmem:[#allocation59_spill] sm:$0xff]  ;;  %vm16562_vm7 = vmmov %vm16560_vm6 }
 0x648   :  { %v7348_v29 = vpack.i.bf16 %v11929_v62, %v11927_v36  ;;  %v2447_v38 = vmul.f32 %v11929_v62, %v16490_v21  ;;  %v2443_v54 = vmul.f32 %v11929_v62, %v16492_v40  ;;  %v2451_v4 = vmul.f32 %v11929_v62, %v16493_v34  ;;  %v16507_v21 = vld [vmem:[#allocation12_spill] sm:$0xff] }
 0x649   :  { %v2459_v14 = vmul.f32 %v11929_v62, %v16495_v59  ;;  %v2455_v28 = vmul.f32 %v11929_v62, %v16496_v58  ;;  %v2463_v33 = vmul.f32 %v11929_v62, %v16499_v56  ;;  %v2471_v32 = vmul.f32 %v11929_v62, %v16501_v13  ;;  %v16511_v59 = vld [vmem:[#allocation102_spill] sm:$0xff]  ;;  %v11995_v58 = vpop.permute.xlu0 %3013 }
 0x64a   :  { %7349 = vrot.lane.b32.xlu1 %v7348_v29, %s9060_s24  ;;  %v7358_v7 = vpack.i.bf16 %v2447_v38, %v2446_v48  ;;  %v7353_v60 = vpack.i.bf16 %v2443_v54, %v2442_v51  ;;  %v7363_v9 = vpack.i.bf16 %v2451_v4, %v2450_v26  ;;  %v2467_v25 = vmul.f32 %v11929_v62, %v16502_v6  ;;  %v16506_v48 = vld [vmem:[#allocation100_spill] sm:$0xff]  ;;  %v16509_v54 = vld [vmem:[#allocation27_spill] sm:$0xff]  ;;  %v11988_v4 = vpop.permute.xlu2 %7249 }
 0x64b   :  { %v7373_v15 = vpack.i.bf16 %v2459_v14, %v2458_v46  ;;  %v7368_v37 = vpack.i.bf16 %v2455_v28, %v2454_v61  ;;  %v7378_v3 = vpack.i.bf16 %v2463_v33, %v2462_v39  ;;  %v7388_v63 = vpack.i.bf16 %v2471_v32, %v2470_v52  ;;  %16512 = vst [vmem:[#allocation50_spill] sm:$0xff] %v11995_v58  ;;  %v16513_v28 = vld [vmem:[#allocation103_spill] sm:$0xff]  ;;  %v16517_v39 = vld [vmem:[#allocation16_spill] sm:$0xff] }
 0x64c   :  { %7359 = vrot.lane.b32.xlu2 %v7358_v7, %s9055_s0  ;;  %7354 = vrot.lane.b32.xlu0 %v7353_v60, %s9050_s29  ;;  %v7383_v43 = vpack.i.bf16 %v2467_v25, %v2466_v17  ;;  %v2475_v10 = vmul.f32 %v11929_v62, %v16505_v53  ;;  %v2474_v29 = vmul.f32 %v11927_v36, %v16506_v48  ;;  %v16510_v60 = vld [vmem:[#allocation106_spill] sm:$0xff]  ;;  %v16518_v17 = vld [vmem:[#allocation95_spill] sm:$0xff]  ;;  %v16519_v53 = vld [vmem:[#allocation113_spill] sm:$0xff] }
 0x64d   :  { %v2483_v38 = vmul.f32 %v11929_v62, %v16507_v21  ;;  %v2479_v51 = vmul.f32 %v11929_v62, %v16508_v30  ;;  %v2482_v7 = vmul.f32 %v11927_v36, %v16509_v54  ;;  %v2478_v34 = vmul.f32 %v11927_v36, %v16510_v60  ;;  %v16520_v48 = vld [vmem:[#allocation34_spill] sm:$0xff] }
 0x64e   :  { %v7393_v40 = vpack.i.bf16 %v2475_v10, %v2474_v29  ;;  %v2495_v14 = vmul.f32 %v11929_v62, %v16511_v59  ;;  %v2491_v46 = vmul.f32 %v11929_v62, %v16514_v44  ;;  %v2487_v61 = vmul.f32 %v11929_v62, %v16515_v24  ;;  %v16525_v44 = vld [vmem:[#allocation109_spill] sm:$0xff] }
 0x64f   :  { %v7403_v23 = vpack.i.bf16 %v2483_v38, %v2482_v7  ;;  %v7398_v26 = vpack.i.bf16 %v2479_v51, %v2478_v34  ;;  %v2486_v32 = vmul.f32 %v11927_v36, %v16517_v39  ;;  %v2510_v10 = vmul.f32 %v11927_v36, %v16519_v53  ;;  %v16521_v38 = vld [vmem:[#allocation32_spill] sm:$0xff]  ;;  %v16522_v7 = vld [vmem:[#allocation33_spill] sm:$0xff] }
 0x650   :  { %v2507_v29 = vmul.f32 %v11929_v62, %v16520_v48  ;;  %v2503_v30 = vmul.f32 %v11929_v62, %v16521_v38  ;;  %v2506_v60 = vmul.f32 %v11927_v36, %v16522_v7  ;;  %v16523_v34 = vld [vmem:[#allocation29_spill] sm:$0xff]  ;;  %v15941_v38 = vunpack.i.h.bf16 %v11988_v4 }
 0x651   :  { %v12022_v51 = vpop.permute.xlu0 %7229 }
 0x652   :  { %7364 = vrot.lane.b32.xlu1 %v7363_v9, %s9077_s3  ;;  %v2494_v9 = vmul.f32 %v11927_v36, %v16513_v28  ;;  %v12008_v52 = vpop.permute.xlu2 %7264 }
 0x654   :  { %7374 = vrot.lane.b32.xlu2 %v7373_v15, %s9048_s27  ;;  %7369 = vrot.lane.b32.xlu0 %v7368_v37, %s9078_s18  ;;  %v7418_v15 = vpack.i.bf16 %v2495_v14, %v2494_v9  ;;  %v16516_v37 = vld [vmem:[#allocation98_spill] sm:$0xff]  ;;  %v16524_v14 = vld [vmem:[#allocation128_spill] sm:$0xff] }
 0x655   :  { %v2490_v33 = vmul.f32 %v11927_v36, %v16516_v37  ;;  %v2523_v28 = vmul.f32 %v11929_v62, %v16524_v14  ;;  %v16527_v37 = vld [vmem:[#allocation117_spill] sm:$0xff] }
 0x657   :  { %v7413_v25 = vpack.i.bf16 %v2491_v46, %v2490_v33  ;;  %v2522_v46 = vmul.f32 %v11927_v36, %v16525_v44  ;;  %v2515_v33 = vmul.f32 %v11929_v62, %v16527_v37 }
 0x65a   :  { %7379 = vrot.lane.b32.xlu1 %v7378_v3, %s9047_s26  ;;  %v7408_v3 = vpack.i.bf16 %v2487_v61, %v2486_v32  ;;  %v12033_v9 = vpop.permute.xlu2 %7279  ;;  %v16526_v61 = vld [vmem:[#allocation122_spill] sm:$0xff] }
 0x65b   :  { %v15943_v47 = vunpack.i.h.bf16 %v12033_v9 }
 0x65c   :  { %7389 = vrot.lane.b32.xlu2 %v7388_v63, %s9075_s30  ;;  %7384 = vrot.lane.b32.xlu0 %v7383_v43, %s9057_s20  ;;  %v2511_v63 = vmul.f32 %v11929_v62, %v16518_v17  ;;  %v12014_v43 = vpop.permute.xlu1 %7239 }
 0x662   :  { %7394 = vrot.lane.b32.xlu1 %v7393_v40, %s9076_s17  ;;  %v7433_v40 = vpack.i.bf16 %v2511_v63, %v2510_v10  ;;  %v16529_v63 = vld [vmem:[#allocation119_spill] sm:$0xff]  ;;  %v12047_v10 = vpop.permute.xlu0 %7244 }
 0x663   :  { %v2514_v53 = vmul.f32 %v11927_v36, %v16529_v63 }
 0x664   :  { %7404 = vrot.lane.b32.xlu2 %v7403_v23, %s9059_s22  ;;  %7399 = vrot.lane.b32.xlu0 %v7398_v26, %s9058_s21  ;;  %v2502_v23 = vmul.f32 %v11927_v36, %v16523_v34  ;;  %v7428_v26 = vpack.i.bf16 %v2507_v29, %v2506_v60  ;;  %v12041_v32 = vpop.permute.xlu1 %7254  ;;  %v7251_v34 = vunpack.i.l.bf16 %v11988_v4 }
 0x666   :  { %v7423_v59 = vpack.i.bf16 %v2503_v30, %v2502_v23  ;;  %v7438_v30 = vpack.i.bf16 %v2515_v33, %v2514_v53  ;;  %v16531_v23 = vld [vmem:[#allocation22_spill] sm:$0xff] }
 0x667   :  { %v16535_v33 = vld [vmem:[#allocation114_spill] sm:$0xff] }
 0x66a   :  { %7419 = vrot.lane.b32.xlu1 %v7418_v15, %s9074_s2  ;;  %v2519_v15 = vmul.f32 %v11929_v62, %v16526_v61  ;;  %v12069_v53 = vpop.permute.xlu0 %7259 }
 0x66c   :  { %7414 = vrot.lane.b32.xlu2 %v7413_v25, %s9073_s23  ;;  %7409 = vrot.lane.b32.xlu0 %v7408_v3, %s9072_s1  ;;  %v7448_v25 = vpack.i.bf16 %v2523_v28, %v2522_v46  ;;  %v16528_v3 = vld [vmem:[#allocation124_spill] sm:$0xff]  ;;  %v12060_v46 = vpop.permute.xlu2 %7289 }
 0x66d   :  { %v2518_v17 = vmul.f32 %v11927_v36, %v16528_v3  ;;  %v16533_v28 = vld [vmem:[#allocation112_spill] sm:$0xff]  ;;  %v12066_v3 = vpop.permute.xlu1 %7269  ;;  %v15942_v39 = vunpack.i.l.bf16 %v12060_v46 }
 0x66e   :  { %v2527_v44 = vmul.f32 %v11929_v62, %v16533_v28  ;;  %v16538_v28 = vld [vmem:[#allocation53_spill] sm:$0xff] }
 0x66f   :  { %v7443_v29 = vpack.i.bf16 %v2519_v15, %v2518_v17  ;;  %v16534_v15 = vld [vmem:[#allocation130_spill] sm:$0xff] }
 0x670   :  { %v2530_v37 = vmul.f32 %v11927_v36, %v16534_v15  ;;  %v2439_v15 = vmul.f32 %v11929_v62, %v16538_v28 }
 0x672   :  { %7434 = vrot.lane.b32.xlu1 %v7433_v40, %s9077_s3  ;;  %v16530_v40 = vld [vmem:[#allocation20_spill] sm:$0xff] }
 0x673   :  { %v2499_v60 = vmul.f32 %v11929_v62, %v16530_v40 }
 0x674   :  { %7429 = vrot.lane.b32.xlu2 %v7428_v26, %s9055_s0  ;;  %7424 = vrot.lane.b32.xlu0 %v7423_v59, %s9050_s29  ;;  %v2498_v26 = vmul.f32 %v11927_v36, %v16531_v23  ;;  %v16532_v59 = vld [vmem:[#allocation118_spill] sm:$0xff]  ;;  %v16545_v23 = vld [vmem:[#allocation116_spill] sm:$0xff] }
 0x675   :  { %v2531_v14 = vmul.f32 %v11929_v62, %v16532_v59  ;;  %v16546_v6 = vunpack.i.l.bf16 %v16545_v23  ;;  %v7281_v23 = vunpack.i.l.bf16 %v12033_v9 }
 0x676   :  { %v7463_v61 = vpack.i.bf16 %v2499_v60, %v2498_v26  ;;  %v15935_v60 = vunpack.i.l.bf16 %v11967_v41  ;;  %v16537_v26 = vld [vmem:[#allocation54_spill] sm:$0xff] }
 0x677   :  { %v7458_v17 = vpack.i.bf16 %v2531_v14, %v2530_v37  ;;  %v2437_v59 = vmul.f32 %v11765_v18, %v16537_v26  ;;  %v16539_v14 = vld [vmem:[#allocation99_spill] sm:$0xff]  ;;  %v12090_v18 = vpop.permute.xlu1 %7284 }
 0x67a   :  { %7449 = vrot.lane.b32.xlu1 %v7448_v25, %s9047_s26  ;;  %v2526_v25 = vmul.f32 %v11927_v36, %v16535_v33  ;;  %v15936_v33 = vunpack.i.h.bf16 %v12022_v51 }
 0x67c   :  { %7444 = vrot.lane.b32.xlu2 %v7443_v29, %s9048_s27  ;;  %7439 = vrot.lane.b32.xlu0 %v7438_v30, %s16479_s7  ;;  %v7453_v63 = vpack.i.bf16 %v2527_v44, %v2526_v25  ;;  %v16536_v29 = vld [vmem:[#allocation142_spill] sm:$0xff]  ;;  %v16540_v44 = vunpack.i.l.bf16 %v16539_v14  ;;  %v7231_v25 = vunpack.i.l.bf16 %v12022_v51  ;;  %v15938_v14 = vunpack.i.l.bf16 %v12047_v10 }
 0x67d   :  { %v2438_v30 = vmul.f32 %v11927_v36, %v16536_v29  ;;  %v12087_v36 = vpop.permute.xlu2 %7304 }
 0x67e   :  { %v2544_v37 = vsel %vm181_vm2, %v16540_v44, %v15935_v60  ;;  %v2720_v62 = vsel %vm15957_vm12, %v7231_v25, %v15936_v33 }
 0x67f   :  { %v7483_v29 = vpack.i.bf16 %v2720_v62, %v7231_v25  ;;  %v12101_v26 = vpop.permute.xlu1 %7294  ;;  %v16541_v25 = vld [vmem:[#allocation110_spill] sm:$0xff] }
 0x682   :  { %7464 = vrot.lane.b32.xlu1 %v7463_v61, %s9079_s5  ;;  %v7468_v61 = vpack.i.bf16 %v2438_v30, %v2437_v59 }
 0x684   :  { %7459 = vrot.lane.b32.xlu2 %v7458_v17, %s9075_s30  ;;  %7454 = vrot.lane.b32.xlu0 %v7453_v63, %s9057_s20  ;;  %v7473_v17 = vpack.i.bf16 %v2544_v37, %v2439_v15  ;;  %v12096_v63 = vpop.permute.xlu0 %7274 }
 0x685   :  { %v12099_v30 = vpop.permute.xlu2 %7319  ;;  %v15940_v35 = vunpack.i.l.bf16 %v12096_v63 }
 0x687   :  { %v12107_v15 = vpop.permute.xlu1 %7309 }
 0x68a   :  { %7469 = vrot.lane.b32.xlu1 %v7468_v61, %s9071_s28 }
 0x68c   :  { %7474 = vrot.lane.b32.xlu2 %v7473_v17, %s9071_s28  ;;  %v12103_v59 = vpop.permute.xlu0 %7299  ;;  %v16542_v17 = vunpack.i.l.bf16 %v16541_v25 }
 0x68d   :  { %v12105_v28 = vpop.permute.xlu2 %7334 }
 0x68e   :  { %v2576_v62 = vsel %vm1287_vm4, %v16542_v17, %v15938_v14 }
 0x68f   :  { %v12122_v60 = vpop.permute.xlu1 %7324 }
 0x692   :  { %7484 = vrot.lane.b32.xlu1 %v7483_v29, %s9071_s28 }
 0x694   :  { %v12109_v61 = vpop.permute.xlu0 %7314 }
 0x697   :  { %v12130_v48 = vpop.permute.xlu1 %7339 }
 0x69c   :  { %v12125_v33 = vpop.permute.xlu0 %7329 }
 0x6a4   :  { %v12132_v7 = vpop.permute.xlu0 %7344 }
 0x6a6   :  { %v12112_v44 = vpop.permute.xlu2 %7359 }
 0x6a7   :  { %v15937_v37 = vunpack.i.h.bf16 %v12112_v44 }
 0x6a9   :  { %v7488_v29 = vpack.i.bf16 %v2576_v62, %v15937_v37  ;;  %v16543_v62 = vld [vmem:[#allocation120_spill] sm:$0xff] }
 0x6aa   :  { %v16544_v37 = vunpack.i.l.bf16 %v16543_v62  ;;  %v2592_v62 = vsel %vm1307_vm15, %v16546_v6, %v7251_v34 }
 0x6ab   :  { %7489 = vrot.lane.b32.xlu2 %v7488_v29, %s9071_s28 }
 0x6ac   :  { %v2672_v29 = vsel %vm1401_vm3, %v16544_v37, %v15940_v35  ;;  %v2593_v37 = vsel %vm1307_vm15, %v7251_v34, %v15941_v38  ;;  %v15944_v34 = vunpack.i.l.bf16 %v12041_v32  ;;  %v16547_v38 = vld [vmem:[#allocation125_spill] sm:$0xff] }
 0x6ad   :  { %v7518_v35 = vpack.i.bf16 %v2593_v37, %v2592_v62  ;;  %v16548_v13 = vunpack.i.l.bf16 %v16547_v38  ;;  %v15947_v38 = vunpack.i.l.bf16 %v12008_v52 }
 0x6ae   :  { %v12127_v56 = vpop.permute.xlu2 %7374 }
 0x6af   :  { %v2688_v16 = vsel %vm423_vm10, %v16548_v13, %v7281_v23 }
 0x6b6   :  { %v12134_v25 = vpop.permute.xlu2 %7389 }
 0x6b7   :  { %v15939_v17 = vunpack.i.h.bf16 %v12134_v25 }
 0x6b9   :  { %v7503_v14 = vpack.i.bf16 %v2672_v29, %v15939_v17 }
 0x6bb   :  { %7504 = vrot.lane.b32.xlu2 %v7503_v14, %s9071_s28 }
 0x6bc   :  { %v12147_v24 = vpop.permute.xlu1 %7349 }
 0x6bd   :  { %v7352_v40 = vunpack.i.h.bf16 %v12147_v24 }
 0x6be   :  { %v12157_v29 = vpop.permute.xlu2 %7404  ;;  %v12159_v17 = vpop.permute.xlu0 %7354 }
 0x6bf   :  { %v7478_v14 = vpack.i.bf16 %v15942_v39, %v7352_v40  ;;  %v2689_v39 = vsel %vm423_vm10, %v7281_v23, %v15943_v47 }
 0x6c0   :  { %v7533_v57 = vpack.i.bf16 %v2689_v39, %v2688_v16 }
 0x6c1   :  { %7479 = vrot.lane.b32.xlu0 %v7478_v14, %s9071_s28 }
 0x6c3   :  { %7519 = vrot.lane.b32.xlu2 %v7518_v35, %s9071_s28  ;;  %v16549_v35 = vld [vmem:[#allocation121_spill] sm:$0xff] }
 0x6c4   :  { %v12167_v6 = vpop.permute.xlu1 %7364  ;;  %v16550_v21 = vunpack.i.l.bf16 %v16549_v35 }
 0x6c6   :  { %v12176_v14 = vpop.permute.xlu0 %7369  ;;  %v12178_v62 = vpop.permute.xlu2 %7414  ;;  %v2608_v54 = vsel %vm121_vm0, %v16550_v21, %v15944_v34  ;;  %v16552_v21 = vld [vmem:[#allocation42_spill] sm:$0xff]  ;;  %v15950_v34 = vunpack.i.h.bf16 %v12014_v43 }
 0x6c7   :  { %v15945_v37 = vunpack.i.h.bf16 %v12176_v14  ;;  %v15946_v13 = vunpack.i.h.bf16 %v12178_v62  ;;  %v16553_v39 = vunpack.i.h.bf16 %v16552_v21  ;;  %v15951_v21 = vunpack.i.h.bf16 %v12132_v7 }
 0x6c9   :  { %v7493_v23 = vpack.i.bf16 %v2608_v54, %v15945_v37  ;;  %v2754_v16 = vsel %vm1492_vm1, %v15946_v13, %v16551_v27  ;;  %v2640_v35 = vsel %vm403_vm9, %v16553_v39, %v15947_v38  ;;  %v7241_v37 = vunpack.i.l.bf16 %v12014_v43  ;;  %v16554_v13 = vld [vmem:[#allocation105_spill] sm:$0xff] }
 0x6ca   :  { %v7346_v39 = vunpack.i.l.bf16 %v12132_v7  ;;  %v16555_v38 = vunpack.i.l.bf16 %v16554_v13  ;;  %v7271_v13 = vunpack.i.l.bf16 %v12066_v3 }
 0x6cb   :  { %7534 = vrot.lane.b32.xlu2 %v7533_v57, %s9071_s28  ;;  %7494 = vrot.lane.b32.xlu1 %v7493_v23, %s9071_s28  ;;  %v15949_v57 = vunpack.i.l.bf16 %v12103_v59 }
 0x6cc   :  { %v12192_v47 = vpop.permute.xlu1 %7379  ;;  %v2560_v5 = vsel %vm349_vm8, %v16555_v38, %v7241_v37 }
 0x6cd   :  { %v15948_v42 = vunpack.i.h.bf16 %v12192_v47  ;;  %v7543_v27 = vpack.i.bf16 %v15949_v57, %v2754_v16  ;;  %v2975_v16 = vsel %vm1761_vm14, %v7346_v39, %v15951_v21  ;;  %v7351_v21 = vunpack.i.l.bf16 %v12147_v24 }
 0x6ce   :  { %v12204_v54 = vpop.permute.xlu0 %7384  ;;  %v7548_v8 = vpack.i.bf16 %v2975_v16, %v7346_v39  ;;  %v16558_v39 = vld [vmem:[#allocation115_spill] sm:$0xff] }
 0x6cf   :  { %v7498_v23 = vpack.i.bf16 %v2640_v35, %v15948_v42  ;;  %v2561_v35 = vsel %vm349_vm8, %v7241_v37, %v15950_v34  ;;  %v16556_v37 = vld [vmem:[#allocation47_spill] sm:$0xff]  ;;  %v16559_v16 = vunpack.i.l.bf16 %v16558_v39  ;;  %v2722_v24 = vsel %vm15957_vm12, %v7351_v21, %v7352_v40 }
 0x6d0   :  { %v7513_v2 = vpack.i.bf16 %v2561_v35, %v2560_v5  ;;  %v16557_v34 = vunpack.i.h.bf16 %v16556_v37  ;;  %v15955_v35 = vunpack.i.h.bf16 %v12069_v53  ;;  %v16561_v37 = vunpack.i.h.bf16 %v12066_v3 }
 0x6d1   :  { %7499 = vrot.lane.b32.xlu0 %v7498_v23, %s9071_s28  ;;  %v15952_v23 = vunpack.i.l.bf16 %v12090_v18  ;;  %v2656_v55 = vsel %vm16560_vm6, %v16559_v16, %v7271_v13  ;;  %vm16567_vm6 = vmmov %vm16566_vm13 }
 0x6d3   :  { %7544 = vrot.lane.b32.xlu2 %v7543_v27, %s9071_s28  ;;  %v2704_v1 = vsel %vm443_vm11, %v16557_v34, %v15952_v23  ;;  %v7261_v27 = vunpack.i.l.bf16 %v12069_v53  ;;  %v2657_v34 = vsel %vm16562_vm7, %v7271_v13, %v16561_v37 }
 0x6d4   :  { %v12223_v42 = vpop.permute.xlu1 %7394  ;;  %v7528_v37 = vpack.i.bf16 %v2657_v34, %v2656_v55  ;;  %v7312_v55 = vunpack.i.h.bf16 %v12107_v15  ;;  %v7307_v34 = vunpack.i.h.bf16 %v12087_v36 }
 0x6d5   :  { %v2625_v13 = vsel %vm16567_vm6, %v7261_v27, %v15955_v35 }
 0x6d6   :  { %v12229_v57 = vpop.permute.xlu0 %7399 }
 0x6d7   :  { %v15953_v38 = vunpack.i.h.bf16 %v12229_v57 }
 0x6d9   :  { %7514 = vrot.lane.b32.xlu0 %v7513_v2, %s9071_s28  ;;  %v7508_v5 = vpack.i.bf16 %v2704_v1, %v15953_v38  ;;  %v16563_v2 = vunpack.i.h.bf16 %v12022_v51  ;;  %v7296_v51 = vunpack.i.l.bf16 %v12101_v26 }
 0x6db   :  { %7549 = vrot.lane.b32.xlu2 %v7548_v8, %s9071_s28  ;;  %7509 = vrot.lane.b32.xlu1 %v7508_v5, %s9071_s28  ;;  %v2721_v1 = vsel %vm15957_vm12, %v16563_v2, %v7351_v21  ;;  %v16564_v8 = vld [vmem:[#allocation126_spill] sm:$0xff]  ;;  %v15956_v5 = vunpack.i.h.bf16 %v12101_v26  ;;  %v7430_v2 = vpop.permute.xlu2 %7429 }
 0x6dc   :  { %v12257_v23 = vpop.permute.xlu1 %7419  ;;  %v16565_v39 = vunpack.i.l.bf16 %v16564_v8  ;;  %v7553_v40 = vpack.i.bf16 %v2722_v24, %v2721_v1  ;;  %v7431_v49 = vunpack.i.l.bf16 %v7430_v2 }
 0x6dd   :  { %v2751_v8 = vsel %vm1492_vm1, %v7296_v51, %v15956_v5 }
 0x6de   :  { %v12259_v38 = vpop.permute.xlu0 %7409  ;;  %v2624_v16 = vsel %vm16566_vm13, %v16565_v39, %v7261_v27  ;;  %v7311_v27 = vunpack.i.l.bf16 %v12107_v15  ;;  %v7306_v39 = vunpack.i.l.bf16 %v12087_v36  ;;  %v7538_v1 = vpack.i.bf16 %v2751_v8, %v7296_v51 }
 0x6df   :  { %v7523_v21 = vpack.i.bf16 %v2625_v13, %v2624_v16  ;;  %v2800_v24 = vsel %vm349_vm8, %v7312_v55, %v7431_v49  ;;  %v7432_v36 = vunpack.i.h.bf16 %v7430_v2  ;;  %vm16571_vm13 = vcmask 924672  }
 0x6e0   :  { %v2799_v35 = vsel %vm349_vm8, %v7311_v27, %v7312_v55  ;;  %v16569_v55 = vld [vmem:[#allocation141_spill] sm:$0xff]  ;;  %vm16572_vm7 = vmmov %vm16571_vm13 }
 0x6e1   :  { %7529 = vrot.lane.b32.xlu0 %v7528_v37, %s9071_s28  ;;  %v7568_v15 = vpack.i.bf16 %v2800_v24, %v2799_v35  ;;  %v16570_v35 = vld [vmem:[#allocation139_spill] sm:$0xff]  ;;  %v7316_v24 = vunpack.i.l.bf16 %v12109_v61  ;;  %vm16574_vm6 = vmmov %vm16572_vm7 }
 0x6e2   :  { %vm16575_vm12 = vmmov %vm16574_vm6 }
 0x6e3   :  { %7554 = vrot.lane.b32.xlu2 %v7553_v40, %s9071_s28  ;;  %7524 = vrot.lane.b32.xlu1 %v7523_v21, %s9071_s28  ;;  %v2783_v21 = vsel %vm181_vm2, %v7306_v39, %v7307_v34  ;;  %v7445_v2 = vpop.permute.xlu2 %7444 }
 0x6e4   :  { %v7435_v16 = vpop.permute.xlu1 %7434 }
 0x6e5   :  { %v7437_v45 = vunpack.i.h.bf16 %v7435_v16  ;;  %v7436_v19 = vunpack.i.l.bf16 %v7435_v16  ;;  %v7446_v16 = vunpack.i.l.bf16 %v7445_v2 }
 0x6e6   :  { %v7425_v37 = vpop.permute.xlu0 %7424 }
 0x6e7   :  { %v7427_v13 = vunpack.i.h.bf16 %v7425_v37  ;;  %v7426_v40 = vunpack.i.l.bf16 %v7425_v37  ;;  %v2818_v27 = vsel %vm1287_vm4, %v7437_v45, %v16569_v55  ;;  %v2817_v39 = vsel %vm1287_vm4, %v7436_v19, %v7437_v45 }
 0x6e8   :  { %v2802_v37 = vsel %vm349_vm8, %v7432_v36, %v16570_v35 }
 0x6e9   :  { %7539 = vrot.lane.b32.xlu0 %v7538_v1, %s9071_s28  ;;  %v2784_v5 = vsel %vm181_vm2, %v7307_v34, %v7426_v40  ;;  %v2786_v51 = vsel %vm181_vm2, %v7427_v13, %v16568_v12  ;;  %v2785_v8 = vsel %vm181_vm2, %v7426_v40, %v7427_v13  ;;  %v7317_v12 = vunpack.i.h.bf16 %v12109_v61 }
 0x6ea   :  { %v7558_v20 = vpack.i.bf16 %v2784_v5, %v2783_v21  ;;  %v7563_v34 = vpack.i.bf16 %v2786_v51, %v2785_v8  ;;  %v2801_v5 = vsel %vm349_vm8, %v7431_v49, %v7432_v36  ;;  %v7327_v21 = vunpack.i.h.bf16 %v12122_v60 }
 0x6eb   :  { %7569 = vrot.lane.b32.xlu1 %v7568_v15, %s9079_s5  ;;  %v7573_v13 = vpack.i.bf16 %v2802_v37, %v2801_v5  ;;  %v2816_v40 = vsel %vm1287_vm4, %v7317_v12, %v7436_v19  ;;  %v7326_v49 = vunpack.i.l.bf16 %v12122_v60  ;;  %v7322_v15 = vunpack.i.h.bf16 %v12099_v30  ;;  %v7460_v35 = vpop.permute.xlu2 %7459 }
 0x6ec   :  { %7559 = vrot.lane.b32.xlu2 %v7558_v20, %s9079_s5  ;;  %v7583_v20 = vpack.i.bf16 %v2818_v27, %v2817_v39  ;;  %v7321_v36 = vunpack.i.l.bf16 %v12099_v30  ;;  %v2815_v61 = vsel %vm1287_vm4, %v7316_v24, %v7317_v12  ;;  %v2848_v51 = vsel %vm121_vm0, %v7327_v21, %v7446_v16  ;;  %v7450_v55 = vpop.permute.xlu1 %7449  ;;  %v16573_v12 = vld [vmem:[#allocation138_spill] sm:$0xff] }
 0x6ed   :  { %v7578_v8 = vpack.i.bf16 %v2816_v40, %v2815_v61  ;;  %v2847_v39 = vsel %vm121_vm0, %v7326_v49, %v7327_v21  ;;  %v7452_v37 = vunpack.i.h.bf16 %v7450_v55  ;;  %v7451_v5 = vunpack.i.l.bf16 %v7450_v55 }
 0x6ee   :  { %v7440_v1 = vpop.permute.xlu0 %7439  ;;  %v2831_v60 = vsel %vm16572_vm7, %v7321_v36, %v7322_v15  ;;  %v7461_v55 = vunpack.i.l.bf16 %v7460_v35  ;;  %vm16582_vm7 = vcmask 891904  }
 0x6ef   :  { %v7441_v45 = vunpack.i.l.bf16 %v7440_v1  ;;  %v7442_v19 = vunpack.i.h.bf16 %v7440_v1  ;;  %v16576_v1 = vld [vmem:[#allocation143_spill] sm:$0xff] }
 0x6f1   :  { %7564 = vrot.lane.b32.xlu0 %v7563_v34, %s9079_s5  ;;  %v2832_v27 = vsel %vm16571_vm13, %v7322_v15, %v7441_v45  ;;  %v7598_v34 = vpack.i.bf16 %v2848_v51, %v2847_v39  ;;  %v2834_v24 = vsel %vm16574_vm6, %v7442_v19, %v16573_v12  ;;  %vm16577_vm13 = vcmask 908288   ;;  %v16579_v15 = vld [vmem:[#allocation146_spill] sm:$0xff]  ;;  %vm16583_vm6 = vmmov %vm16582_vm7 }
 0x6f2   :  { %v7588_v30 = vpack.i.bf16 %v2832_v27, %v2831_v60  ;;  %v2866_v40 = vsel %vm16577_vm13, %v7452_v37, %v16576_v1  ;;  %vm16578_vm5 = vmmov %vm16577_vm13  ;;  %v7331_v51 = vunpack.i.l.bf16 %v12125_v33  ;;  %v7342_v60 = vunpack.i.h.bf16 %v12130_v48 }
 0x6f3   :  { %7584 = vrot.lane.b32.xlu1 %v7583_v20, %s9079_s5  ;;  %v7447_v20 = vunpack.i.h.bf16 %v7445_v2  ;;  %v2865_v21 = vsel %vm16578_vm5, %v7451_v5, %v7452_v37  ;;  %v7337_v37 = vunpack.i.h.bf16 %v12105_v28  ;;  %vm16587_vm13 = vmmov %vm16583_vm6 }
 0x6f4   :  { %7574 = vrot.lane.b32.xlu2 %v7573_v13, %s9079_s5  ;;  %v2833_v13 = vsel %vm16575_vm12, %v7441_v45, %v7442_v19  ;;  %v7332_v45 = vunpack.i.h.bf16 %v12125_v33  ;;  %vm16580_vm12 = vmmov %vm16578_vm5  ;;  %v7336_v33 = vunpack.i.l.bf16 %v12105_v28  ;;  %v16584_v28 = vld [vmem:[#allocation145_spill] sm:$0xff] }
 0x6f5   :  { %v7593_v49 = vpack.i.bf16 %v2834_v24, %v2833_v13  ;;  %v2850_v36 = vsel %vm121_vm0, %v7447_v20, %v16579_v15  ;;  %v2849_v2 = vsel %vm121_vm0, %v7446_v16, %v7447_v20  ;;  %v12329_v16 = vpop.permute.xlu2 %7474  ;;  %v2896_v20 = vsel %vm16582_vm7, %v7342_v60, %v7461_v55 }
 0x6f6   :  { %v7455_v61 = vpop.permute.xlu0 %7454  ;;  %v7603_v19 = vpack.i.bf16 %v2850_v36, %v2849_v2  ;;  %v2864_v27 = vsel %vm16580_vm12, %v7332_v45, %v7451_v5  ;;  %16581 = vst [vmem:[#allocation134_spill] sm:$0xff] %v12329_v16  ;;  %v7237_v2 = vunpack.i.h.bf16 %v11967_v41  ;;  %vm16588_vm12 = vmmov %vm16583_vm6 }
 0x6f7   :  { %v7456_v39 = vunpack.i.l.bf16 %v7455_v61  ;;  %v7457_v12 = vunpack.i.h.bf16 %v7455_v61 }
 0x6f9   :  { %7579 = vrot.lane.b32.xlu0 %v7578_v8, %s9079_s5  ;;  %v7613_v8 = vpack.i.bf16 %v2866_v40, %v2865_v21  ;;  %v2880_v24 = vsel %vm403_vm9, %v7337_v37, %v7456_v39  ;;  %v7356_v40 = vunpack.i.l.bf16 %v12159_v17  ;;  %v2882_v15 = vsel %vm403_vm9, %v7457_v12, %v16584_v28 }
 0x6fa   :  { %v2881_v36 = vsel %vm403_vm9, %v7456_v39, %v7457_v12  ;;  %v16589_v39 = vunpack.i.l.bf16 %v11967_v41  ;;  %v16590_v41 = vunpack.i.l.bf16 %v12047_v10 }
 0x6fb   :  { %7599 = vrot.lane.b32.xlu1 %v7598_v34, %s9079_s5  ;;  %v7341_v34 = vunpack.i.l.bf16 %v12130_v48  ;;  %v2879_v48 = vsel %vm403_vm9, %v7336_v33, %v7337_v37  ;;  %v7361_v33 = vunpack.i.l.bf16 %v12112_v44 }
 0x6fc   :  { %7589 = vrot.lane.b32.xlu2 %v7588_v30, %s9079_s5  ;;  %v2863_v30 = vsel %vm16578_vm5, %v7331_v51, %v7332_v45  ;;  %v7618_v21 = vpack.i.bf16 %v2880_v24, %v2879_v48  ;;  %v2546_v45 = vsel %vm181_vm2, %v7237_v2, %v7356_v40  ;;  %v7623_v51 = vpack.i.bf16 %v2882_v15, %v2881_v36 }
 0x6fd   :  { %v7608_v5 = vpack.i.bf16 %v2864_v27, %v2863_v30  ;;  %v2895_v13 = vsel %vm16583_vm6, %v7341_v34, %v7342_v60  ;;  %v2545_v60 = vsel %vm181_vm2, %v16589_v39, %v7237_v2  ;;  %v7247_v34 = vunpack.i.h.bf16 %v12047_v10 }
 0x6fe   :  { %v7628_v1 = vpack.i.bf16 %v2896_v20, %v2895_v13  ;;  %v7638_v37 = vpack.i.bf16 %v2546_v45, %v2545_v60  ;;  %v7357_v20 = vunpack.i.h.bf16 %v12159_v17  ;;  %v16591_v24 = vunpack.i.h.bf16 %v12014_v43 }
 0x6ff   :  { %v2577_v12 = vsel %vm1287_vm4, %v16590_v41, %v7247_v34  ;;  %v16592_v48 = vunpack.i.h.bf16 %v12112_v44  ;;  %v7367_v10 = vunpack.i.h.bf16 %v12167_v6  ;;  %v7376_v36 = vunpack.i.l.bf16 %v12127_v56 }
 0x700   :  { %v2562_v13 = vsel %vm349_vm8, %v16591_v24, %v7361_v33  ;;  %v16593_v43 = vunpack.i.h.bf16 %v11988_v4  ;;  %v16594_v44 = vunpack.i.h.bf16 %v12176_v14  ;;  %v7386_v60 = vunpack.i.l.bf16 %v12204_v54 }
 0x701   :  { %7594 = vrot.lane.b32.xlu0 %v7593_v49, %s9079_s5  ;;  %v7462_v49 = vunpack.i.h.bf16 %v7460_v35  ;;  %v2563_v17 = vsel %vm349_vm8, %v7361_v33, %v16592_v48  ;;  %v7381_v33 = vunpack.i.l.bf16 %v12192_v47  ;;  %v16598_v41 = vunpack.i.h.bf16 %v12192_v47 }
 0x702   :  { %v7648_v28 = vpack.i.bf16 %v2563_v17, %v2562_v13  ;;  %v7396_v24 = vunpack.i.l.bf16 %v12223_v42  ;;  %v16600_v13 = vunpack.i.l.bf16 %v12008_v52  ;;  %v7277_v17 = vunpack.i.h.bf16 %v12096_v63 }
 0x703   :  { %7614 = vrot.lane.b32.xlu1 %v7613_v8, %s9079_s5  ;;  %v7366_v8 = vunpack.i.l.bf16 %v12167_v6  ;;  %v2897_v27 = vsel %vm16588_vm12, %v7461_v55, %v7462_v49  ;;  %v7387_v47 = vunpack.i.h.bf16 %v12204_v54 }
 0x704   :  { %7604 = vrot.lane.b32.xlu2 %v7603_v19, %s9079_s5  ;;  %v16586_v19 = vld [vmem:[#allocation140_spill] sm:$0xff] }
 0x705   :  { %v12346_v61 = vpop.permute.xlu2 %7489  ;;  %v2898_v35 = vsel %vm16587_vm13, %v7462_v49, %v16586_v19  ;;  %v7371_v49 = vunpack.i.l.bf16 %v12176_v14  ;;  %v2579_v6 = vsel %vm1287_vm4, %v7366_v8, %v7367_v10  ;;  %v16595_v14 = vunpack.i.l.bf16 %v12041_v32 }
 0x706   :  { %16585 = vst [vmem:[#allocation135_spill] sm:$0xff] %v12346_v61  ;;  %v7633_v30 = vpack.i.bf16 %v2898_v35, %v2897_v27  ;;  %v7377_v35 = vunpack.i.h.bf16 %v12127_v56  ;;  %v7658_v39 = vpack.i.bf16 %v7367_v10, %v2579_v6  ;;  %v7267_v56 = vunpack.i.h.bf16 %v12008_v52 }
 0x707   :  { %v2594_v2 = vsel %vm1307_vm15, %v16593_v43, %v7371_v49  ;;  %v2595_v45 = vsel %vm1307_vm15, %v7371_v49, %v16594_v44  ;;  %v16601_v52 = vunpack.i.l.bf16 %v12096_v63  ;;  %v16602_v10 = vunpack.i.h.bf16 %v12066_v3 }
 0x708   :  { %v7663_v19 = vpack.i.bf16 %v2595_v45, %v2594_v2  ;;  %v2641_v48 = vsel %vm403_vm9, %v16600_v13, %v7267_v56  ;;  %v16604_v43 = vunpack.i.h.bf16 %v12134_v25  ;;  %v2643_v45 = vsel %vm403_vm9, %v7386_v60, %v7387_v47 }
 0x709   :  { %7609 = vrot.lane.b32.xlu0 %v7608_v5, %s9079_s5  ;;  %v2578_v5 = vsel %vm1287_vm4, %v7247_v34, %v7366_v8  ;;  %vm16597_vm4 = vmmov %vm16578_vm5  ;;  %v7688_v6 = vpack.i.bf16 %v7387_v47, %v2643_v45  ;;  %v7406_v3 = vunpack.i.l.bf16 %v12157_v29  ;;  %v7421_v13 = vunpack.i.l.bf16 %v12257_v23 }
 0x70a   :  { %vm16599_vm15 = vmmov %vm16597_vm4 }
 0x70b   :  { %7629 = vrot.lane.b32.xlu1 %v7628_v1, %s9079_s5  ;;  %v7653_v1 = vpack.i.bf16 %v2578_v5, %v2577_v12  ;;  %v2627_v12 = vsel %vm16599_vm15, %v7381_v33, %v16598_v41  ;;  %vm16603_vm5 = vmmov %vm16583_vm6  ;;  %v7292_v41 = vunpack.i.h.bf16 %v12060_v46 }
 0x70c   :  { %7619 = vrot.lane.b32.xlu2 %v7618_v21, %s9079_s5  ;;  %v2547_v21 = vsel %vm181_vm2, %v7356_v40, %v7357_v20  ;;  %vm16605_vm7 = vmmov %vm16603_vm5 }
 0x70d   :  { %v7643_v15 = vpack.i.bf16 %v7357_v20, %v2547_v21  ;;  %v16596_v20 = vunpack.i.h.bf16 %v12069_v53  ;;  %v7391_v53 = vunpack.i.l.bf16 %v12134_v25 }
 0x70f   :  { %v2626_v5 = vsel %vm16597_vm4, %v16596_v20, %v7381_v33  ;;  %v2659_v2 = vsel %vm16605_vm7, %v7391_v53, %v16604_v43  ;;  %vm16616_vm4 = vcmask 654336  }
 0x710   :  { %v7678_v49 = vpack.i.bf16 %v2627_v12, %v2626_v5  ;;  %vm16618_vm15 = vmmov %vm16616_vm4 }
 0x711   :  { %7624 = vrot.lane.b32.xlu0 %v7623_v51, %s9079_s5  ;;  %v7257_v51 = vunpack.i.h.bf16 %v12041_v32  ;;  %v2642_v32 = vsel %vm403_vm9, %v7267_v56, %v7386_v60 }
 0x712   :  { %v7683_v21 = vpack.i.bf16 %v2642_v32, %v2641_v48  ;;  %v16611_v48 = vld [vmem:[#allocation94_spill] sm:$0xff] }
 0x713   :  { %7639 = vrot.lane.b32.xlu1 %v7638_v37, %s9071_s28  ;;  %v2610_v4 = vsel %vm121_vm0, %v7257_v51, %v7376_v36  ;;  %v2609_v27 = vsel %vm121_vm0, %v16595_v14, %v7257_v51  ;;  %v2611_v37 = vsel %vm121_vm0, %v7376_v36, %v7377_v35  ;;  %v2658_v36 = vsel %vm16603_vm5, %v16602_v10, %v7391_v53 }
 0x714   :  { %7634 = vrot.lane.b32.xlu2 %v7633_v30, %s9079_s5  ;;  %v7668_v34 = vpack.i.bf16 %v2610_v4, %v2609_v27  ;;  %v7673_v30 = vpack.i.bf16 %v7377_v35, %v2611_v37  ;;  %v7401_v51 = vunpack.i.l.bf16 %v12229_v57  ;;  %v7693_v63 = vpack.i.bf16 %v2659_v2, %v2658_v36 }
 0x715   :  { %v12364_v55 = vpop.permute.xlu2 %7504  ;;  %v16606_v35 = vunpack.i.h.bf16 %v12033_v9  ;;  %v16607_v4 = vunpack.i.h.bf16 %v12229_v57  ;;  %v16609_v57 = vunpack.i.l.bf16 %v12090_v18 }
 0x717   :  { %v2690_v25 = vsel %vm423_vm10, %v16606_v35, %v7401_v51  ;;  %v2691_v14 = vsel %vm423_vm10, %v7401_v51, %v16607_v4  ;;  %v16620_v51 = vunpack.i.h.bf16 %v12178_v62  ;;  %v7422_v35 = vunpack.i.h.bf16 %v12257_v23 }
 0x718   :  { %v7708_v60 = vpack.i.bf16 %v2691_v14, %v2690_v25 }
 0x719   :  { %7654 = vrot.lane.b32.xlu0 %v7653_v1, %s9071_s28  ;;  %v12419_v1 = vpop.permute.xlu1 %7464 }
 0x71b   :  { %7649 = vrot.lane.b32.xlu1 %v7648_v28, %s9071_s28  ;;  %v2674_v28 = vsel %vm1401_vm3, %v7277_v17, %v7396_v24 }
 0x71c   :  { %7644 = vrot.lane.b32.xlu2 %v7643_v15, %s9071_s28  ;;  %v2673_v15 = vsel %vm1401_vm3, %v16601_v52, %v7277_v17 }
 0x71d   :  { %v12388_v40 = vpop.permute.xlu2 %7519  ;;  %v7698_v54 = vpack.i.bf16 %v2674_v28, %v2673_v15  ;;  %v7416_v28 = vunpack.i.l.bf16 %v12178_v62 }
 0x721   :  { %7664 = vrot.lane.b32.xlu0 %v7663_v19, %s9071_s28  ;;  %v7397_v19 = vunpack.i.h.bf16 %v12223_v42  ;;  %v12448_v27 = vpop.permute.xlu1 %7469 }
 0x722   :  { %16608 = vst [vmem:[#allocation65_spill] sm:$0xff] %v12448_v27 }
 0x723   :  { %7659 = vrot.lane.b32.xlu1 %v7658_v39, %s9071_s28  ;;  %v7287_v39 = vunpack.i.h.bf16 %v12090_v18  ;;  %v2675_v42 = vsel %vm1401_vm3, %v7396_v24, %v7397_v19  ;;  %vm16610_vm3 = vcmask 760832  }
 0x724   :  { %7669 = vrot.lane.b32.xlu2 %v7668_v34, %s9071_s28  ;;  %v7407_v34 = vunpack.i.h.bf16 %v12157_v29  ;;  %v7703_v56 = vpack.i.bf16 %v7397_v19, %v2675_v42  ;;  %v7412_v29 = vunpack.i.h.bf16 %v12259_v38  ;;  %vm16612_vm6 = vmmov %vm16610_vm3  ;;  %v7467_v19 = vunpack.i.h.bf16 %v12419_v1  ;;  %v16622_v42 = vld [vmem:[#allocation108_spill] sm:$0xff] }
 0x725   :  { %v12404_v8 = vpop.permute.xlu2 %7534  ;;  %v2706_v9 = vsel %vm443_vm11, %v7287_v39, %v7406_v3  ;;  %v2705_v33 = vsel %vm443_vm11, %v16609_v57, %v7287_v39  ;;  %vm16613_vm13 = vmmov %vm16610_vm3 }
 0x726   :  { %v7713_v20 = vpack.i.bf16 %v2706_v9, %v2705_v33  ;;  %v2707_v5 = vsel %vm443_vm11, %v7406_v3, %v7407_v34  ;;  %v2738_v17 = vsel %vm16612_vm6, %v7412_v29, %v16611_v48  ;;  %vm16615_vm12 = vmmov %vm16610_vm3  ;;  %v7466_v3 = vunpack.i.l.bf16 %v12419_v1 }
 0x727   :  { %v7718_v18 = vpack.i.bf16 %v7407_v34, %v2707_v5 }
 0x728   :  { %v2977_v62 = vsel %vm1761_vm14, %v7466_v3, %v7467_v19 }
 0x729   :  { %7674 = vrot.lane.b32.xlu0 %v7673_v30, %s9071_s28  ;;  %v7411_v30 = vunpack.i.l.bf16 %v12259_v38  ;;  %v12470_v12 = vpop.permute.xlu1 %7484  ;;  %v16614_v38 = vunpack.i.l.bf16 %v12060_v46  ;;  %v16617_v46 = vunpack.i.l.bf16 %v12103_v59 }
 0x72b   :  { %7684 = vrot.lane.b32.xlu1 %v7683_v21, %s9071_s28  ;;  %v2736_v24 = vsel %vm16610_vm3, %v7292_v41, %v7411_v30  ;;  %v2737_v21 = vsel %vm16613_vm13, %v7411_v30, %v7412_v29  ;;  %v2735_v53 = vsel %vm16615_vm12, %v16614_v38, %v7292_v41 }
 0x72c   :  { %7679 = vrot.lane.b32.xlu2 %v7678_v49, %s9071_s28  ;;  %v7302_v49 = vunpack.i.h.bf16 %v12103_v59  ;;  %v7723_v47 = vpack.i.bf16 %v2736_v24, %v2735_v53  ;;  %v7728_v10 = vpack.i.bf16 %v2738_v17, %v2737_v21  ;;  %v16627_v53 = vld [vmem:[#allocation136_spill] sm:$0xff] }
 0x72d   :  { %v12435_v44 = vpop.permute.xlu2 %7544 }
 0x72e   :  { %v2768_v36 = vsel %vm16616_vm4, %v7302_v49, %v7421_v13  ;;  %v2767_v43 = vsel %vm16618_vm15, %v16617_v46, %v7302_v49  ;;  %v16628_v49 = vunpack.i.l.bf16 %v16627_v53 }
 0x731   :  { %7699 = vrot.lane.b32.xlu0 %v7698_v54, %s9071_s28  ;;  %v16619_v54 = vunpack.i.h.bf16 %v12101_v26  ;;  %v16621_v26 = vunpack.i.h.bf16 %v12132_v7 }
 0x733   :  { %7694 = vrot.lane.b32.xlu1 %v7693_v63, %s9071_s28  ;;  %v12463_v32 = vpop.permute.xlu0 %7479  ;;  %v2752_v45 = vsel %vm1492_vm1, %v16619_v54, %v7416_v28  ;;  %v2753_v63 = vsel %vm1492_vm1, %v7416_v28, %v16620_v51  ;;  %v2976_v4 = vsel %vm1761_vm14, %v16621_v26, %v7466_v3  ;;  %vm16623_vm1 = vmmov %vm16616_vm4 }
 0x734   :  { %7689 = vrot.lane.b32.xlu2 %v7688_v6, %s9071_s28  ;;  %v7738_v6 = vpack.i.bf16 %v2768_v36, %v2767_v43  ;;  %v7733_v59 = vpack.i.bf16 %v2753_v63, %v2752_v45  ;;  %v2770_v1 = vsel %vm16623_vm1, %v7422_v35, %v16622_v42  ;;  %vm16624_vm5 = vmmov %vm16623_vm1  ;;  %v7748_v34 = vpack.i.bf16 %v2977_v62, %v2976_v4  ;;  %v16629_v43 = vld [vmem:[#allocation131_spill] sm:$0xff] }
 0x735   :  { %v12456_v37 = vpop.permute.xlu2 %7549  ;;  %v16630_v54 = vunpack.i.h.bf16 %v16629_v43 }
 0x739   :  { %7709 = vrot.lane.b32.xlu0 %v7708_v60, %s9071_s28  ;;  %v2769_v60 = vsel %vm16624_vm5, %v7421_v13, %v7422_v35 }
 0x73a   :  { %v7743_v23 = vpack.i.bf16 %v2770_v1, %v2769_v60 }
 0x73b   :  { %7704 = vrot.lane.b32.xlu1 %v7703_v56, %s9071_s28  ;;  %v16625_v56 = vld [vmem:[#allocation132_spill] sm:$0xff] }
 0x73c   :  { %7714 = vrot.lane.b32.xlu2 %v7713_v20, %s9071_s28  ;;  %v16626_v30 = vunpack.i.l.bf16 %v16625_v56  ;;  %v16633_v56 = vld [vmem:[#allocation133_spill] sm:$0xff] }
 0x73d   :  { %v12483_v52 = vpop.permute.xlu2 %7554  ;;  %v12493_v2 = vpop.permute.xlu1 %7494 }
 0x73e   :  { %v2978_v20 = vsel %vm1761_vm14, %v7467_v19, %v16626_v30  ;;  %v16634_v30 = vunpack.i.l.bf16 %v16633_v56 }
 0x741   :  { %7719 = vrot.lane.b32.xlu0 %v7718_v18, %s9071_s28 }
 0x743   :  { %v12485_v15 = vpop.permute.xlu0 %7499  ;;  %7724 = vrot.lane.b32.xlu1 %v7723_v47, %s9071_s28 }
 0x744   :  { %7729 = vrot.lane.b32.xlu2 %v7728_v10, %s9071_s28 }
 0x746   :  { %v7560_v14 = vpop.permute.xlu2 %7559 }
 0x747   :  { %v7561_v7 = vunpack.i.l.bf16 %v7560_v14 }
 0x749   :  { %7739 = vrot.lane.b32.xlu0 %v7738_v6, %s9071_s28  ;;  %v7753_v5 = vpack.i.bf16 %v7561_v7, %v2978_v20 }
 0x74b   :  { %v12505_v25 = vpop.permute.xlu0 %7514  ;;  %7734 = vrot.lane.b32.xlu1 %v7733_v59, %s9071_s28  ;;  %v16631_v59 = vld [vmem:[#allocation148_spill] sm:$0xff] }
 0x74c   :  { %v16632_v35 = vunpack.i.l.bf16 %v16631_v59 }
 0x74d   :  { %v12512_v39 = vpop.permute.xlu1 %7509 }
 0x74e   :  { %v12523_v33 = vpop.permute.xlu2 %7574 }
 0x74f   :  { %v7577_v48 = vunpack.i.h.bf16 %v12523_v33 }
 0x751   :  { %7749 = vrot.lane.b32.xlu0 %v7748_v34, %s9071_s28  ;;  %v2986_v47 = vsel %vm1761_vm14, %v7577_v48, %v16628_v49 }
 0x753   :  { %v12518_v9 = vpop.permute.xlu0 %7529  ;;  %7744 = vrot.lane.b32.xlu1 %v7743_v23, %s9071_s28 }
 0x755   :  { %v12521_v57 = vpop.permute.xlu1 %7524 }
 0x756   :  { %v12531_v18 = vpop.permute.xlu2 %7589 }
 0x757   :  { %v7592_v42 = vunpack.i.h.bf16 %v12531_v18  ;;  %v7591_v1 = vunpack.i.l.bf16 %v12531_v18 }
 0x759   :  { %v2991_v53 = vsel %vm1761_vm14, %v7591_v1, %v7592_v42 }
 0x75a   :  { %v7803_v43 = vpack.i.bf16 %v2991_v53, %v7591_v1 }
 0x75b   :  { %v12528_v29 = vpop.permute.xlu0 %7539  ;;  %7754 = vrot.lane.b32.xlu1 %v7753_v5, %s9071_s28  ;;  %v7562_v5 = vunpack.i.h.bf16 %v7560_v14 }
 0x75d   :  { %v7570_v41 = vpop.permute.xlu1 %7569 }
 0x75e   :  { %v12536_v17 = vpop.permute.xlu2 %7604  ;;  %v7572_v49 = vunpack.i.h.bf16 %v7570_v41  ;;  %v7571_v18 = vunpack.i.l.bf16 %v7570_v41  ;;  %v7576_v41 = vunpack.i.l.bf16 %v12523_v33 }
 0x75f   :  { %v7606_v59 = vunpack.i.l.bf16 %v12536_v17 }
 0x760   :  { %v2983_v14 = vsel %vm1761_vm14, %v7571_v18, %v7572_v49  ;;  %v2984_v1 = vsel %vm1761_vm14, %v7572_v49, %v7576_v41  ;;  %v16636_v49 = vld [vmem:[#allocation149_spill] sm:$0xff] }
 0x763   :  { %v7565_v24 = vpop.permute.xlu0 %7564 }
 0x764   :  { %v7567_v36 = vunpack.i.h.bf16 %v7565_v24  ;;  %v7566_v46 = vunpack.i.l.bf16 %v7565_v24 }
 0x765   :  { %v12533_v13 = vpop.permute.xlu1 %7584 }
 0x766   :  { %v2982_v45 = vsel %vm1761_vm14, %v7567_v36, %v16630_v54  ;;  %v2981_v51 = vsel %vm1761_vm14, %v7566_v46, %v7567_v36  ;;  %v12549_v19 = vpop.permute.xlu2 %7619  ;;  %v2979_v36 = vsel %vm1761_vm14, %v7561_v7, %v7562_v5  ;;  %v7587_v56 = vunpack.i.h.bf16 %v12533_v13 }
 0x767   :  { %v7778_v62 = vpack.i.bf16 %v2982_v45, %v2981_v51  ;;  %v7621_v23 = vunpack.i.l.bf16 %v12549_v19 }
 0x76b   :  { %v7580_v21 = vpop.permute.xlu0 %7579 }
 0x76c   :  { %v7581_v38 = vunpack.i.l.bf16 %v7580_v21 }
 0x76d   :  { %v7600_v10 = vpop.permute.xlu1 %7599 }
 0x76e   :  { %v7758_v28 = vpack.i.bf16 %v7581_v38, %v2986_v47  ;;  %v7601_v3 = vunpack.i.l.bf16 %v7600_v10  ;;  %v7602_v45 = vunpack.i.h.bf16 %v7600_v10  ;;  %v7586_v10 = vunpack.i.l.bf16 %v12533_v13 }
 0x770   :  { %7759 = vrot.lane.b32.xlu0 %v7758_v28, %s9071_s28  ;;  %v2980_v28 = vsel %vm1761_vm14, %v7562_v5, %v7566_v46  ;;  %v7783_v46 = vpack.i.bf16 %v2983_v14, %v7571_v18  ;;  %v2996_v7 = vsel %vm1761_vm14, %v7602_v45, %v7606_v59  ;;  %v2989_v18 = vsel %vm1761_vm14, %v7586_v10, %v7587_v56 }
 0x771   :  { %v7773_v51 = vpack.i.bf16 %v2980_v28, %v2979_v36 }
 0x773   :  { %v12546_v63 = vpop.permute.xlu0 %7594 }
 0x774   :  { %v7597_v6 = vunpack.i.h.bf16 %v12546_v63  ;;  %v7596_v28 = vunpack.i.l.bf16 %v12546_v63 }
 0x775   :  { %v7615_v4 = vpop.permute.xlu1 %7614 }
 0x776   :  { %v2994_v26 = vsel %vm1761_vm14, %v7597_v6, %v16632_v35  ;;  %v7617_v60 = vunpack.i.h.bf16 %v7615_v4  ;;  %v7582_v35 = vunpack.i.h.bf16 %v7580_v21 }
 0x777   :  { %v7763_v34 = vpack.i.bf16 %v7601_v3, %v2994_v26  ;;  %v2995_v26 = vsel %vm1761_vm14, %v7601_v3, %v7602_v45 }
 0x778   :  { %7779 = vrot.lane.b32.xlu0 %v7778_v62, %s9071_s28  ;;  %v3002_v20 = vsel %vm1761_vm14, %v7617_v60, %v16634_v30  ;;  %v7813_v33 = vpack.i.bf16 %v2996_v7, %v2995_v26  ;;  %v2987_v21 = vsel %vm1761_vm14, %v7581_v38, %v7582_v35  ;;  %v2988_v3 = vsel %vm1761_vm14, %v7582_v35, %v7586_v10  ;;  %v16640_v10 = vld [vmem:[#allocation137_spill] sm:$0xff] }
 0x779   :  { %7764 = vrot.lane.b32.xlu2 %v7763_v34, %s9071_s28  ;;  %v7768_v24 = vpack.i.bf16 %v7621_v23, %v3002_v20  ;;  %v2985_v34 = vsel %vm1761_vm14, %v7576_v41, %v7577_v48  ;;  %v7793_v53 = vpack.i.bf16 %v2988_v3, %v2987_v21  ;;  %v16637_v48 = vunpack.i.h.bf16 %v16636_v49 }
 0x77a   :  { %v7788_v5 = vpack.i.bf16 %v2985_v34, %v2984_v1  ;;  %v2992_v41 = vsel %vm1761_vm14, %v7592_v42, %v7596_v28  ;;  %v16641_v34 = vunpack.i.h.bf16 %v16640_v10 }
 0x77b   :  { %v12567_v47 = vpop.permute.xlu0 %7609  ;;  %7769 = vrot.lane.b32.xlu1 %v7768_v24, %s9071_s28  ;;  %v7616_v24 = vunpack.i.l.bf16 %v7615_v4  ;;  %v2990_v13 = vsel %vm1761_vm14, %v7587_v56, %v16637_v48 }
 0x77c   :  { %v7612_v20 = vunpack.i.h.bf16 %v12567_v47  ;;  %v7611_v7 = vunpack.i.l.bf16 %v12567_v47 }
 0x77d   :  { %v12572_v54 = vpop.permute.xlu1 %7629  ;;  %v3001_v4 = vsel %vm1761_vm14, %v7616_v24, %v7617_v60  ;;  %v7607_v60 = vunpack.i.h.bf16 %v12536_v17 }
 0x77e   :  { %v3000_v38 = vsel %vm1761_vm14, %v7612_v20, %v7616_v24  ;;  %v7632_v48 = vunpack.i.h.bf16 %v12572_v54 }
 0x77f   :  { %v7828_v45 = vpack.i.bf16 %v3001_v4, %v3000_v38  ;;  %v2997_v17 = vsel %vm1761_vm14, %v7606_v59, %v7607_v60 }
 0x780   :  { %7804 = vrot.lane.b32.xlu0 %v7803_v43, %s9071_s28  ;;  %v7635_v43 = vpop.permute.xlu2 %7634 }
 0x781   :  { %7774 = vrot.lane.b32.xlu2 %v7773_v51, %s9071_s28  ;;  %v7798_v51 = vpack.i.bf16 %v2990_v13, %v2989_v18  ;;  %v7637_v49 = vunpack.i.h.bf16 %v7635_v43  ;;  %v7631_v13 = vunpack.i.l.bf16 %v12572_v54 }
 0x783   :  { %v7625_v62 = vpop.permute.xlu0 %7624  ;;  %7784 = vrot.lane.b32.xlu1 %v7783_v46, %s9071_s28  ;;  %v2993_v46 = vsel %vm1761_vm14, %v7596_v28, %v7597_v6  ;;  %v2999_v6 = vsel %vm1761_vm14, %v7611_v7, %v7612_v20  ;;  %v7622_v20 = vunpack.i.h.bf16 %v12549_v19  ;;  %v3007_v4 = vsel %vm1761_vm14, %v7631_v13, %v7632_v48 }
 0x784   :  { %v7627_v35 = vunpack.i.h.bf16 %v7625_v62  ;;  %v7626_v26 = vunpack.i.l.bf16 %v7625_v62  ;;  %v7808_v1 = vpack.i.bf16 %v2993_v46, %v2992_v41  ;;  %v7823_v24 = vpack.i.bf16 %v2999_v6, %v7611_v7 }
 0x785   :  { %v12586_v30 = vpop.permute.xlu1 %7639  ;;  %v3003_v59 = vsel %vm1761_vm14, %v7621_v23, %v7622_v20  ;;  %v7636_v41 = vunpack.i.l.bf16 %v7635_v43  ;;  %v7843_v46 = vpack.i.bf16 %v3007_v4, %v7631_v13  ;;  %v7542_v6 = vunpack.i.h.bf16 %v12528_v29 }
 0x786   :  { %16635 = vst [vmem:[#allocation68_spill] sm:$0xff] %v12586_v30  ;;  %v3006_v56 = vsel %vm1761_vm14, %v7627_v35, %v16641_v34  ;;  %v3005_v42 = vsel %vm1761_vm14, %v7626_v26, %v7627_v35  ;;  %v3004_v28 = vsel %vm1761_vm14, %v7622_v20, %v7626_v26  ;;  %v7486_v13 = vunpack.i.l.bf16 %v12470_v12 }
 0x787   :  { %v7838_v62 = vpack.i.bf16 %v3006_v56, %v3005_v42  ;;  %v3008_v19 = vsel %vm1761_vm14, %v7632_v48, %v7636_v41  ;;  %v3009_v23 = vsel %vm1761_vm14, %v7636_v41, %v7637_v49  ;;  %v7547_v56 = vunpack.i.h.bf16 %v12435_v44 }
 0x788   :  { %7814 = vrot.lane.b32.xlu0 %v7813_v33, %s9071_s28  ;;  %v16642_v33 = vld [vmem:[#allocation52_spill] sm:$0xff]  ;;  %v7487_v48 = vunpack.i.h.bf16 %v12470_v12  ;;  %v15971_v4 = vunpack.i.l.bf16 %v12483_v52 }
 0x789   :  { %7789 = vrot.lane.b32.xlu2 %v7788_v5, %s9071_s28  ;;  %v16643_v21 = vunpack.i.h.bf16 %v16642_v33  ;;  %v12627_v5 = vpop.permute.xlu2 %7644 }
 0x78a   :  { %16644 = vst [vmem:[#allocation77_spill] sm:$0xff] %v12627_v5 }
 0x78b   :  { %v12599_v36 = vpop.permute.xlu0 %7654  ;;  %7794 = vrot.lane.b32.xlu1 %v7793_v53, %s9071_s28  ;;  %v2998_v3 = vsel %vm1761_vm14, %v7607_v60, %v16643_v21 }
 0x78c   :  { %16638 = vst [vmem:[#allocation69_spill] sm:$0xff] %v12599_v36  ;;  %v7818_v53 = vpack.i.bf16 %v2998_v3, %v2997_v17 }
 0x78d   :  { %v12603_v14 = vpop.permute.xlu1 %7649 }
 0x78e   :  { %16639 = vst [vmem:[#allocation72_spill] sm:$0xff] %v12603_v14 }
 0x790   :  { %7829 = vrot.lane.b32.xlu0 %v7828_v45, %s9071_s28  ;;  %v3010_v45 = vsel %vm1761_vm14, %v7637_v49, %v16436_v50  ;;  %v7848_v50 = vpack.i.bf16 %v3009_v23, %v3008_v19  ;;  %vm16646_vm14 = vcmask 277504   ;;  %v7537_v19 = vunpack.i.h.bf16 %v12404_v8 }
 0x791   :  { %7799 = vrot.lane.b32.xlu2 %v7798_v51, %s9071_s28  ;;  %v7833_v51 = vpack.i.bf16 %v3004_v28, %v3003_v59  ;;  %v12647_v54 = vpop.permute.xlu2 %7669  ;;  %vm16647_vm7 = vmmov %vm16646_vm14  ;;  %v7482_v28 = vunpack.i.h.bf16 %v12463_v32  ;;  %v7536_v23 = vunpack.i.l.bf16 %v12404_v8 }
 0x792   :  { %16645 = vst [vmem:[#allocation73_spill] sm:$0xff] %v12647_v54  ;;  %vm16648_vm3 = vmmov %vm16647_vm7 }
 0x793   :  { %v12617_v63 = vpop.permute.xlu0 %7664  ;;  %7809 = vrot.lane.b32.xlu1 %v7808_v1, %s9071_s28  ;;  %vm16649_vm6 = vmmov %vm16648_vm3 }
 0x794   :  { %vm16650_vm13 = vmmov %vm16648_vm3 }
 0x795   :  { %v12621_v47 = vpop.permute.xlu1 %7659  ;;  %vm16651_vm12 = vmmov %vm16648_vm3 }
 0x796   :  { %vm16652_vm4 = vmmov %vm16648_vm3 }
 0x797   :  { %vm16653_vm15 = vmmov %vm16648_vm3 }
 0x798   :  { %7839 = vrot.lane.b32.xlu0 %v7838_v62, %s9071_s28  ;;  %v7541_v62 = vunpack.i.l.bf16 %v12528_v29  ;;  %vm16654_vm1 = vmmov %vm16648_vm3 }
 0x799   :  { %7824 = vrot.lane.b32.xlu2 %v7823_v24, %s9071_s28  ;;  %v12658_v7 = vpop.permute.xlu2 %7679  ;;  %vm16655_vm5 = vmmov %vm16654_vm1 }
 0x79a   :  { %v3324_v59 = vsel %vm16648_vm3, %v7541_v62, %v7542_v6  ;;  %v3317_v62 = vsel %vm16653_vm15, %v7487_v48, %v15971_v4  ;;  %vm16658_vm3 = vmmov %vm16654_vm1 }
 0x79b   :  { %v12634_v18 = vpop.permute.xlu0 %7674  ;;  %7819 = vrot.lane.b32.xlu1 %v7818_v53, %s9071_s28  ;;  %vm16663_vm15 = vmmov %vm16654_vm1 }
 0x79d   :  { %v12641_v38 = vpop.permute.xlu1 %7684 }
 0x7a0   :  { %3266 = vrot.lane.b32.xlu0 %v3010_v45, %s9071_s28 }
 0x7a1   :  { %7834 = vrot.lane.b32.xlu2 %v7833_v51, %s9071_s28  ;;  %v12666_v10 = vpop.permute.xlu2 %7689 }
 0x7a3   :  { %v12650_v35 = vpop.permute.xlu0 %7699  ;;  %7844 = vrot.lane.b32.xlu1 %v7843_v46, %s9071_s28 }
 0x7a5   :  { %v12655_v26 = vpop.permute.xlu1 %7694 }
 0x7a9   :  { %7849 = vrot.lane.b32.xlu2 %v7848_v50, %s9071_s28  ;;  %v12684_v53 = vpop.permute.xlu2 %7714  ;;  %v7512_v50 = vunpack.i.h.bf16 %v12512_v39 }
 0x7aa   :  { %v7716_v51 = vunpack.i.l.bf16 %v12684_v53  ;;  %v15970_v46 = vunpack.i.h.bf16 %v12684_v53 }
 0x7ab   :  { %v12660_v1 = vpop.permute.xlu0 %7709 }
 0x7ac   :  { %v3313_v8 = vsel %vm16655_vm5, %v7716_v51, %v15970_v46  ;;  %vm16664_vm5 = vmmov %vm16654_vm1 }
 0x7ad   :  { %v12662_v60 = vpop.permute.xlu1 %7704 }
 0x7b3   :  { %v12664_v43 = vpop.permute.xlu0 %7719 }
 0x7b5   :  { %v12668_v34 = vpop.permute.xlu1 %7724 }
 0x7b6   :  { %v7726_v3 = vunpack.i.l.bf16 %v12668_v34  ;;  %v15972_v49 = vunpack.i.h.bf16 %v12668_v34 }
 0x7b8   :  { %v3320_v41 = vsel %vm16650_vm13, %v7482_v28, %v7726_v3  ;;  %v3321_v12 = vsel %vm16651_vm12, %v7726_v3, %v15972_v49  ;;  %v3312_v3 = vsel %vm16654_vm1, %v7512_v50, %v7716_v51  ;;  %v7531_v28 = vunpack.i.l.bf16 %v12518_v9  ;;  %v12727_v50 = vpop.permute.xlu2 %7729  ;;  %vm16660_vm13 = vmmov %vm16654_vm1 }
 0x7b9   :  { %vm16661_vm12 = vmmov %vm16654_vm1 }
 0x7bb   :  { %v12671_v42 = vpop.permute.xlu0 %7739 }
 0x7bc   :  { %v15974_v33 = vunpack.i.h.bf16 %v12671_v42  ;;  %v7741_v21 = vunpack.i.l.bf16 %v12671_v42 }
 0x7bd   :  { %v12678_v17 = vpop.permute.xlu1 %7734 }
 0x7be   :  { %v3328_v24 = vsel %vm16646_vm14, %v7547_v56, %v7741_v21  ;;  %v3329_v20 = vsel %vm16647_vm7, %v7741_v21, %v15974_v33  ;;  %v15973_v29 = vunpack.i.l.bf16 %v12678_v17  ;;  %v3316_v56 = vsel %vm16652_vm4, %v7486_v13, %v7487_v48  ;;  %vm16656_vm14 = vmmov %vm16654_vm1 }
 0x7bf   :  { %3471 = vmatpush.msrb.mxu3 %v3328_v24  ;;  %3511 = vmatpush.msrb.mxu2 %v3329_v20  ;;  %v7701_v21 = vunpack.i.l.bf16 %v12650_v35  ;;  %v15968_v24 = vunpack.i.h.bf16 %v12650_v35  ;;  %v7507_v20 = vunpack.i.h.bf16 %v12364_v55  ;;  %v7532_v13 = vunpack.i.h.bf16 %v12518_v9  ;;  %vm16657_vm7 = vmmov %vm16654_vm1 }
 0x7c0   :  { %v3325_v45 = vsel %vm16649_vm6, %v7542_v6, %v15973_v29  ;;  %v15969_v6 = vunpack.i.l.bf16 %v12660_v1  ;;  %v3308_v48 = vsel %vm16656_vm14, %v7536_v23, %v7537_v19  ;;  %vm16659_vm6 = vmmov %vm16654_vm1  ;;  %v7502_v23 = vunpack.i.h.bf16 %v12485_v15 }
 0x7c1   :  { %3472 = vmatpush.msrb.mxu3 %v3324_v59  ;;  %3512 = vmatpush.msrb.mxu2 %v3325_v45  ;;  %v15967_v59 = vunpack.i.l.bf16 %v12655_v26  ;;  %v3304_v51 = vsel %vm16658_vm3, %v7507_v20, %v7701_v21  ;;  %v3305_v9 = vsel %vm16659_vm6, %v7701_v21, %v15968_v24  ;;  %v7671_v20 = vunpack.i.l.bf16 %v12647_v54  ;;  %vm16662_vm4 = vmmov %vm16654_vm1 }
 0x7c2   :  { %v3309_v45 = vsel %vm16657_vm7, %v7537_v19, %v15969_v6  ;;  %v7526_v19 = vunpack.i.l.bf16 %v12521_v57  ;;  %vm16665_vm14 = vmmov %vm16654_vm1 }
 0x7c3   :  { %3473 = vmatpush.msrb.mxu3 %v3320_v41  ;;  %3513 = vmatpush.msrb.mxu2 %v3321_v12  ;;  %v7686_v41 = vunpack.i.l.bf16 %v12641_v38  ;;  %v15966_v12 = vunpack.i.h.bf16 %v12641_v38  ;;  %vm16666_vm7 = vmmov %vm16654_vm1 }
 0x7c4   :  { %vm16667_vm3 = vmmov %vm16654_vm1 }
 0x7c5   :  { %3474 = vmatpush.msrb.mxu3 %v3316_v56  ;;  %3514 = vmatpush.msrb.mxu2 %v3317_v62  ;;  %v7527_v56 = vunpack.i.h.bf16 %v12521_v57  ;;  %v3300_v62 = vsel %vm16660_vm13, %v7531_v28, %v7532_v13  ;;  %v3296_v21 = vsel %vm16662_vm4, %v7502_v23, %v7686_v41  ;;  %v3297_v57 = vsel %vm16663_vm15, %v7686_v41, %v15966_v12  ;;  %vm16668_vm6 = vmmov %vm16654_vm1 }
 0x7c6   :  { %v7522_v28 = vunpack.i.h.bf16 %v12388_v40  ;;  %vm16669_vm13 = vmmov %vm16654_vm1 }
 0x7c7   :  { %3475 = vmatpush.msrb.mxu3 %v3312_v3  ;;  %3515 = vmatpush.msrb.mxu2 %v3313_v8  ;;  %v15965_v3 = vunpack.i.l.bf16 %v12658_v7  ;;  %v3301_v8 = vsel %vm16661_vm12, %v7532_v13, %v15967_v59  ;;  %v3292_v13 = vsel %vm16654_vm1, %v7526_v19, %v7527_v56  ;;  %vm16670_vm12 = vmmov %vm16654_vm1 }
 0x7c8   :  { %vm16671_vm4 = vmmov %vm16654_vm1 }
 0x7c9   :  { %3476 = vmatpush.msrb.mxu3 %v3308_v48  ;;  %3516 = vmatpush.msrb.mxu2 %v3309_v45  ;;  %v15959_v48 = vunpack.i.h.bf16 %v12647_v54  ;;  %v7521_v45 = vunpack.i.l.bf16 %v12388_v40  ;;  %v3293_v23 = vsel %vm16664_vm5, %v7527_v56, %v15965_v3  ;;  %v7516_v56 = vunpack.i.l.bf16 %v12505_v25  ;;  %vm16672_vm15 = vmmov %vm16654_vm1 }
 0x7ca   :  { %vm16673_vm5 = vmmov %vm16654_vm1 }
 0x7cb   :  { %3477 = vmatpush.msrb.mxu3 %v3304_v51  ;;  %3517 = vmatpush.msrb.mxu2 %v3305_v9  ;;  %v7497_v51 = vunpack.i.h.bf16 %v12493_v2  ;;  %v15964_v9 = vunpack.i.l.bf16 %v12617_v63  ;;  %v3289_v19 = vsel %vm16666_vm7, %v7671_v20, %v15959_v48  ;;  %v15960_v48 = vunpack.i.h.bf16 %v12586_v30  ;;  %vm16678_vm7 = vmmov %vm16654_vm1 }
 0x7cd   :  { %3478 = vmatpush.msrb.mxu3 %v3300_v62  ;;  %3518 = vmatpush.msrb.mxu2 %v3301_v8  ;;  %v7656_v62 = vunpack.i.l.bf16 %v12599_v36  ;;  %v3288_v41 = vsel %vm16665_vm14, %v7497_v51, %v7671_v20  ;;  %v15963_v8 = vunpack.i.h.bf16 %v12599_v36  ;;  %v15962_v51 = vunpack.i.l.bf16 %v12603_v14  ;;  %vm16677_vm14 = vmmov %vm16654_vm1 }
 0x7cf   :  { %3479 = vmatpush.msrb.mxu3 %v3296_v21  ;;  %3519 = vmatpush.msrb.mxu2 %v3297_v57  ;;  %v7492_v21 = vunpack.i.h.bf16 %v12346_v61  ;;  %v7517_v57 = vunpack.i.h.bf16 %v12505_v25  ;;  %v3281_v25 = vsel %vm16670_vm12, %v7656_v62, %v15963_v8  ;;  %vm16682_vm12 = vmmov %vm16654_vm1 }
 0x7d1   :  { %3480 = vmatpush.msrb.mxu3 %v3292_v13  ;;  %3520 = vmatpush.msrb.mxu2 %v3293_v23  ;;  %v3284_v13 = vsel %vm16667_vm3, %v7521_v45, %v7522_v28  ;;  %v3285_v23 = vsel %vm16668_vm6, %v7522_v28, %v15964_v9  ;;  %v3280_v20 = vsel %vm16669_vm13, %v7492_v21, %v7656_v62  ;;  %v7227_v45 = vunpack.i.h.bf16 %v11885_v31  ;;  %vm16679_vm3 = vmmov %vm16654_vm1 }
 0x7d2   :  { %v15961_v28 = vunpack.i.l.bf16 %v12448_v27  ;;  %v3277_v21 = vsel %vm16672_vm15, %v7517_v57, %v15962_v51  ;;  %vm16680_vm6 = vmmov %vm16654_vm1 }
 0x7d3   :  { %v12757_v40 = vpop.permute.xlu2 %7764  ;;  %3481 = vmatpush.msrb.mxu3 %v3288_v41  ;;  %3521 = vmatpush.msrb.mxu2 %v3289_v19  ;;  %v7641_v41 = vunpack.i.l.bf16 %v12586_v30  ;;  %v7477_v19 = vunpack.i.h.bf16 %v12329_v16  ;;  %vm16681_vm13 = vmmov %vm16654_vm1 }
 0x7d4   :  { %vm16685_vm15 = vmmov %vm16654_vm1 }
 0x7d5   :  { %3482 = vmatpush.msrb.mxu3 %v3284_v13  ;;  %3522 = vmatpush.msrb.mxu2 %v3285_v23  ;;  %v3276_v13 = vsel %vm16671_vm4, %v7516_v56, %v7517_v57  ;;  %v12783_v23 = vpop.permute.xlu0 %7749  ;;  %v3273_v31 = vsel %vm16673_vm5, %v7641_v41, %v15960_v48  ;;  %v12794_v56 = vld [vmem:[%s15644_s6] sm:$0xff]  ;;  %v16675_v57 = vld [vmem:[#allocation147_spill] sm:$0xff]  ;;  %vm16683_vm4 = vmmov %vm16654_vm1 }
 0x7d6   :  { %16674 = vst [vmem:[#allocation81_spill] sm:$0xff] %v12794_v56  ;;  %vm16686_vm5 = vmmov %vm16654_vm1 }
 0x7d7   :  { %3483 = vmatpush.msrb.mxu3 %v3280_v20  ;;  %3523 = vmatpush.msrb.mxu2 %v3281_v25  ;;  %v3272_v20 = vsel %vm16654_vm1, %v7477_v19, %v7641_v41  ;;  %v12796_v25 = vpop.permute.xlu1 %7744  ;;  %v3269_v19 = vsel %vm16678_vm7, %v7227_v45, %v15961_v28  ;;  %vm16690_vm7 = vmmov %vm16654_vm1 }
 0x7d9   :  { %3484 = vmatpush.msrb.mxu3 %v3276_v13  ;;  %3524 = vmatpush.msrb.mxu2 %v3277_v21  ;;  %v16676_v13 = vunpack.i.l.bf16 %v16675_v57 }
 0x7db   :  { %v12786_v62 = vpop.permute.xlu2 %7774  ;;  %3485 = vmatpush.msrb.mxu3 %v3272_v20  ;;  %3525 = vmatpush.msrb.mxu2 %v3273_v31  ;;  %v3268_v21 = vsel %vm16677_vm14, %v16676_v13, %v7227_v45  ;;  %vm16689_vm14 = vmmov %vm16654_vm1 }
 0x7dd   :  { %3486 = vmatpush.msrb.mxu3 %v3268_v21  ;;  %3526 = vmatpush.msrb.mxu2 %v3269_v19 }
 0x7de   :  { %3487 = vmatmul.f32.vlgmr.msrb.gmra.mxu3 %v12794_v56  ;;  %3527 = vmatmul.f32.vlgmr.msrb.gmra.mxu2 %v12794_v56 }
 0x7df   :  { %v12810_v48 = vpop.permute.xlu1 %7754 }
 0x7e2   :  { %v12806_v41 = vpop.permute.xlu0 %7759 }
 0x7e3   :  { %v12808_v20 = vpop.permute.xlu2 %7789 }
 0x7ea   :  { %v12812_v31 = vpop.permute.xlu0 %7779 }
 0x7eb   :  { %v12814_v57 = vpop.permute.xlu2 %7799 }
 0x7ec   :  { %v7801_v58 = vunpack.i.l.bf16 %v12814_v57 }
 0x7ed   :  { %v12816_v13 = vpop.permute.xlu1 %7769 }
 0x7f2   :  { %v12818_v21 = vpop.permute.xlu0 %7804 }
 0x7f3   :  { %v12820_v45 = vpop.permute.xlu2 %7824 }
 0x7f5   :  { %v12822_v19 = vpop.permute.xlu1 %7784 }
 0x7fa   :  { %v12824_v28 = vpop.permute.xlu0 %7814 }
 0x7fb   :  { %v12826_v51 = vpop.permute.xlu2 %7834  ;;  %v15986_v0 = vunpack.i.h.bf16 %v12824_v28 }
 0x7fc   :  { %v7837_v4 = vunpack.i.h.bf16 %v12826_v51 }
 0x7fd   :  { %v12828_v8 = vpop.permute.xlu1 %7794 }
 0x7fe   :  { %v15990_v30 = vunpack.i.h.bf16 %v12828_v8 }
 0x802   :  { %v12830_v9 = vpop.permute.xlu0 %7829 }
 0x803   :  { %v7850_v3 = vpop.permute.xlu2 %7849  ;;  %v7832_v49 = vunpack.i.h.bf16 %v12830_v9  ;;  %v15985_v29 = vunpack.i.l.bf16 %v12830_v9 }
 0x804   :  { %v7852_v12 = vunpack.i.h.bf16 %v7850_v3  ;;  %v7851_v59 = vunpack.i.l.bf16 %v7850_v3 }
 0x805   :  { %v12832_v24 = vpop.permute.xlu1 %7809 }
 0x806   :  { %v3366_v6 = vsel %vm16679_vm3, %v7851_v59, %v7852_v12  ;;  %v7812_v3 = vunpack.i.h.bf16 %v12832_v24  ;;  %vm16691_vm3 = vmmov %vm16654_vm1 }
 0x807   :  { %3578 = vmatpush.msra.mxu3 %v3366_v6  ;;  %v3358_v6 = vsel %vm16681_vm13, %v15985_v29, %v7832_v49  ;;  %v16684_v29 = vunpack.i.l.bf16 %v12832_v24  ;;  %vm16693_vm13 = vmmov %vm16654_vm1 }
 0x80a   :  { %v7840_v46 = vpop.permute.xlu0 %7839 }
 0x80b   :  { %v7841_v33 = vunpack.i.l.bf16 %v7840_v46  ;;  %v7842_v16 = vunpack.i.h.bf16 %v7840_v46  ;;  %v7771_v46 = vunpack.i.l.bf16 %v12816_v13 }
 0x80d   :  { %v3362_v22 = vsel %vm16680_vm6, %v7837_v4, %v7841_v33  ;;  %v7820_v11 = vpop.permute.xlu1 %7819  ;;  %vm16692_vm6 = vmmov %vm16654_vm1 }
 0x80e   :  { %3579 = vmatpush.msra.mxu3 %v3362_v22  ;;  %v7821_v56 = vunpack.i.l.bf16 %v7820_v11  ;;  %v3363_v22 = vsel %vm16686_vm5, %v7841_v33, %v7842_v16  ;;  %v7822_v36 = vunpack.i.h.bf16 %v7820_v11  ;;  %v7752_v16 = vunpack.i.h.bf16 %v12783_v23  ;;  %vm16697_vm5 = vmmov %vm16654_vm1 }
 0x80f   :  { %v7751_v33 = vunpack.i.l.bf16 %v12783_v23  ;;  %v7777_v11 = vunpack.i.h.bf16 %v12786_v62 }
 0x810   :  { %3580 = vmatpush.msra.mxu3 %v3358_v6  ;;  %v3354_v27 = vsel %vm16682_vm12, %v15986_v0, %v7821_v56  ;;  %v3350_v6 = vsel %vm16685_vm15, %v16684_v29, %v7812_v3  ;;  %v3346_v0 = vsel %vm16654_vm1, %v15990_v30, %v7801_v58  ;;  %v16688_v29 = vunpack.i.l.bf16 %v12808_v20  ;;  %vm16694_vm12 = vmmov %vm16654_vm1 }
 0x811   :  { %v3359_v30 = vsel %vm16690_vm7, %v7832_v49, %v7771_v46  ;;  %v7766_v49 = vunpack.i.l.bf16 %v12757_v40  ;;  %v7802_v46 = vunpack.i.h.bf16 %v12814_v57  ;;  %vm16696_vm15 = vmmov %vm16654_vm1  ;;  %v7767_v57 = vunpack.i.h.bf16 %v12757_v40 }
 0x812   :  { %v3267_v5 = vpop.permute.xlu0 %3266  ;;  %3581 = vmatpush.msra.mxu3 %v3354_v27  ;;  %v7781_v27 = vunpack.i.l.bf16 %v12812_v31  ;;  %v16699_v40 = vunpack.i.l.bf16 %v12830_v9  ;;  %vm16700_vm7 = vmmov %vm16654_vm1 }
 0x813   :  { %v3367_v61 = vsel %vm16683_vm4, %v7852_v12, %v3267_v5  ;;  %v16687_v5 = vunpack.i.h.bf16 %v12808_v20  ;;  %v7836_v12 = vunpack.i.l.bf16 %v12826_v51  ;;  %vm16695_vm4 = vmmov %vm16654_vm1 }
 0x814   :  { %3582 = vmatpush.msra.mxu3 %v3350_v6  ;;  %3618 = vmatpush.msra.mxu2 %v3367_v61 }
 0x815   :  { %v7845_v14 = vpop.permute.xlu1 %7844  ;;  %v3342_v61 = vsel %vm16689_vm14, %v16688_v29, %v16687_v5  ;;  %v7826_v5 = vunpack.i.l.bf16 %v12820_v45  ;;  %v7761_v29 = vunpack.i.l.bf16 %v12806_v41  ;;  %vm16698_vm14 = vmmov %vm16654_vm1 }
 0x816   :  { %3583 = vmatpush.msra.mxu3 %v3346_v0  ;;  %3619 = vmatpush.msra.mxu2 %v3363_v22  ;;  %v7847_v6 = vunpack.i.h.bf16 %v7845_v14  ;;  %v7846_v54 = vunpack.i.l.bf16 %v7845_v14  ;;  %v7772_v0 = vunpack.i.h.bf16 %v12816_v13  ;;  %v7827_v22 = vunpack.i.h.bf16 %v12820_v45 }
 0x817   :  { %v3355_v13 = vsel %vm16694_vm12, %v7821_v56, %v7822_v36  ;;  %v7816_v45 = vunpack.i.l.bf16 %v12824_v28  ;;  %v3334_v36 = vsel %vm16654_vm1, %v7751_v33, %v7752_v16  ;;  %v3351_v56 = vsel %vm16697_vm5, %v7812_v3, %v7766_v49  ;;  %vm16710_vm5 = vmmov %vm16654_vm1 }
 0x818   :  { %3584 = vmatpush.msra.mxu3 %v3342_v61  ;;  %3620 = vmatpush.msra.mxu2 %v3359_v30  ;;  %v3364_v51 = vsel %vm16691_vm3, %v7846_v54, %v7847_v6  ;;  %v3365_v14 = vsel %vm16692_vm6, %v7847_v6, %v7851_v59  ;;  %v3338_v30 = vsel %vm16693_vm13, %v7777_v11, %v7781_v27  ;;  %v7807_v61 = vunpack.i.h.bf16 %v12818_v21  ;;  %vm16701_vm3 = vmmov %vm16654_vm1 }
 0x819   :  { %3498 = vmatpush.msrb.mxu1 %v3364_v51  ;;  %3538 = vmatpush.msrb.mxu0 %v3365_v14  ;;  %v3360_v54 = vsel %vm16695_vm4, %v7772_v0, %v7836_v12  ;;  %v3361_v59 = vsel %vm16696_vm15, %v7836_v12, %v7837_v4  ;;  %v7806_v6 = vunpack.i.l.bf16 %v12818_v21  ;;  %v3356_v4 = vsel %vm16698_vm14, %v7826_v5, %v7827_v22  ;;  %v2434_v0 = vld [vmem:[%s15644_s6 + $0x8] sm:$0xff]  ;;  %vm16702_vm6 = vmmov %vm16654_vm1 }
 0x81a   :  { %3585 = vmatpush.msra.mxu3 %v3338_v30  ;;  %3621 = vmatpush.msra.mxu2 %v3355_v13  ;;  %v3357_v12 = vsel %vm16700_vm7, %v7827_v22, %v16699_v40  ;;  %v7782_v51 = vunpack.i.h.bf16 %v12812_v31  ;;  %v3347_v3 = vsel %vm16701_vm3, %v7801_v58, %v7802_v46  ;;  %v7796_v21 = vunpack.i.l.bf16 %v12828_v8  ;;  %vm16704_vm13 = vmmov %vm16654_vm1 }
 0x81b   :  { %3499 = vmatpush.msrb.mxu1 %v3360_v54  ;;  %3539 = vmatpush.msrb.mxu0 %v3361_v59  ;;  %v3352_v14 = vsel %vm16702_vm6, %v7767_v57, %v7816_v45  ;;  %v16703_v5 = vunpack.i.h.bf16 %v12824_v28  ;;  %vm16705_vm12 = vcmask 588800   ;;  %v7756_v22 = vunpack.i.l.bf16 %v12810_v48  ;;  %vm16707_vm4 = vmmov %vm16654_vm1 }
 0x81c   :  { %3586 = vmatpush.msra.mxu3 %v3334_v36  ;;  %3622 = vmatpush.msra.mxu2 %v3351_v56  ;;  %v7762_v49 = vunpack.i.h.bf16 %v12806_v41  ;;  %v16706_v30 = vunpack.i.h.bf16 %v12808_v20  ;;  %v7787_v46 = vunpack.i.h.bf16 %v12822_v19  ;;  %v7786_v13 = vunpack.i.l.bf16 %v12822_v19  ;;  %vm16708_vm15 = vmmov %vm16654_vm1 }
 0x81d   :  { %3500 = vmatpush.msrb.mxu1 %v3356_v4  ;;  %3540 = vmatpush.msrb.mxu0 %v3357_v12  ;;  %v3353_v9 = vsel %vm16704_vm13, %v7816_v45, %v16703_v5  ;;  %v3348_v28 = vsel %vm16708_vm15, %v7806_v6, %v7807_v61  ;;  %v16709_v45 = vunpack.i.l.bf16 %v12832_v24  ;;  %v3339_v41 = vsel %vm16710_vm5, %v7781_v27, %v7782_v51  ;;  %vm16711_vm14 = vmmov %vm16654_vm1 }
 0x81e   :  { %3623 = vmatpush.msra.mxu2 %v3347_v3  ;;  %6266 = vmatmul.msk.f32.vlgmr.msra.gmra.mxu3 %vm16705_vm12, %v2434_v0  ;;  %v3343_v58 = vsel %vm16707_vm4, %v16706_v30, %v7761_v29  ;;  %v7776_v59 = vunpack.i.l.bf16 %v12786_v62  ;;  %v3344_v57 = vsel %vm16711_vm14, %v7762_v49, %v7796_v21  ;;  %v16712_v19 = vunpack.i.h.bf16 %v12828_v8  ;;  %vm16713_vm7 = vmmov %vm16654_vm1 }
 0x81f   :  { %3501 = vmatpush.msrb.mxu1 %v3352_v14  ;;  %3541 = vmatpush.msrb.mxu0 %v3353_v9  ;;  %v3349_v54 = vsel %vm16654_vm1, %v7807_v61, %v16709_v45  ;;  %v7552_v36 = vunpack.i.h.bf16 %v12456_v37  ;;  %vm16714_vm3 = vmmov %vm16654_vm1  ;;  %v7551_v31 = vunpack.i.l.bf16 %v12456_v37  ;;  %v7757_v27 = vunpack.i.h.bf16 %v12810_v48 }
 0x820   :  { %3624 = vmatpush.msra.mxu2 %v3343_v58  ;;  %v3345_v29 = vsel %vm16713_vm7, %v7796_v21, %v16712_v19  ;;  %v3335_v24 = vsel %vm16714_vm3, %v7752_v16, %v7756_v22  ;;  %vm16715_vm6 = vmmov %vm16654_vm1  ;;  %v16716_v61 = vunpack.i.l.bf16 %v12808_v20  ;;  %v7747_v6 = vunpack.i.h.bf16 %v12796_v25 }
 0x821   :  { %3502 = vmatpush.msrb.mxu1 %v3348_v28  ;;  %3542 = vmatpush.msrb.mxu0 %v3349_v54  ;;  %v3340_v56 = vsel %vm16715_vm6, %v7786_v13, %v7787_v46  ;;  %vm16717_vm13 = vmmov %vm16654_vm1  ;;  %v7746_v4 = vunpack.i.l.bf16 %v12796_v25  ;;  %vm16720_vm15 = vcmask 588800   ;;  %v7737_v48 = vunpack.i.h.bf16 %v12678_v17 }
 0x822   :  { %3625 = vmatpush.msra.mxu2 %v3339_v41  ;;  %v3341_v8 = vsel %vm16717_vm13, %v7787_v46, %v16716_v61  ;;  %vm16718_vm12 = vmmov %vm16654_vm1  ;;  %v3332_v20 = vsel %vm16654_vm1, %v7551_v31, %v7552_v36  ;;  %v7546_v25 = vunpack.i.l.bf16 %v12435_v44  ;;  %v7732_v62 = vunpack.i.h.bf16 %v12727_v50 }
 0x823   :  { %3503 = vmatpush.msrb.mxu1 %v3344_v57  ;;  %3543 = vmatpush.msrb.mxu0 %v3345_v29  ;;  %v3336_v40 = vsel %vm16718_vm12, %v7757_v27, %v7776_v59  ;;  %vm16719_vm4 = vmmov %vm16654_vm1  ;;  %v16724_v12 = vunpack.i.h.bf16 %v12671_v42  ;;  %v7557_v44 = vunpack.i.h.bf16 %v12483_v52  ;;  %v7481_v21 = vunpack.i.l.bf16 %v12463_v32 }
 0x824   :  { %3626 = vmatpush.msra.mxu2 %v3335_v24  ;;  %v3337_v37 = vsel %vm16719_vm4, %v7776_v59, %v7777_v11  ;;  %vm16721_vm5 = vmmov %vm16654_vm1  ;;  %v7731_v11 = vunpack.i.l.bf16 %v12727_v50  ;;  %v7722_v42 = vunpack.i.h.bf16 %v12664_v43  ;;  %v16730_v14 = vunpack.i.h.bf16 %v12668_v34 }
 0x825   :  { %3504 = vmatpush.msrb.mxu1 %v3340_v56  ;;  %3544 = vmatpush.msrb.mxu0 %v3341_v8  ;;  %v3333_v16 = vsel %vm16721_vm5, %v7552_v36, %v7751_v33  ;;  %vm16722_vm14 = vmmov %vm16720_vm15  ;;  %v16727_v33 = vunpack.i.l.bf16 %v12678_v17  ;;  %v7712_v17 = vunpack.i.h.bf16 %v12660_v1  ;;  %v16733_v22 = vunpack.i.l.bf16 %v12483_v52 }
 0x826   :  { %6267 = vmatmul.msk.f32.vlgmr.msra.gmra.mxu2 %vm16720_vm15, %v2434_v0  ;;  %vm16723_vm7 = vmmov %vm16722_vm14  ;;  %v7511_v30 = vunpack.i.l.bf16 %v12512_v39  ;;  %v7706_v34 = vunpack.i.l.bf16 %v12662_v60  ;;  %v16735_v58 = vunpack.i.h.bf16 %v12684_v53  ;;  %v7697_v52 = vunpack.i.h.bf16 %v12655_v26 }
 0x827   :  { %3505 = vmatpush.msrb.mxu1 %v3336_v40  ;;  %3545 = vmatpush.msrb.mxu0 %v3337_v37  ;;  %vm16725_vm3 = vmmov %vm16654_vm1  ;;  %v3318_v32 = vsel %vm16654_vm1, %v16733_v22, %v7557_v44  ;;  %v16738_v28 = vunpack.i.l.bf16 %v12660_v1  ;;  %v7506_v54 = vunpack.i.l.bf16 %v12364_v55  ;;  %v7691_v53 = vunpack.i.l.bf16 %v12666_v10 }
 0x828   :  { %v3330_v51 = vsel %vm16725_vm3, %v16724_v12, %v7746_v4  ;;  %vm16726_vm6 = vmmov %vm16654_vm1  ;;  %v16741_v41 = vunpack.i.h.bf16 %v12650_v35  ;;  %v7682_v1 = vunpack.i.h.bf16 %v12658_v7  ;;  %v16744_v19 = vunpack.i.l.bf16 %v12655_v26 }
 0x829   :  { %3506 = vmatpush.msrb.mxu1 %v3332_v20  ;;  %3546 = vmatpush.msrb.mxu0 %v3333_v16  ;;  %v3331_v23 = vsel %vm16726_vm6, %v7746_v4, %v7747_v6  ;;  %vm16728_vm13 = vmmov %vm16654_vm1  ;;  %v7501_v36 = vunpack.i.l.bf16 %v12485_v15  ;;  %v7677_v35 = vunpack.i.h.bf16 %v12634_v18  ;;  %v16747_v24 = vunpack.i.h.bf16 %v12641_v38  ;;  %v16752_v6 = vld [vmem:[#allocation73_spill] sm:$0xff] }
 0x82a   :  { %6264 = vmatmul.msk.f32.vlgmr.msrb.gmra.mxu1 %vm16722_vm14, %v2434_v0  ;;  %6265 = vmatmul.msk.f32.vlgmr.msrb.gmra.mxu0 %vm16723_vm7, %v2434_v0  ;;  %v3326_v3 = vsel %vm16728_vm13, %v16727_v33, %v7737_v48  ;;  %vm16729_vm12 = vmmov %vm16654_vm1  ;;  %v7721_v0 = vunpack.i.l.bf16 %v12664_v43  ;;  %v7707_v43 = vunpack.i.h.bf16 %v12662_v60  ;;  %v7692_v60 = vunpack.i.h.bf16 %v12666_v10 }
 0x82b   :  { %3551 = vmatpush.msra.mxu1 %v3330_v51  ;;  %3591 = vmatpush.msra.mxu0 %v3331_v23  ;;  %v3327_v50 = vsel %vm16729_vm12, %v7737_v48, %v7546_v25  ;;  %vm16731_vm4 = vmmov %vm16654_vm1  ;;  %v7676_v10 = vunpack.i.l.bf16 %v12634_v18  ;;  %v3298_v31 = vsel %vm16654_vm1, %v16747_v24, %v7691_v53  ;;  %v7667_v26 = vunpack.i.h.bf16 %v12617_v63  ;;  %v16760_v25 = vld [vmem:[#allocation135_spill] sm:$0xff]  ;;  %v16762_v51 = vld [vmem:[#allocation69_spill] sm:$0xff] }
 0x82c   :  { %v3322_v5 = vsel %vm16731_vm4, %v16730_v14, %v7731_v11  ;;  %vm16732_vm15 = vmmov %vm16654_vm1  ;;  %v16749_v56 = vunpack.i.l.bf16 %v12658_v7  ;;  %v7496_v8 = vunpack.i.l.bf16 %v12493_v2  ;;  %v7662_v18 = vunpack.i.h.bf16 %v12621_v47  ;;  %v16756_v7 = vld [vmem:[#allocation72_spill] sm:$0xff] }
 0x82d   :  { %3552 = vmatpush.msra.mxu1 %v3326_v3  ;;  %3592 = vmatpush.msra.mxu0 %v3327_v50  ;;  %v3323_v9 = vsel %vm16732_vm15, %v7731_v11, %v7732_v62  ;;  %vm16734_vm5 = vmmov %vm16654_vm1  ;;  %v7661_v38 = vunpack.i.l.bf16 %v12621_v47  ;;  %v16753_v4 = vunpack.i.h.bf16 %v16752_v6  ;;  %v7652_v48 = vunpack.i.h.bf16 %v16756_v7  ;;  %v16761_v47 = vld [vmem:[#allocation77_spill] sm:$0xff]  ;;  %v16785_v24 = vld [vmem:[#allocation8_spill] sm:$0xff] }
 0x82e   :  { %v3319_v49 = vsel %vm16734_vm5, %v7557_v44, %v7481_v21  ;;  %vm16736_vm14 = vmmov %vm16654_vm1  ;;  %v16757_v20 = vunpack.i.l.bf16 %v12617_v63  ;;  %v7491_v62 = vunpack.i.l.bf16 %v16760_v25  ;;  %v7647_v11 = vunpack.i.h.bf16 %v16761_v47  ;;  %v16766_v63 = vld [vmem:[#allocation65_spill] sm:$0xff] }
 0x82f   :  { %3553 = vmatpush.msra.mxu1 %v3322_v5  ;;  %3593 = vmatpush.msra.mxu0 %v3323_v9  ;;  %v3314_v46 = vsel %vm16736_vm14, %v16735_v58, %v7721_v0  ;;  %vm16737_vm7 = vmmov %vm16654_vm1  ;;  %v7646_v12 = vunpack.i.l.bf16 %v16761_v47  ;;  %v16763_v23 = vunpack.i.h.bf16 %v16762_v51  ;;  %v7472_v3 = vunpack.i.h.bf16 %v16766_v63  ;;  %v16770_v5 = vld [vmem:[#allocation68_spill] sm:$0xff]  ;;  %v16789_v6 = vld [vmem:[#allocation13_spill] sm:$0xff] }
 0x830   :  { %v3315_v13 = vsel %vm16737_vm7, %v7721_v0, %v7722_v42  ;;  %vm16739_vm3 = vmmov %vm16654_vm1  ;;  %v16767_v50 = vunpack.i.l.bf16 %v16756_v7  ;;  %v16769_v0 = vld [vmem:[#allocation134_spill] sm:$0xff]  ;;  %v16771_v9 = vunpack.i.h.bf16 %v16770_v5  ;;  %v16791_v7 = vld [vmem:[#allocation11_spill] sm:$0xff] }
 0x831   :  { %3554 = vmatpush.msra.mxu1 %v3318_v32  ;;  %3594 = vmatpush.msra.mxu0 %v3319_v49  ;;  %v3310_v39 = vsel %vm16739_vm3, %v16738_v28, %v7712_v17  ;;  %vm16740_vm6 = vmmov %vm16654_vm1  ;;  %v7476_v14 = vunpack.i.l.bf16 %v16769_v0  ;;  %v16774_v32 = vunpack.i.l.bf16 %v16766_v63  ;;  %v16793_v47 = vld [vmem:[#allocation25_spill] sm:$0xff]  ;;  %v16798_v0 = vld [vmem:[#allocation39_spill] sm:$0xff] }
 0x832   :  { %v3311_v45 = vsel %vm16740_vm6, %v7712_v17, %v7511_v30  ;;  %vm16742_vm13 = vmmov %vm16654_vm1  ;;  %v3278_v21 = vsel %vm16654_vm1, %v16767_v50, %v7652_v48 }
 0x833   :  { %3555 = vmatpush.msra.mxu1 %v3314_v46  ;;  %3595 = vmatpush.msra.mxu0 %v3315_v13  ;;  %v3306_v59 = vsel %vm16742_vm13, %v16741_v41, %v7706_v34  ;;  %vm16743_vm12 = vmmov %vm16654_vm1  ;;  %v16778_v13 = vld [vmem:[#allocation50_spill] sm:$0xff] }
 0x834   :  { %v3307_v57 = vsel %vm16743_vm12, %v7706_v34, %v7707_v43  ;;  %vm16745_vm4 = vmmov %vm16654_vm1  ;;  %v16777_v43 = vld [vmem:[#allocation81_spill] sm:$0xff]  ;;  %v3640_v34 = vld [vmem:[%s15645_s9] sm:$0xff]  ;;  %s16799_s9 = smov 17  }
 0x835   :  { %3556 = vmatpush.msra.mxu1 %v3310_v39  ;;  %3596 = vmatpush.msra.mxu0 %v3311_v45  ;;  %v3302_v55 = vsel %vm16745_vm4, %v16744_v19, %v7697_v52  ;;  %vm16746_vm15 = vmmov %vm16654_vm1 }
 0x836   :  { %v3303_v29 = vsel %vm16746_vm15, %v7697_v52, %v7506_v54  ;;  %vm16748_vm5 = vmmov %vm16654_vm1  ;;  %3802 = vperm.xlu2 %7853, %v3640_v34  }
 0x837   :  { %3557 = vmatpush.msra.mxu1 %v3306_v59  ;;  %3597 = vmatpush.msra.mxu0 %v3307_v57  ;;  %v3299_v27 = vsel %vm16748_vm5, %v7691_v53, %v7692_v60  ;;  %vm16750_vm14 = vmmov %vm16654_vm1  ;;  %v16779_v53 = vld [vmem:[#allocation64_spill] sm:$0xff]  ;;  %v16780_v59 = vld [vmem:[#allocation66_spill] sm:$0xff] }
 0x838   :  { %v3294_v15 = vsel %vm16750_vm14, %v16749_v56, %v7682_v1  ;;  %vm16751_vm7 = vmmov %vm16654_vm1 }
 0x839   :  { %3558 = vmatpush.msra.mxu1 %v3302_v55  ;;  %3598 = vmatpush.msra.mxu0 %v3303_v29  ;;  %v3295_v61 = vsel %vm16751_vm7, %v7682_v1, %v7501_v36  ;;  %vm16754_vm3 = vmmov %vm16654_vm1  ;;  %v16783_v29 = vld [vmem:[#allocation9_spill] sm:$0xff] }
 0x83a   :  { %v3290_v40 = vsel %vm16754_vm3, %v16753_v4, %v7676_v10  ;;  %vm16755_vm6 = vmmov %vm16654_vm1 }
 0x83b   :  { %3559 = vmatpush.msra.mxu1 %v3298_v31  ;;  %3599 = vmatpush.msra.mxu0 %v3299_v27  ;;  %v3291_v37 = vsel %vm16755_vm6, %v7676_v10, %v7677_v35  ;;  %vm16758_vm13 = vmmov %vm16654_vm1  ;;  %v16784_v35 = vld [vmem:[#allocation28_spill] sm:$0xff] }
 0x83c   :  { %v3286_v2 = vsel %vm16758_vm13, %v16757_v20, %v7667_v26  ;;  %vm16759_vm12 = vmmov %vm16654_vm1  ;;  %v16786_v27 = vld [vmem:[#allocation24_spill] sm:$0xff]  ;;  %v16792_v20 = vld [vmem:[#allocation14_spill] sm:$0xff]  ;;  %vm16822_vm13 = vcmask 908288  }
 0x83d   :  { %3560 = vmatpush.msra.mxu1 %v3294_v15  ;;  %3600 = vmatpush.msra.mxu0 %v3295_v61  ;;  %v3287_v16 = vsel %vm16759_vm12, %v7667_v26, %v7496_v8  ;;  %vm16764_vm4 = vmmov %vm16654_vm1  ;;  %v16787_v61 = vld [vmem:[#allocation3_spill] sm:$0xff] }
 0x83e   :  { %v3282_v44 = vsel %vm16764_vm4, %v16763_v23, %v7661_v38  ;;  %vm16765_vm15 = vmmov %vm16654_vm1  ;;  %v16795_v23 = vld [vmem:[#allocation30_spill] sm:$0xff] }
 0x83f   :  { %3561 = vmatpush.msra.mxu1 %v3290_v40  ;;  %3601 = vmatpush.msra.mxu0 %v3291_v37  ;;  %v3283_v33 = vsel %vm16765_vm15, %v7661_v38, %v7662_v18  ;;  %vm16768_vm5 = vmmov %vm16654_vm1  ;;  %v16788_v18 = vld [vmem:[#allocation18_spill] sm:$0xff]  ;;  %v16790_v40 = vld [vmem:[#allocation21_spill] sm:$0xff]  ;;  %vm16830_vm15 = vcmask 769024  }
 0x840   :  { %v3279_v42 = vsel %vm16768_vm5, %v7652_v48, %v7491_v62  ;;  %vm16772_vm14 = vmmov %vm16654_vm1 }
 0x841   :  { %3562 = vmatpush.msra.mxu1 %v3286_v2  ;;  %3602 = vmatpush.msra.mxu0 %v3287_v16  ;;  %v3274_v17 = vsel %vm16772_vm14, %v16771_v9, %v7646_v12  ;;  %vm16773_vm7 = vmmov %vm16654_vm1 }
 0x842   :  { %v3275_v22 = vsel %vm16773_vm7, %v7646_v12, %v7647_v11  ;;  %vm16775_vm3 = vmmov %vm16654_vm1  ;;  %v16794_v12 = vld [vmem:[#allocation26_spill] sm:$0xff]  ;;  %vm16836_vm7 = vcmask 138240  }
 0x843   :  { %3563 = vmatpush.msra.mxu1 %v3282_v44  ;;  %3603 = vmatpush.msra.mxu0 %v3283_v33  ;;  %v3270_v49 = vsel %vm16775_vm3, %v16774_v32, %v7472_v3  ;;  %vm16776_vm6 = vmmov %vm16654_vm1  ;;  %v16796_v33 = vld [vmem:[#allocation31_spill] sm:$0xff] }
 0x844   :  { %v3271_v30 = vsel %vm16776_vm6, %v7472_v3, %v7476_v14  ;;  %vm16823_vm12 = vmmov %vm16822_vm13 }
 0x845   :  { %3564 = vmatpush.msra.mxu1 %v3278_v21  ;;  %3604 = vmatpush.msra.mxu0 %v3279_v42  ;;  %v16797_v21 = vld [vmem:[#allocation36_spill] sm:$0xff]  ;;  %vm16825_vm4 = vmmov %vm16823_vm12 }
 0x846   :  { %vm16831_vm1 = vmmov %vm16830_vm15 }
 0x847   :  { %3565 = vmatpush.msra.mxu1 %v3274_v17  ;;  %3605 = vmatpush.msra.mxu0 %v3275_v22  ;;  %vm16834_vm5 = vmmov %vm16831_vm1 }
 0x848   :  { %vm16835_vm14 = vmmov %vm16831_vm1 }
 0x849   :  { %3566 = vmatpush.msra.mxu1 %v3270_v49  ;;  %3606 = vmatpush.msra.mxu0 %v3271_v30  ;;  %vm16837_vm3 = vmmov %vm16836_vm7 }
 0x84a   :  { %3567 = vmatmul.f32.vlgmr.msra.gmra.mxu1 %v16777_v43  ;;  %3607 = vmatmul.f32.vlgmr.msra.gmra.mxu0 %v16777_v43  ;;  %vm16838_vm6 = vmmov %vm16837_vm3 }
 0x861   :  { %v3488_v58 = vpop.f32.mrf.mxu3  ;;  %v3528_v46 = vpop.f32.mrf.mxu2 }
 0x862   :  { %v3489_v52 = vadd.f32 %v3488_v58, %v16778_v13  ;;  %v3529_v28 = vadd.f32 %v3528_v46, %v16778_v13  ;;  %v16800_v58 = vld [vmem:[#allocation67_spill] sm:$0xff] }
 0x8a1   :  { %v3588_v5 = vpop.f32.mrf.mxu3 }
 0x8a7   :  { %v3508_v39 = vpop.f32.mrf.mxu1  ;;  %v3548_v45 = vpop.f32.mrf.mxu0 }
 0x8a8   :  { %v3509_v54 = vadd.f32 %v3508_v39, %v3489_v52  ;;  %v3549_v60 = vadd.f32 %v3548_v45, %v3529_v28  ;;  %v16801_v52 = vld [vmem:[#allocation84_spill] sm:$0xff] }
 0x8a9   :  { %v3628_v9 = vpop.f32.mrf.mxu2 }
 0x8aa   :  { %v3631_v41 = vadd.f32 %v3509_v54, %v16779_v53  ;;  %v3632_v57 = vadd.f32 %v3549_v60, %v16780_v59  ;;  %v16804_v60 = vld [vmem:[#allocation27_spill] sm:$0xff] }
 0x8ac   :  { %v13058_v1 = vmax.f32 %v3631_v41, 0.0  ;;  %v13060_v19 = vmax.f32 %v3632_v57, 0.0 }
 0x8ae   :  { %16781 = vst [vmem:[#allocation85_spill] sm:$0xff] %v13058_v1  ;;  %v7854_v55 = vpack.i.bf16 %v13060_v19, %v13058_v1  ;;  %v3653_v36 = vmul.f32 %v13058_v1, %v16783_v29  ;;  %v3654_v10 = vmul.f32 %v13060_v19, %v16784_v35  ;;  %v3649_v31 = vmul.f32 %v13058_v1, %v16785_v24 }
 0x8af   :  { %16782 = vst [vmem:[#allocation78_spill] sm:$0xff] %v13060_v19  ;;  %v3650_v26 = vmul.f32 %v13060_v19, %v16786_v27  ;;  %v3645_v8 = vmul.f32 %v13058_v1, %v16787_v61  ;;  %v3646_v38 = vmul.f32 %v13060_v19, %v16788_v18  ;;  %v3661_v4 = vmul.f32 %v13058_v1, %v16789_v6 }
 0x8b0   :  { %7855 = vrot.lane.b32.xlu1 %v7854_v55, %s9047_s26  ;;  %v7869_v56 = vpack.i.bf16 %v3654_v10, %v3653_v36  ;;  %v3662_v37 = vmul.f32 %v13060_v19, %v16790_v40  ;;  %v3657_v48 = vmul.f32 %v13058_v1, %v16791_v7  ;;  %v3658_v2 = vmul.f32 %v13060_v19, %v16792_v20  ;;  %v16806_v55 = vld [vmem:[#allocation23_spill] sm:$0xff]  ;;  %v16807_v10 = vld [vmem:[#allocation5_spill] sm:$0xff] }
 0x8b1   :  { %v7864_v15 = vpack.i.bf16 %v3650_v26, %v3649_v31  ;;  %v7859_v16 = vpack.i.bf16 %v3646_v38, %v3645_v8  ;;  %v3665_v11 = vmul.f32 %v13058_v1, %v16793_v47  ;;  %v3666_v51 = vmul.f32 %v13060_v19, %v16794_v12  ;;  %v16809_v38 = vld [vmem:[#allocation6_spill] sm:$0xff] }
 0x8b2   :  { %7870 = vrot.lane.b32.xlu2 %v7869_v56, %s9048_s27  ;;  %v7879_v25 = vpack.i.bf16 %v3662_v37, %v3661_v4  ;;  %v7874_v62 = vpack.i.bf16 %v3658_v2, %v3657_v48  ;;  %v3669_v44 = vmul.f32 %v13058_v1, %v16795_v23  ;;  %v3670_v63 = vmul.f32 %v13060_v19, %v16796_v33  ;;  %v16810_v37 = vld [vmem:[#allocation22_spill] sm:$0xff]  ;;  %v16811_v2 = vld [vmem:[#allocation20_spill] sm:$0xff] }
 0x8b3   :  { %7865 = vrot.lane.b32.xlu0 %v7864_v15, %s9055_s0  ;;  %v7884_v3 = vpack.i.bf16 %v3666_v51, %v3665_v11  ;;  %v3641_v42 = vmul.f32 %v13058_v1, %v16797_v21  ;;  %v3642_v14 = vmul.f32 %v13060_v19, %v16798_v0  ;;  %v16808_v15 = vld [vmem:[#allocation19_spill] sm:$0xff]  ;;  %v16813_v11 = vld [vmem:[#allocation17_spill] sm:$0xff] }
 0x8b4   :  { %v7889_v50 = vpack.i.bf16 %v3670_v63, %v3669_v44 }
 0x8b5   :  { %v7894_v30 = vpack.i.bf16 %v3642_v14, %v3641_v42  ;;  %v16815_v14 = vld [vmem:[#allocation32_spill] sm:$0xff] }
 0x8b8   :  { %7860 = vrot.lane.b32.xlu1 %v7859_v16, %s9050_s29 }
 0x8ba   :  { %7880 = vrot.lane.b32.xlu2 %v7879_v25, %s9058_s21  ;;  %v16812_v25 = vld [vmem:[#allocation16_spill] sm:$0xff] }
 0x8bb   :  { %7875 = vrot.lane.b32.xlu0 %v7874_v62, %s9057_s20 }
 0x8c0   :  { %7885 = vrot.lane.b32.xlu1 %v7884_v3, %s9059_s22 }
 0x8c3   :  { %7890 = vrot.lane.b32.xlu0 %v7889_v50, %s9060_s24  ;;  %v16814_v50 = vld [vmem:[#allocation29_spill] sm:$0xff] }
 0x8c7   :  { %v3568_v17 = vpop.f32.mrf.mxu1  ;;  %v3608_v22 = vpop.f32.mrf.mxu0 }
 0x8c8   :  { %v3569_v32 = vadd.f32 %v3568_v17, %v16778_v13  ;;  %v3609_v49 = vadd.f32 %v3608_v22, %v16778_v13  ;;  %v16805_v13 = vld [vmem:[#allocation12_spill] sm:$0xff]  ;;  %v16817_v22 = vld [vmem:[#allocation34_spill] sm:$0xff] }
 0x8ca   :  { %v3589_v43 = vadd.f32 %v3588_v5, %v3569_v32  ;;  %v3629_v34 = vadd.f32 %v3628_v9, %v3609_v49  ;;  %v16816_v9 = vld [vmem:[#allocation33_spill] sm:$0xff] }
 0x8cb   :  { %7895 = vrot.lane.b32.xlu0 %v7894_v30, %s16799_s9 }
 0x8cc   :  { %v3633_v46 = vadd.f32 %v3589_v43, %v16800_v58  ;;  %v3634_v28 = vadd.f32 %v3629_v34, %v16801_v52  ;;  %v16818_v43 = vld [vmem:[#allocation40_spill] sm:$0xff] }
 0x8ce   :  { %v13109_v39 = vmax.f32 %v3633_v46, 0.0  ;;  %v13111_v45 = vmax.f32 %v3634_v28, 0.0  ;;  %v16819_v46 = vld [vmem:[#allocation4_spill] sm:$0xff] }
 0x8d0   :  { %16802 = vst [vmem:[#allocation82_spill] sm:$0xff] %v13109_v39  ;;  %v7899_v54 = vpack.i.bf16 %v13111_v45, %v13109_v39  ;;  %v3655_v41 = vmul.f32 %v13109_v39, %v16804_v60  ;;  %v3656_v57 = vmul.f32 %v13111_v45, %v16805_v13  ;;  %v3651_v36 = vmul.f32 %v13109_v39, %v16806_v55 }
 0x8d1   :  { %16803 = vst [vmem:[#allocation97_spill] sm:$0xff] %v13111_v45  ;;  %v3652_v31 = vmul.f32 %v13111_v45, %v16807_v10  ;;  %v3647_v8 = vmul.f32 %v13109_v39, %v16808_v15  ;;  %v3648_v4 = vmul.f32 %v13111_v45, %v16809_v38  ;;  %v3663_v48 = vmul.f32 %v13109_v39, %v16810_v37 }
 0x8d2   :  { %7900 = vrot.lane.b32.xlu2 %v7899_v54, %s9047_s26  ;;  %v7914_v26 = vpack.i.bf16 %v3656_v57, %v3655_v41  ;;  %v3664_v16 = vmul.f32 %v13111_v45, %v16811_v2  ;;  %v3659_v62 = vmul.f32 %v13109_v39, %v16812_v25  ;;  %v3660_v51 = vmul.f32 %v13111_v45, %v16813_v11  ;;  %v13156_v41 = vpop.permute.xlu2 %3802 }
 0x8d3   :  { %v7909_v56 = vpack.i.bf16 %v3652_v31, %v3651_v36  ;;  %v7904_v44 = vpack.i.bf16 %v3648_v4, %v3647_v8  ;;  %v3667_v42 = vmul.f32 %v13109_v39, %v16814_v50  ;;  %v3668_v5 = vmul.f32 %v13111_v45, %v16815_v14 }
 0x8d4   :  { %7915 = vrot.lane.b32.xlu0 %v7914_v26, %s9048_s27  ;;  %v7924_v63 = vpack.i.bf16 %v3664_v16, %v3663_v48  ;;  %v7919_v3 = vpack.i.bf16 %v3660_v51, %v3659_v62  ;;  %v3671_v17 = vmul.f32 %v13109_v39, %v16816_v9  ;;  %v3672_v32 = vmul.f32 %v13111_v45, %v16817_v22  ;;  %v16820_v26 = vld [vmem:[#allocation44_spill] sm:$0xff] }
 0x8d5   :  { %7910 = vrot.lane.b32.xlu1 %v7909_v56, %s9055_s0  ;;  %v7929_v49 = vpack.i.bf16 %v3668_v5, %v3667_v42  ;;  %v3643_v34 = vmul.f32 %v13109_v39, %v16818_v43  ;;  %v3644_v28 = vmul.f32 %v13111_v45, %v16819_v46 }
 0x8d6   :  { %v7934_v30 = vpack.i.bf16 %v3672_v32, %v3671_v17  ;;  %v16821_v17 = vld [vmem:[#allocation41_spill] sm:$0xff] }
 0x8d7   :  { %v7939_v54 = vpack.i.bf16 %v3644_v28, %v3643_v34 }
 0x8da   :  { %7905 = vrot.lane.b32.xlu2 %v7904_v44, %s9050_s29 }
 0x8dc   :  { %7925 = vrot.lane.b32.xlu0 %v7924_v63, %s9058_s21 }
 0x8dd   :  { %7920 = vrot.lane.b32.xlu1 %v7919_v3, %s9057_s20 }
 0x8e2   :  { %7930 = vrot.lane.b32.xlu2 %v7929_v49, %s9059_s22 }
 0x8e5   :  { %7935 = vrot.lane.b32.xlu1 %v7934_v30, %s9060_s24 }
 0x8ed   :  { %7940 = vrot.lane.b32.xlu1 %v7939_v54, %s16799_s9 }
 0x90c   :  { %v13158_v57 = vpop.permute.xlu2 %7870 }
 0x90d   :  { %v15991_v36 = vunpack.i.h.bf16 %v13158_v57  ;;  %v7872_v31 = vunpack.i.l.bf16 %v13158_v57 }
 0x90f   :  { %v3717_v56 = vsel %vm121_vm0, %v16820_v26, %v7872_v31  ;;  %v3718_v8 = vsel %vm121_vm0, %v7872_v31, %v15991_v36 }
 0x910   :  { %v7949_v4 = vpack.i.bf16 %v3718_v8, %v3717_v56 }
 0x912   :  { %7950 = vrot.lane.b32.xlu1 %v7949_v4, %s16799_s9 }
 0x914   :  { %v13168_v16 = vpop.permute.xlu2 %7880 }
 0x922   :  { %v7856_v48 = vpop.permute.xlu1 %7855 }
 0x923   :  { %v7858_v44 = vunpack.i.h.bf16 %v7856_v48  ;;  %v7857_v63 = vunpack.i.l.bf16 %v7856_v48 }
 0x925   :  { %v7866_v62 = vpop.permute.xlu0 %7865  ;;  %v3733_v56 = vsel %vm16822_vm13, %v7857_v63, %v7858_v44  ;;  %vm16839_vm13 = vmmov %vm16837_vm3 }
 0x926   :  { %v7867_v36 = vunpack.i.l.bf16 %v7866_v62 }
 0x92a   :  { %v7861_v51 = vpop.permute.xlu1 %7860 }
 0x92b   :  { %v7863_v3 = vunpack.i.h.bf16 %v7861_v51  ;;  %v7862_v42 = vunpack.i.l.bf16 %v7861_v51 }
 0x92c   :  { %v7901_v5 = vpop.permute.xlu2 %7900 }
 0x92d   :  { %v3685_v32 = vsel %vm181_vm2, %v16821_v17, %v7862_v42  ;;  %v3686_v49 = vsel %vm181_vm2, %v7862_v42, %v7863_v3  ;;  %v7902_v30 = vunpack.i.l.bf16 %v7901_v5  ;;  %v7876_v34 = vpop.permute.xlu0 %7875 }
 0x92e   :  { %v7878_v28 = vunpack.i.h.bf16 %v7876_v34  ;;  %v7877_v54 = vunpack.i.l.bf16 %v7876_v34  ;;  %v7944_v31 = vpack.i.bf16 %v3686_v49, %v3685_v32 }
 0x92f   :  { %v3734_v8 = vsel %vm16823_vm12, %v7858_v44, %v7902_v30  ;;  %vm16840_vm12 = vmmov %vm16837_vm3 }
 0x930   :  { %v3748_v4 = vsel %vm403_vm9, %v7877_v54, %v7878_v28  ;;  %7945 = vrot.lane.b32.xlu2 %v7944_v31, %s16799_s9  ;;  %v7964_v48 = vpack.i.bf16 %v3734_v8, %v3733_v56  ;;  %v16824_v56 = vld [vmem:[#allocation43_spill] sm:$0xff] }
 0x931   :  { %v7954_v51 = vpack.i.bf16 %v3748_v4, %v7877_v54  ;;  %v3701_v8 = vsel %vm349_vm8, %v16824_v56, %v7867_v36  ;;  %v7903_v4 = vunpack.i.h.bf16 %v7901_v5 }
 0x932   :  { %7965 = vrot.lane.b32.xlu1 %v7964_v48, %s16799_s9  ;;  %v13178_v52 = vpop.permute.xlu1 %7885 }
 0x933   :  { %v15993_v42 = vunpack.i.h.bf16 %v13178_v52  ;;  %v7887_v34 = vunpack.i.l.bf16 %v13178_v52  ;;  %7955 = vrot.lane.b32.xlu0 %v7954_v51, %s16799_s9  ;;  %v3735_v51 = vsel %vm16825_vm4, %v7902_v30, %v7903_v4  ;;  %vm16841_vm4 = vmmov %vm16837_vm3 }
 0x934   :  { %v7906_v32 = vpop.permute.xlu2 %7905  ;;  %v7969_v45 = vpack.i.bf16 %v7903_v4, %v3735_v51  ;;  %v16826_v51 = vunpack.i.h.bf16 %v13158_v57  ;;  %v16827_v57 = vld [vmem:[#allocation46_spill] sm:$0xff] }
 0x935   :  { %v3780_v44 = vsel %vm443_vm11, %v7887_v34, %v15993_v42  ;;  %v7908_v49 = vunpack.i.h.bf16 %v7906_v32  ;;  %v13186_v31 = vpop.permute.xlu0 %7890  ;;  %v7868_v42 = vunpack.i.h.bf16 %v7866_v62 }
 0x936   :  { %v7959_v54 = vpack.i.bf16 %v3780_v44, %v7887_v34 }
 0x937   :  { %v7974_v48 = vpack.i.bf16 %v3701_v8, %v7908_v49  ;;  %v3702_v5 = vsel %vm349_vm8, %v7867_v36, %v7868_v42  ;;  %v7907_v8 = vunpack.i.l.bf16 %v7906_v32 }
 0x938   :  { %7960 = vrot.lane.b32.xlu2 %v7959_v54, %s16799_s9 }
 0x939   :  { %v3687_v4 = vsel %vm181_vm2, %v7863_v3, %v7907_v8 }
 0x93a   :  { %7975 = vrot.lane.b32.xlu1 %v7974_v48, %s16799_s9 }
 0x93d   :  { %v13193_v58 = vpop.permute.xlu0 %7895 }
 0x940   :  { %7970 = vrot.lane.b32.xlu2 %v7969_v45, %s16799_s9  ;;  %v3688_v45 = vsel %vm181_vm2, %v7907_v8, %v7908_v49 }
 0x941   :  { %v7984_v1 = vpack.i.bf16 %v3688_v45, %v3687_v4 }
 0x946   :  { %v7916_v39 = vpop.permute.xlu0 %7915 }
 0x947   :  { %v7918_v59 = vunpack.i.h.bf16 %v7916_v39  ;;  %v7911_v34 = vpop.permute.xlu1 %7910  ;;  %v7917_v30 = vunpack.i.l.bf16 %v7916_v39 }
 0x948   :  { %v7912_v44 = vunpack.i.l.bf16 %v7911_v34 }
 0x949   :  { %v7979_v53 = vpack.i.bf16 %v7857_v63, %v7918_v59  ;;  %v3719_v63 = vsel %vm121_vm0, %v16826_v51, %v7917_v30  ;;  %v3720_v36 = vsel %vm121_vm0, %v7917_v30, %v7918_v59  ;;  %v7931_v30 = vpop.permute.xlu2 %7930 }
 0x94a   :  { %v3703_v54 = vsel %vm349_vm8, %v7868_v42, %v7912_v44  ;;  %v7999_v3 = vpack.i.bf16 %v3720_v36, %v3719_v63  ;;  %v7883_v63 = vunpack.i.h.bf16 %v13168_v16 }
 0x94b   :  { %7980 = vrot.lane.b32.xlu0 %v7979_v53, %s16799_s9  ;;  %v7989_v48 = vpack.i.bf16 %v3703_v54, %v3702_v5  ;;  %v7913_v53 = vunpack.i.h.bf16 %v7911_v34 }
 0x94d   :  { %7990 = vrot.lane.b32.xlu2 %v7989_v48, %s16799_s9  ;;  %v3704_v59 = vsel %vm349_vm8, %v7912_v44, %v7913_v53  ;;  %v7933_v44 = vunpack.i.h.bf16 %v7931_v30 }
 0x94e   :  { %v7926_v42 = vpop.permute.xlu0 %7925  ;;  %v7994_v4 = vpack.i.bf16 %v7913_v53, %v3704_v59  ;;  %v7932_v59 = vunpack.i.l.bf16 %v7931_v30  ;;  %v4065_v30 = vld [vmem:[%s15646_s11] sm:$0xff] }
 0x94f   :  { %v7921_v62 = vpop.permute.xlu1 %7920  ;;  %v7928_v8 = vunpack.i.h.bf16 %v7926_v42  ;;  %v7927_v54 = vunpack.i.l.bf16 %v7926_v42  ;;  %v7893_v42 = vunpack.i.h.bf16 %v13186_v31 }
 0x950   :  { %v7923_v32 = vunpack.i.h.bf16 %v7921_v62  ;;  %v7922_v19 = vunpack.i.l.bf16 %v7921_v62 }
 0x951   :  { %v3767_v48 = vsel %vm423_vm10, %v7928_v8, %v16827_v57  ;;  %v3766_v34 = vsel %vm423_vm10, %v7927_v54, %v7928_v8 }
 0x952   :  { %v3749_v39 = vsel %vm403_vm9, %v7878_v28, %v7922_v19  ;;  %v3750_v5 = vsel %vm403_vm9, %v7922_v19, %v7923_v32  ;;  %v16828_v28 = vld [vmem:[#allocation45_spill] sm:$0xff]  ;;  %v8019_v51 = vpack.i.bf16 %v3767_v48, %v3766_v34 }
 0x953   :  { %7985 = vrot.lane.b32.xlu0 %v7984_v1, %s16799_s9  ;;  %v8004_v49 = vpack.i.bf16 %v3750_v5, %v3749_v39  ;;  %v3751_v19 = vsel %vm403_vm9, %v7923_v32, %v16828_v28  ;;  %v7882_v1 = vunpack.i.l.bf16 %v13168_v16  ;;  %v7892_v32 = vunpack.i.l.bf16 %v13186_v31  ;;  %v16829_v5 = vld [vmem:[#allocation48_spill] sm:$0xff] }
 0x954   :  { %v3765_v39 = vsel %vm423_vm10, %v7883_v63, %v7927_v54  ;;  %v16832_v31 = vunpack.i.h.bf16 %v13178_v52 }
 0x955   :  { %8000 = vrot.lane.b32.xlu2 %v7999_v3, %s16799_s9  ;;  %8005 = vrot.lane.b32.xlu1 %v8004_v49, %s16799_s9  ;;  %v8009_v62 = vpack.i.bf16 %v7882_v1, %v3751_v19  ;;  %v3764_v53 = vsel %vm423_vm10, %v7882_v1, %v7883_v63  ;;  %v3783_v3 = vsel %vm443_vm11, %v7933_v44, %v16829_v5 }
 0x956   :  { %v8014_v16 = vpack.i.bf16 %v3765_v39, %v3764_v53  ;;  %v3796_v8 = vsel %vm16831_vm1, %v7892_v32, %v7893_v42  ;;  %v8029_v34 = vpack.i.bf16 %v7892_v32, %v3783_v3  ;;  %v3781_v54 = vsel %vm443_vm11, %v16832_v31, %v7932_v59  ;;  %vm16843_vm1 = vmmov %vm16837_vm3 }
 0x957   :  { %v7936_v45 = vpop.permute.xlu1 %7935  ;;  %v3782_v19 = vsel %vm443_vm11, %v7932_v59, %v7933_v44 }
 0x958   :  { %v7937_v36 = vunpack.i.l.bf16 %v7936_v45  ;;  %v8024_v1 = vpack.i.bf16 %v3782_v19, %v3781_v54 }
 0x95a   :  { %v3797_v49 = vsel %vm16830_vm15, %v7893_v42, %v7937_v36  ;;  %vm16842_vm15 = vmmov %vm16837_vm3 }
 0x95b   :  { %7995 = vrot.lane.b32.xlu0 %v7994_v4, %s16799_s9  ;;  %v8034_v48 = vpack.i.bf16 %v3797_v49, %v3796_v8  ;;  %v7938_v4 = vunpack.i.h.bf16 %v7936_v45 }
 0x95d   :  { %8010 = vrot.lane.b32.xlu2 %v8009_v62, %s16799_s9  ;;  %8020 = vrot.lane.b32.xlu1 %v8019_v51, %s16799_s9  ;;  %v16833_v62 = vld [vmem:[#allocation49_spill] sm:$0xff]  ;;  %v3798_v63 = vsel %vm16835_vm14, %v7937_v36, %v7938_v4  ;;  %vm16845_vm14 = vmmov %vm16843_vm1 }
 0x95e   :  { %v3799_v51 = vsel %vm16834_vm5, %v7938_v4, %v16833_v62  ;;  %vm16844_vm5 = vmmov %vm16843_vm1 }
 0x95f   :  { %v8039_v42 = vpack.i.bf16 %v3799_v51, %v3798_v63  ;;  %v13249_v45 = vpop.permute.xlu1 %7940 }
 0x963   :  { %8015 = vrot.lane.b32.xlu0 %v8014_v16, %s16799_s9 }
 0x965   :  { %8035 = vrot.lane.b32.xlu2 %v8034_v48, %s16799_s9  ;;  %8030 = vrot.lane.b32.xlu1 %v8029_v34, %s16799_s9 }
 0x96b   :  { %8025 = vrot.lane.b32.xlu0 %v8024_v1, %s16799_s9 }
 0x96d   :  { %4227 = vperm.xlu2 %7853, %v4065_v30  }
 0x973   :  { %8040 = vrot.lane.b32.xlu0 %v8039_v42, %s16799_s9 }
 0x984   :  { %v13253_v53 = vpop.permute.xlu1 %7950 }
 0x98a   :  { %v13245_v52 = vpop.permute.xlu2 %7945 }
 0x992   :  { %v7961_v44 = vpop.permute.xlu2 %7960 }
 0x993   :  { %v7963_v42 = vunpack.i.h.bf16 %v7961_v44  ;;  %v7962_v62 = vunpack.i.l.bf16 %v7961_v44 }
 0x995   :  { %v3925_v56 = vsel %vm16838_vm6, %v7962_v62, %v7963_v42  ;;  %vm16849_vm6 = vmmov %vm16843_vm1 }
 0x99a   :  { %v13247_v32 = vpop.permute.xlu2 %7970 }
 0x9a4   :  { %v13257_v49 = vpop.permute.xlu1 %7965 }
 0x9a5   :  { %v7956_v16 = vpop.permute.xlu0 %7955 }
 0x9a6   :  { %v7957_v57 = vunpack.i.l.bf16 %v7956_v16 }
 0x9a7   :  { %v13251_v39 = vpop.permute.xlu2 %7990 }
 0x9ac   :  { %v13263_v59 = vpop.permute.xlu1 %7975 }
 0x9ad   :  { %v7978_v2 = vunpack.i.h.bf16 %v13263_v59 }
 0x9af   :  { %v13255_v3 = vpop.permute.xlu2 %8000 }
 0x9b7   :  { %v13259_v36 = vpop.permute.xlu2 %8010 }
 0x9b8   :  { %v8013_v17 = vunpack.i.h.bf16 %v13259_v36 }
 0x9bd   :  { %v13261_v8 = vpop.permute.xlu0 %7980 }
 0x9be   :  { %v7983_v43 = vunpack.i.h.bf16 %v13261_v8 }
 0x9bf   :  { %v13265_v48 = vpop.permute.xlu2 %8035 }
 0x9c0   :  { %v15997_v34 = vunpack.i.h.bf16 %v13265_v48  ;;  %v8037_v31 = vunpack.i.l.bf16 %v13265_v48  ;;  %v16852_v22 = vunpack.i.h.bf16 %v13265_v48 }
 0x9c2   :  { %v3930_v54 = vsel %vm16836_vm7, %v8037_v31, %v15997_v34  ;;  %v7958_v34 = vunpack.i.h.bf16 %v7956_v16  ;;  %v7967_v16 = vunpack.i.l.bf16 %v13257_v49  ;;  %vm16846_vm7 = vmmov %vm16843_vm1 }
 0x9c3   :  { %3999 = vmatpush.msrb.mxu1 %v3930_v54 }
 0x9c5   :  { %v13272_v19 = vpop.permute.xlu0 %7985 }
 0x9c7   :  { %v13274_v1 = vpop.permute.xlu1 %8005 }
 0x9c8   :  { %v15998_v62 = vunpack.i.l.bf16 %v13274_v1 }
 0x9cd   :  { %v13276_v4 = vpop.permute.xlu0 %7995 }
 0x9cf   :  { %v13278_v30 = vpop.permute.xlu1 %8020 }
 0x9d0   :  { %v8022_v48 = vunpack.i.l.bf16 %v13278_v30 }
 0x9d5   :  { %v13280_v51 = vpop.permute.xlu0 %8015 }
 0x9d6   :  { %v8017_v28 = vunpack.i.l.bf16 %v13280_v51  ;;  %v8018_v44 = vunpack.i.h.bf16 %v13280_v51  ;;  %v7993_v51 = vunpack.i.h.bf16 %v13251_v39 }
 0x9d7   :  { %v13282_v63 = vpop.permute.xlu1 %8030 }
 0x9d8   :  { %v8033_v5 = vunpack.i.h.bf16 %v13282_v63  ;;  %v3921_v37 = vsel %vm16839_vm13, %v8013_v17, %v8017_v28  ;;  %v3913_v17 = vsel %vm16842_vm15, %v7983_v43, %v7967_v16  ;;  %v3922_v9 = vsel %vm16843_vm1, %v8017_v28, %v8018_v44  ;;  %vm16851_vm13 = vmmov %vm16843_vm1 }
 0x9d9   :  { %v7897_v43 = vunpack.i.l.bf16 %v13193_v58  ;;  %vm16856_vm15 = vmmov %vm16843_vm1 }
 0x9da   :  { %v3929_v54 = vsel %vm16837_vm3, %v8033_v5, %v8037_v31  ;;  %v7953_v5 = vunpack.i.h.bf16 %v13253_v53  ;;  %v7952_v31 = vunpack.i.l.bf16 %v13253_v53  ;;  %v7947_v53 = vunpack.i.l.bf16 %v13245_v52  ;;  %vm16848_vm3 = vmmov %vm16843_vm1 }
 0x9db   :  { %3979 = vmatpush.msrb.mxu3 %v3929_v54 }
 0x9dd   :  { %3980 = vmatpush.msrb.mxu3 %v3925_v56  ;;  %v13289_v26 = vpop.permute.xlu0 %8025  ;;  %v3917_v56 = vsel %vm16840_vm12, %v7957_v57, %v7958_v34  ;;  %v7992_v57 = vunpack.i.l.bf16 %v13251_v39  ;;  %vm16853_vm12 = vmmov %vm16843_vm1 }
 0x9de   :  { %v8027_v46 = vunpack.i.l.bf16 %v13289_v26 }
 0x9df   :  { %3981 = vmatpush.msrb.mxu3 %v3921_v37  ;;  %v7948_v37 = vunpack.i.h.bf16 %v13245_v52 }
 0x9e0   :  { %v3926_v54 = vsel %vm16841_vm4, %v7963_v42, %v8027_v46  ;;  %vm16855_vm4 = vmmov %vm16843_vm1 }
 0x9e1   :  { %3982 = vmatpush.msrb.mxu3 %v3917_v56  ;;  %4000 = vmatpush.msrb.mxu1 %v3926_v54  ;;  %v3909_v56 = vsel %vm16844_vm5, %v7952_v31, %v7953_v5  ;;  %v3918_v54 = vsel %vm16845_vm14, %v7958_v34, %v15998_v62  ;;  %v8028_v31 = vunpack.i.h.bf16 %v13289_v26  ;;  %v3901_v34 = vsel %vm16849_vm6, %v7947_v53, %v7948_v37  ;;  %v13331_v26 = vld [vmem:[%s15647_s8] sm:$0xff]  ;;  %v16854_v53 = vld [vmem:[#allocation57_spill] sm:$0xff]  ;;  %vm16858_vm14 = vmmov %vm16843_vm1 }
 0x9e2   :  { %v7987_v62 = vunpack.i.l.bf16 %v13272_v19  ;;  %vm16857_vm5 = vcmask 588800   ;;  %vm16861_vm6 = vmmov %vm16843_vm1 }
 0x9e3   :  { %3983 = vmatpush.msrb.mxu3 %v3913_v17  ;;  %4001 = vmatpush.msrb.mxu1 %v3922_v9  ;;  %v3905_v9 = vsel %vm16846_vm7, %v7978_v2, %v7992_v57  ;;  %v16847_v17 = vunpack.i.h.bf16 %v13257_v49  ;;  %vm16859_vm7 = vmmov %vm16843_vm1 }
 0x9e5   :  { %3984 = vmatpush.msrb.mxu3 %v3909_v56  ;;  %v8041_v28 = vpop.permute.xlu0 %8040  ;;  %4002 = vmatpush.msrb.mxu1 %v3918_v54  ;;  %v3914_v42 = vsel %vm16848_vm3, %v7967_v16, %v16847_v17  ;;  %v16850_v54 = vunpack.i.l.bf16 %v13255_v3  ;;  %v7898_v16 = vunpack.i.h.bf16 %v13193_v58  ;;  %v8032_v17 = vunpack.i.l.bf16 %v13282_v63  ;;  %vm16860_vm3 = vmmov %vm16843_vm1 }
 0x9e6   :  { %v8042_v52 = vunpack.i.l.bf16 %v8041_v28  ;;  %v8043_v56 = vunpack.i.h.bf16 %v8041_v28  ;;  %v3906_v28 = vsel %vm16856_vm15, %v7992_v57, %v7993_v51  ;;  %v3902_v57 = vsel %vm16859_vm7, %v7948_v37, %v7987_v62  ;;  %vm16866_vm15 = vmmov %vm16857_vm5 }
 0x9e7   :  { %3985 = vmatpush.msrb.mxu3 %v3905_v9  ;;  %4003 = vmatpush.msrb.mxu1 %v3914_v42  ;;  %v3910_v39 = vsel %vm16851_vm13, %v7953_v5, %v16850_v54  ;;  %v3897_v42 = vsel %vm16855_vm4, %v16854_v53, %v7897_v43  ;;  %v8008_v5 = vunpack.i.h.bf16 %v13274_v1  ;;  %v8023_v9 = vunpack.i.h.bf16 %v13278_v30  ;;  %vm16862_vm13 = vmmov %vm16843_vm1 }
 0x9e8   :  { %v3931_v2 = vsel %vm16853_vm12, %v16852_v22, %v8042_v52  ;;  %v3927_v22 = vsel %vm16843_vm1, %v8027_v46, %v8028_v31  ;;  %v3932_v58 = vsel %vm16858_vm14, %v8042_v52, %v8043_v56  ;;  %v3928_v54 = vsel %vm16861_vm6, %v8028_v31, %v8032_v17  ;;  %vm16864_vm12 = vmmov %vm16843_vm1 }
 0x9e9   :  { %3986 = vmatpush.msrb.mxu3 %v3901_v34  ;;  %4004 = vmatpush.msrb.mxu1 %v3910_v39  ;;  %v3923_v34 = vsel %vm16860_vm3, %v8018_v44, %v8022_v48  ;;  %v3898_v46 = vsel %vm16862_vm13, %v7897_v43, %v7898_v16  ;;  %v7972_v30 = vunpack.i.l.bf16 %v13247_v32  ;;  %v8003_v63 = vunpack.i.h.bf16 %v13255_v3  ;;  %vm16865_vm4 = vmmov %vm16843_vm1 }
 0x9ea   :  { %4019 = vmatpush.msrb.mxu2 %v3931_v2  ;;  %v16863_v39 = vunpack.i.l.bf16 %v13274_v1  ;;  %v7973_v37 = vunpack.i.h.bf16 %v13247_v32  ;;  %v8012_v56 = vunpack.i.l.bf16 %v13259_v36  ;;  %v3924_v44 = vsel %vm16865_vm4, %v8022_v48, %v8023_v9  ;;  %vm16870_vm14 = vmmov %vm16843_vm1 }
 0x9eb   :  { %3987 = vmatpush.msrb.mxu3 %v3897_v42  ;;  %4005 = vmatpush.msrb.mxu1 %v3906_v28  ;;  %v7997_v43 = vunpack.i.l.bf16 %v13276_v4  ;;  %v16867_v31 = vunpack.i.h.bf16 %v13257_v49  ;;  %v7982_v1 = vunpack.i.l.bf16 %v13261_v8  ;;  %v7988_v36 = vunpack.i.h.bf16 %v13272_v19  ;;  %vm16871_vm7 = vmmov %vm16843_vm1 }
 0x9ec   :  { %6268 = vmatmul.msk.f32.vlgmr.msrb.gmra.mxu3 %vm16857_vm5, %v13331_v26  ;;  %4020 = vmatpush.msrb.mxu2 %v3927_v22  ;;  %v3919_v52 = vsel %vm16864_vm12, %v16863_v39, %v8008_v5  ;;  %vm16868_vm5 = vmmov %vm16843_vm1  ;;  %v16869_v42 = vunpack.i.l.bf16 %v13255_v3  ;;  %v7998_v48 = vunpack.i.h.bf16 %v13276_v4  ;;  %v3916_v22 = vsel %vm16871_vm7, %v7972_v30, %v7973_v37 }
 0x9ed   :  { %4039 = vmatpush.msra.mxu3 %v3932_v58  ;;  %4006 = vmatpush.msrb.mxu1 %v3902_v57  ;;  %v3915_v2 = vsel %vm16843_vm1, %v16867_v31, %v7972_v30  ;;  %v3920_v32 = vsel %vm16868_vm5, %v8008_v5, %v8012_v56  ;;  %v7942_v49 = vunpack.i.l.bf16 %v13249_v45  ;;  %vm16872_vm3 = vmmov %vm16843_vm1  ;;  %v7943_v3 = vunpack.i.h.bf16 %v13249_v45 }
 0x9ee   :  { %4021 = vmatpush.msrb.mxu2 %v3923_v34  ;;  %v3911_v28 = vsel %vm16870_vm14, %v16869_v42, %v8003_v63  ;;  %v3907_v8 = vsel %vm16872_vm3, %v7993_v51, %v7997_v43  ;;  %vm16873_vm6 = vmmov %vm16843_vm1  ;;  %v7977_v9 = vunpack.i.l.bf16 %v13263_v59 }
 0x9ef   :  { %4040 = vmatpush.msra.mxu3 %v3928_v54  ;;  %4007 = vmatpush.msrb.mxu1 %v3898_v46  ;;  %v3912_v5 = vsel %vm16873_vm6, %v8003_v63, %v7982_v1  ;;  %vm16874_vm13 = vmmov %vm16843_vm1 }
 0x9f0   :  { %4022 = vmatpush.msrb.mxu2 %v3919_v52  ;;  %6269 = vmatmul.msk.f32.vlgmr.msrb.gmra.mxu1 %vm16866_vm15, %v13331_v26  ;;  %v3903_v19 = vsel %vm16874_vm13, %v7987_v62, %v7988_v36  ;;  %vm16875_vm12 = vmmov %vm16843_vm1 }
 0x9f1   :  { %4041 = vmatpush.msra.mxu3 %v3924_v44  ;;  %v3908_v4 = vsel %vm16875_vm12, %v7997_v43, %v7998_v48  ;;  %vm16876_vm4 = vmmov %vm16843_vm1  ;;  %vm16888_vm12 = vcmask 908288  }
 0x9f2   :  { %4023 = vmatpush.msrb.mxu2 %v3915_v2  ;;  %v3899_v17 = vsel %vm16876_vm4, %v7898_v16, %v7942_v49  ;;  %vm16877_vm15 = vmmov %vm16843_vm1  ;;  %vm16878_vm1 = vcmask 588800  }
 0x9f3   :  { %4042 = vmatpush.msra.mxu3 %v3920_v32  ;;  %v3904_v58 = vsel %vm16877_vm15, %v7988_v36, %v7977_v9  ;;  %vm16879_vm5 = vmmov %vm16872_vm3 }
 0x9f4   :  { %4024 = vmatpush.msrb.mxu2 %v3911_v28  ;;  %v3900_v51 = vsel %vm16879_vm5, %v7942_v49, %v7943_v3  ;;  %vm16880_vm14 = vmmov %vm16878_vm1 }
 0x9f5   :  { %4043 = vmatpush.msra.mxu3 %v3916_v22  ;;  %vm16889_vm4 = vmmov %vm16888_vm12 }
 0x9f6   :  { %4025 = vmatpush.msrb.mxu2 %v3907_v8  ;;  %vm16892_vm15 = vmmov %vm16889_vm4 }
 0x9f7   :  { %4044 = vmatpush.msra.mxu3 %v3912_v5 }
 0x9f8   :  { %4026 = vmatpush.msrb.mxu2 %v3903_v19 }
 0x9f9   :  { %4045 = vmatpush.msra.mxu3 %v3908_v4 }
 0x9fa   :  { %4027 = vmatpush.msrb.mxu2 %v3899_v17 }
 0x9fb   :  { %4046 = vmatpush.msra.mxu3 %v3904_v58  ;;  %6270 = vmatmul.msk.f32.vlgmr.msrb.gmra.mxu2 %vm16878_vm1, %v13331_v26  ;;  %vm16897_vm1 = vcmask 769024  }
 0x9fc   :  { %vm16898_vm5 = vmmov %vm16897_vm1 }
 0x9fd   :  { %4047 = vmatpush.msra.mxu3 %v3900_v51 }
 0x9fe   :  { %6271 = vmatmul.msk.f32.vlgmr.msra.gmra.mxu3 %vm16880_vm14, %v13331_v26  ;;  %vm16902_vm14 = vmmov %vm16897_vm1 }
 0xa6d   :  { %v4009_v45 = vpop.f32.mrf.mxu1 }
 0xa6e   :  { %v4010_v59 = vadd.f32 %v4009_v45, %v13156_v41 }
 0xa6f   :  { %v3989_v62 = vpop.f32.mrf.mxu3 }
 0xa70   :  { %vm4053_vm7 = vcmp.ge.f32.partialorder %v4010_v59, 0.0  ;;  %v4057_v57 = vmul.f32 0.25, %v4010_v59  ;;  %v3990_v16 = vadd.f32 %v3989_v62, %v13156_v41 }
 0xa72   :  { %v4061_v34 = vsel %vm4053_vm7, %v4010_v59, %v4057_v57  ;;  %vm4052_vm3 = vcmp.ge.f32.partialorder %v3990_v16, 0.0  ;;  %v4056_v54 = vmul.f32 0.25, %v3990_v16  ;;  %vm16903_vm7 = vmmov %vm16897_vm1 }
 0xa73   :  { %v4079_v46 = vmul.f32 %v4061_v34, %v16784_v35  ;;  %v4075_v30 = vmul.f32 %v4061_v34, %v16786_v27  ;;  %v4071_v43 = vmul.f32 %v4061_v34, %v16788_v18  ;;  %v4087_v2 = vmul.f32 %v4061_v34, %v16790_v40 }
 0xa74   :  { %v4060_v63 = vsel %vm4052_vm3, %v3990_v16, %v4056_v54  ;;  %v4083_v32 = vmul.f32 %v4061_v34, %v16792_v20  ;;  %v4091_v5 = vmul.f32 %v4061_v34, %v16794_v12  ;;  %v4095_v4 = vmul.f32 %v4061_v34, %v16796_v33 }
 0xa75   :  { %v8044_v39 = vpack.i.bf16 %v4061_v34, %v4060_v63  ;;  %v4078_v52 = vmul.f32 %v4060_v63, %v16783_v29  ;;  %v4074_v26 = vmul.f32 %v4060_v63, %v16785_v24  ;;  %v4070_v44 = vmul.f32 %v4060_v63, %v16787_v61 }
 0xa76   :  { %v4086_v31 = vmul.f32 %v4060_v63, %v16789_v6  ;;  %v4082_v1 = vmul.f32 %v4060_v63, %v16791_v7  ;;  %v4090_v8 = vmul.f32 %v4060_v63, %v16793_v47  ;;  %v4094_v9 = vmul.f32 %v4060_v63, %v16795_v23 }
 0xa77   :  { %8045 = vrot.lane.b32.xlu1 %v8044_v39, %s9047_s26  ;;  %v8059_v37 = vpack.i.bf16 %v4079_v46, %v4078_v52  ;;  %v8054_v56 = vpack.i.bf16 %v4075_v30, %v4074_v26  ;;  %v8049_v36 = vpack.i.bf16 %v4071_v43, %v4070_v44  ;;  %v4066_v16 = vmul.f32 %v4060_v63, %v16797_v21 }
 0xa78   :  { %v8069_v48 = vpack.i.bf16 %v4087_v2, %v4086_v31  ;;  %v8064_v22 = vpack.i.bf16 %v4083_v32, %v4082_v1  ;;  %v8074_v58 = vpack.i.bf16 %v4091_v5, %v4090_v8  ;;  %v8079_v59 = vpack.i.bf16 %v4095_v4, %v4094_v9  ;;  %v16881_v32 = vld [vmem:[#allocation34_spill] sm:$0xff]  ;;  %v16886_v4 = vld [vmem:[#allocation40_spill] sm:$0xff] }
 0xa79   :  { %8060 = vrot.lane.b32.xlu2 %v8059_v37, %s9048_s27  ;;  %8055 = vrot.lane.b32.xlu0 %v8054_v56, %s9055_s0  ;;  %v4067_v54 = vmul.f32 %v4061_v34, %v16798_v0  ;;  %v16884_v8 = vld [vmem:[#allocation22_spill] sm:$0xff]  ;;  %vm16904_vm3 = vcmask 138240  }
 0xa7b   :  { %v8084_v52 = vpack.i.bf16 %v4067_v54, %v4066_v16  ;;  %v16887_v16 = vld [vmem:[#allocation44_spill] sm:$0xff] }
 0xa7e   :  { %v4029_v42 = vpop.f32.mrf.mxu2 }
 0xa7f   :  { %v4030_v28 = vadd.f32 %v4029_v42, %v13156_v41  ;;  %8050 = vrot.lane.b32.xlu1 %v8049_v36, %s9050_s29  ;;  %v16882_v42 = vld [vmem:[#allocation33_spill] sm:$0xff] }
 0xa81   :  { %v4049_v49 = vpop.f32.mrf.mxu3  ;;  %8070 = vrot.lane.b32.xlu2 %v8069_v48, %s9058_s21  ;;  %8065 = vrot.lane.b32.xlu0 %v8064_v22, %s9057_s20  ;;  %v4058_v19 = vmul.f32 0.25, %v4030_v28  ;;  %vm4054_vm6 = vcmp.ge.f32.partialorder %v4030_v28, 0.0  ;;  %v16883_v48 = vld [vmem:[#allocation20_spill] sm:$0xff] }
 0xa82   :  { %v4050_v3 = vadd.f32 %v4049_v49, %v13156_v41 }
 0xa83   :  { %v4062_v51 = vsel %vm4054_vm6, %v4030_v28, %v4058_v19  ;;  %vm16905_vm6 = vmmov %vm16904_vm3 }
 0xa84   :  { %vm4055_vm13 = vcmp.ge.f32.partialorder %v4050_v3, 0.0  ;;  %v4059_v17 = vmul.f32 0.25, %v4050_v3  ;;  %v4076_v57 = vmul.f32 %v4062_v51, %v16806_v55  ;;  %v4072_v39 = vmul.f32 %v4062_v51, %v16808_v15 }
 0xa85   :  { %v4084_v56 = vmul.f32 %v4062_v51, %v16812_v25  ;;  %v4080_v43 = vmul.f32 %v4062_v51, %v16804_v60  ;;  %v4092_v31 = vmul.f32 %v4062_v51, %v16814_v50  ;;  %v4096_v28 = vmul.f32 %v4062_v51, %v16882_v42 }
 0xa86   :  { %v4063_v45 = vsel %vm4055_vm13, %v4050_v3, %v4059_v17  ;;  %v4088_v5 = vmul.f32 %v4062_v51, %v16884_v8  ;;  %v16885_v3 = vld [vmem:[#allocation4_spill] sm:$0xff]  ;;  %v4068_v17 = vmul.f32 %v4062_v51, %v16886_v4  ;;  %vm16906_vm13 = vmmov %vm16904_vm3 }
 0xa87   :  { %8075 = vrot.lane.b32.xlu1 %v8074_v58, %s9059_s22  ;;  %v8089_v62 = vpack.i.bf16 %v4063_v45, %v4062_v51  ;;  %v4077_v41 = vmul.f32 %v4063_v45, %v16807_v10  ;;  %v4073_v46 = vmul.f32 %v4063_v45, %v16809_v38  ;;  %v4085_v37 = vmul.f32 %v4063_v45, %v16813_v11 }
 0xa88   :  { %v4081_v63 = vmul.f32 %v4063_v45, %v16805_v13  ;;  %v4093_v34 = vmul.f32 %v4063_v45, %v16815_v14  ;;  %v4097_v36 = vmul.f32 %v4063_v45, %v16881_v32  ;;  %v4089_v22 = vmul.f32 %v4063_v45, %v16883_v48 }
 0xa89   :  { %8080 = vrot.lane.b32.xlu0 %v8079_v59, %s9060_s24  ;;  %8090 = vrot.lane.b32.xlu2 %v8089_v62, %s9047_s26  ;;  %v8099_v30 = vpack.i.bf16 %v4077_v41, %v4076_v57  ;;  %v8094_v26 = vpack.i.bf16 %v4073_v46, %v4072_v39  ;;  %v8109_v44 = vpack.i.bf16 %v4085_v37, %v4084_v56  ;;  %v13439_v59 = vpop.permute.xlu2 %4227 }
 0xa8a   :  { %v8104_v2 = vpack.i.bf16 %v4081_v63, %v4080_v43  ;;  %v8119_v1 = vpack.i.bf16 %v4093_v34, %v4092_v31  ;;  %v8124_v49 = vpack.i.bf16 %v4097_v36, %v4096_v28  ;;  %v8114_v19 = vpack.i.bf16 %v4089_v22, %v4088_v5  ;;  %v16890_v36 = vld [vmem:[#allocation43_spill] sm:$0xff] }
 0xa8b   :  { %v4069_v9 = vmul.f32 %v4063_v45, %v16885_v3 }
 0xa8d   :  { %v8129_v58 = vpack.i.bf16 %v4069_v9, %v4068_v17 }
 0xa8f   :  { %8100 = vrot.lane.b32.xlu1 %v8099_v30, %s9055_s0 }
 0xa91   :  { %8085 = vrot.lane.b32.xlu0 %v8084_v52, %s16799_s9  ;;  %8095 = vrot.lane.b32.xlu2 %v8094_v26, %s9050_s29 }
 0xa97   :  { %8110 = vrot.lane.b32.xlu1 %v8109_v44, %s9057_s20 }
 0xa99   :  { %8105 = vrot.lane.b32.xlu0 %v8104_v2, %s9048_s27  ;;  %8120 = vrot.lane.b32.xlu2 %v8119_v1, %s9059_s22 }
 0xa9f   :  { %8125 = vrot.lane.b32.xlu1 %v8124_v49, %s9060_s24 }
 0xaa1   :  { %8115 = vrot.lane.b32.xlu0 %v8114_v19, %s9058_s21  ;;  %v16891_v19 = vld [vmem:[#allocation41_spill] sm:$0xff] }
 0xaa7   :  { %8130 = vrot.lane.b32.xlu1 %v8129_v58, %s16799_s9 }
 0xad3   :  { %v13441_v62 = vpop.permute.xlu2 %8060 }
 0xad4   :  { %v15999_v41 = vunpack.i.h.bf16 %v13441_v62  ;;  %v8062_v57 = vunpack.i.l.bf16 %v13441_v62 }
 0xad6   :  { %v4142_v54 = vsel %vm121_vm0, %v16887_v16, %v8062_v57  ;;  %v4143_v45 = vsel %vm121_vm0, %v8062_v57, %v15999_v41 }
 0xad7   :  { %v8139_v46 = vpack.i.bf16 %v4143_v45, %v4142_v54 }
 0xad9   :  { %8140 = vrot.lane.b32.xlu1 %v8139_v46, %s16799_s9 }
 0xadb   :  { %v13451_v51 = vpop.permute.xlu2 %8070 }
 0xae3   :  { %v8091_v30 = vpop.permute.xlu2 %8090 }
 0xae4   :  { %v8092_v52 = vunpack.i.l.bf16 %v8091_v30 }
 0xae9   :  { %v8046_v39 = vpop.permute.xlu1 %8045 }
 0xaea   :  { %v8048_v26 = vunpack.i.h.bf16 %v8046_v39  ;;  %v8047_v37 = vunpack.i.l.bf16 %v8046_v39 }
 0xaeb   :  { %v8056_v56 = vpop.permute.xlu0 %8055  ;;  %v8096_v31 = vpop.permute.xlu2 %8095 }
 0xaec   :  { %v4158_v63 = vsel %vm16888_vm12, %v8047_v37, %v8048_v26  ;;  %v4159_v34 = vsel %vm16889_vm4, %v8048_v26, %v8092_v52  ;;  %v8057_v43 = vunpack.i.l.bf16 %v8056_v56  ;;  %v8098_v2 = vunpack.i.h.bf16 %v8096_v31  ;;  %vm16907_vm12 = vmmov %vm16904_vm3 }
 0xaed   :  { %v8154_v44 = vpack.i.bf16 %v4159_v34, %v4158_v63  ;;  %vm16908_vm4 = vmmov %vm16904_vm3 }
 0xaee   :  { %v4126_v28 = vsel %vm349_vm8, %v16890_v36, %v8057_v43 }
 0xaef   :  { %8155 = vrot.lane.b32.xlu1 %v8154_v44, %s16799_s9  ;;  %v8164_v57 = vpack.i.bf16 %v4126_v28, %v8098_v2 }
 0xaf1   :  { %v8051_v1 = vpop.permute.xlu1 %8050 }
 0xaf2   :  { %v8053_v22 = vunpack.i.h.bf16 %v8051_v1  ;;  %v8052_v49 = vunpack.i.l.bf16 %v8051_v1 }
 0xaf3   :  { %v8066_v5 = vpop.permute.xlu0 %8065 }
 0xaf4   :  { %v4110_v9 = vsel %vm181_vm2, %v16891_v19, %v8052_v49  ;;  %v4111_v17 = vsel %vm181_vm2, %v8052_v49, %v8053_v22  ;;  %v8068_v58 = vunpack.i.h.bf16 %v8066_v5  ;;  %v8067_v54 = vunpack.i.l.bf16 %v8066_v5 }
 0xaf5   :  { %v8134_v45 = vpack.i.bf16 %v4111_v17, %v4110_v9  ;;  %v8093_v49 = vunpack.i.h.bf16 %v8091_v30 }
 0xaf6   :  { %v4173_v46 = vsel %vm403_vm9, %v8067_v54, %v8068_v58 }
 0xaf7   :  { %8135 = vrot.lane.b32.xlu2 %v8134_v45, %s16799_s9  ;;  %8165 = vrot.lane.b32.xlu1 %v8164_v57, %s16799_s9  ;;  %v8144_v39 = vpack.i.bf16 %v4173_v46, %v8067_v54  ;;  %v4160_v9 = vsel %vm16892_vm15, %v8092_v52, %v8093_v49  ;;  %v8058_v45 = vunpack.i.h.bf16 %v8056_v56  ;;  %v8097_v56 = vunpack.i.l.bf16 %v8096_v31  ;;  %vm16909_vm15 = vmmov %vm16904_vm3 }
 0xaf8   :  { %v8159_v57 = vpack.i.bf16 %v8093_v49, %v4160_v9 }
 0xaf9   :  { %v13464_v26 = vpop.permute.xlu1 %8075  ;;  %8145 = vrot.lane.b32.xlu0 %v8144_v39, %s16799_s9  ;;  %v4127_v30 = vsel %vm349_vm8, %v8057_v43, %v8058_v45 }
 0xafa   :  { %v16000_v63 = vunpack.i.h.bf16 %v13464_v26  ;;  %v8077_v34 = vunpack.i.l.bf16 %v13464_v26 }
 0xafb   :  { %v13469_v44 = vpop.permute.xlu0 %8080 }
 0xafc   :  { %v4205_v1 = vsel %vm443_vm11, %v8077_v34, %v16000_v63 }
 0xafd   :  { %v8149_v28 = vpack.i.bf16 %v4205_v1, %v8077_v34 }
 0xaff   :  { %8150 = vrot.lane.b32.xlu2 %v8149_v28, %s16799_s9 }
 0xb01   :  { %v8101_v5 = vpop.permute.xlu1 %8100 }
 0xb02   :  { %v8102_v54 = vunpack.i.l.bf16 %v8101_v5 }
 0xb03   :  { %v13476_v17 = vpop.permute.xlu0 %8085 }
 0xb04   :  { %v4128_v39 = vsel %vm349_vm8, %v8058_v45, %v8102_v54 }
 0xb05   :  { %v8179_v28 = vpack.i.bf16 %v4128_v39, %v4127_v30  ;;  %v16894_v30 = vld [vmem:[#allocation46_spill] sm:$0xff] }
 0xb07   :  { %8160 = vrot.lane.b32.xlu2 %v8159_v57, %s16799_s9  ;;  %v16893_v57 = vunpack.i.h.bf16 %v13441_v62  ;;  %v8121_v62 = vpop.permute.xlu2 %8120 }
 0xb09   :  { %v8111_v46 = vpop.permute.xlu1 %8110 }
 0xb0a   :  { %v8113_v41 = vunpack.i.h.bf16 %v8111_v46  ;;  %v8112_v19 = vunpack.i.l.bf16 %v8111_v46 }
 0xb0b   :  { %v8106_v63 = vpop.permute.xlu0 %8105 }
 0xb0c   :  { %v4174_v34 = vsel %vm403_vm9, %v8068_v58, %v8112_v19  ;;  %v4175_v1 = vsel %vm403_vm9, %v8112_v19, %v8113_v41  ;;  %v8108_v52 = vunpack.i.h.bf16 %v8106_v63  ;;  %v8107_v9 = vunpack.i.l.bf16 %v8106_v63 }
 0xb0d   :  { %v8194_v36 = vpack.i.bf16 %v4175_v1, %v4174_v34  ;;  %v4112_v19 = vsel %vm181_vm2, %v8053_v22, %v8097_v56  ;;  %v8103_v1 = vunpack.i.h.bf16 %v8101_v5  ;;  %v16895_v22 = vld [vmem:[#allocation45_spill] sm:$0xff]  ;;  %v8082_v5 = vunpack.i.l.bf16 %v13469_v44 }
 0xb0e   :  { %v8169_v49 = vpack.i.bf16 %v8047_v37, %v8108_v52  ;;  %v4144_v43 = vsel %vm121_vm0, %v16893_v57, %v8107_v9  ;;  %v4145_v58 = vsel %vm121_vm0, %v8107_v9, %v8108_v52  ;;  %v4113_v37 = vsel %vm181_vm2, %v8097_v56, %v8098_v2 }
 0xb0f   :  { %8180 = vrot.lane.b32.xlu2 %v8179_v28, %s16799_s9  ;;  %8195 = vrot.lane.b32.xlu1 %v8194_v36, %s16799_s9  ;;  %v8189_v39 = vpack.i.bf16 %v4145_v58, %v4144_v43  ;;  %v8174_v34 = vpack.i.bf16 %v4113_v37, %v4112_v19  ;;  %v4176_v28 = vsel %vm403_vm9, %v8113_v41, %v16895_v22  ;;  %v8072_v2 = vunpack.i.l.bf16 %v13451_v51  ;;  %v16896_v19 = vld [vmem:[#allocation48_spill] sm:$0xff] }
 0xb10   :  { %8170 = vrot.lane.b32.xlu0 %v8169_v49, %s16799_s9  ;;  %v8123_v49 = vunpack.i.h.bf16 %v8121_v62  ;;  %v4129_v9 = vsel %vm349_vm8, %v8102_v54, %v8103_v1  ;;  %v8083_v41 = vunpack.i.h.bf16 %v13469_v44  ;;  %v8073_v37 = vunpack.i.h.bf16 %v13451_v51  ;;  %v4495_v44 = vld [vmem:[%s15648_s13 + $0x10] sm:$0xff] }
 0xb11   :  { %v8126_v56 = vpop.permute.xlu1 %8125  ;;  %v8199_v57 = vpack.i.bf16 %v8072_v2, %v4176_v28  ;;  %v8184_v43 = vpack.i.bf16 %v8103_v1, %v4129_v9  ;;  %v8122_v51 = vunpack.i.l.bf16 %v8121_v62  ;;  %v4493_v28 = vld [vmem:[%s15648_s13] sm:$0xff]  ;;  %v16901_v62 = vld [vmem:[#allocation49_spill] sm:$0xff] }
 0xb12   :  { %v8127_v58 = vunpack.i.l.bf16 %v8126_v56 }
 0xb13   :  { %v8116_v45 = vpop.permute.xlu0 %8115 }
 0xb14   :  { %v8118_v46 = vunpack.i.h.bf16 %v8116_v45  ;;  %v8117_v63 = vunpack.i.l.bf16 %v8116_v45  ;;  %v4208_v45 = vsel %vm443_vm11, %v8123_v49, %v16896_v19  ;;  %v4222_v54 = vsel %vm16897_vm1, %v8083_v41, %v8127_v58  ;;  %vm16910_vm1 = vmmov %vm16904_vm3 }
 0xb16   :  { %v4192_v36 = vsel %vm423_vm10, %v8118_v46, %v16894_v30  ;;  %v4191_v31 = vsel %vm423_vm10, %v8117_v63, %v8118_v46  ;;  %v8219_v46 = vpack.i.bf16 %v8082_v5, %v4208_v45  ;;  %v4496_v45 = vld [vmem:[%s15648_s13 + $0x18] sm:$0xff] }
 0xb17   :  { %8190 = vrot.lane.b32.xlu2 %v8189_v39, %s16799_s9  ;;  %v8209_v52 = vpack.i.bf16 %v4192_v36, %v4191_v31  ;;  %v4190_v39 = vsel %vm423_vm10, %v8073_v37, %v8117_v63  ;;  %v4221_v36 = vsel %vm16898_vm5, %v8082_v5, %v8083_v41  ;;  %v8128_v5 = vunpack.i.h.bf16 %v8126_v56  ;;  %vm16911_vm5 = vmmov %vm16910_vm1 }
 0xb18   :  { %8175 = vrot.lane.b32.xlu0 %v8174_v34, %s16799_s9  ;;  %v4189_v34 = vsel %vm423_vm10, %v8072_v2, %v8073_v37  ;;  %v8224_v1 = vpack.i.bf16 %v4222_v54, %v4221_v36  ;;  %v4207_v2 = vsel %vm443_vm11, %v8122_v51, %v8123_v49  ;;  %v4494_v49 = vld [vmem:[%s15648_s13 + $0x8] sm:$0xff] }
 0xb19   :  { %8210 = vrot.lane.b32.xlu1 %v8209_v52, %s16799_s9  ;;  %v8204_v31 = vpack.i.bf16 %v4190_v39, %v4189_v34  ;;  %v16899_v52 = vunpack.i.h.bf16 %v13464_v26  ;;  %v4223_v26 = vsel %vm16903_vm7, %v8127_v58, %v8128_v5  ;;  %v13543_v54 = vpop.permute.xlu1 %8130  ;;  %vm16913_vm7 = vmmov %vm16910_vm1 }
 0xb1b   :  { %v4206_v63 = vsel %vm443_vm11, %v16899_v52, %v8122_v51 }
 0xb1c   :  { %v8214_v9 = vpack.i.bf16 %v4207_v2, %v4206_v63 }
 0xb1f   :  { %8200 = vrot.lane.b32.xlu2 %v8199_v57, %s16799_s9  ;;  %v16900_v57 = vld [vmem:[#allocation38_spill] sm:$0xff] }
 0xb20   :  { %8185 = vrot.lane.b32.xlu0 %v8184_v43, %s16799_s9  ;;  %v4224_v43 = vsel %vm16902_vm14, %v8128_v5, %v16901_v62  ;;  %vm16912_vm14 = vmmov %vm16910_vm1 }
 0xb21   :  { %8220 = vrot.lane.b32.xlu1 %v8219_v46, %s16799_s9  ;;  %v8229_v41 = vpack.i.bf16 %v4224_v43, %v4223_v26 }
 0xb27   :  { %8225 = vrot.lane.b32.xlu2 %v8224_v1, %s16799_s9 }
 0xb28   :  { %8205 = vrot.lane.b32.xlu0 %v8204_v31, %s16799_s9 }
 0xb29   :  { %4668 = vperm.xlu1 %6431, %v4495_v44  }
 0xb2f   :  { %4658 = vperm.xlu2 %7853, %v4493_v28  }
 0xb30   :  { %8215 = vrot.lane.b32.xlu0 %v8214_v9, %s16799_s9 }
 0xb31   :  { %5412 = vrot.lane.b32.xlu1 %v16900_v57, %s9047_s26 }
 0xb37   :  { %4673 = vperm.xlu2 %7853, %v4496_v45  }
 0xb38   :  { %8230 = vrot.lane.b32.xlu0 %v8229_v41, %s16799_s9 }
 0xb40   :  { %4663 = vperm.xlu0 %7222, %v4494_v49  }
 0xb4b   :  { %v13547_v39 = vpop.permute.xlu1 %8140 }
 0xb4c   :  { %v8143_v4 = vunpack.i.h.bf16 %v13547_v39 }
 0xb51   :  { %v13539_v56 = vpop.permute.xlu2 %8135 }
 0xb52   :  { %v8138_v48 = vunpack.i.h.bf16 %v13539_v56 }
 0xb59   :  { %v8151_v46 = vpop.permute.xlu2 %8150 }
 0xb5a   :  { %v8153_v45 = vunpack.i.h.bf16 %v8151_v46  ;;  %v8152_v41 = vunpack.i.l.bf16 %v8151_v46 }
 0xb5c   :  { %v4350_v19 = vsel %vm16906_vm13, %v8152_v41, %v8153_v45  ;;  %vm16916_vm13 = vmmov %vm16910_vm1 }
 0xb61   :  { %v13541_v37 = vpop.permute.xlu2 %8160  ;;  %v13551_v34 = vpop.permute.xlu1 %8155 }
 0xb62   :  { %v8158_v14 = vunpack.i.h.bf16 %v13551_v34 }
 0xb69   :  { %v13545_v58 = vpop.permute.xlu2 %8180  ;;  %v13555_v44 = vpop.permute.xlu1 %8165 }
 0xb6a   :  { %v8168_v41 = vunpack.i.h.bf16 %v13555_v44 }
 0xb6b   :  { %v8146_v31 = vpop.permute.xlu0 %8145 }
 0xb6c   :  { %v8147_v22 = vunpack.i.l.bf16 %v8146_v31 }
 0xb71   :  { %v13549_v36 = vpop.permute.xlu2 %8190 }
 0xb79   :  { %v13553_v1 = vpop.permute.xlu2 %8200 }
 0xb7a   :  { %v8203_v30 = vunpack.i.h.bf16 %v13553_v1 }
 0xb81   :  { %v13557_v51 = vpop.permute.xlu2 %8225  ;;  %v13563_v2 = vpop.permute.xlu1 %8195 }
 0xb82   :  { %v16001_v52 = vunpack.i.h.bf16 %v13557_v51  ;;  %v8227_v63 = vunpack.i.l.bf16 %v13557_v51  ;;  %v13561_v28 = vpop.permute.xlu0 %8170 }
 0xb83   :  { %v8173_v3 = vunpack.i.h.bf16 %v13561_v28 }
 0xb84   :  { %v4355_v9 = vsel %vm16904_vm3, %v8227_v63, %v16001_v52  ;;  %vm16914_vm3 = vmmov %vm16910_vm1 }
 0xb85   :  { %4424 = vmatpush.msra.mxu1 %v4355_v9  ;;  %v8148_v9 = vunpack.i.h.bf16 %v8146_v31  ;;  %v8182_v31 = vunpack.i.l.bf16 %v13545_v58 }
 0xb87   :  { %v4330_v42 = vsel %vm16911_vm5, %v8168_v41, %v8182_v31  ;;  %vm16921_vm5 = vmmov %vm16910_vm1 }
 0xb8a   :  { %v13568_v5 = vpop.permute.xlu0 %8175 }
 0xb8b   :  { %v13570_v57 = vpop.permute.xlu1 %8210 }
 0xb92   :  { %v13572_v43 = vpop.permute.xlu0 %8185 }
 0xb93   :  { %v13574_v26 = vpop.permute.xlu1 %8220 }
 0xb94   :  { %v8223_v49 = vunpack.i.h.bf16 %v13574_v26 }
 0xb96   :  { %v4354_v62 = vsel %vm16905_vm6, %v8223_v49, %v8227_v63  ;;  %v8157_v63 = vunpack.i.l.bf16 %v13551_v34  ;;  %vm16915_vm6 = vmmov %vm16910_vm1 }
 0xb97   :  { %4404 = vmatpush.msrb.mxu0 %v4354_v62  ;;  %v8142_v62 = vunpack.i.l.bf16 %v13547_v39 }
 0xb98   :  { %v4338_v49 = vsel %vm16909_vm15, %v8173_v3, %v8157_v63  ;;  %vm16919_vm15 = vmmov %vm16910_vm1 }
 0xb99   :  { %4405 = vmatpush.msrb.mxu0 %v4350_v19  ;;  %v4342_v19 = vsel %vm16908_vm4, %v8147_v22, %v8148_v9  ;;  %v4334_v32 = vsel %vm16910_vm1, %v8142_v62, %v8143_v4  ;;  %v8087_v22 = vunpack.i.l.bf16 %v13476_v17  ;;  %v8192_v62 = vunpack.i.l.bf16 %v13549_v36 }
 0xb9a   :  { %v13579_v52 = vpop.permute.xlu0 %8205  ;;  %vm16918_vm4 = vcmask 588800  }
 0xb9b   :  { %v8207_v16 = vunpack.i.l.bf16 %v13579_v52 }
 0xb9d   :  { %v4346_v46 = vsel %vm16907_vm12, %v8203_v30, %v8207_v16  ;;  %v8137_v30 = vunpack.i.l.bf16 %v13539_v56  ;;  %vm16917_vm12 = vmmov %vm16910_vm1 }
 0xb9e   :  { %4406 = vmatpush.msrb.mxu0 %v4346_v46  ;;  %v8208_v46 = vunpack.i.h.bf16 %v13579_v52  ;;  %v4339_v41 = vsel %vm16917_vm12, %v8157_v63, %v8158_v14  ;;  %v8213_v63 = vunpack.i.h.bf16 %v13570_v57  ;;  %vm16927_vm12 = vmmov %vm16910_vm1 }
 0xb9f   :  { %v4326_v56 = vsel %vm16913_vm7, %v8137_v30, %v8138_v48  ;;  %vm16923_vm7 = vmmov %vm16910_vm1 }
 0xba0   :  { %4407 = vmatpush.msrb.mxu0 %v4342_v19  ;;  %v8197_v19 = vunpack.i.l.bf16 %v13563_v2  ;;  %v4347_v52 = vsel %vm16914_vm3, %v8207_v16, %v8208_v46  ;;  %v8183_v16 = vunpack.i.h.bf16 %v13545_v58  ;;  %v8222_v58 = vunpack.i.l.bf16 %v13574_v26  ;;  %vm16924_vm3 = vmmov %vm16910_vm1 }
 0xba2   :  { %v8216_v8 = vpop.permute.xlu0 %8215  ;;  %4408 = vmatpush.msrb.mxu0 %v4338_v49  ;;  %v4343_v34 = vsel %vm16916_vm13, %v8148_v9, %v8197_v19  ;;  %v16920_v9 = vunpack.i.h.bf16 %v13557_v51  ;;  %vm16926_vm13 = vmmov %vm16910_vm1 }
 0xba3   :  { %v8217_v39 = vunpack.i.l.bf16 %v8216_v8  ;;  %v8218_v49 = vunpack.i.h.bf16 %v8216_v8  ;;  %v8212_v8 = vunpack.i.l.bf16 %v13570_v57 }
 0xba4   :  { %4409 = vmatpush.msrb.mxu0 %v4334_v32  ;;  %v13606_v32 = vld [vmem:[%s15649_s10] sm:$0xff] }
 0xba5   :  { %v4351_v3 = vsel %vm16912_vm14, %v8153_v45, %v8217_v39  ;;  %v4322_v45 = vsel %vm16915_vm6, %v16854_v53, %v8087_v22  ;;  %vm16922_vm14 = vmmov %vm16910_vm1  ;;  %v4352_v51 = vsel %vm16923_vm7, %v8217_v39, %v8218_v49  ;;  %v4348_v26 = vsel %vm16926_vm13, %v8208_v46, %v8212_v8 }
 0xba6   :  { %4410 = vmatpush.msrb.mxu0 %v4330_v42  ;;  %4425 = vmatpush.msra.mxu1 %v4351_v3  ;;  %vm16925_vm6 = vmmov %vm16910_vm1  ;;  %v8193_v39 = vunpack.i.h.bf16 %v13549_v36  ;;  %v8188_v36 = vunpack.i.h.bf16 %v13572_v43 }
 0xba7   :  { %vm16932_vm7 = vmmov %vm16910_vm1 }
 0xba8   :  { %4411 = vmatpush.msrb.mxu0 %v4326_v56  ;;  %4426 = vmatpush.msra.mxu1 %v4347_v52  ;;  %v8177_v56 = vunpack.i.l.bf16 %v13568_v5  ;;  %v4335_v52 = vsel %vm16919_vm15, %v8143_v4, %v8192_v62  ;;  %v4331_v4 = vsel %vm16922_vm14, %v8182_v31, %v8183_v16  ;;  %v4349_v31 = vsel %vm16927_vm12, %v8212_v8, %v8213_v63  ;;  %vm16929_vm15 = vmmov %vm16910_vm1 }
 0xba9   :  { %vm16931_vm14 = vmmov %vm16910_vm1 }
 0xbaa   :  { %v8231_v42 = vpop.permute.xlu0 %8230  ;;  %4412 = vmatpush.msrb.mxu0 %v4322_v45  ;;  %4427 = vmatpush.msra.mxu1 %v4343_v34  ;;  %v4327_v57 = vsel %vm16925_vm6, %v8138_v48, %v8177_v56  ;;  %vm16934_vm6 = vmmov %vm16910_vm1 }
 0xbab   :  { %v8233_v30 = vunpack.i.h.bf16 %v8231_v42  ;;  %v8232_v3 = vunpack.i.l.bf16 %v8231_v42  ;;  %6272 = vmatmul.msk.f32.vlgmr.msrb.gmra.mxu0 %vm16918_vm4, %v13606_v32  ;;  %v8088_v42 = vunpack.i.h.bf16 %v13476_v17  ;;  %v8163_v17 = vunpack.i.h.bf16 %v13541_v37  ;;  %vm16928_vm4 = vmmov %vm16910_vm1 }
 0xbac   :  { %4428 = vmatpush.msra.mxu1 %v4339_v41  ;;  %v8198_v41 = vunpack.i.h.bf16 %v13563_v2  ;;  %v8202_v2 = vunpack.i.l.bf16 %v13553_v1  ;;  %vm16935_vm13 = vmmov %vm16910_vm1 }
 0xbad   :  { %v4356_v45 = vsel %vm16910_vm1, %v16920_v9, %v8232_v3  ;;  %v4357_v34 = vsel %vm16921_vm5, %v8232_v3, %v8233_v30  ;;  %v4353_v30 = vsel %vm16924_vm3, %v8218_v49, %v8222_v58  ;;  %v8162_v3 = vunpack.i.l.bf16 %v13541_v37  ;;  %vm16933_vm3 = vmmov %vm16910_vm1 }
 0xbae   :  { %4429 = vmatpush.msra.mxu1 %v4335_v52  ;;  %4444 = vmatpush.msra.mxu2 %v4356_v45  ;;  %v4323_v49 = vsel %vm16928_vm4, %v8087_v22, %v8088_v42  ;;  %v4344_v52 = vsel %vm16929_vm15, %v8197_v19, %v8198_v41  ;;  %v8172_v9 = vunpack.i.l.bf16 %v13561_v28  ;;  %v4345_v48 = vsel %vm16910_vm1, %v8198_v41, %v8202_v2  ;;  %vm16936_vm12 = vmmov %vm16910_vm1 }
 0xbaf   :  { %4464 = vmatpush.msrb.mxu3 %v4357_v34  ;;  %v8187_v37 = vunpack.i.l.bf16 %v13572_v43  ;;  %vm16930_vm5 = vcmask 588800   ;;  %v4340_v1 = vsel %vm16931_vm14, %v8158_v14, %v8162_v3  ;;  %v4341_v46 = vsel %vm16932_vm7, %v8162_v3, %v8163_v17  ;;  %vm16937_vm4 = vmmov %vm16910_vm1  ;;  %v16944_v3 = vld [vmem:[#allocation64_spill] sm:$0xff]  ;;  %v16945_v17 = vld [vmem:[#allocation66_spill] sm:$0xff] }
 0xbb0   :  { %4430 = vmatpush.msra.mxu1 %v4331_v4  ;;  %4445 = vmatpush.msra.mxu2 %v4352_v51  ;;  %v8178_v22 = vunpack.i.h.bf16 %v13568_v5  ;;  %v4336_v28 = vsel %vm16933_vm3, %v8192_v62, %v8193_v39  ;;  %v4337_v19 = vsel %vm16934_vm6, %v8193_v39, %v8172_v9  ;;  %v8132_v45 = vunpack.i.l.bf16 %v13543_v54  ;;  %vm16938_vm15 = vmmov %vm16910_vm1 }
 0xbb1   :  { %4465 = vmatpush.msrb.mxu3 %v4353_v30  ;;  %v4332_v34 = vsel %vm16935_vm13, %v8183_v16, %v8187_v37  ;;  %v8133_v14 = vunpack.i.h.bf16 %v13543_v54  ;;  %v8167_v43 = vunpack.i.l.bf16 %v13555_v44  ;;  %v4333_v63 = vsel %vm16936_vm12, %v8187_v37, %v8188_v36  ;;  %v16942_v16 = vld [vmem:[#allocation85_spill] sm:$0xff] }
 0xbb2   :  { %4431 = vmatpush.msra.mxu1 %v4327_v57  ;;  %4446 = vmatpush.msra.mxu2 %v4348_v26  ;;  %v4328_v5 = vsel %vm16937_vm4, %v8177_v56, %v8178_v22  ;;  %v4324_v8 = vsel %vm16910_vm1, %v8088_v42, %v8132_v45  ;;  %vm16940_vm14 = vcmask 588800   ;;  %v16943_v42 = vld [vmem:[#allocation78_spill] sm:$0xff]  ;;  %vm16960_vm3 = vcmask 908288   ;;  %vm16976_vm4 = vmmov %vm16910_vm1 }
 0xbb3   :  { %4466 = vmatpush.msrb.mxu3 %v4349_v31  ;;  %v4329_v62 = vsel %vm16938_vm15, %v8178_v22, %v8167_v43  ;;  %vm16941_vm7 = vmmov %vm16940_vm14 }
 0xbb4   :  { %4432 = vmatpush.msra.mxu1 %v4323_v49  ;;  %4447 = vmatpush.msra.mxu2 %v4344_v52  ;;  %vm16961_vm6 = vmmov %vm16960_vm3 }
 0xbb5   :  { %4467 = vmatpush.msrb.mxu3 %v4345_v48  ;;  %6273 = vmatmul.msk.f32.vlgmr.msra.gmra.mxu1 %vm16930_vm5, %v13606_v32  ;;  %vm16939_vm5 = vmmov %vm16910_vm1 }
 0xbb6   :  { %4448 = vmatpush.msra.mxu2 %v4340_v1  ;;  %v4325_v58 = vsel %vm16939_vm5, %v8132_v45, %v8133_v14  ;;  %vm16964_vm13 = vmmov %vm16960_vm3 }
 0xbb7   :  { %4468 = vmatpush.msrb.mxu3 %v4341_v46  ;;  %vm16977_vm15 = vmmov %vm16910_vm1 }
 0xbb8   :  { %4449 = vmatpush.msra.mxu2 %v4336_v28  ;;  %vm16978_vm5 = vmmov %vm16910_vm1 }
 0xbb9   :  { %4469 = vmatpush.msrb.mxu3 %v4337_v19 }
 0xbba   :  { %4450 = vmatpush.msra.mxu2 %v4332_v34 }
 0xbbb   :  { %4470 = vmatpush.msrb.mxu3 %v4333_v63  ;;  %v16946_v63 = vld [vmem:[#allocation82_spill] sm:$0xff] }
 0xbbc   :  { %4451 = vmatpush.msra.mxu2 %v4328_v5 }
 0xbbd   :  { %4471 = vmatpush.msrb.mxu3 %v4329_v62 }
 0xbbe   :  { %4452 = vmatpush.msra.mxu2 %v4324_v8 }
 0xbbf   :  { %4472 = vmatpush.msrb.mxu3 %v4325_v58  ;;  %6274 = vmatmul.msk.f32.vlgmr.msra.gmra.mxu2 %vm16940_vm14, %v13606_v32  ;;  %v16947_v58 = vld [vmem:[#allocation97_spill] sm:$0xff]  ;;  %vm16979_vm14 = vmmov %vm16910_vm1 }
 0xbc0   :  { %6275 = vmatmul.msk.f32.vlgmr.msrb.gmra.mxu3 %vm16941_vm7, %v13606_v32  ;;  %vm16980_vm7 = vmmov %vm16910_vm1 }
 0xc28   :  { %v4414_v54 = vpop.f32.mrf.mxu0 }
 0xc29   :  { %v4415_v44 = vadd.f32 %v4414_v54, %v13439_v59 }
 0xc2b   :  { %v4477_v56 = vadd.f32 %v4415_v44, %v16942_v16 }
 0xc2d   :  { %v4481_v41 = vmax.f32 %v4477_v56, 0.0 }
 0xc2f   :  { %v4485_v57 = vadd.f32 %v4481_v41, %v16944_v3  ;;  %v16948_v41 = vld [vmem:[#allocation67_spill] sm:$0xff] }
 0xc31   :  { %v4509_v31 = vmul.f32 %v4485_v57, %v16783_v29  ;;  %v4505_v49 = vmul.f32 %v4485_v57, %v16785_v24  ;;  %v4501_v1 = vmul.f32 %v4485_v57, %v16787_v61  ;;  %v4517_v34 = vmul.f32 %v4485_v57, %v16789_v6 }
 0xc32   :  { %v4434_v4 = vpop.f32.mrf.mxu1  ;;  %v4513_v14 = vmul.f32 %v4485_v57, %v16791_v7 }
 0xc33   :  { %v4435_v51 = vadd.f32 %v4434_v4, %v13439_v59 }
 0xc35   :  { %v4478_v30 = vadd.f32 %v4435_v51, %v16943_v42  ;;  %v16949_v42 = vld [vmem:[#allocation84_spill] sm:$0xff] }
 0xc37   :  { %v4482_v26 = vmax.f32 %v4478_v30, 0.0 }
 0xc39   :  { %v4486_v2 = vadd.f32 %v4482_v26, %v16945_v17  ;;  %v4525_v26 = vmul.f32 %v4485_v57, %v16795_v23 }
 0xc3b   :  { %v8234_v39 = vpack.i.bf16 %v4486_v2, %v4485_v57  ;;  %v4510_v32 = vmul.f32 %v4486_v2, %v16784_v35  ;;  %v4506_v52 = vmul.f32 %v4486_v2, %v16786_v27  ;;  %v4502_v37 = vmul.f32 %v4486_v2, %v16788_v18 }
 0xc3c   :  { %v4518_v36 = vmul.f32 %v4486_v2, %v16790_v40  ;;  %v4514_v46 = vmul.f32 %v4486_v2, %v16792_v20  ;;  %v4522_v16 = vmul.f32 %v4486_v2, %v16794_v12  ;;  %v4526_v51 = vmul.f32 %v4486_v2, %v16796_v33 }
 0xc3d   :  { %8235 = vrot.lane.b32.xlu1 %v8234_v39, %s9047_s26  ;;  %v8249_v9 = vpack.i.bf16 %v4510_v32, %v4509_v31  ;;  %v8244_v48 = vpack.i.bf16 %v4506_v52, %v4505_v49  ;;  %v8239_v45 = vpack.i.bf16 %v4502_v37, %v4501_v1  ;;  %v4498_v49 = vmul.f32 %v4486_v2, %v16798_v0 }
 0xc3e   :  { %v8259_v62 = vpack.i.bf16 %v4518_v36, %v4517_v34  ;;  %v8254_v8 = vpack.i.bf16 %v4514_v46, %v4513_v14  ;;  %v8269_v17 = vpack.i.bf16 %v4526_v51, %v4525_v26  ;;  %v4497_v37 = vmul.f32 %v4485_v57, %v16797_v21 }
 0xc3f   :  { %8250 = vrot.lane.b32.xlu2 %v8249_v9, %s9048_s27  ;;  %8245 = vrot.lane.b32.xlu0 %v8244_v48, %s9055_s0 }
 0xc40   :  { %v8274_v1 = vpack.i.bf16 %v4498_v49, %v4497_v37 }
 0xc42   :  { %v4454_v22 = vpop.f32.mrf.mxu2 }
 0xc43   :  { %v4455_v28 = vadd.f32 %v4454_v22, %v13439_v59  ;;  %v4474_v19 = vpop.f32.mrf.mxu3 }
 0xc44   :  { %v4475_v43 = vadd.f32 %v4474_v19, %v13439_v59  ;;  %v4521_v59 = vmul.f32 %v4485_v57, %v16793_v47 }
 0xc45   :  { %v4479_v5 = vadd.f32 %v4455_v28, %v16946_v63  ;;  %8240 = vrot.lane.b32.xlu1 %v8239_v45, %s9050_s29  ;;  %v16950_v45 = vld [vmem:[#allocation32_spill] sm:$0xff]  ;;  %v16951_v63 = vld [vmem:[#allocation33_spill] sm:$0xff] }
 0xc46   :  { %v4480_v54 = vadd.f32 %v4475_v43, %v16947_v58  ;;  %v8264_v3 = vpack.i.bf16 %v4522_v16, %v4521_v59  ;;  %v16953_v58 = vld [vmem:[#allocation22_spill] sm:$0xff]  ;;  %v16955_v59 = vld [vmem:[#allocation40_spill] sm:$0xff] }
 0xc47   :  { %v4483_v44 = vmax.f32 %v4479_v5, 0.0  ;;  %8260 = vrot.lane.b32.xlu2 %v8259_v62, %s9058_s21  ;;  %8255 = vrot.lane.b32.xlu0 %v8254_v8, %s9057_s20  ;;  %v16952_v62 = vld [vmem:[#allocation34_spill] sm:$0xff] }
 0xc48   :  { %v4484_v56 = vmax.f32 %v4480_v54, 0.0 }
 0xc49   :  { %v4487_v4 = vadd.f32 %v4483_v44, %v16948_v41  ;;  %v16954_v44 = vld [vmem:[#allocation20_spill] sm:$0xff] }
 0xc4a   :  { %v4488_v30 = vadd.f32 %v4484_v56, %v16949_v42  ;;  %v16956_v42 = vld [vmem:[#allocation4_spill] sm:$0xff] }
 0xc4b   :  { %v4507_v39 = vmul.f32 %v4487_v4, %v16806_v55  ;;  %v4503_v52 = vmul.f32 %v4487_v4, %v16808_v15  ;;  %v4515_v46 = vmul.f32 %v4487_v4, %v16812_v25  ;;  %v4511_v2 = vmul.f32 %v4487_v4, %v16804_v60 }
 0xc4c   :  { %v8279_v31 = vpack.i.bf16 %v4488_v30, %v4487_v4  ;;  %v4508_v32 = vmul.f32 %v4488_v30, %v16807_v10  ;;  %v4504_v9 = vmul.f32 %v4488_v30, %v16809_v38  ;;  %v4516_v22 = vmul.f32 %v4488_v30, %v16813_v11 }
 0xc4d   :  { %8265 = vrot.lane.b32.xlu1 %v8264_v3, %s9059_s22  ;;  %v4512_v28 = vmul.f32 %v4488_v30, %v16805_v13  ;;  %v4523_v19 = vmul.f32 %v4487_v4, %v16814_v50  ;;  %v4524_v57 = vmul.f32 %v4488_v30, %v16950_v45  ;;  %v4527_v5 = vmul.f32 %v4487_v4, %v16951_v63 }
 0xc4e   :  { %v8289_v48 = vpack.i.bf16 %v4508_v32, %v4507_v39  ;;  %v8284_v36 = vpack.i.bf16 %v4504_v9, %v4503_v52  ;;  %v8299_v34 = vpack.i.bf16 %v4516_v22, %v4515_v46  ;;  %v4528_v8 = vmul.f32 %v4488_v30, %v16952_v62  ;;  %v16958_v52 = vld [vmem:[#allocation44_spill] sm:$0xff] }
 0xc4f   :  { %8270 = vrot.lane.b32.xlu0 %v8269_v17, %s9060_s24  ;;  %8280 = vrot.lane.b32.xlu2 %v8279_v31, %s9047_s26  ;;  %v8294_v14 = vpack.i.bf16 %v4512_v28, %v4511_v2  ;;  %v8309_v43 = vpack.i.bf16 %v4524_v57, %v4523_v19  ;;  %v4519_v54 = vmul.f32 %v4487_v4, %v16953_v58  ;;  %v13725_v17 = vpop.permute.xlu2 %4658 }
 0xc50   :  { %v4520_v16 = vmul.f32 %v4488_v30, %v16954_v44  ;;  %v8314_v56 = vpack.i.bf16 %v4528_v8, %v4527_v5  ;;  %v4499_v51 = vmul.f32 %v4487_v4, %v16955_v59  ;;  %v4500_v3 = vmul.f32 %v4488_v30, %v16956_v42  ;;  %v13738_v30 = vpop.permute.xlu1 %4668 }
 0xc52   :  { %v8304_v41 = vpack.i.bf16 %v4520_v16, %v4519_v54  ;;  %v8319_v26 = vpack.i.bf16 %v4500_v3, %v4499_v51 }
 0xc55   :  { %8290 = vrot.lane.b32.xlu1 %v8289_v48, %s9055_s0 }
 0xc57   :  { %8275 = vrot.lane.b32.xlu0 %v8274_v1, %s16799_s9  ;;  %8285 = vrot.lane.b32.xlu2 %v8284_v36, %s9050_s29  ;;  %v13727_v31 = vpop.permute.xlu2 %4673  ;;  %v13745_v36 = vpop.permute.xlu0 %4663 }
 0xc58   :  { %16957 = vst [vmem:[#allocation70_spill] sm:$0xff] %v13727_v31  ;;  %v13743_v1 = vpop.permute.xlu1 %5412 }
 0xc59   :  { %16959 = vst [vmem:[#allocation104_spill] sm:$0xff] %v13743_v1 }
 0xc5d   :  { %8300 = vrot.lane.b32.xlu1 %v8299_v34, %s9057_s20 }
 0xc5f   :  { %8295 = vrot.lane.b32.xlu0 %v8294_v14, %s9048_s27  ;;  %8310 = vrot.lane.b32.xlu2 %v8309_v43, %s9059_s22 }
 0xc65   :  { %8315 = vrot.lane.b32.xlu1 %v8314_v56, %s9060_s24  ;;  %v16962_v56 = vld [vmem:[#allocation43_spill] sm:$0xff] }
 0xc67   :  { %8305 = vrot.lane.b32.xlu0 %v8304_v41, %s9058_s21 }
 0xc6d   :  { %8320 = vrot.lane.b32.xlu1 %v8319_v26, %s16799_s9 }
 0xc99   :  { %v13729_v39 = vpop.permute.xlu2 %8250 }
 0xc9a   :  { %v16003_v32 = vunpack.i.h.bf16 %v13729_v39  ;;  %v8252_v49 = vunpack.i.l.bf16 %v13729_v39 }
 0xc9c   :  { %v4573_v9 = vsel %vm121_vm0, %v16958_v52, %v8252_v49  ;;  %v4574_v4 = vsel %vm121_vm0, %v8252_v49, %v16003_v32  ;;  %v16963_v49 = vld [vmem:[#allocation41_spill] sm:$0xff] }
 0xc9d   :  { %v8329_v48 = vpack.i.bf16 %v4574_v4, %v4573_v9 }
 0xc9f   :  { %8330 = vrot.lane.b32.xlu1 %v8329_v48, %s16799_s9 }
 0xca1   :  { %v13741_v37 = vpop.permute.xlu2 %8260 }
 0xca9   :  { %v8281_v46 = vpop.permute.xlu2 %8280 }
 0xcaa   :  { %v8282_v2 = vunpack.i.l.bf16 %v8281_v46 }
 0xcaf   :  { %v8236_v22 = vpop.permute.xlu1 %8235 }
 0xcb0   :  { %v8238_v28 = vunpack.i.h.bf16 %v8236_v22  ;;  %v8237_v19 = vunpack.i.l.bf16 %v8236_v22 }
 0xcb1   :  { %v8246_v57 = vpop.permute.xlu0 %8245  ;;  %v8286_v8 = vpop.permute.xlu2 %8285 }
 0xcb2   :  { %v4589_v34 = vsel %vm16960_vm3, %v8237_v19, %v8238_v28  ;;  %v4590_v14 = vsel %vm16961_vm6, %v8238_v28, %v8282_v2  ;;  %v8247_v5 = vunpack.i.l.bf16 %v8246_v57  ;;  %v8288_v54 = vunpack.i.h.bf16 %v8286_v8  ;;  %vm16981_vm3 = vmmov %vm16910_vm1 }
 0xcb3   :  { %v8344_v43 = vpack.i.bf16 %v4590_v14, %v4589_v34  ;;  %vm16982_vm6 = vmmov %vm16910_vm1 }
 0xcb4   :  { %v4557_v41 = vsel %vm349_vm8, %v16962_v56, %v8247_v5 }
 0xcb5   :  { %8345 = vrot.lane.b32.xlu1 %v8344_v43, %s16799_s9  ;;  %v8354_v22 = vpack.i.bf16 %v4557_v41, %v8288_v54 }
 0xcb7   :  { %v8241_v16 = vpop.permute.xlu1 %8240 }
 0xcb8   :  { %v8243_v51 = vunpack.i.h.bf16 %v8241_v16  ;;  %v8242_v3 = vunpack.i.l.bf16 %v8241_v16 }
 0xcb9   :  { %v8256_v26 = vpop.permute.xlu0 %8255 }
 0xcba   :  { %v4541_v9 = vsel %vm181_vm2, %v16963_v49, %v8242_v3  ;;  %v4542_v4 = vsel %vm181_vm2, %v8242_v3, %v8243_v51  ;;  %v8258_v48 = vunpack.i.h.bf16 %v8256_v26  ;;  %v8257_v28 = vunpack.i.l.bf16 %v8256_v26 }
 0xcbb   :  { %v8324_v34 = vpack.i.bf16 %v4542_v4, %v4541_v9  ;;  %v8283_v9 = vunpack.i.h.bf16 %v8281_v46 }
 0xcbc   :  { %v4604_v14 = vsel %vm403_vm9, %v8257_v28, %v8258_v48 }
 0xcbd   :  { %8325 = vrot.lane.b32.xlu2 %v8324_v34, %s16799_s9  ;;  %8355 = vrot.lane.b32.xlu1 %v8354_v22, %s16799_s9  ;;  %v8334_v43 = vpack.i.bf16 %v4604_v14, %v8257_v28  ;;  %v4591_v22 = vsel %vm16964_vm13, %v8282_v2, %v8283_v9  ;;  %vm16983_vm13 = vmmov %vm16910_vm1 }
 0xcbe   :  { %v8349_v34 = vpack.i.bf16 %v8283_v9, %v4591_v22 }
 0xcbf   :  { %v13758_v56 = vpop.permute.xlu1 %8265  ;;  %8335 = vrot.lane.b32.xlu0 %v8334_v43, %s16799_s9  ;;  %v8248_v43 = vunpack.i.h.bf16 %v8246_v57  ;;  %v8287_v57 = vunpack.i.l.bf16 %v8286_v8 }
 0xcc0   :  { %v16004_v16 = vunpack.i.h.bf16 %v13758_v56  ;;  %v8267_v32 = vunpack.i.l.bf16 %v13758_v56 }
 0xcc1   :  { %v13763_v3 = vpop.permute.xlu0 %8270 }
 0xcc2   :  { %v4636_v41 = vsel %vm443_vm11, %v8267_v32, %v16004_v16 }
 0xcc3   :  { %v8339_v26 = vpack.i.bf16 %v4636_v41, %v8267_v32  ;;  %v4558_v32 = vsel %vm349_vm8, %v8247_v5, %v8248_v43 }
 0xcc5   :  { %8340 = vrot.lane.b32.xlu2 %v8339_v26, %s16799_s9 }
 0xcc7   :  { %v8291_v4 = vpop.permute.xlu1 %8290 }
 0xcc8   :  { %v8292_v14 = vunpack.i.l.bf16 %v8291_v4 }
 0xcc9   :  { %v13770_v28 = vpop.permute.xlu0 %8275 }
 0xcca   :  { %v4559_v49 = vsel %vm349_vm8, %v8248_v43, %v8292_v14 }
 0xccb   :  { %v8369_v26 = vpack.i.bf16 %v4559_v49, %v4558_v32  ;;  %v16966_v32 = vld [vmem:[#allocation46_spill] sm:$0xff] }
 0xccd   :  { %8350 = vrot.lane.b32.xlu2 %v8349_v34, %s16799_s9 }
 0xccf   :  { %v8301_v1 = vpop.permute.xlu1 %8300 }
 0xcd0   :  { %v8303_v52 = vunpack.i.h.bf16 %v8301_v1  ;;  %v8302_v42 = vunpack.i.l.bf16 %v8301_v1  ;;  %v16965_v1 = vunpack.i.h.bf16 %v13729_v39  ;;  %v8311_v39 = vpop.permute.xlu2 %8310 }
 0xcd1   :  { %v8296_v16 = vpop.permute.xlu0 %8295 }
 0xcd2   :  { %v4605_v46 = vsel %vm403_vm9, %v8258_v48, %v8302_v42  ;;  %v4606_v41 = vsel %vm403_vm9, %v8302_v42, %v8303_v52  ;;  %v8298_v2 = vunpack.i.h.bf16 %v8296_v16  ;;  %v8297_v22 = vunpack.i.l.bf16 %v8296_v16 }
 0xcd3   :  { %v8384_v59 = vpack.i.bf16 %v4606_v41, %v4605_v46  ;;  %v4543_v42 = vsel %vm181_vm2, %v8243_v51, %v8287_v57  ;;  %v8293_v41 = vunpack.i.h.bf16 %v8291_v4  ;;  %v16967_v51 = vld [vmem:[#allocation45_spill] sm:$0xff]  ;;  %v8272_v4 = vunpack.i.l.bf16 %v13763_v3 }
 0xcd4   :  { %v8359_v9 = vpack.i.bf16 %v8237_v19, %v8298_v2  ;;  %v4575_v5 = vsel %vm121_vm0, %v16965_v1, %v8297_v22  ;;  %v4576_v48 = vsel %vm121_vm0, %v8297_v22, %v8298_v2  ;;  %v4544_v19 = vsel %vm181_vm2, %v8287_v57, %v8288_v54 }
 0xcd5   :  { %8370 = vrot.lane.b32.xlu2 %v8369_v26, %s16799_s9  ;;  %8385 = vrot.lane.b32.xlu1 %v8384_v59, %s16799_s9  ;;  %v8379_v43 = vpack.i.bf16 %v4576_v48, %v4575_v5  ;;  %v8364_v46 = vpack.i.bf16 %v4544_v19, %v4543_v42  ;;  %v4607_v2 = vsel %vm403_vm9, %v8303_v52, %v16967_v51  ;;  %v8262_v54 = vunpack.i.l.bf16 %v13741_v37  ;;  %v16968_v42 = vld [vmem:[#allocation48_spill] sm:$0xff] }
 0xcd6   :  { %8360 = vrot.lane.b32.xlu0 %v8359_v9, %s16799_s9  ;;  %v8313_v9 = vunpack.i.h.bf16 %v8311_v39  ;;  %v4560_v22 = vsel %vm349_vm8, %v8292_v14, %v8293_v41  ;;  %v8273_v52 = vunpack.i.h.bf16 %v13763_v3  ;;  %v8263_v19 = vunpack.i.h.bf16 %v13741_v37 }
 0xcd7   :  { %v8316_v57 = vpop.permute.xlu1 %8315  ;;  %v8389_v1 = vpack.i.bf16 %v8262_v54, %v4607_v2  ;;  %v8374_v5 = vpack.i.bf16 %v8293_v41, %v4560_v22  ;;  %vm16969_vm9 = vcmask 769024   ;;  %v8312_v3 = vunpack.i.l.bf16 %v8311_v39 }
 0xcd8   :  { %v8317_v48 = vunpack.i.l.bf16 %v8316_v57  ;;  %vm16970_vm8 = vmmov %vm16969_vm9  ;;  %v8318_v2 = vunpack.i.h.bf16 %v8316_v57 }
 0xcd9   :  { %v8306_v34 = vpop.permute.xlu0 %8305  ;;  %vm16973_vm12 = vmmov %vm16970_vm8 }
 0xcda   :  { %v8308_v49 = vunpack.i.h.bf16 %v8306_v34  ;;  %v8307_v16 = vunpack.i.l.bf16 %v8306_v34  ;;  %v4639_v34 = vsel %vm443_vm11, %v8313_v9, %v16968_v42  ;;  %v4653_v14 = vsel %vm16969_vm9, %v8273_v52, %v8317_v48  ;;  %vm16984_vm9 = vmmov %vm16910_vm1 }
 0xcdc   :  { %v4623_v59 = vsel %vm423_vm10, %v8308_v49, %v16966_v32  ;;  %v4622_v8 = vsel %vm423_vm10, %v8307_v16, %v8308_v49  ;;  %v8409_v49 = vpack.i.bf16 %v8272_v4, %v4639_v34  ;;  %v4652_v32 = vsel %vm16970_vm8, %v8272_v4, %v8273_v52 }
 0xcdd   :  { %8380 = vrot.lane.b32.xlu2 %v8379_v43, %s16799_s9  ;;  %v8399_v26 = vpack.i.bf16 %v4623_v59, %v4622_v8  ;;  %v4621_v43 = vsel %vm423_vm10, %v8263_v19, %v8307_v16  ;;  %v4620_v59 = vsel %vm423_vm10, %v8262_v54, %v8263_v19  ;;  %v16971_v8 = vunpack.i.h.bf16 %v13758_v56  ;;  %v16972_v16 = vld [vmem:[#allocation49_spill] sm:$0xff]  ;;  %vm16974_vm10 = vmmov %vm16970_vm8 }
 0xcde   :  { %8365 = vrot.lane.b32.xlu0 %v8364_v46, %s16799_s9  ;;  %v8414_v46 = vpack.i.bf16 %v4653_v14, %v4652_v32  ;;  %v8394_v41 = vpack.i.bf16 %v4621_v43, %v4620_v59  ;;  %v4655_v54 = vsel %vm16973_vm12, %v8318_v2, %v16972_v16  ;;  %v4654_v22 = vsel %vm16974_vm10, %v8317_v48, %v8318_v2  ;;  %vm16985_vm8 = vmmov %vm16910_vm1 }
 0xcdf   :  { %8400 = vrot.lane.b32.xlu1 %v8399_v26, %s16799_s9  ;;  %v4637_v37 = vsel %vm443_vm11, %v16971_v8, %v8312_v3  ;;  %v4638_v26 = vsel %vm443_vm11, %v8312_v3, %v8313_v9  ;;  %v8419_v4 = vpack.i.bf16 %v4655_v54, %v4654_v22  ;;  %vm16975_vm11 = vmmov %vm16910_vm1 }
 0xce0   :  { %v8404_v51 = vpack.i.bf16 %v4638_v26, %v4637_v37  ;;  %vm16986_vm12 = vmmov %vm16910_vm1 }
 0xce1   :  { %vm16987_vm10 = vmmov %vm16910_vm1 }
 0xce5   :  { %8390 = vrot.lane.b32.xlu2 %v8389_v1, %s16799_s9 }
 0xce6   :  { %8375 = vrot.lane.b32.xlu0 %v8374_v5, %s16799_s9  ;;  %v13823_v5 = vpop.permute.xlu1 %8320 }
 0xce7   :  { %8410 = vrot.lane.b32.xlu1 %v8409_v49, %s16799_s9 }
 0xced   :  { %8415 = vrot.lane.b32.xlu2 %v8414_v46, %s16799_s9 }
 0xcee   :  { %8395 = vrot.lane.b32.xlu0 %v8394_v41, %s16799_s9 }
 0xcf6   :  { %8405 = vrot.lane.b32.xlu0 %v8404_v51, %s16799_s9 }
 0xcfe   :  { %8420 = vrot.lane.b32.xlu0 %v8419_v4, %s16799_s9 }
 0xd11   :  { %v13827_v57 = vpop.permute.xlu1 %8330 }
 0xd12   :  { %v8333_v27 = vunpack.i.h.bf16 %v13827_v57 }
 0xd17   :  { %v13819_v1 = vpop.permute.xlu2 %8325 }
 0xd18   :  { %v8328_v38 = vunpack.i.h.bf16 %v13819_v1 }
 0xd1f   :  { %v8341_v39 = vpop.permute.xlu2 %8340 }
 0xd20   :  { %v8343_v26 = vunpack.i.h.bf16 %v8341_v39  ;;  %v8342_v51 = vunpack.i.l.bf16 %v8341_v39 }
 0xd22   :  { %v4796_v54 = vsel %vm16977_vm15, %v8342_v51, %v8343_v26  ;;  %vm16991_vm15 = vmmov %vm16910_vm1 }
 0xd27   :  { %v13821_v56 = vpop.permute.xlu2 %8350  ;;  %v13831_v34 = vpop.permute.xlu1 %8345 }
 0xd28   :  { %v8347_v51 = vunpack.i.l.bf16 %v13831_v34  ;;  %v8348_v31 = vunpack.i.h.bf16 %v13831_v34 }
 0xd2f   :  { %v13825_v9 = vpop.permute.xlu2 %8370  ;;  %v13835_v49 = vpop.permute.xlu1 %8355 }
 0xd31   :  { %v8336_v48 = vpop.permute.xlu0 %8335 }
 0xd32   :  { %v8338_v4 = vunpack.i.h.bf16 %v8336_v48 }
 0xd37   :  { %v13829_v42 = vpop.permute.xlu2 %8380 }
 0xd3f   :  { %v13833_v52 = vpop.permute.xlu2 %8390 }
 0xd47   :  { %v13837_v19 = vpop.permute.xlu2 %8415  ;;  %v13843_v59 = vpop.permute.xlu1 %8385 }
 0xd48   :  { %v16005_v14 = vunpack.i.h.bf16 %v13837_v19  ;;  %v8417_v43 = vunpack.i.l.bf16 %v13837_v19  ;;  %v13841_v32 = vpop.permute.xlu0 %8360 }
 0xd49   :  { %v8363_v0 = vunpack.i.h.bf16 %v13841_v32 }
 0xd4a   :  { %v4801_v46 = vsel %vm16975_vm11, %v8417_v43, %v16005_v14  ;;  %v8393_v14 = vunpack.i.h.bf16 %v13833_v52  ;;  %vm16988_vm11 = vcmask 588800  }
 0xd4b   :  { %4888 = vmatpush.msrb.mxu1 %v4801_v46  ;;  %v8337_v46 = vunpack.i.l.bf16 %v8336_v48  ;;  %v8372_v48 = vunpack.i.l.bf16 %v13825_v9 }
 0xd50   :  { %v13848_v41 = vpop.permute.xlu0 %8365 }
 0xd51   :  { %v13850_v3 = vpop.permute.xlu1 %8400 }
 0xd58   :  { %v13852_v8 = vpop.permute.xlu0 %8375 }
 0xd59   :  { %v13854_v37 = vpop.permute.xlu1 %8410 }
 0xd5a   :  { %v8413_v2 = vunpack.i.h.bf16 %v13854_v37 }
 0xd5c   :  { %v4800_v16 = vsel %vm16976_vm4, %v8413_v2, %v8417_v43  ;;  %v8332_v43 = vunpack.i.l.bf16 %v13827_v57  ;;  %v4788_v2 = vsel %vm16978_vm5, %v8337_v46, %v8338_v4  ;;  %v8277_v46 = vunpack.i.l.bf16 %v13770_v28  ;;  %vm16989_vm4 = vmmov %vm16910_vm1 }
 0xd5d   :  { %4859 = vmatpush.msra.mxu0 %v4800_v16  ;;  %v8358_v16 = vunpack.i.h.bf16 %v13835_v49  ;;  %vm16992_vm5 = vmmov %vm16910_vm1 }
 0xd5e   :  { %v4780_v55 = vsel %vm16980_vm7, %v8332_v43, %v8333_v27  ;;  %v8382_v43 = vunpack.i.l.bf16 %v13829_v42  ;;  %vm16994_vm7 = vmmov %vm16910_vm1 }
 0xd5f   :  { %4860 = vmatpush.msra.mxu0 %v4796_v54  ;;  %v4784_v54 = vsel %vm16979_vm14, %v8363_v0, %v8347_v51  ;;  %v4776_v10 = vsel %vm16981_vm3, %v8358_v16, %v8372_v48  ;;  %v4785_v16 = vsel %vm16987_vm10, %v8347_v51, %v8348_v31  ;;  %v8403_v51 = vunpack.i.h.bf16 %v13850_v3  ;;  %vm16993_vm14 = vmmov %vm16910_vm1 }
 0xd60   :  { %v13859_v22 = vpop.permute.xlu0 %8395  ;;  %vm16995_vm3 = vmmov %vm16910_vm1 }
 0xd61   :  { %v8397_v21 = vunpack.i.l.bf16 %v13859_v22  ;;  %vm17001_vm10 = vmmov %vm16910_vm1 }
 0xd63   :  { %v4792_v39 = vsel %vm16910_vm1, %v8393_v14, %v8397_v21  ;;  %v8327_v14 = vunpack.i.l.bf16 %v13819_v1 }
 0xd64   :  { %4861 = vmatpush.msra.mxu0 %v4792_v39  ;;  %v8398_v39 = vunpack.i.h.bf16 %v13859_v22 }
 0xd65   :  { %v4772_v1 = vsel %vm16983_vm13, %v8327_v14, %v8328_v38  ;;  %vm16997_vm13 = vmmov %vm16910_vm1 }
 0xd66   :  { %4862 = vmatpush.msra.mxu0 %v4788_v2  ;;  %v8387_v2 = vunpack.i.l.bf16 %v13843_v59  ;;  %v4793_v22 = vsel %vm16984_vm9, %v8397_v21, %v8398_v39  ;;  %v8373_v21 = vunpack.i.h.bf16 %v13825_v9  ;;  %v8412_v9 = vunpack.i.l.bf16 %v13854_v37  ;;  %vm16998_vm9 = vmmov %vm16988_vm11 }
 0xd67   :  { %v8352_v37 = vunpack.i.l.bf16 %v13821_v56 }
 0xd68   :  { %v8406_v15 = vpop.permute.xlu0 %8405  ;;  %4863 = vmatpush.msra.mxu0 %v4784_v54  ;;  %v4789_v34 = vsel %vm16986_vm12, %v8338_v4, %v8387_v2  ;;  %v16990_v4 = vunpack.i.h.bf16 %v13837_v19  ;;  %vm17000_vm12 = vmmov %vm16910_vm1 }
 0xd69   :  { %v8407_v57 = vunpack.i.l.bf16 %v8406_v15  ;;  %v8408_v54 = vunpack.i.h.bf16 %v8406_v15  ;;  %v8402_v15 = vunpack.i.l.bf16 %v13850_v3  ;;  %v4490_v3 = vld [vmem:[%s15650_s12 + $0x8] sm:$0xff] }
 0xd6a   :  { %4864 = vmatpush.msra.mxu0 %v4780_v55  ;;  %v13886_v55 = vld [vmem:[%s15650_s12] sm:$0xff] }
 0xd6b   :  { %v4797_v0 = vsel %vm16982_vm6, %v8343_v26, %v8407_v57  ;;  %v4768_v26 = vsel %vm16985_vm8, %v16854_v53, %v8277_v46  ;;  %v4798_v19 = vsel %vm16993_vm14, %v8407_v57, %v8408_v54  ;;  %vm16996_vm6 = vmmov %vm16910_vm1  ;;  %v4795_v57 = vsel %vm16997_vm13, %v8402_v15, %v8403_v51 }
 0xd6c   :  { %4865 = vmatpush.msra.mxu0 %v4776_v10  ;;  %4889 = vmatpush.msrb.mxu1 %v4797_v0  ;;  %vm16999_vm8 = vmmov %vm16910_vm1  ;;  %v8322_v51 = vunpack.i.l.bf16 %v13823_v5 }
 0xd6d   :  { %vm17006_vm14 = vmmov %vm16910_vm1 }
 0xd6e   :  { %4866 = vmatpush.msra.mxu0 %v4772_v1  ;;  %4890 = vmatpush.msrb.mxu1 %v4793_v22  ;;  %v8367_v1 = vunpack.i.l.bf16 %v13848_v41  ;;  %v4781_v22 = vsel %vm16989_vm4, %v8333_v27, %v8382_v43  ;;  %v4777_v27 = vsel %vm16992_vm5, %v8372_v48, %v8373_v21  ;;  %v8392_v48 = vunpack.i.l.bf16 %v13833_v52  ;;  %vm17003_vm4 = vmmov %vm16910_vm1 }
 0xd6f   :  { %v8377_v52 = vunpack.i.l.bf16 %v13852_v8  ;;  %vm17005_vm5 = vmmov %vm16910_vm1 }
 0xd70   :  { %v8421_v10 = vpop.permute.xlu0 %8420  ;;  %4867 = vmatpush.msra.mxu0 %v4768_v26  ;;  %4891 = vmatpush.msrb.mxu1 %v4789_v34  ;;  %vm17010_vm13 = vmmov %vm16910_vm1 }
 0xd71   :  { %v8423_v14 = vunpack.i.h.bf16 %v8421_v10  ;;  %v8422_v0 = vunpack.i.l.bf16 %v8421_v10  ;;  %6276 = vmatmul.msk.f32.vlgmr.msra.gmra.mxu0 %vm16988_vm11, %v13886_v55  ;;  %v8278_v10 = vunpack.i.h.bf16 %v13770_v28  ;;  %v4773_v28 = vsel %vm16995_vm3, %v8328_v38, %v8367_v1  ;;  %vm17002_vm11 = vmmov %vm16998_vm9 }
 0xd72   :  { %4892 = vmatpush.msrb.mxu1 %v4785_v16  ;;  %v8388_v16 = vunpack.i.h.bf16 %v13843_v59  ;;  %v4794_v59 = vsel %vm16996_vm6, %v8398_v39, %v8402_v15  ;;  %v8362_v38 = vunpack.i.l.bf16 %v13841_v32  ;;  %v8378_v39 = vunpack.i.h.bf16 %v13852_v8  ;;  %vm17008_vm3 = vmmov %vm16998_vm9 }
 0xd73   :  { %v4802_v26 = vsel %vm16991_vm15, %v16990_v4, %v8422_v0  ;;  %v4803_v34 = vsel %vm16910_vm1, %v8422_v0, %v8423_v14  ;;  %v4799_v14 = vsel %vm16994_vm7, %v8408_v54, %v8412_v9  ;;  %v8353_v0 = vunpack.i.h.bf16 %v13821_v56  ;;  %vm17004_vm15 = vmmov %vm16910_vm1 }
 0xd74   :  { %4893 = vmatpush.msrb.mxu1 %v4781_v22  ;;  %4917 = vmatpush.msrb.mxu2 %v4802_v26  ;;  %v8383_v54 = vunpack.i.h.bf16 %v13829_v42  ;;  %v4769_v22 = vsel %vm16999_vm8, %v8277_v46, %v8278_v10  ;;  %v4790_v4 = vsel %vm17000_vm12, %v8387_v2, %v8388_v16  ;;  %v4791_v56 = vsel %vm17001_vm10, %v8388_v16, %v8392_v48  ;;  %vm17007_vm7 = vmmov %vm16910_vm1  ;;  %v17026_v16 = vld [vmem:[#allocation35_spill] sm:$0xff] }
 0xd75   :  { %4946 = vmatpush.msra.mxu3 %v4803_v34  ;;  %v4786_v42 = vsel %vm17003_vm4, %v8348_v31, %v8352_v37  ;;  %v4787_v46 = vsel %vm17004_vm15, %v8352_v37, %v8353_v0  ;;  %v8368_v2 = vunpack.i.h.bf16 %v13848_v41  ;;  %v4491_v34 = vld [vmem:[%s15650_s12 + $0x10] sm:$0xff]  ;;  %v4778_v31 = vsel %vm17006_vm14, %v8373_v21, %v8377_v52  ;;  %vm17009_vm6 = vmmov %vm16910_vm1 }
 0xd76   :  { %4894 = vmatpush.msrb.mxu1 %v4777_v27  ;;  %4918 = vmatpush.msrb.mxu2 %v4798_v19  ;;  %v4782_v32 = vsel %vm16910_vm1, %v8382_v43, %v8383_v54  ;;  %v4783_v26 = vsel %vm17005_vm5, %v8383_v54, %v8362_v38  ;;  %v8323_v8 = vunpack.i.h.bf16 %v13823_v5  ;;  %v8357_v15 = vunpack.i.l.bf16 %v13835_v49  ;;  %vm17012_vm8 = vmmov %vm16910_vm1  ;;  %v4492_v49 = vld [vmem:[%s15650_s12 + $0x18] sm:$0xff]  ;;  %s17042_s12 = smov 16  }
 0xd77   :  { %4947 = vmatpush.msra.mxu3 %v4799_v14  ;;  %v4779_v41 = vsel %vm17007_vm7, %v8377_v52, %v8378_v39  ;;  %v4774_v43 = vsel %vm17009_vm6, %v8367_v1, %v8368_v2  ;;  %v4770_v21 = vsel %vm17012_vm8, %v8278_v10, %v8322_v51  ;;  %vm17013_vm12 = vmmov %vm16910_vm1 }
 0xd78   :  { %4895 = vmatpush.msrb.mxu1 %v4773_v28  ;;  %4919 = vmatpush.msrb.mxu2 %v4794_v59  ;;  %v4775_v9 = vsel %vm17010_vm13, %v8368_v2, %v8357_v15  ;;  %v4771_v5 = vsel %vm17013_vm12, %v8322_v51, %v8323_v8  ;;  %vm17014_vm10 = vmmov %vm17008_vm3 }
 0xd79   :  { %4948 = vmatpush.msra.mxu3 %v4795_v57  ;;  %6277 = vmatmul.msk.f32.gmra.mxu0 %vm16998_vm9, %v4490_v3  ;;  %vm17011_vm9 = vmmov %vm17008_vm3 }
 0xd7a   :  { %4896 = vmatpush.msrb.mxu1 %v4769_v22  ;;  %4920 = vmatpush.msrb.mxu2 %v4790_v4  ;;  %vm17016_vm4 = vmmov %vm17008_vm3 }
 0xd7b   :  { %4949 = vmatpush.msra.mxu3 %v4791_v56  ;;  %6280 = vmatmul.msk.f32.vlgmr.msrb.gmra.mxu1 %vm17002_vm11, %v13886_v55  ;;  %vm17015_vm11 = vmmov %vm17008_vm3 }
 0xd7c   :  { %4921 = vmatpush.msrb.mxu2 %v4786_v42  ;;  %vm17017_vm15 = vmmov %vm17008_vm3 }
 0xd7d   :  { %4950 = vmatpush.msra.mxu3 %v4787_v46  ;;  %vm17018_vm1 = vmmov %vm17008_vm3 }
 0xd7e   :  { %4922 = vmatpush.msrb.mxu2 %v4782_v32  ;;  %vm17019_vm5 = vmmov %vm17018_vm1 }
 0xd7f   :  { %4951 = vmatpush.msra.mxu3 %v4783_v26  ;;  %vm17020_vm14 = vmmov %vm17018_vm1 }
 0xd80   :  { %4923 = vmatpush.msrb.mxu2 %v4778_v31  ;;  %vm17021_vm7 = vmmov %vm17018_vm1 }
 0xd81   :  { %4952 = vmatpush.msra.mxu3 %v4779_v41  ;;  %6278 = vmatmul.msk.f32.gmra.mxu0 %vm17008_vm3, %v4491_v34  ;;  %vm17022_vm3 = vmmov %vm17018_vm1 }
 0xd82   :  { %4924 = vmatpush.msrb.mxu2 %v4774_v43  ;;  %vm17023_vm6 = vmmov %vm17018_vm1 }
 0xd83   :  { %4953 = vmatpush.msra.mxu3 %v4775_v9  ;;  %6281 = vmatmul.msk.f32.gmra.mxu1 %vm17011_vm9, %v4490_v3  ;;  %vm17024_vm13 = vmmov %vm17018_vm1  ;;  %vm17054_vm9 = vcmask 908288  }
 0xd84   :  { %4925 = vmatpush.msrb.mxu2 %v4770_v21  ;;  %vm17072_vm8 = vmmov %vm17054_vm9 }
 0xd85   :  { %4954 = vmatpush.msra.mxu3 %v4771_v5  ;;  %6284 = vmatmul.msk.f32.vlgmr.msrb.gmra.mxu2 %vm17014_vm10, %v13886_v55  ;;  %vm17073_vm12 = vmmov %vm17072_vm8 }
 0xd86   :  { %6288 = vmatmul.msk.f32.vlgmr.msra.gmra.mxu3 %vm17015_vm11, %v13886_v55  ;;  %vm17077_vm10 = vmmov %vm17072_vm8 }
 0xd87   :  { %vm17079_vm11 = vmmov %vm17072_vm8 }
 0xd89   :  { %6279 = vmatmul.msk.f32.gmra.mxu0 %vm17016_vm4, %v4492_v49  ;;  %vm17080_vm4 = vmmov %vm17072_vm8 }
 0xd8b   :  { %6282 = vmatmul.msk.f32.gmra.mxu1 %vm17017_vm15, %v4491_v34  ;;  %vm17082_vm15 = vmmov %vm17080_vm4 }
 0xd8d   :  { %6285 = vmatmul.msk.f32.gmra.mxu2 %vm17018_vm1, %v4490_v3  ;;  %vm17084_vm1 = vmmov %vm17080_vm4 }
 0xd8e   :  { %6289 = vmatmul.msk.f32.gmra.mxu3 %vm17019_vm5, %v4490_v3  ;;  %vm17085_vm5 = vmmov %vm17084_vm1 }
 0xd93   :  { %6283 = vmatmul.msk.f32.gmra.mxu1 %vm17020_vm14, %v4492_v49  ;;  %vm17090_vm14 = vmmov %vm17084_vm1 }
 0xd95   :  { %6286 = vmatmul.msk.f32.gmra.mxu2 %vm17021_vm7, %v4491_v34  ;;  %vm17091_vm7 = vmmov %vm17084_vm1 }
 0xd96   :  { %6290 = vmatmul.msk.f32.gmra.mxu3 %vm17022_vm3, %v4491_v34  ;;  %vm17094_vm3 = vmmov %vm17084_vm1 }
 0xd9d   :  { %6287 = vmatmul.msk.f32.gmra.mxu2 %vm17023_vm6, %v4492_v49  ;;  %vm17095_vm6 = vmmov %vm17084_vm1 }
 0xd9e   :  { %6291 = vmatmul.msk.f32.gmra.mxu3 %vm17024_vm13, %v4492_v49  ;;  %v17035_v49 = vld [vmem:[#allocation37_spill] sm:$0xff]  ;;  %vm17097_vm13 = vmmov %vm17084_vm1 }
 0xdee   :  { %v4869_v55 = vpop.f32.mrf.mxu0 }
 0xdef   :  { %v13965_v1 = vadd.f32 %v4869_v55, %v13725_v17 }
 0xdf1   :  { %17025 = vst [vmem:[#allocation74_spill] sm:$0xff] %v13965_v1  ;;  %v13969_v10 = vmul.f32 %v13965_v1, %v16793_v47  ;;  %v13981_v37 = vmul.f32 %v13965_v1, %v16791_v7  ;;  %v5328_v48 = vmul.f32 %v13965_v1, %v16795_v23 }
 0xdf3   :  { %v8424_v27 = vpack.i.bf16 %v13969_v10, %v17026_v16 }
 0xdf5   :  { %8425 = vrot.lane.b32.xlu1 %v8424_v27, %s9048_s27 }
 0xdf6   :  { %v4872_v54 = vpop.f32.mrf.mxu0 }
 0xdf7   :  { %v13998_v56 = vadd.f32 %v4872_v54, %v13745_v36 }
 0xdf8   :  { %v4898_v19 = vpop.f32.mrf.mxu1 }
 0xdf9   :  { %v13975_v14 = vadd.f32 %v4898_v19, %v13725_v17  ;;  %17029 = vst [vmem:[#allocation89_spill] sm:$0xff] %v13998_v56  ;;  %v14052_v27 = vmul.f32 %v13998_v56, %v16783_v29  ;;  %v17037_v19 = vld [vmem:[#allocation15_spill] sm:$0xff] }
 0xdfb   :  { %17027 = vst [vmem:[#allocation91_spill] sm:$0xff] %v13975_v14  ;;  %v8434_v3 = vpack.i.bf16 %v13975_v14, %v13965_v1  ;;  %v5117_v28 = vmul.f32 %v13975_v14, %v16792_v20  ;;  %v5329_v0 = vmul.f32 %v13975_v14, %v16796_v33  ;;  %v5225_v32 = vmul.f32 %v13975_v14, %v16794_v12 }
 0xdfc   :  { %17036 = vst [vmem:[#allocation92_spill] sm:$0xff] %v14052_v27 }
 0xdfd   :  { %8435 = vrot.lane.b32.xlu2 %v8434_v3, %s9048_s27  ;;  %8430 = vrot.lane.b32.xlu1 %v8434_v3, %s9047_s26  ;;  %v8439_v59 = vpack.i.bf16 %v5117_v28, %v13981_v37  ;;  %v8444_v57 = vpack.i.bf16 %v5329_v0, %v5328_v48 }
 0xdfe   :  { %v4875_v48 = vpop.f32.mrf.mxu0 }
 0xdff   :  { %8440 = vrot.lane.b32.xlu0 %v8439_v59, %s9047_s26 }
 0xe00   :  { %v4901_v42 = vpop.f32.mrf.mxu1 }
 0xe01   :  { %v14011_v39 = vadd.f32 %v4901_v42, %v13745_v36 }
 0xe03   :  { %17031 = vst [vmem:[#allocation111_spill] sm:$0xff] %v14011_v39  ;;  %v8474_v51 = vpack.i.bf16 %v14011_v39, %v13998_v56  ;;  %v14048_v16 = vmul.f32 %v14011_v39, %v16784_v35  ;;  %v5221_v0 = vmul.f32 %v14011_v39, %v16790_v40 }
 0xe05   :  { %8445 = vrot.lane.b32.xlu2 %v8444_v57, %s9047_s26  ;;  %v8519_v59 = vpack.i.bf16 %v14048_v16, %v14052_v27  ;;  %v5220_v57 = vmul.f32 %v13998_v56, %v16789_v6  ;;  %v5229_v6 = vmul.f32 %v14011_v39, %v16794_v12 }
 0xe08   :  { %v4927_v22 = vpop.f32.mrf.mxu2 }
 0xe09   :  { %v13995_v4 = vadd.f32 %v4927_v22, %v13725_v17  ;;  %v4956_v38 = vpop.f32.mrf.mxu3  ;;  %v14065_v22 = vadd.f32 %v4875_v48, %v13738_v30 }
 0xe0a   :  { %v14001_v52 = vadd.f32 %v4956_v38, %v13725_v17  ;;  %v8524_v38 = vpack.i.bf16 %v5221_v0, %v5220_v57 }
 0xe0b   :  { %17028 = vst [vmem:[#allocation61_spill] sm:$0xff] %v13995_v4  ;;  %v5226_v17 = vmul.f32 %v13995_v4, %v16814_v50  ;;  %v8459_v31 = vpack.i.bf16 %v13995_v4, %v13975_v14  ;;  %v5118_v15 = vmul.f32 %v13995_v4, %v16812_v25 }
 0xe0c   :  { %17030 = vst [vmem:[#allocation60_spill] sm:$0xff] %v14001_v52  ;;  %v8464_v33 = vpack.i.bf16 %v13998_v56, %v14001_v52  ;;  %v8454_v23 = vpack.i.bf16 %v14001_v52, %v13995_v4  ;;  %v5227_v9 = vmul.f32 %v14001_v52, %v16950_v45  ;;  %v5331_v40 = vmul.f32 %v14001_v52, %v16952_v62 }
 0xe0d   :  { %v8484_v8 = vpack.i.bf16 %v5226_v17, %v5225_v32  ;;  %v8494_v54 = vpack.i.bf16 %v5118_v15, %v5117_v28  ;;  %17038 = vst [vmem:[#allocation123_spill] sm:$0xff] %v14065_v22  ;;  %v5112_v28 = vmul.f32 %v14065_v22, %v16785_v24  ;;  %v4904_v24 = vpop.f32.mrf.mxu1  ;;  %v4972_v32 = vmul.f32 %v14065_v22, %v16787_v61 }
 0xe0e   :  { %8465 = vrot.lane.b32.xlu1 %v8464_v33, %s9050_s29  ;;  %8455 = vrot.lane.b32.xlu0 %v8454_v23, %s9048_s27  ;;  %v8509_v55 = vpack.i.bf16 %v17035_v49, %v5227_v9  ;;  %v5330_v33 = vmul.f32 %v13995_v4, %v16951_v63  ;;  %v5120_v63 = vmul.f32 %v14065_v22, %v16791_v7 }
 0xe0f   :  { %8450 = vrot.lane.b32.xlu2 %v8454_v23, %s9047_s26  ;;  %v5228_v23 = vmul.f32 %v13998_v56, %v16793_v47  ;;  %v14093_v47 = vadd.f32 %v4904_v24, %v13738_v30 }
 0xe10   :  { %v4930_v46 = vpop.f32.mrf.mxu2  ;;  %v8514_v42 = vpack.i.bf16 %v5331_v40, %v5330_v33  ;;  %v8544_v62 = vpack.i.bf16 %v5120_v63, %v17037_v19  ;;  %v4878_v33 = vpop.f32.mrf.mxu0  ;;  %v17046_v40 = vld [vmem:[#allocation70_spill] sm:$0xff] }
 0xe11   :  { %v4959_v2 = vpop.f32.mrf.mxu3  ;;  %v14018_v26 = vadd.f32 %v4930_v46, %v13745_v36  ;;  %v8529_v46 = vpack.i.bf16 %v5229_v6, %v5228_v23  ;;  %17040 = vst [vmem:[#allocation87_spill] sm:$0xff] %v14093_v47  ;;  %v4973_v9 = vmul.f32 %v14093_v47, %v16788_v18 }
 0xe12   :  { %v14021_v34 = vadd.f32 %v4959_v2, %v13745_v36  ;;  %v5119_v36 = vmul.f32 %v14001_v52, %v16813_v11  ;;  %v17039_v2 = vld [vmem:[#allocation7_spill] sm:$0xff] }
 0xe13   :  { %17032 = vst [vmem:[#allocation76_spill] sm:$0xff] %v14018_v26  ;;  %v4982_v41 = vmul.f32 %v14018_v26, %v16804_v60  ;;  %v8539_v17 = vpack.i.bf16 %v5112_v28, %v17039_v2  ;;  %v5222_v57 = vmul.f32 %v14018_v26, %v16953_v58  ;;  %v17048_v28 = vld [vmem:[#allocation5_spill] sm:$0xff] }
 0xe14   :  { %17033 = vst [vmem:[#allocation107_spill] sm:$0xff] %v14021_v34  ;;  %v4983_v43 = vmul.f32 %v14021_v34, %v16805_v13  ;;  %v8479_v21 = vpack.i.bf16 %v5119_v36, %v5118_v15  ;;  %v8499_v3 = vpack.i.bf16 %v17037_v19, %v5119_v36  ;;  %v8554_v12 = vpack.i.bf16 %v14021_v34, %v14018_v26 }
 0xe15   :  { %v5231_v15 = vmul.f32 %v14021_v34, %v16950_v45  ;;  %v8569_v36 = vpack.i.bf16 %v14065_v22, %v14021_v34 }
 0xe16   :  { %8475 = vrot.lane.b32.xlu1 %v8474_v51, %s9048_s27  ;;  %8460 = vrot.lane.b32.xlu0 %v8459_v31, %s9050_s29  ;;  %v14040_v5 = vpack.i.bf16 %v4983_v43, %v4982_v41  ;;  %v8579_v31 = vpack.i.bf16 %v14093_v47, %v14065_v22  ;;  %v8564_v43 = vpack.i.bf16 %v14018_v26, %v14011_v39 }
 0xe17   :  { %8485 = vrot.lane.b32.xlu2 %v8484_v8, %s9047_s26 }
 0xe18   :  { %17034 = vst [vmem:[#allocation88_spill] sm:$0xff] %v14040_v5 }
 0xe19   :  { %v4962_v49 = vpop.f32.mrf.mxu3 }
 0xe1a   :  { %v14126_v19 = vadd.f32 %v4962_v49, %v13738_v30 }
 0xe1c   :  { %17044 = vst [vmem:[#allocation127_spill] sm:$0xff] %v14126_v19  ;;  %v5115_v58 = vmul.f32 %v14126_v19, %v17048_v28 }
 0xe1e   :  { %8470 = vrot.lane.b32.xlu0 %v8474_v51, %s9047_s26  ;;  %8480 = vrot.lane.b32.xlu1 %v8479_v21, %s9047_s26  ;;  %v17041_v51 = vld [vmem:[#allocation2_spill] sm:$0xff]  ;;  %v4933_v21 = vpop.f32.mrf.mxu2 }
 0xe1f   :  { %8510 = vrot.lane.b32.xlu2 %v8509_v55, %s9048_s27  ;;  %v8549_v7 = vpack.i.bf16 %v4972_v32, %v17041_v51 }
 0xe26   :  { %8490 = vrot.lane.b32.xlu0 %v8509_v55, %s9047_s26  ;;  %8500 = vrot.lane.b32.xlu1 %v8499_v3, %s9050_s29  ;;  %v14123_v55 = vadd.f32 %v4933_v21, %v13738_v30  ;;  %v5121_v3 = vmul.f32 %v14093_v47, %v16792_v20  ;;  %v5223_v30 = vmul.f32 %v14021_v34, %v16954_v44 }
 0xe27   :  { %8520 = vrot.lane.b32.xlu2 %v8519_v59, %s9048_s27  ;;  %v14154_v44 = vadd.f32 %v4878_v33, %v17046_v40 }
 0xe28   :  { %17043 = vst [vmem:[#allocation80_spill] sm:$0xff] %v14123_v55  ;;  %v8619_v59 = vpack.i.bf16 %v14126_v19, %v14123_v55  ;;  %v8609_v0 = vpack.i.bf16 %v5121_v3, %v5120_v63  ;;  %v8624_v20 = vpack.i.bf16 %v14123_v55, %v14093_v47  ;;  %v17050_v63 = vld [vmem:[#allocation23_spill] sm:$0xff]  ;;  %v5122_v24 = vmul.f32 %v14123_v55, %v16812_v25 }
 0xe29   :  { %17049 = vst [vmem:[#allocation90_spill] sm:$0xff] %v14154_v44  ;;  %v8629_v2 = vpack.i.bf16 %v14154_v44, %v14126_v19 }
 0xe2e   :  { %8495 = vrot.lane.b32.xlu0 %v8494_v54, %s9050_s29  ;;  %8505 = vrot.lane.b32.xlu1 %v8484_v8, %s9048_s27  ;;  %v5230_v8 = vmul.f32 %v14018_v26, %v16814_v50  ;;  %v8604_v50 = vpack.i.bf16 %v4973_v9, %v4972_v32  ;;  %v8589_v54 = vpack.i.bf16 %v5223_v30, %v5222_v57  ;;  %v17051_v32 = vld [vmem:[#allocation19_spill] sm:$0xff] }
 0xe2f   :  { %8525 = vrot.lane.b32.xlu2 %v8524_v38, %s9048_s27  ;;  %v4907_v38 = vpop.f32.mrf.mxu1  ;;  %v4974_v51 = vmul.f32 %v14123_v55, %v17051_v32 }
 0xe30   :  { %v8599_v41 = vpack.i.bf16 %v5231_v15, %v5230_v8  ;;  %v14147_v6 = vadd.f32 %v4907_v38, %v17046_v40 }
 0xe32   :  { %17047 = vst [vmem:[#allocation93_spill] sm:$0xff] %v14147_v6 }
 0xe36   :  { %8515 = vrot.lane.b32.xlu0 %v8514_v42, %s9047_s26  ;;  %8530 = vrot.lane.b32.xlu1 %v8529_v46, %s9047_s26  ;;  %v8639_v42 = vpack.i.bf16 %v14147_v6, %v14154_v44 }
 0xe37   :  { %8540 = vrot.lane.b32.xlu2 %v8539_v17, %s9050_s29 }
 0xe3e   :  { %8535 = vrot.lane.b32.xlu0 %v8529_v46, %s9048_s27  ;;  %8555 = vrot.lane.b32.xlu1 %v8554_v12, %s9047_s26  ;;  %v8649_v46 = vpack.i.bf16 %v13965_v1, %v5115_v58 }
 0xe3f   :  { %8545 = vrot.lane.b32.xlu2 %v8544_v62, %s9047_s26 }
 0xe46   :  { %8550 = vrot.lane.b32.xlu0 %v8549_v7, %s17042_s12  ;;  %8580 = vrot.lane.b32.xlu1 %v8579_v31, %s9047_s26  ;;  %v17052_v7 = vld [vmem:[#allocation6_spill] sm:$0xff] }
 0xe47   :  { %8560 = vrot.lane.b32.xlu2 %v8554_v12, %s9048_s27  ;;  %v5114_v12 = vmul.f32 %v14123_v55, %v17050_v63 }
 0xe4e   :  { %8570 = vrot.lane.b32.xlu0 %v8569_v36, %s9050_s29  ;;  %8600 = vrot.lane.b32.xlu1 %v8599_v41, %s9048_s27  ;;  %v17053_v36 = vld [vmem:[#allocation24_spill] sm:$0xff] }
 0xe4f   :  { %8565 = vrot.lane.b32.xlu2 %v8564_v43, %s9050_s29 }
 0xe56   :  { %8575 = vrot.lane.b32.xlu0 %v14040_v5, %s9048_s27  ;;  %8605 = vrot.lane.b32.xlu1 %v8604_v50, %s9050_s29  ;;  %v8659_v50 = vpack.i.bf16 %v5122_v24, %v5121_v3  ;;  %v4965_v3 = vpop.f32.mrf.mxu3 }
 0xe57   :  { %8595 = vrot.lane.b32.xlu2 %v8599_v41, %s9047_s26  ;;  %v14120_v45 = vpop.permute.xlu2 %8435  ;;  %v5113_v41 = vmul.f32 %v14093_v47, %v17053_v36  ;;  %v14205_v33 = vadd.f32 %v4965_v3, %v17046_v40 }
 0xe59   :  { %v8644_v43 = vpack.i.bf16 %v5114_v12, %v5113_v41  ;;  %17057 = vst [vmem:[#allocation151_spill] sm:$0xff] %v14205_v33 }
 0xe5e   :  { %8585 = vrot.lane.b32.xlu0 %v8579_v31, %s9048_s27  ;;  %8620 = vrot.lane.b32.xlu1 %v8619_v59, %s9048_s27  ;;  %v4975_v31 = vmul.f32 %v14126_v19, %v17052_v7 }
 0xe5f   :  { %8610 = vrot.lane.b32.xlu2 %v8609_v0, %s9050_s29  ;;  %v14135_v48 = vpop.permute.xlu2 %8445  ;;  %v5123_v0 = vmul.f32 %v14126_v19, %v16813_v11 }
 0xe60   :  { %17045 = vst [vmem:[#allocation129_spill] sm:$0xff] %v14135_v48  ;;  %v8634_v21 = vpack.i.bf16 %v4975_v31, %v4974_v51 }
 0xe61   :  { %v8669_v30 = vpack.i.bf16 %v5123_v0, %v5122_v24 }
 0xe66   :  { %8590 = vrot.lane.b32.xlu0 %v8589_v54, %s9048_s27  ;;  %8625 = vrot.lane.b32.xlu1 %v8624_v20, %s9050_s29  ;;  %v8674_v54 = vpack.i.bf16 %v4974_v51, %v4973_v9  ;;  %v4936_v20 = vpop.f32.mrf.mxu2  ;;  %v14213_v9 = vmul.f32 %v14147_v6, %v16788_v18 }
 0xe67   :  { %8615 = vrot.lane.b32.xlu2 %v8619_v59, %s9047_s26  ;;  %v14161_v17 = vpop.permute.xlu1 %8425  ;;  %v14202_v38 = vadd.f32 %v4936_v20, %v17046_v40  ;;  %v8664_v40 = vpack.i.bf16 %v13969_v10, %v5123_v0 }
 0xe69   :  { %v14151_v23 = vpop.permute.xlu2 %8450  ;;  %17056 = vst [vmem:[#allocation152_spill] sm:$0xff] %v14202_v38  ;;  %v4978_v20 = vmul.f32 %v14202_v38, %v17051_v32 }
 0xe6a   :  { %v8453_v53 = vunpack.i.h.bf16 %v14151_v23 }
 0xe6b   :  { %v8734_v14 = vpack.i.bf16 %v4978_v20, %v14213_v9 }
 0xe6e   :  { %8640 = vrot.lane.b32.xlu0 %v8639_v42, %s9047_s26  ;;  %8650 = vrot.lane.b32.xlu1 %v8649_v46, %s9050_s29  ;;  %v4976_v46 = vmul.f32 %v14154_v44, %v16787_v61 }
 0xe6f   :  { %8630 = vrot.lane.b32.xlu2 %v8629_v2, %s9050_s29  ;;  %v14190_v49 = vpop.permute.xlu1 %8430  ;;  %v8699_v2 = vpack.i.bf16 %v14205_v33, %v14202_v38 }
 0xe71   :  { %v14170_v62 = vpop.permute.xlu2 %8485  ;;  %v14192_v59 = vpop.permute.xlu0 %8440 }
 0xe72   :  { %v16017_v8 = vunpack.i.h.bf16 %v14170_v62  ;;  %v16016_v15 = vunpack.i.l.bf16 %v14170_v62 }
 0xe74   :  { %v14185_v25 = vsel %vm17054_vm9, %v16016_v15, %v16017_v8  ;;  %v17064_v15 = vld [vmem:[#allocation40_spill] sm:$0xff]  ;;  %vm17099_vm9 = vmmov %vm17084_vm1 }
 0xe75   :  { %v4970_v8 = vmul.f32 %v14202_v38, %v17064_v15  ;;  %v8443_v15 = vunpack.i.h.bf16 %v14192_v59 }
 0xe76   :  { %8645 = vrot.lane.b32.xlu0 %v8644_v43, %s9050_s29  ;;  %8660 = vrot.lane.b32.xlu1 %v8659_v50, %s9047_s26  ;;  %v8714_v50 = vpack.i.bf16 %v13981_v37, %v14205_v33  ;;  %v14267_v37 = vmul.f32 %v14147_v6, %v16784_v35 }
 0xe77   :  { %8635 = vrot.lane.b32.xlu2 %v8634_v21, %s9050_s29  ;;  %v8679_v21 = vpack.i.bf16 %v4976_v46, %v4975_v31  ;;  %v14271_v31 = vmul.f32 %v14154_v44, %v16783_v29 }
 0xe79   :  { %v14196_v57 = vpop.permute.xlu2 %8510  ;;  %v8689_v32 = vpack.i.bf16 %v14267_v37, %v14271_v31 }
 0xe7a   :  { %17055 = vst [vmem:[#allocation150_spill] sm:$0xff] %v14196_v57 }
 0xe7e   :  { %8670 = vrot.lane.b32.xlu0 %v8669_v30, %s9050_s29  ;;  %8675 = vrot.lane.b32.xlu1 %v8674_v54, %s17042_s12  ;;  %v14257_v30 = vmul.f32 %v14205_v33, %v17052_v7 }
 0xe7f   :  { %8655 = vrot.lane.b32.xlu2 %v8639_v42, %s9048_s27  ;;  %v8684_v42 = vpack.i.bf16 %v14213_v9, %v4976_v46  ;;  %v8709_v46 = vpack.i.bf16 %v14202_v38, %v14147_v6 }
 0xe80   :  { %v14207_v28 = vpop.permute.xlu1 %8465  ;;  %v14209_v11 = vpop.permute.xlu0 %8455  ;;  %v8719_v7 = vpack.i.bf16 %v14257_v30, %v4978_v20 }
 0xe81   :  { %v14215_v58 = vpop.permute.xlu2 %8520  ;;  %v8467_v12 = vunpack.i.l.bf16 %v14207_v28 }
 0xe86   :  { %8685 = vrot.lane.b32.xlu0 %v8684_v42, %s9050_s29  ;;  %8700 = vrot.lane.b32.xlu1 %v8699_v2, %s9047_s26  ;;  %v8438_v42 = vunpack.i.h.bf16 %v14120_v45 }
 0xe87   :  { %8665 = vrot.lane.b32.xlu2 %v8664_v40, %s9047_s26  ;;  %v4986_v40 = vmul.f32 %v14202_v38, %v16804_v60  ;;  %s17068_s26 = smov 1  }
 0xe88   :  { %v14226_v18 = vpop.permute.xlu1 %8475  ;;  %v14228_v63 = vpop.permute.xlu0 %8460 }
 0xe89   :  { %v16015_v61 = vunpack.i.h.bf16 %v14226_v18  ;;  %v16018_v24 = vunpack.i.l.bf16 %v14226_v18  ;;  %v16014_v51 = vunpack.i.h.bf16 %v14228_v63  ;;  %v14234_v36 = vpop.permute.xlu2 %8525  ;;  %v17076_v56 = vunpack.i.l.bf16 %v14226_v18 }
 0xe8b   :  { %v14241_v10 = vsel %vm121_vm0, %v16018_v24, %v16015_v61  ;;  %v5242_v41 = vsel %vm181_vm2, %v16014_v51, %v8467_v12 }
 0xe8c   :  { %v14246_v43 = vpack.i.bf16 %v8467_v12, %v5242_v41  ;;  %v4987_v12 = vmul.f32 %v14205_v33, %v16805_v13 }
 0xe8e   :  { %17058 = vst [vmem:[#allocation75_spill] sm:$0xff] %v14246_v43  ;;  %8705 = vrot.lane.b32.xlu0 %v8699_v2, %s9048_s27  ;;  %8715 = vrot.lane.b32.xlu1 %v8714_v50, %s9050_s29  ;;  %v8437_v2 = vunpack.i.l.bf16 %v14120_v45  ;;  %v17060_v50 = vld [vmem:[#allocation39_spill] sm:$0xff]  ;;  %v8724_v51 = vpack.i.bf16 %v4987_v12, %v4986_v40  ;;  %v17106_v43 = vunpack.i.h.bf16 %v14226_v18 }
 0xe8f   :  { %8680 = vrot.lane.b32.xlu2 %v8679_v21, %s17042_s12  ;;  %v4969_v21 = vmul.f32 %v14147_v6, %v17060_v50  ;;  %v17065_v50 = vld [vmem:[#allocation4_spill] sm:$0xff] }
 0xe90   :  { %v14253_v0 = vpop.permute.xlu0 %8470  ;;  %v14259_v54 = vpop.permute.xlu1 %8480  ;;  %v5150_v45 = vsel %vm121_vm0, %v8437_v2, %v8438_v42  ;;  %v4971_v24 = vmul.f32 %v14205_v33, %v17065_v50  ;;  %v17098_v33 = vunpack.i.l.bf16 %v14170_v62 }
 0xe91   :  { %v14263_v3 = vpop.permute.xlu2 %8540  ;;  %v8472_v47 = vunpack.i.l.bf16 %v14253_v0  ;;  %v8482_v38 = vunpack.i.l.bf16 %v14259_v54 }
 0xe96   :  { %8710 = vrot.lane.b32.xlu0 %v8709_v46, %s9050_s29  ;;  %8720 = vrot.lane.b32.xlu1 %v8719_v7, %s9050_s29  ;;  %v17061_v46 = vld [vmem:[#allocation36_spill] sm:$0xff] }
 0xe97   :  { %8690 = vrot.lane.b32.xlu2 %v8689_v32, %s9048_s27  ;;  %v4968_v7 = vmul.f32 %v14154_v44, %v17061_v46  ;;  %v8744_v32 = vpack.i.bf16 %v5150_v45, %v8437_v2  ;;  %v16022_v45 = vunpack.i.l.bf16 %v14196_v57 }
 0xe98   :  { %v14283_v29 = vpop.permute.xlu0 %8490  ;;  %v14285_v35 = vpop.permute.xlu1 %8500 }
 0xe99   :  { %17059 = vst [vmem:[#allocation55_spill] sm:$0xff] %v14285_v35  ;;  %v14292_v41 = vpop.permute.xlu2 %8545  ;;  %v8694_v61 = vpack.i.bf16 %v4969_v21, %v4968_v7  ;;  %v8729_v21 = vpack.i.bf16 %v4971_v24, %v4970_v8  ;;  %v16025_v7 = vunpack.i.l.bf16 %v14285_v35 }
 0xe9a   :  { %v8548_v27 = vunpack.i.h.bf16 %v14292_v41 }
 0xe9e   :  { %8725 = vrot.lane.b32.xlu0 %v8724_v51, %s9048_s27  ;;  %8745 = vrot.lane.b32.xlu1 %v8744_v32, %s17042_s12  ;;  %v8442_v32 = vunpack.i.l.bf16 %v14192_v59 }
 0xe9f   :  { %8695 = vrot.lane.b32.xlu2 %v8694_v61, %s16799_s9  ;;  %v8428_v61 = vunpack.i.h.bf16 %v14161_v17 }
 0xea0   :  { %v14301_v60 = vpop.permute.xlu0 %8495  ;;  %v14303_v13 = vpop.permute.xlu1 %8505 }
 0xea1   :  { %17062 = vst [vmem:[#allocation71_spill] sm:$0xff] %v14301_v60  ;;  %v14309_v46 = vpop.permute.xlu2 %8560  ;;  %v16021_v2 = vunpack.i.h.bf16 %v14303_v13  ;;  %v16019_v40 = vunpack.i.l.bf16 %v14303_v13  ;;  %v17069_v8 = vunpack.i.h.bf16 %v14301_v60 }
 0xea2   :  { %17063 = vst [vmem:[#allocation51_spill] sm:$0xff] %v14303_v13 }
 0xea3   :  { %v14323_v50 = vsel %vm121_vm0, %v8428_v61, %v16019_v40  ;;  %v14330_v12 = vsel %vm121_vm0, %v16021_v2, %v16022_v45  ;;  %v14338_v59 = vsel %vm181_vm2, %v17069_v8, %v16025_v7  ;;  %v5178_v40 = vsel %vm17072_vm8, %v8442_v32, %v8443_v15  ;;  %vm17101_vm8 = vmmov %vm17084_vm1 }
 0xea4   :  { %17066 = vst [vmem:[#allocation56_spill] sm:$0xff] %v14323_v50  ;;  %v16031_v45 = vunpack.i.h.bf16 %v14135_v48  ;;  %v8749_v1 = vpack.i.bf16 %v5178_v40, %v8442_v32  ;;  %v8458_v8 = vunpack.i.h.bf16 %v14209_v11  ;;  %v8457_v7 = vunpack.i.l.bf16 %v14209_v11 }
 0xea5   :  { %17067 = vst [vmem:[#allocation79_spill] sm:$0xff] %v14330_v12  ;;  %v8493_v32 = vunpack.i.h.bf16 %v14283_v29 }
 0xea6   :  { %8730 = vrot.lane.b32.xlu0 %v8729_v21, %s16799_s9  ;;  %17070 = vst [vmem:[#allocation58_spill] sm:$0xff] %v14338_v59  ;;  %v5152_v40 = vsel %vm121_vm0, %v8457_v7, %v8458_v8  ;;  %v8432_v59 = vunpack.i.l.bf16 %v14190_v49 }
 0xea7   :  { %8740 = vrot.lane.b32.xlu2 %v8724_v51, %s17068_s26  ;;  %v16028_v51 = vunpack.i.h.bf16 %v14207_v28 }
 0xea8   :  { %v14340_v24 = vpop.permute.xlu0 %8515  ;;  %v14342_v61 = vpop.permute.xlu1 %8530 }
 0xea9   :  { %17071 = vst [vmem:[#allocation62_spill] sm:$0xff] %v14340_v24  ;;  %v8566_v21 = vpop.permute.xlu2 %8565  ;;  %v16030_v2 = vunpack.i.l.bf16 %v14340_v24 }
 0xeaa   :  { %v8567_v4 = vunpack.i.l.bf16 %v8566_v21  ;;  %v8568_v6 = vunpack.i.h.bf16 %v8566_v21 }
 0xeab   :  { %v14362_v39 = vsel %vm17073_vm12, %v16031_v45, %v16030_v2  ;;  %v8759_v2 = vpack.i.bf16 %v17076_v56, %v8458_v8  ;;  %v8433_v45 = vunpack.i.h.bf16 %v14190_v49  ;;  %v16039_v56 = vunpack.i.l.bf16 %v14151_v23  ;;  %vm17102_vm12 = vmmov %vm17084_vm1 }
 0xeac   :  { %v14355_v26 = vsel %vm181_vm2, %v16028_v51, %v8567_v4  ;;  %17074 = vst [vmem:[#allocation86_spill] sm:$0xff] %v14362_v39 }
 0xead   :  { %v5048_v49 = vsel %vm17079_vm11, %v8432_v59, %v8433_v45  ;;  %vm17105_vm11 = vmmov %vm17084_vm1 }
 0xeae   :  { %8735 = vrot.lane.b32.xlu0 %v8734_v14, %s17042_s12  ;;  %v5151_v14 = vsel %vm121_vm0, %v8438_v42, %v8457_v7  ;;  %v16040_v7 = vunpack.i.h.bf16 %v14253_v0 }
 0xeaf   :  { %8750 = vrot.lane.b32.xlu2 %v8749_v1, %s17042_s12  ;;  %v8774_v55 = vpack.i.bf16 %v5152_v40, %v5151_v14  ;;  %v5049_v14 = vsel %vm17080_vm4, %v8433_v45, %v16039_v56  ;;  %v5179_v56 = vsel %vm17084_vm1, %v8443_v15, %v8482_v38  ;;  %v16043_v15 = vunpack.i.h.bf16 %v14196_v57  ;;  %vm17107_vm4 = vmmov %vm17084_vm1 }
 0xeb0   :  { %v14365_v9 = vpop.permute.xlu0 %8535  ;;  %v14367_v20 = vpop.permute.xlu1 %8555  ;;  %v8764_v42 = vpack.i.bf16 %v5049_v14, %v5048_v49 }
 0xeb1   :  { %17075 = vst [vmem:[#allocation83_spill] sm:$0xff] %v14365_v9  ;;  %v14369_v11 = vpop.permute.xlu2 %8595  ;;  %v16049_v12 = vunpack.i.h.bf16 %v14365_v9  ;;  %v16058_v52 = vunpack.i.h.bf16 %v14367_v20 }
 0xeb2   :  { %v16034_v51 = vunpack.i.h.bf16 %v14369_v11 }
 0xeb4   :  { %v14380_v1 = vsel %vm17077_vm10, %v16034_v51, %v8493_v32  ;;  %vm17104_vm10 = vmmov %vm17084_vm1 }
 0xeb6   :  { %8760 = vrot.lane.b32.xlu0 %v8759_v2, %s17042_s12  ;;  %v5063_v2 = vsel %vm17082_vm15, %v8472_v47, %v16040_v7  ;;  %vm17109_vm15 = vcmask 130048  }
 0xeb7   :  { %8775 = vrot.lane.b32.xlu2 %v8774_v55, %s17042_s12  ;;  %v8779_v22 = vpack.i.bf16 %v5063_v2, %v8472_v47  ;;  %v16041_v55 = vunpack.i.h.bf16 %v14259_v54 }
 0xeb8   :  { %v14391_v8 = vpop.permute.xlu0 %8550  ;;  %v14393_v51 = vpop.permute.xlu1 %8580 }
 0xeb9   :  { %17078 = vst [vmem:[#allocation59_spill] sm:$0xff] %v14391_v8  ;;  %v14399_v40 = vpop.permute.xlu2 %8610  ;;  %v5180_v49 = vsel %vm17085_vm5, %v8482_v38, %v16041_v55  ;;  %v8492_v55 = vunpack.i.l.bf16 %v14283_v29  ;;  %vm17113_vm5 = vmmov %vm17084_vm1 }
 0xeba   :  { %17081 = vst [vmem:[#allocation100_spill] sm:$0xff] %v14399_v40  ;;  %v8784_v7 = vpack.i.bf16 %v5180_v49, %v5179_v56  ;;  %v8523_v56 = vunpack.i.h.bf16 %v14215_v58 }
 0xebb   :  { %v5311_v50 = vsel %vm17091_vm7, %v8492_v55, %v8493_v32  ;;  %vm17116_vm7 = vmmov %vm17109_vm15 }
 0xebe   :  { %8765 = vrot.lane.b32.xlu0 %v8764_v42, %s16799_s9 }
 0xebf   :  { %8780 = vrot.lane.b32.xlu2 %v8779_v22, %s16799_s9  ;;  %v14422_v22 = vsel %vm181_vm2, %v8567_v4, %v8568_v6 }
 0xec0   :  { %v14408_v44 = vpop.permute.xlu0 %8570  ;;  %v14410_v45 = vpop.permute.xlu1 %8600  ;;  %17086 = vst [vmem:[#allocation106_spill] sm:$0xff] %v14422_v22 }
 0xec1   :  { %17083 = vst [vmem:[#allocation63_spill] sm:$0xff] %v14410_v45  ;;  %v14416_v47 = vpop.permute.xlu2 %8615  ;;  %v8572_v14 = vunpack.i.l.bf16 %v14408_v44  ;;  %v16042_v2 = vunpack.i.h.bf16 %v14410_v45  ;;  %v16048_v21 = vunpack.i.l.bf16 %v14410_v45 }
 0xec2   :  { %v8618_v18 = vunpack.i.h.bf16 %v14416_v47 }
 0xec3   :  { %v14425_v42 = vsel %vm181_vm2, %v8568_v6, %v8572_v14  ;;  %v14438_v4 = vsel %vm121_vm0, %v16042_v2, %v16043_v15  ;;  %v14445_v6 = vsel %vm121_vm0, %v16049_v12, %v16048_v21 }
 0xec4   :  { %17087 = vst [vmem:[#allocation102_spill] sm:$0xff] %v14438_v4  ;;  %v8597_v4 = vunpack.i.l.bf16 %v14369_v11 }
 0xec5   :  { %17088 = vst [vmem:[#allocation103_spill] sm:$0xff] %v14445_v6 }
 0xec6   :  { %8785 = vrot.lane.b32.xlu0 %v8784_v7, %s17042_s12  ;;  %v17089_v7 = vunpack.i.h.bf16 %v14170_v62  ;;  %v17100_v62 = vunpack.i.h.bf16 %v14369_v11  ;;  %v16073_v11 = vunpack.i.l.bf16 %v14391_v8 }
 0xec8   :  { %v8576_v49 = vpop.permute.xlu0 %8575  ;;  %v14448_v29 = vpop.permute.xlu1 %8605  ;;  %v5310_v38 = vsel %vm17090_vm14, %v17089_v7, %v8492_v55  ;;  %v8522_v55 = vunpack.i.l.bf16 %v14215_v58  ;;  %v17092_v7 = vld [vmem:[#allocation44_spill] sm:$0xff]  ;;  %vm17114_vm14 = vmmov %vm17084_vm1 }
 0xec9   :  { %v14454_v2 = vpop.permute.xlu2 %8630  ;;  %v8578_v15 = vunpack.i.h.bf16 %v8576_v49  ;;  %v8577_v13 = vunpack.i.l.bf16 %v8576_v49  ;;  %v8789_v6 = vpack.i.bf16 %v5311_v50, %v5310_v38 }
 0xeca   :  { %v16052_v45 = vunpack.i.h.bf16 %v14454_v2  ;;  %v5033_v50 = vsel %vm121_vm0, %v8522_v55, %v8523_v56 }
 0xecb   :  { %v8824_v39 = vpack.i.bf16 %v8432_v59, %v8578_v15  ;;  %v14458_v21 = vsel %vm121_vm0, %v8523_v56, %v8577_v13  ;;  %v14461_v12 = vsel %vm121_vm0, %v8577_v13, %v8578_v15  ;;  %v5032_v13 = vsel %vm121_vm0, %v17092_v7, %v8522_v55 }
 0xecc   :  { %v14465_v9 = vpack.i.bf16 %v16052_v45, %v8572_v14  ;;  %v8794_v45 = vpack.i.bf16 %v5033_v50, %v5032_v13  ;;  %v8427_v55 = vunpack.i.l.bf16 %v14161_v17  ;;  %v17093_v13 = vunpack.i.h.bf16 %v14253_v0 }
 0xecd   :  { %8825 = vrot.lane.b32.xlu2 %v8824_v39, %s16799_s9  ;;  %v8557_v39 = vunpack.i.l.bf16 %v14367_v20  ;;  %v8573_v17 = vunpack.i.h.bf16 %v14408_v44  ;;  %v17096_v0 = vunpack.i.h.bf16 %v14234_v36  ;;  %v8563_v44 = vunpack.i.h.bf16 %v14309_v46 }
 0xece   :  { %8790 = vrot.lane.b32.xlu0 %v8789_v6, %s17068_s26 }
 0xecf   :  { %v5064_v50 = vsel %vm17094_vm3, %v17093_v13, %v8557_v39  ;;  %vm17118_vm3 = vmmov %vm17116_vm7 }
 0xed0   :  { %v8586_v59 = vpop.permute.xlu0 %8585  ;;  %v14472_v49 = vpop.permute.xlu1 %8620 }
 0xed1   :  { %v14477_v15 = vpop.permute.xlu2 %8635  ;;  %v8588_v14 = vunpack.i.h.bf16 %v8586_v59  ;;  %v8587_v38 = vunpack.i.l.bf16 %v8586_v59  ;;  %v16056_v32 = vunpack.i.l.bf16 %v14472_v49 }
 0xed3   :  { %v5190_v58 = vsel %vm121_vm0, %v8587_v38, %v8588_v14  ;;  %v14488_v56 = vsel %vm121_vm0, %v8588_v14, %v16056_v32 }
 0xed4   :  { %v8839_v6 = vpack.i.bf16 %v5190_v58, %v8587_v38 }
 0xed6   :  { %8840 = vrot.lane.b32.xlu2 %v8839_v6, %s17042_s12  ;;  %8795 = vrot.lane.b32.xlu0 %v8794_v45, %s16799_s9  ;;  %v5065_v45 = vsel %vm17095_vm6, %v8557_v39, %v16058_v52  ;;  %vm17125_vm6 = vmmov %vm17084_vm1 }
 0xed7   :  { %v8814_v39 = vpack.i.bf16 %v5065_v45, %v5064_v50 }
 0xed8   :  { %v8591_v38 = vpop.permute.xlu0 %8590  ;;  %v14495_v58 = vpop.permute.xlu1 %8625 }
 0xed9   :  { %v14500_v6 = vpop.permute.xlu2 %8655  ;;  %v8593_v48 = vunpack.i.h.bf16 %v8591_v38  ;;  %v8592_v14 = vunpack.i.l.bf16 %v8591_v38  ;;  %v16060_v32 = vunpack.i.l.bf16 %v14495_v58 }
 0xedb   :  { %v14505_v59 = vsel %vm121_vm0, %v8593_v48, %v8427_v55  ;;  %v14510_v13 = vsel %vm121_vm0, %v17096_v0, %v8592_v14  ;;  %v14513_v34 = vsel %vm121_vm0, %v8592_v14, %v8593_v48  ;;  %v5262_v38 = vsel %vm181_vm2, %v8573_v17, %v16060_v32 }
 0xedc   :  { %v8562_v55 = vunpack.i.l.bf16 %v14309_v46  ;;  %v14522_v19 = vpack.i.bf16 %v5262_v38, %v8573_v17 }
 0xede   :  { %8815 = vrot.lane.b32.xlu0 %v8814_v39, %s16799_s9  ;;  %v5163_v50 = vsel %vm121_vm0, %v8562_v55, %v8563_v44  ;;  %v5162_v22 = vsel %vm121_vm0, %v17106_v43, %v8562_v55  ;;  %v8617_v43 = vunpack.i.l.bf16 %v14416_v47 }
 0xedf   :  { %v8819_v38 = vpack.i.bf16 %v8563_v44, %v5163_v50 }
 0xee0   :  { %v14525_v0 = vpop.permute.xlu0 %8640  ;;  %v14527_v48 = vpop.permute.xlu1 %8650 }
 0xee1   :  { %v14530_v45 = vpop.permute.xlu2 %8665  ;;  %v16067_v14 = vunpack.i.h.bf16 %v14525_v0  ;;  %v8642_v52 = vunpack.i.l.bf16 %v14525_v0  ;;  %v16068_v32 = vunpack.i.h.bf16 %v14527_v48 }
 0xee2   :  { %v16069_v46 = vunpack.i.h.bf16 %v14530_v45 }
 0xee3   :  { %v14539_v17 = vsel %vm17097_vm13, %v8642_v52, %v16067_v14  ;;  %v14544_v39 = vpack.i.bf16 %v16068_v32, %v14355_v26  ;;  %v8533_v14 = vunpack.i.h.bf16 %v14342_v61  ;;  %vm17128_vm13 = vmmov %vm17084_vm1 }
 0xee4   :  { %v5308_v57 = vsel %vm17099_vm9, %v16069_v46, %v17098_v33  ;;  %v5326_v33 = vsel %vm17101_vm8, %v8597_v4, %v17100_v62  ;;  %v8532_v46 = vunpack.i.l.bf16 %v14342_v61  ;;  %vm17138_vm9 = vmmov %vm17084_vm1 }
 0xee5   :  { %v8754_v24 = vpack.i.bf16 %v14267_v37, %v5308_v57  ;;  %v5325_v50 = vsel %vm17102_vm12, %v8533_v14, %v8597_v4  ;;  %vm17140_vm8 = vmmov %vm17084_vm1 }
 0xee6   :  { %8820 = vrot.lane.b32.xlu0 %v8819_v38, %s17042_s12  ;;  %v17103_v38 = vunpack.i.l.bf16 %v14151_v23  ;;  %v8844_v5 = vpack.i.bf16 %v5326_v33, %v5325_v50  ;;  %v8874_v23 = vpack.i.bf16 %v8642_v52, %v8618_v18  ;;  %vm17142_vm12 = vmmov %vm17084_vm1 }
 0xee7   :  { %8755 = vrot.lane.b32.xlu1 %v8754_v24, %s17068_s26 }
 0xee8   :  { %v14557_v26 = vpop.permute.xlu0 %8645  ;;  %v14559_v44 = vpop.permute.xlu1 %8660  ;;  %v5050_v24 = vsel %vm17104_vm10, %v17103_v38, %v8453_v53  ;;  %vm17143_vm10 = vcmask 138240  }
 0xee9   :  { %v14565_v32 = vpop.permute.xlu2 %8680  ;;  %v16074_v57 = vunpack.i.h.bf16 %v14559_v44  ;;  %v8662_v37 = vunpack.i.l.bf16 %v14559_v44  ;;  %v8769_v62 = vpack.i.bf16 %v8453_v53, %v5050_v24 }
 0xeea   :  { %v17108_v50 = vunpack.i.h.bf16 %v14565_v32 }
 0xeeb   :  { %v14578_v4 = vsel %vm17105_vm11, %v8662_v37, %v16074_v57  ;;  %v5216_v38 = vsel %vm17107_vm4, %v8548_v27, %v8662_v37  ;;  %v16083_v57 = vunpack.i.l.bf16 %v14292_v41  ;;  %vm17147_vm11 = vmmov %vm17084_vm1 }
 0xeec   :  { %v8864_v33 = vpack.i.bf16 %v5162_v22, %v5216_v38  ;;  %v14593_v53 = vsel %vm17109_vm15, %v16073_v11, %v17108_v50  ;;  %v5324_v22 = vsel %vm17084_vm1, %v8532_v46, %v8533_v14  ;;  %v16076_v50 = vunpack.i.h.bf16 %v14285_v35  ;;  %vm17149_vm4 = vmmov %vm17118_vm3 }
 0xeed   :  { %17110 = vst [vmem:[#allocation96_spill] sm:$0xff] %v14593_v53  ;;  %v16077_v11 = vunpack.i.h.bf16 %v14391_v8  ;;  %v8682_v14 = vunpack.i.l.bf16 %v14565_v32  ;;  %v8799_v37 = vpack.i.bf16 %v5324_v22, %v8532_v46  ;;  %v16080_v38 = vunpack.i.h.bf16 %v14399_v40  ;;  %vm17154_vm15 = vmmov %vm17118_vm3 }
 0xeee   :  { %8845 = vrot.lane.b32.xlu0 %v8844_v5, %s17068_s26  ;;  %8865 = vrot.lane.b32.xlu2 %v8864_v33, %s17042_s12  ;;  %v16075_v5 = vunpack.i.h.bf16 %v14393_v51  ;;  %vm17158_vm1 = vmmov %vm17143_vm10 }
 0xeef   :  { %8770 = vrot.lane.b32.xlu1 %v8769_v62, %s16799_s9  ;;  %v5096_v62 = vsel %vm17114_vm14, %v8617_v43, %v8618_v18  ;;  %vm17166_vm14 = vmmov %vm17158_vm1 }
 0xef0   :  { %v14599_v55 = vpop.permute.xlu0 %8670  ;;  %v14601_v61 = vpop.permute.xlu1 %8675  ;;  %v5095_v47 = vsel %vm17113_vm5, %v16075_v5, %v8617_v43  ;;  %vm17161_vm5 = vmmov %vm17118_vm3 }
 0xef1   :  { %17111 = vst [vmem:[#allocation98_spill] sm:$0xff] %v14599_v55  ;;  %v8884_v24 = vpack.i.bf16 %v5096_v62, %v5095_v47  ;;  %v17115_v5 = vunpack.i.h.bf16 %v14601_v61  ;;  %v17117_v33 = vunpack.i.l.bf16 %v14601_v61  ;;  %v17120_v46 = vunpack.i.h.bf16 %v14599_v55  ;;  %v14639_v22 = vpop.permute.xlu2 %8690 }
 0xef2   :  { %17112 = vst [vmem:[#allocation95_spill] sm:$0xff] %v14601_v61 }
 0xef3   :  { %v14622_v43 = vsel %vm17116_vm7, %v17115_v5, %v8682_v14  ;;  %v14629_v52 = vsel %vm17118_vm3, %v16077_v11, %v17117_v33  ;;  %v14636_v18 = vsel %vm181_vm2, %v17120_v46, %v16076_v50  ;;  %v17122_v5 = vunpack.i.l.bf16 %v14599_v55  ;;  %vm17167_vm7 = vmmov %vm17158_vm1 }
 0xef4   :  { %17119 = vst [vmem:[#allocation113_spill] sm:$0xff] %v14629_v52  ;;  %v8632_v55 = vunpack.i.l.bf16 %v14454_v2  ;;  %v8648_v52 = vunpack.i.h.bf16 %v14557_v26 }
 0xef5   :  { %17121 = vst [vmem:[#allocation128_spill] sm:$0xff] %v14636_v18  ;;  %v14647_v47 = vsel %vm181_vm2, %v16080_v38, %v17122_v5  ;;  %v17126_v5 = vunpack.i.l.bf16 %v14472_v49  ;;  %v8628_v18 = vunpack.i.h.bf16 %v14495_v58 }
 0xef6   :  { %8875 = vrot.lane.b32.xlu0 %v8874_v23, %s16799_s9  ;;  %v8623_v23 = vunpack.i.h.bf16 %v14472_v49  ;;  %17123 = vst [vmem:[#allocation109_spill] sm:$0xff] %v14647_v47  ;;  %8885 = vrot.lane.b32.xlu2 %v8884_v24, %s16799_s9  ;;  %v8543_v49 = vunpack.i.h.bf16 %v14263_v3 }
 0xef7   :  { %8800 = vrot.lane.b32.xlu1 %v8799_v37, %s17068_s26  ;;  %v17124_v37 = vunpack.i.h.bf16 %v14259_v54  ;;  %v17129_v54 = vunpack.i.h.bf16 %v14530_v45 }
 0xef8   :  { %v8686_v62 = vpop.permute.xlu0 %8685  ;;  %v14650_v33 = vpop.permute.xlu1 %8700  ;;  %v5192_v38 = vsel %vm121_vm0, %v17126_v5, %v8623_v23  ;;  %v8542_v5 = vunpack.i.l.bf16 %v14263_v3 }
 0xef9   :  { %v8688_v14 = vunpack.i.h.bf16 %v8686_v62  ;;  %v8687_v46 = vunpack.i.l.bf16 %v8686_v62  ;;  %v16086_v50 = vunpack.i.l.bf16 %v14650_v33  ;;  %v5181_v11 = vsel %vm17125_vm6, %v17124_v37, %v16083_v57 }
 0xefa   :  { %v17127_v62 = vunpack.i.h.bf16 %v14525_v0  ;;  %v8879_v40 = vpack.i.bf16 %v17129_v54, %v8632_v55  ;;  %v8804_v57 = vpack.i.bf16 %v8548_v27, %v5181_v11  ;;  %v8889_v35 = vpack.i.bf16 %v8623_v23, %v5192_v38  ;;  %v14686_v54 = vpop.permute.xlu2 %8695  ;;  %v17130_v27 = vld [vmem:[#allocation41_spill] sm:$0xff] }
 0xefb   :  { %v14663_v24 = vsel %vm181_vm2, %v8687_v46, %v8688_v14  ;;  %v5016_v11 = vsel %vm181_vm2, %v17130_v27, %v8687_v46  ;;  %v5138_v3 = vsel %vm181_vm2, %v8542_v5, %v8543_v49  ;;  %v8638_v38 = vunpack.i.h.bf16 %v14477_v15 }
 0xefc   :  { %v14670_v47 = vsel %vm17128_vm13, %v17127_v62, %v16086_v50  ;;  %v5264_v23 = vsel %vm181_vm2, %v8628_v18, %v8632_v55  ;;  %v16089_v37 = vunpack.i.l.bf16 %v14301_v60  ;;  %v8809_v61 = vpack.i.bf16 %v5138_v3, %v14257_v30  ;;  %vm17176_vm13 = vmmov %vm17158_vm1 }
 0xefd   :  { %v8899_v50 = vpack.i.bf16 %v5016_v11, %v8638_v38  ;;  %v16090_v55 = vunpack.i.l.bf16 %v14228_v63  ;;  %vm17171_vm6 = vcmask 7168  }
 0xefe   :  { %8880 = vrot.lane.b32.xlu0 %v8879_v40, %s17068_s26  ;;  %8890 = vrot.lane.b32.xlu2 %v8889_v35, %s17042_s12 }
 0xeff   :  { %8805 = vrot.lane.b32.xlu1 %v8804_v57, %s17042_s12  ;;  %v17131_v57 = vunpack.i.l.bf16 %v14495_v58  ;;  %v8637_v58 = vunpack.i.l.bf16 %v14477_v15  ;;  %v17133_v15 = vunpack.i.h.bf16 %v14228_v63 }
 0xf00   :  { %v14682_v0 = vpop.permute.xlu0 %8705  ;;  %v14684_v62 = vpop.permute.xlu1 %8715 }
 0xf01   :  { %v8718_v40 = vunpack.i.h.bf16 %v14684_v62  ;;  %v5263_v35 = vsel %vm181_vm2, %v17131_v57, %v8628_v18  ;;  %v8652_v18 = vunpack.i.l.bf16 %v14527_v48  ;;  %v8707_v60 = vunpack.i.l.bf16 %v14682_v0 }
 0xf02   :  { %v8894_v46 = vpack.i.bf16 %v5264_v23, %v5263_v35  ;;  %v5003_v35 = vsel %vm181_vm2, %v8637_v58, %v8638_v38 }
 0xf03   :  { %v14704_v5 = vsel %vm181_vm2, %v8718_v40, %v16089_v37  ;;  %v5141_v3 = vsel %vm181_vm2, %v8648_v52, %v8652_v18  ;;  %v17134_v37 = vunpack.i.h.bf16 %v14454_v2 }
 0xf04   :  { %17132 = vst [vmem:[#allocation122_spill] sm:$0xff] %v14704_v5  ;;  %v8914_v5 = vpack.i.bf16 %v8652_v18, %v5141_v3  ;;  %v8647_v18 = vunpack.i.l.bf16 %v14557_v26  ;;  %v17136_v3 = vpack.i.bf16 %v14461_v12, %v14458_v21 }
 0xf06   :  { %8900 = vrot.lane.b32.xlu0 %v8899_v50, %s16799_s9  ;;  %8895 = vrot.lane.b32.xlu2 %v8894_v46, %s17068_s26  ;;  %v16093_v50 = vunpack.i.h.bf16 %v14448_v29  ;;  %v14730_v46 = vpop.permute.xlu2 %8740  ;;  %v5140_v12 = vsel %vm181_vm2, %v8647_v18, %v8648_v52 }
 0xf07   :  { %8810 = vrot.lane.b32.xlu1 %v8809_v61, %s17042_s12  ;;  %v14724_v61 = vsel %vm181_vm2, %v16090_v55, %v17133_v15  ;;  %v8708_v55 = vunpack.i.h.bf16 %v14682_v0 }
 0xf08   :  { %v14711_v30 = vpop.permute.xlu0 %8710  ;;  %v14713_v11 = vpop.permute.xlu1 %8720  ;;  %v5002_v57 = vsel %vm181_vm2, %v16093_v50, %v8637_v58  ;;  %v8582_v58 = vunpack.i.l.bf16 %v14393_v51 }
 0xf09   :  { %v8712_v40 = vunpack.i.l.bf16 %v14711_v30  ;;  %v17135_v50 = vunpack.i.l.bf16 %v14713_v11  ;;  %v8904_v8 = vpack.i.bf16 %v5003_v35, %v5002_v57  ;;  %v17137_v57 = vunpack.i.h.bf16 %v14393_v51 }
 0xf0a   :  { %v5139_v35 = vsel %vm181_vm2, %v8543_v49, %v8647_v18  ;;  %v8713_v2 = vunpack.i.h.bf16 %v14711_v30  ;;  %v8667_v51 = vunpack.i.l.bf16 %v14530_v45 }
 0xf0b   :  { %v14737_v23 = vsel %vm181_vm2, %v17134_v37, %v8712_v40  ;;  %v14746_v38 = vsel %vm181_vm2, %v8688_v14, %v17135_v50  ;;  %v16096_v37 = vunpack.i.h.bf16 %v14500_v6  ;;  %v5094_v26 = vsel %vm17138_vm9, %v8582_v58, %v17137_v57  ;;  %vm17180_vm9 = vmmov %vm17171_vm6 }
 0xf0c   :  { %v8909_v15 = vpack.i.bf16 %v5140_v12, %v5139_v35 }
 0xf0d   :  { %v5202_v50 = vsel %vm121_vm0, %v16096_v37, %v8707_v60  ;;  %v8717_v37 = vunpack.i.l.bf16 %v14684_v62  ;;  %v17141_v62 = vunpack.i.l.bf16 %v14292_v41  ;;  %v17144_v41 = vpack.i.bf16 %v14185_v25, %v14380_v1 }
 0xf0e   :  { %8915 = vrot.lane.b32.xlu0 %v8914_v5, %s17042_s12  ;;  %8905 = vrot.lane.b32.xlu2 %v8904_v8, %s16799_s9  ;;  %v5203_v5 = vsel %vm121_vm0, %v8707_v60, %v8708_v55  ;;  %v8834_v8 = vpack.i.bf16 %v5094_v26, %v8582_v58  ;;  %v17139_v58 = vunpack.i.h.bf16 %v14559_v44  ;;  %v17148_v25 = vunpack.i.h.bf16 %v14565_v32 }
 0xf0f   :  { %8830 = vrot.lane.b32.xlu1 %v17136_v3, %s16799_s9  ;;  %v8949_v21 = vpack.i.bf16 %v5203_v5, %v5202_v50  ;;  %v14772_v3 = vpop.permute.xlu2 %8750  ;;  %v5275_v52 = vsel %vm181_vm2, %v8713_v2, %v8717_v37  ;;  %v16104_v50 = vunpack.i.h.bf16 %v14686_v54  ;;  %v5219_v57 = vsel %vm17142_vm12, %v8667_v51, %v17141_v62  ;;  %vm17185_vm12 = vmmov %vm17171_vm6 }
 0xf10   :  { %v14759_v14 = vpop.permute.xlu0 %8725  ;;  %v5218_v18 = vsel %vm17140_vm8, %v17139_v58, %v8667_v51  ;;  %v8959_v5 = vpack.i.bf16 %v8717_v37, %v5275_v52  ;;  %v8703_v37 = vunpack.i.h.bf16 %v14650_v33  ;;  %v8527_v58 = vunpack.i.l.bf16 %v14234_v36  ;;  %vm17184_vm8 = vmmov %vm17118_vm3 }
 0xf11   :  { %v8727_v26 = vunpack.i.l.bf16 %v14759_v14  ;;  %v8924_v45 = vpack.i.bf16 %v5219_v57, %v5218_v18  ;;  %v8607_v18 = vunpack.i.l.bf16 %v14448_v29  ;;  %v17152_v57 = vunpack.i.h.bf16 %v14234_v36 }
 0xf13   :  { %v5000_v32 = vsel %vm181_vm2, %v17130_v27, %v8607_v18  ;;  %v8723_v27 = vunpack.i.h.bf16 %v14713_v11 }
 0xf16   :  { %8950 = vrot.lane.b32.xlu0 %v8949_v21, %s17042_s12  ;;  %8910 = vrot.lane.b32.xlu2 %v8909_v15, %s17042_s12  ;;  %v8728_v15 = vunpack.i.h.bf16 %v14759_v14 }
 0xf17   :  { %8835 = vrot.lane.b32.xlu1 %v8834_v8, %s16799_s9  ;;  %v14802_v35 = vpop.permute.xlu2 %8775  ;;  %v17146_v8 = vunpack.i.l.bf16 %v14650_v33  ;;  %v17151_v33 = vpack.i.bf16 %v14513_v34, %v14510_v13  ;;  %v5274_v13 = vsel %vm181_vm2, %v8712_v40, %v8713_v2 }
 0xf18   :  { %v14779_v60 = vpop.permute.xlu0 %8730  ;;  %v5081_v12 = vsel %vm121_vm0, %v8727_v26, %v8728_v15  ;;  %v16099_v36 = vunpack.i.h.bf16 %v14802_v35 }
 0xf19   :  { %v16115_v49 = vunpack.i.l.bf16 %v14779_v60  ;;  %v5111_v51 = vsel %vm17147_vm11, %v17146_v8, %v8703_v37  ;;  %v8979_v52 = vpack.i.bf16 %v8728_v15, %v5081_v12  ;;  %v5290_v15 = vsel %vm121_vm0, %v8527_v58, %v17152_v57  ;;  %vm17188_vm11 = vmmov %vm17171_vm6 }
 0xf1a   :  { %v8984_v12 = vpack.i.bf16 %v5290_v15, %v8527_v58  ;;  %v17155_v58 = vunpack.i.l.bf16 %v14713_v11  ;;  %v17157_v15 = vpack.i.bf16 %v14724_v61, %v14737_v23  ;;  %v16102_v23 = vunpack.i.h.bf16 %v14772_v3  ;;  %v17160_v61 = vld [vmem:[#allocation10_spill] sm:$0xff] }
 0xf1b   :  { %v14799_v44 = vsel %vm17143_vm10, %v16104_v50, %v16115_v49  ;;  %vm17186_vm10 = vmmov %vm17118_vm3 }
 0xf1e   :  { %8960 = vrot.lane.b32.xlu0 %v8959_v5, %s17068_s26  ;;  %8925 = vrot.lane.b32.xlu2 %v8924_v45, %s17042_s12  ;;  %v8944_v5 = vpack.i.bf16 %v8703_v37, %v5111_v51  ;;  %v17153_v37 = vunpack.i.h.bf16 %v14448_v29  ;;  %v8692_v51 = vunpack.i.l.bf16 %v14639_v22 }
 0xf1f   :  { %8850 = vrot.lane.b32.xlu1 %v17144_v41, %s17068_s26  ;;  %v14836_v45 = vpop.permute.xlu2 %8780 }
 0xf20   :  { %v14809_v14 = vpop.permute.xlu0 %8735  ;;  %v5001_v41 = vsel %vm181_vm2, %v8607_v18, %v17153_v37  ;;  %v5019_v18 = vsel %vm181_vm2, %v17155_v58, %v8723_v27  ;;  %v16112_v0 = vunpack.i.h.bf16 %v14836_v45 }
 0xf21   :  { %17145 = vst [vmem:[#allocation117_spill] sm:$0xff] %v14809_v14  ;;  %v16098_v21 = vunpack.i.l.bf16 %v14809_v14  ;;  %v8859_v8 = vpack.i.bf16 %v5001_v41, %v5000_v32  ;;  %v8969_v57 = vpack.i.bf16 %v8723_v27, %v5019_v18  ;;  %v9014_v41 = vpack.i.bf16 %v14048_v16, %v17160_v61 }
 0xf23   :  { %v14824_v1 = vsel %vm17149_vm4, %v17148_v25, %v16098_v21  ;;  %v17156_v25 = vunpack.i.h.bf16 %v14367_v20  ;;  %v8693_v20 = vunpack.i.h.bf16 %v14639_v22  ;;  %vm17193_vm4 = vmmov %vm17118_vm3 }
 0xf24   :  { %17150 = vst [vmem:[#allocation124_spill] sm:$0xff] %v14824_v1 }
 0xf25   :  { %v5080_v37 = vsel %vm121_vm0, %v8693_v20, %v8727_v26  ;;  %v17163_v26 = vpack.i.bf16 %v14578_v4, %v14241_v10 }
 0xf26   :  { %8980 = vrot.lane.b32.xlu0 %v8979_v52, %s16799_s9  ;;  %8945 = vrot.lane.b32.xlu2 %v8944_v5, %s16799_s9  ;;  %v8954_v52 = vpack.i.bf16 %v5274_v13, %v14505_v59  ;;  %v5078_v59 = vsel %vm121_vm0, %v17092_v7, %v8692_v51  ;;  %v8657_v13 = vunpack.i.l.bf16 %v14500_v6 }
 0xf27   :  { %8855 = vrot.lane.b32.xlu1 %v17151_v33, %s17068_s26  ;;  %v14861_v40 = vpop.permute.xlu2 %8825  ;;  %v8869_v33 = vpack.i.bf16 %v5078_v59, %v17156_v25 }
 0xf28   :  { %v14831_v62 = vpop.permute.xlu0 %8760  ;;  %v8828_v5 = vunpack.i.h.bf16 %v14861_v40 }
 0xf29   :  { %v8762_v34 = vunpack.i.l.bf16 %v14831_v62 }
 0xf2b   :  { %v14854_v29 = vsel %vm17154_vm15, %v16099_v36, %v8762_v34  ;;  %v5079_v34 = vsel %vm121_vm0, %v8692_v51, %v8693_v20  ;;  %vm17194_vm15 = vmmov %vm17118_vm3 }
 0xf2e   :  { %8985 = vrot.lane.b32.xlu0 %v8984_v12, %s17068_s26  ;;  %8955 = vrot.lane.b32.xlu2 %v8954_v52, %s17068_s26  ;;  %v8974_v12 = vpack.i.bf16 %v5080_v37, %v5079_v34  ;;  %v16103_v37 = vunpack.i.l.bf16 %v14730_v46  ;;  %v17173_v34 = vpack.i.bf16 %v14746_v38, %v14663_v24  ;;  %v17177_v24 = vld [vmem:[#allocation106_spill] sm:$0xff] }
 0xf2f   :  { %8860 = vrot.lane.b32.xlu1 %v8859_v8, %s16799_s9  ;;  %v17164_v8 = vunpack.i.h.bf16 %v14500_v6  ;;  %v8934_v6 = vpack.i.bf16 %v14488_v56, %v8708_v55  ;;  %v17165_v56 = vunpack.i.h.bf16 %v14207_v28  ;;  %v17178_v38 = vpack.i.bf16 %v14425_v42, %v17177_v24  ;;  %v17182_v42 = vld [vmem:[#allocation75_spill] sm:$0xff] }
 0xf30   :  { %v14859_v30 = vpop.permute.xlu0 %8765  ;;  %v14911_v52 = vpop.permute.xlu2 %8840 }
 0xf31   :  { %v16107_v2 = vunpack.i.l.bf16 %v14859_v30  ;;  %v5201_v51 = vsel %vm121_vm0, %v8657_v13, %v17164_v8  ;;  %v9024_v55 = vpack.i.bf16 %v17165_v56, %v14271_v31 }
 0xf32   :  { %v8929_v27 = vpack.i.bf16 %v5201_v51, %v8657_v13  ;;  %v16108_v51 = vunpack.i.h.bf16 %v14859_v30 }
 0xf33   :  { %v14879_v7 = vsel %vm17158_vm1, %v8828_v5, %v16107_v2 }
 0xf36   :  { %9000 = vrot.lane.b32.xlu0 %v17157_v15, %s17068_s26  ;;  %8970 = vrot.lane.b32.xlu2 %v8969_v57, %s16799_s9 }
 0xf37   :  { %8870 = vrot.lane.b32.xlu1 %v8869_v33, %s16799_s9  ;;  %v17168_v33 = vpack.i.bf16 %v14670_v47, %v14539_v17  ;;  %v5907_v17 = vld [vmem:[%s15651_s15] sm:$0xff] }
 0xf38   :  { %v14883_v11 = vpop.permute.xlu0 %8785 }
 0xf39   :  { %17159 = vst [vmem:[#allocation119_spill] sm:$0xff] %v14883_v11  ;;  %v16101_v32 = vunpack.i.l.bf16 %v14883_v11 }
 0xf3b   :  { %v14899_v22 = vsel %vm17161_vm5, %v16102_v23, %v16101_v32  ;;  %v16109_v23 = vunpack.i.h.bf16 %v14883_v11  ;;  %vm17196_vm5 = vmmov %vm17158_vm1 }
 0xf3c   :  { %17162 = vst [vmem:[#allocation118_spill] sm:$0xff] %v14899_v22 }
 0xf3e   :  { %9015 = vrot.lane.b32.xlu0 %v9014_v41, %s17068_s26  ;;  %8975 = vrot.lane.b32.xlu2 %v8974_v12, %s16799_s9 }
 0xf3f   :  { %8920 = vrot.lane.b32.xlu1 %v17163_v26, %s17042_s12 }
 0xf40   :  { %v14906_v16 = vpop.permute.xlu0 %8790 }
 0xf46   :  { %9030 = vrot.lane.b32.xlu0 %v14544_v39, %s17068_s26  ;;  %8995 = vrot.lane.b32.xlu2 %v14465_v9, %s17068_s26  ;;  %v14930_v39 = vpop.permute.xlu1 %8745 }
 0xf47   :  { %8930 = vrot.lane.b32.xlu1 %v8929_v27, %s17042_s12 }
 0xf48   :  { %v14918_v10 = vpop.permute.xlu0 %8795  ;;  %v14920_v4 = vpop.permute.xlu2 %8865 }
 0xf49   :  { %v16100_v61 = vunpack.i.h.bf16 %v14920_v4 }
 0xf4e   :  { %9010 = vrot.lane.b32.xlu2 %v14522_v19, %s17068_s26 }
 0xf4f   :  { %8935 = vrot.lane.b32.xlu1 %v8934_v6, %s17042_s12 }
 0xf50   :  { %v14928_v59 = vpop.permute.xlu0 %8815  ;;  %v14932_v58 = vpop.permute.xlu2 %8885 }
 0xf51   :  { %v16110_v9 = vunpack.i.l.bf16 %v14928_v59  ;;  %v8888_v18 = vunpack.i.h.bf16 %v14932_v58  ;;  %v16119_v5 = vunpack.i.l.bf16 %v14932_v58 }
 0xf53   :  { %v14946_v19 = vsel %vm17166_vm14, %v16119_v5, %v8888_v18  ;;  %v14953_v25 = vsel %vm17167_vm7, %v16112_v0, %v16110_v9  ;;  %v17191_v9 = vunpack.i.h.bf16 %v14527_v48  ;;  %vm17197_vm14 = vmmov %vm17158_vm1 }
 0xf54   :  { %vm17198_vm7 = vmmov %vm17118_vm3 }
 0xf56   :  { %9025 = vrot.lane.b32.xlu2 %v9024_v55, %s17068_s26 }
 0xf57   :  { %8940 = vrot.lane.b32.xlu1 %v17168_v33, %s16799_s9 }
 0xf58   :  { %v14960_v28 = vpop.permute.xlu0 %8820  ;;  %v14965_v15 = vpop.permute.xlu2 %8890 }
 0xf59   :  { %v14962_v31 = vpop.permute.xlu1 %8755  ;;  %v16114_v20 = vunpack.i.l.bf16 %v14960_v28 }
 0xf5a   :  { %17169 = vst [vmem:[#allocation112_spill] sm:$0xff] %v14962_v31  ;;  %v16097_v57 = vunpack.i.h.bf16 %v14962_v31 }
 0xf5b   :  { %v14978_v47 = vsel %vm17118_vm3, %v16100_v61, %v16114_v20  ;;  %v17192_v20 = vld [vmem:[#allocation92_spill] sm:$0xff]  ;;  %vm17201_vm3 = vmmov %vm17158_vm1 }
 0xf5c   :  { %17170 = vst [vmem:[#allocation130_spill] sm:$0xff] %v14978_v47  ;;  %v14985_v41 = vsel %vm17171_vm6, %v16097_v57, %v16103_v37  ;;  %v16113_v37 = vunpack.i.l.bf16 %v14920_v4 }
 0xf5d   :  { %17172 = vst [vmem:[#allocation114_spill] sm:$0xff] %v14985_v41 }
 0xf5e   :  { %5910 = vperm.xlu2 %7853, %v5907_v17  }
 0xf5f   :  { %8965 = vrot.lane.b32.xlu1 %v17173_v34, %s16799_s9 }
 0xf60   :  { %v14991_v13 = vpop.permute.xlu0 %8845  ;;  %v14996_v8 = vpop.permute.xlu2 %8895 }
 0xf61   :  { %17174 = vst [vmem:[#allocation142_spill] sm:$0xff] %v14991_v13  ;;  %v14993_v12 = vpop.permute.xlu1 %8770  ;;  %v16105_v17 = vunpack.i.l.bf16 %v14991_v13  ;;  %v16111_v50 = vunpack.i.h.bf16 %v14996_v8 }
 0xf62   :  { %v16118_v26 = vunpack.i.l.bf16 %v14993_v12  ;;  %17175 = vst [vmem:[#allocation54_spill] sm:$0xff] %v14996_v8  ;;  %v16134_v8 = vunpack.i.l.bf16 %v14906_v16  ;;  %v17210_v53 = vunpack.i.l.bf16 %v14993_v12 }
 0xf64   :  { %v15004_v27 = vsel %vm17176_vm13, %v16108_v51, %v16118_v26  ;;  %vm17202_vm13 = vmmov %vm17171_vm6 }
 0xf67   :  { %8990 = vrot.lane.b32.xlu1 %v17178_v38, %s17068_s26 }
 0xf68   :  { %v15010_v6 = vpop.permute.xlu0 %8875  ;;  %v15014_v55 = vpop.permute.xlu2 %8905 }
 0xf69   :  { %v15012_v56 = vpop.permute.xlu1 %8800 }
 0xf6a   :  { %17179 = vst [vmem:[#allocation53_spill] sm:$0xff] %v15012_v56  ;;  %v16106_v33 = vunpack.i.h.bf16 %v15012_v56 }
 0xf6c   :  { %v15023_v34 = vsel %vm17180_vm9, %v16106_v33, %v16105_v17  ;;  %v8757_v17 = vunpack.i.l.bf16 %v14962_v31  ;;  %vm17204_vm9 = vmmov %vm17171_vm6 }
 0xf6d   :  { %17181 = vst [vmem:[#allocation99_spill] sm:$0xff] %v15023_v34 }
 0xf6f   :  { %9005 = vrot.lane.b32.xlu1 %v17182_v42, %s17068_s26 }
 0xf70   :  { %v8881_v24 = vpop.permute.xlu0 %8880  ;;  %v15027_v57 = vpop.permute.xlu2 %8910 }
 0xf71   :  { %v8806_v38 = vpop.permute.xlu1 %8805  ;;  %17183 = vst [vmem:[#allocation110_spill] sm:$0xff] %v15027_v57  ;;  %v8882_v61 = vunpack.i.l.bf16 %v8881_v24  ;;  %v8883_v32 = vunpack.i.h.bf16 %v8881_v24 }
 0xf72   :  { %v8808_v21 = vunpack.i.h.bf16 %v8806_v38  ;;  %v8807_v36 = vunpack.i.l.bf16 %v8806_v38  ;;  %v17187_v38 = vld [vmem:[#allocation88_spill] sm:$0xff] }
 0xf73   :  { %v15041_v33 = vsel %vm17185_vm12, %v16111_v50, %v8882_v61  ;;  %v15051_v2 = vsel %vm17188_vm11, %v8883_v32, %v8757_v17  ;;  %vm17208_vm12 = vmmov %vm17158_vm1 }
 0xf74   :  { %v15036_v42 = vsel %vm17184_vm8, %v16109_v23, %v8807_v36  ;;  %v15046_v24 = vsel %vm17186_vm10, %v8808_v21, %v16113_v37  ;;  %17189 = vst [vmem:[#allocation120_spill] sm:$0xff] %v15051_v2  ;;  %v17190_v23 = vunpack.i.l.bf16 %v14228_v63  ;;  %v16116_v37 = vunpack.i.h.bf16 %v14809_v14  ;;  %vm17206_vm8 = vmmov %vm17171_vm6 }
 0xf75   :  { %v16133_v2 = vunpack.i.h.bf16 %v14991_v13  ;;  %vm17209_vm10 = vmmov %vm17158_vm1 }
 0xf76   :  { %v5240_v61 = vsel %vm181_vm2, %v17191_v9, %v17190_v23  ;;  %vm17211_vm11 = vmmov %vm17158_vm1 }
 0xf77   :  { %9020 = vrot.lane.b32.xlu1 %v17187_v38, %s17068_s26  ;;  %v16117_v38 = vunpack.i.l.bf16 %v15027_v57  ;;  %v9034_v32 = vpack.i.bf16 %v17192_v20, %v5240_v61 }
 0xf78   :  { %v15053_v51 = vpop.permute.xlu0 %8900  ;;  %v15060_v50 = vpop.permute.xlu2 %8925 }
 0xf79   :  { %v8811_v36 = vpop.permute.xlu1 %8810 }
 0xf7a   :  { %v8813_v0 = vunpack.i.h.bf16 %v8811_v36  ;;  %v8812_v21 = vunpack.i.l.bf16 %v8811_v36  ;;  %v8877_v36 = vunpack.i.l.bf16 %v15010_v6 }
 0xf7c   :  { %v15068_v49 = vsel %vm17193_vm4, %v16116_v37, %v8812_v21  ;;  %v15073_v63 = vsel %vm17194_vm15, %v8813_v0, %v16117_v38  ;;  %v16122_v0 = vunpack.i.h.bf16 %v14918_v10  ;;  %v5545_v5 = vsel %vm17197_vm14, %v8888_v18, %v8877_v36  ;;  %vm17212_vm4 = vmmov %vm17158_vm1 }
 0xf7d   :  { %17195 = vst [vmem:[#allocation116_spill] sm:$0xff] %v15073_v63  ;;  %vm17213_vm15 = vmmov %vm17158_vm1  ;;  %vm17216_vm14 = vcmask 588800  }
 0xf7f   :  { %9035 = vrot.lane.b32.xlu1 %v9034_v32, %s17068_s26  ;;  %v16124_v32 = vunpack.i.h.bf16 %v15027_v57 }
 0xf80   :  { %v15076_v48 = vpop.permute.xlu0 %8915  ;;  %v15080_v9 = vpop.permute.xlu2 %8945 }
 0xf81   :  { %v15078_v23 = vpop.permute.xlu1 %8830  ;;  %v8948_v61 = vunpack.i.h.bf16 %v15080_v9  ;;  %v16120_v21 = vunpack.i.l.bf16 %v15080_v9  ;;  %v16125_v37 = vunpack.i.l.bf16 %v15076_v48 }
 0xf82   :  { %v16121_v20 = vunpack.i.l.bf16 %v15078_v23 }
 0xf83   :  { %v5549_v38 = vsel %vm17158_vm1, %v16120_v21, %v8948_v61  ;;  %v15107_v41 = vsel %vm17198_vm7, %v16124_v32, %v16125_v37 }
 0xf84   :  { %5983 = vmatpush.msrb.mxu3 %v5549_v38  ;;  %v15097_v26 = vsel %vm17196_vm5, %v16122_v0, %v16121_v20  ;;  %17199 = vst [vmem:[#allocation125_spill] sm:$0xff] %v15107_v41  ;;  %v17200_v20 = vunpack.i.l.bf16 %v14932_v58  ;;  %v8902_v41 = vunpack.i.l.bf16 %v15053_v51  ;;  %vm17215_vm5 = vmmov %vm17158_vm1 }
 0xf86   :  { %5984 = vmatpush.msrb.mxu3 %v5545_v5 }
 0xf88   :  { %v15109_v38 = vpop.permute.xlu0 %8950  ;;  %v15123_v31 = vpop.permute.xlu2 %8955 }
 0xf89   :  { %v15111_v61 = vpop.permute.xlu1 %8835  ;;  %v16135_v58 = vunpack.i.h.bf16 %v15123_v31 }
 0xf8a   :  { %v16128_v21 = vunpack.i.h.bf16 %v15111_v61 }
 0xf8c   :  { %v15119_v18 = vsel %vm17201_vm3, %v16128_v21, %v17200_v20  ;;  %vm17217_vm3 = vmmov %vm17198_vm7 }
 0xf90   :  { %v15121_v36 = vpop.permute.xlu0 %8960 }
 0xf91   :  { %v8851_v0 = vpop.permute.xlu1 %8850  ;;  %v16136_v37 = vunpack.i.l.bf16 %v15121_v36 }
 0xf92   :  { %v8853_v32 = vunpack.i.h.bf16 %v8851_v0  ;;  %v8852_v5 = vunpack.i.l.bf16 %v8851_v0 }
 0xf93   :  { %v15147_v34 = vsel %vm17206_vm8, %v16135_v58, %v16136_v37  ;;  %v16146_v58 = vunpack.i.h.bf16 %v14928_v59  ;;  %v8773_v37 = vunpack.i.h.bf16 %v14993_v12  ;;  %vm17222_vm8 = vmmov %vm17158_vm1 }
 0xf94   :  { %v15132_v20 = vsel %vm17171_vm6, %v16133_v2, %v8852_v5  ;;  %v15135_v21 = vsel %vm17202_vm13, %v8757_v17, %v8853_v32  ;;  %v15140_v0 = vsel %vm17204_vm9, %v8853_v32, %v16134_v8  ;;  %17207 = vst [vmem:[#allocation42_spill] sm:$0xff] %v15147_v34  ;;  %vm17218_vm6 = vmmov %vm17217_vm3 }
 0xf95   :  { %17203 = vst [vmem:[#allocation121_spill] sm:$0xff] %v15135_v21  ;;  %v16145_v21 = vunpack.i.h.bf16 %v15078_v23  ;;  %v5533_v56 = vsel %vm17211_vm11, %v17210_v53, %v8773_v37  ;;  %v8928_v53 = vunpack.i.h.bf16 %v15060_v50  ;;  %v16143_v37 = vunpack.i.l.bf16 %v15060_v50  ;;  %vm17220_vm13 = vmmov %vm17217_vm3 }
 0xf96   :  { %17205 = vst [vmem:[#allocation101_spill] sm:$0xff] %v15140_v0  ;;  %v15165_v0 = vpop.permute.xlu2 %8970  ;;  %vm17221_vm9 = vmmov %vm17158_vm1 }
 0xf97   :  { %vm17228_vm11 = vmmov %vm17217_vm3 }
 0xf98   :  { %v15149_v14 = vpop.permute.xlu0 %8980 }
 0xf99   :  { %v15151_v13 = vpop.permute.xlu1 %8855  ;;  %v8983_v5 = vunpack.i.h.bf16 %v15149_v14  ;;  %v16137_v17 = vunpack.i.l.bf16 %v15149_v14 }
 0xf9b   :  { %v5541_v32 = vsel %vm17208_vm12, %v16137_v17, %v8983_v5  ;;  %v8827_v5 = vunpack.i.l.bf16 %v14861_v40  ;;  %v16144_v17 = vunpack.i.l.bf16 %v15165_v0  ;;  %v16142_v40 = vunpack.i.h.bf16 %v15014_v55  ;;  %vm17224_vm12 = vmmov %vm17158_vm1 }
 0xf9c   :  { %5985 = vmatpush.msrb.mxu3 %v5541_v32  ;;  %v8973_v32 = vunpack.i.h.bf16 %v15165_v0 }
 0xf9d   :  { %v5529_v63 = vsel %vm17212_vm4, %v16145_v21, %v8827_v5  ;;  %vm17229_vm4 = vmmov %vm17158_vm1 }
 0xf9e   :  { %v5525_v12 = vsel %vm17213_vm15, %v16144_v17, %v8973_v32  ;;  %v5709_v32 = vsel %vm17198_vm7, %v16143_v37, %v8928_v53  ;;  %v17219_v17 = vunpack.i.l.bf16 %v14960_v28  ;;  %vm17230_vm15 = vmmov %vm17158_vm1  ;;  %vm17237_vm7 = vcmask 588800  }
 0xfa1   :  { %v15158_v2 = vpop.permute.xlu1 %8860 }
 0xfa9   :  { %v15160_v8 = vpop.permute.xlu1 %8870 }
 0xfaa   :  { %v8872_v34 = vunpack.i.l.bf16 %v15160_v8 }
 0xfac   :  { %v5537_v1 = vsel %vm17209_vm10, %v16146_v58, %v8872_v34  ;;  %v15196_v34 = vld [vmem:[%s15652_s14] sm:$0xff]  ;;  %v8878_v58 = vunpack.i.h.bf16 %v15010_v6  ;;  %v8782_v6 = vunpack.i.l.bf16 %v14836_v45  ;;  %vm17226_vm10 = vmmov %vm17158_vm1 }
 0xfad   :  { %5986 = vmatpush.msrb.mxu3 %v5537_v1  ;;  %v8733_v1 = vunpack.i.h.bf16 %v14779_v60 }
 0xfaf   :  { %5987 = vmatpush.msrb.mxu3 %v5533_v56  ;;  %v5521_v56 = vsel %vm17158_vm1, %v16142_v40, %v8902_v41  ;;  %v8892_v40 = vunpack.i.l.bf16 %v14965_v15 }
 0xfb1   :  { %v15181_v57 = vpop.permute.xlu1 %8920  ;;  %5988 = vmatpush.msrb.mxu3 %v5529_v63  ;;  %v17214_v63 = vunpack.i.l.bf16 %v14779_v60  ;;  %v16147_v60 = vunpack.i.h.bf16 %v15109_v38 }
 0xfb3   :  { %5989 = vmatpush.msrb.mxu3 %v5525_v12  ;;  %v5517_v5 = vsel %vm17215_vm5, %v17214_v63, %v8733_v1  ;;  %vm17233_vm5 = vmmov %vm17158_vm1 }
 0xfb5   :  { %5990 = vmatpush.msrb.mxu3 %v5521_v56  ;;  %v8893_v56 = vunpack.i.h.bf16 %v14965_v15  ;;  %v17282_v15 = vld [vmem:[#allocation119_spill] sm:$0xff] }
 0xfb7   :  { %5991 = vmatpush.msrb.mxu3 %v5517_v5  ;;  %v8823_v5 = vunpack.i.h.bf16 %v14960_v28  ;;  %v5701_v53 = vsel %vm17218_vm6, %v8892_v40, %v8893_v56  ;;  %v8873_v56 = vunpack.i.h.bf16 %v15160_v8  ;;  %v17223_v28 = vunpack.i.l.bf16 %v15080_v9  ;;  %vm17242_vm6 = vmmov %vm17158_vm1 }
 0xfb8   :  { %6295 = vmatmul.msk.f32.vlgmr.msrb.gmra.mxu3 %vm17216_vm14, %v15196_v34  ;;  %vm17236_vm14 = vmmov %vm17158_vm1 }
 0xfb9   :  { %6063 = vmatpush.msra.mxu3 %v5709_v32  ;;  %v15206_v41 = vpop.permute.xlu1 %8930  ;;  %v8976_v32 = vpop.permute.xlu2 %8975  ;;  %v5693_v21 = vsel %vm17220_vm13, %v17219_v17, %v8823_v5  ;;  %v8793_v5 = vunpack.i.h.bf16 %v14906_v16  ;;  %vm17244_vm13 = vcmask 7168  }
 0xfba   :  { %v8978_v11 = vunpack.i.h.bf16 %v8976_v32  ;;  %v8977_v22 = vunpack.i.l.bf16 %v8976_v32 }
 0xfbc   :  { %v5538_v9 = vsel %vm17229_vm4, %v8873_v56, %v8977_v22  ;;  %v8863_v56 = vunpack.i.h.bf16 %v15158_v2  ;;  %vm17253_vm4 = vmmov %vm17158_vm1 }
 0xfc1   :  { %v15208_v12 = vpop.permute.xlu1 %8935 }
 0xfc2   :  { %v8937_v1 = vunpack.i.l.bf16 %v15208_v12 }
 0xfc4   :  { %v5705_v63 = vsel %vm17217_vm3, %v16147_v60, %v8937_v1  ;;  %v8837_v1 = vunpack.i.l.bf16 %v15111_v61  ;;  %vm17240_vm3 = vmmov %vm17158_vm1 }
 0xfc5   :  { %6064 = vmatpush.msra.mxu3 %v5705_v63  ;;  %v8918_v63 = vunpack.i.h.bf16 %v15076_v48 }
 0xfc7   :  { %6065 = vmatpush.msra.mxu3 %v5701_v53 }
 0xfc9   :  { %v8941_v37 = vpop.permute.xlu1 %8940  ;;  %6066 = vmatpush.msra.mxu3 %v15036_v42 }
 0xfca   :  { %v8943_v60 = vunpack.i.h.bf16 %v8941_v37  ;;  %v8942_v47 = vunpack.i.l.bf16 %v8941_v37  ;;  %v17225_v37 = vunpack.i.h.bf16 %v15111_v61 }
 0xfcb   :  { %6067 = vmatpush.msra.mxu3 %v5693_v21 }
 0xfcc   :  { %v5546_v53 = vsel %vm17221_vm9, %v8878_v58, %v8942_v47  ;;  %v5547_v42 = vsel %vm17222_vm8, %v8942_v47, %v8943_v60  ;;  %v5548_v17 = vsel %vm17224_vm12, %v8943_v60, %v17223_v28  ;;  %v5542_v21 = vsel %vm17226_vm10, %v8837_v1, %v17225_v37  ;;  %vm17247_vm9 = vmmov %vm17158_vm1 }
 0xfcd   :  { %5923 = vmatpush.msrb.mxu0 %v5546_v53  ;;  %5943 = vmatpush.msra.mxu1 %v5547_v42  ;;  %v17227_v47 = vunpack.i.l.bf16 %v15076_v48  ;;  %v5539_v58 = vsel %vm17230_vm15, %v8977_v22, %v8978_v11  ;;  %v17232_v48 = vunpack.i.h.bf16 %v14836_v45  ;;  %v17234_v22 = vunpack.i.h.bf16 %v14928_v59  ;;  %vm17248_vm8 = vmmov %vm17158_vm1 }
 0xfce   :  { %5963 = vmatpush.msra.mxu2 %v5548_v17  ;;  %6068 = vmatpush.msra.mxu3 %v14854_v29  ;;  %v17231_v29 = vunpack.i.l.bf16 %v15149_v14  ;;  %v17235_v14 = vunpack.i.l.bf16 %v14928_v59  ;;  %v17239_v1 = vunpack.i.l.bf16 %v14859_v30  ;;  %v17241_v53 = vunpack.i.h.bf16 %v14918_v10  ;;  %vm17249_vm12 = vmmov %vm17244_vm13 }
 0xfcf   :  { %5924 = vmatpush.msrb.mxu0 %v5542_v21  ;;  %5944 = vmatpush.msra.mxu1 %v15119_v18  ;;  %v5685_v8 = vsel %vm17228_vm11, %v17227_v47, %v8918_v63  ;;  %v8797_v18 = vunpack.i.l.bf16 %v14918_v10  ;;  %v8903_v63 = vunpack.i.h.bf16 %v15053_v51  ;;  %v8963_v28 = vunpack.i.h.bf16 %v15121_v36  ;;  %vm17250_vm10 = vmmov %vm17158_vm1  ;;  %v15299_v47 = vpop.permute.xlu0 %8985 }
 0xfd0   :  { %5964 = vmatpush.msra.mxu2 %v14946_v19  ;;  %6069 = vmatpush.msra.mxu3 %v5685_v8  ;;  %v5540_v61 = vsel %vm17158_vm1, %v8978_v11, %v17231_v29  ;;  %v5534_v19 = vsel %vm17233_vm5, %v8782_v6, %v17232_v48  ;;  %v5536_v11 = vsel %vm17236_vm14, %v17235_v14, %v17234_v22  ;;  %v17245_v10 = vunpack.i.h.bf16 %v15078_v23  ;;  %vm17252_vm11 = vmmov %vm17158_vm1  ;;  %v15319_v22 = vpop.permute.xlu2 %8995 }
 0xfd1   :  { %v8966_v60 = vpop.permute.xlu1 %8965  ;;  %5925 = vmatpush.msrb.mxu0 %v5538_v9  ;;  %5945 = vmatpush.msra.mxu1 %v5539_v58  ;;  %v5526_v42 = vsel %vm17242_vm6, %v8797_v18, %v17241_v53  ;;  %v17246_v17 = vunpack.i.l.bf16 %v15078_v23  ;;  %v17254_v9 = vunpack.i.l.bf16 %v15121_v36  ;;  %vm17255_vm15 = vmmov %vm17249_vm12  ;;  %v8923_v29 = vunpack.i.h.bf16 %v15181_v57  ;;  %v17258_v18 = vld [vmem:[#allocation57_spill] sm:$0xff] }
 0xfd2   :  { %5965 = vmatpush.msra.mxu2 %v5540_v61  ;;  %6070 = vmatpush.msra.mxu3 %v15068_v49  ;;  %v8967_v32 = vunpack.i.l.bf16 %v8966_v60  ;;  %v8858_v49 = vunpack.i.h.bf16 %v15151_v13  ;;  %v8968_v45 = vunpack.i.h.bf16 %v8966_v60  ;;  %v17256_v61 = vunpack.i.h.bf16 %v15014_v55  ;;  %vm17257_vm5 = vmmov %vm17158_vm1 }
 0xfd3   :  { %5926 = vmatpush.msrb.mxu0 %v5534_v19  ;;  %5946 = vmatpush.msra.mxu1 %v14953_v25  ;;  %v17238_v25 = vunpack.i.h.bf16 %v14859_v30  ;;  %v17243_v30 = vunpack.i.l.bf16 %v14906_v16  ;;  %v5528_v6 = vsel %vm17247_vm9, %v17246_v17, %v17245_v10  ;;  %v5857_v58 = vsel %vm17255_vm15, %v17254_v9, %v8963_v28  ;;  %vm17259_vm14 = vmmov %vm17158_vm1  ;;  %v17289_v9 = vld [vmem:[#allocation130_spill] sm:$0xff] }
 0xfd4   :  { %5966 = vmatpush.msra.mxu2 %v5536_v11  ;;  %6071 = vmatpush.msra.mxu3 %v14622_v43  ;;  %v8862_v43 = vunpack.i.l.bf16 %v15158_v2  ;;  %v8697_v2 = vunpack.i.l.bf16 %v14686_v54  ;;  %v5523_v21 = vsel %vm17250_vm10, %v8967_v32, %v8968_v45  ;;  %v8743_v19 = vunpack.i.h.bf16 %v14730_v46  ;;  %vm17274_vm15 = vmmov %vm17249_vm12 }
 0xfd5   :  { %6299 = vmatmul.msk.f32.vlgmr.msra.gmra.mxu3 %vm17237_vm7, %v15196_v34  ;;  %5927 = vmatpush.msrb.mxu0 %v14879_v7  ;;  %v5531_v59 = vsel %vm17240_vm3, %v17239_v1, %v17238_v25  ;;  %v8957_v7 = vunpack.i.l.bf16 %v15123_v31  ;;  %v5865_v51 = vsel %vm17244_vm13, %v17243_v30, %v8793_v5  ;;  %v17260_v36 = vunpack.i.h.bf16 %v14686_v54  ;;  %vm17261_vm7 = vmmov %vm17158_vm1 }
 0xfd6   :  { %6143 = vmatpush.msrb.mxu3 %v15132_v20  ;;  %5947 = vmatpush.msra.mxu1 %v5531_v59  ;;  %v8907_v20 = vunpack.i.l.bf16 %v15014_v55  ;;  %v5518_v8 = vsel %vm17253_vm4, %v8862_v43, %v8863_v56  ;;  %v5514_v48 = vsel %vm17259_vm14, %v17258_v18, %v8697_v2  ;;  %v8933_v14 = vunpack.i.h.bf16 %v15206_v41  ;;  %vm17277_vm14 = vmmov %vm17249_vm12 }
 0xfd7   :  { %5967 = vmatpush.msra.mxu2 %v15004_v27  ;;  %5928 = vmatpush.msrb.mxu0 %v5526_v42  ;;  %v5522_v27 = vsel %vm17248_vm8, %v8903_v63, %v8967_v32  ;;  %v5861_v16 = vsel %vm17249_vm12, %v8858_v49, %v8957_v7  ;;  %v5515_v5 = vsel %vm17261_vm7, %v8697_v2, %v17260_v36  ;;  %v8932_v11 = vunpack.i.l.bf16 %v15206_v41  ;;  %v15360_v28 = vpop.permute.xlu0 %9000 }
 0xfd8   :  { %6144 = vmatpush.msrb.mxu3 %v5865_v51  ;;  %5948 = vmatpush.msra.mxu1 %v15097_v26  ;;  %v17251_v26 = vunpack.i.l.bf16 %v15165_v0  ;;  %v5519_v60 = vsel %vm17158_vm1, %v8863_v56, %v8907_v20  ;;  %v5520_v0 = vsel %vm17257_vm5, %v8907_v20, %v17256_v61  ;;  %v8952_v55 = vunpack.i.l.bf16 %v15109_v38  ;;  %v15398_v18 = vpop.permute.xlu2 %9010 }
 0xfd9   :  { %5968 = vmatpush.msra.mxu2 %v5528_v6  ;;  %v15296_v37 = vpop.permute.xlu1 %8990  ;;  %5929 = vmatpush.msrb.mxu0 %v5522_v27  ;;  %vm17262_vm3 = vcmask 588800   ;;  %v8843_v54 = vunpack.i.h.bf16 %v14911_v52  ;;  %v8938_v25 = vunpack.i.h.bf16 %v15208_v12  ;;  %vm17266_vm9 = vcmask 130048  }
 0xfda   :  { %6145 = vmatpush.msrb.mxu3 %v5861_v16  ;;  %5949 = vmatpush.msra.mxu1 %v5523_v21  ;;  %v5524_v23 = vsel %vm17252_vm11, %v8968_v45, %v17251_v26  ;;  %v8993_v32 = vunpack.i.h.bf16 %v15296_v37  ;;  %v8842_v45 = vunpack.i.l.bf16 %v14911_v52  ;;  %vm17263_vm6 = vmmov %vm17262_vm3  ;;  %v8997_v1 = vunpack.i.l.bf16 %v15319_v22  ;;  %v17281_v21 = vld [vmem:[#allocation118_spill] sm:$0xff] }
 0xfdb   :  { %5969 = vmatpush.msra.mxu2 %v5524_v23  ;;  %5930 = vmatpush.msrb.mxu0 %v5518_v8  ;;  %vm17264_vm13 = vmmov %vm17262_vm3  ;;  %v17267_v52 = vunpack.i.l.bf16 %v15060_v50  ;;  %v17269_v59 = vunpack.i.l.bf16 %v14730_v46  ;;  %v17272_v50 = vunpack.i.h.bf16 %v15109_v38  ;;  %v8922_v30 = vunpack.i.l.bf16 %v15181_v57 }
 0xfdc   :  { %6146 = vmatpush.msrb.mxu3 %v5857_v58  ;;  %5950 = vmatpush.msra.mxu1 %v5519_v60  ;;  %vm17268_vm8 = vmmov %vm17266_vm9  ;;  %v5845_v7 = vsel %vm17274_vm15, %v8993_v32, %v8997_v1  ;;  %v17279_v10 = vunpack.i.h.bf16 %v14772_v3  ;;  %v8777_v17 = vunpack.i.l.bf16 %v14802_v35  ;;  %v8748_v6 = vunpack.i.h.bf16 %v14930_v39  ;;  %v17305_v1 = vld [vmem:[#allocation117_spill] sm:$0xff] }
 0xfdd   :  { %5970 = vmatpush.msra.mxu2 %v5520_v0  ;;  %5931 = vmatpush.msrb.mxu0 %v5514_v48  ;;  %v5708_v12 = vsel %vm17268_vm8, %v8923_v29, %v17267_v52  ;;  %v5849_v63 = vsel %vm17249_vm12, %v17269_v59, %v8743_v19  ;;  %vm17270_vm10 = vmmov %vm17268_vm8  ;;  %v8747_v27 = vunpack.i.l.bf16 %v14930_v39  ;;  %v8763_v16 = vunpack.i.h.bf16 %v14831_v62  ;;  %v17294_v48 = vld [vmem:[#allocation110_spill] sm:$0xff] }
 0xfde   :  { %6147 = vmatpush.msrb.mxu3 %v15041_v33  ;;  %5951 = vmatpush.msra.mxu1 %v5515_v5  ;;  %v17265_v33 = vunpack.i.l.bf16 %v14920_v4  ;;  %v5702_v43 = vsel %vm17270_vm10, %v8932_v11, %v8933_v14  ;;  %vm17271_vm11 = vmmov %vm17268_vm8  ;;  %v17283_v26 = vunpack.i.h.bf16 %v17282_v15  ;;  %v17287_v8 = vunpack.i.h.bf16 %v14920_v4  ;;  %v17299_v11 = vld [vmem:[#allocation62_spill] sm:$0xff] }
 0xfdf   :  { %5971 = vmatpush.msra.mxu2 %v14799_v44  ;;  %6292 = vmatmul.msk.f32.vlgmr.msrb.gmra.mxu0 %vm17262_vm3, %v15196_v34  ;;  %v8752_v44 = vunpack.i.l.bf16 %v14772_v3  ;;  %v5703_v53 = vsel %vm17271_vm11, %v8933_v14, %v8952_v55  ;;  %vm17273_vm4 = vmmov %vm17268_vm8  ;;  %v17292_v4 = vunpack.i.h.bf16 %v14802_v35  ;;  %v17295_v19 = vunpack.i.h.bf16 %v17294_v48  ;;  %v15410_v35 = vpop.permute.xlu0 %9015 }
 0xfe0   :  { %6293 = vmatmul.msk.f32.vlgmr.msra.gmra.mxu1 %vm17263_vm6, %v15196_v34  ;;  %6294 = vmatmul.msk.f32.vlgmr.msra.gmra.mxu2 %vm17264_vm13, %v15196_v34  ;;  %v5707_v41 = vsel %vm17266_vm9, %v17265_v33, %v8923_v29  ;;  %v5704_v46 = vsel %vm17273_vm4, %v8952_v55, %v17272_v50  ;;  %vm17275_vm1 = vmmov %vm17273_vm4  ;;  %v17296_v36 = vunpack.i.l.bf16 %v17294_v48  ;;  %v8518_v55 = vunpack.i.h.bf16 %v17299_v11  ;;  %v17313_v50 = vld [vmem:[#allocation113_spill] sm:$0xff] }
 0xfe1   :  { %6003 = vmatpush.msra.mxu0 %v15046_v24  ;;  %6023 = vmatpush.msrb.mxu1 %v5707_v41  ;;  %v15348_v56 = vpop.permute.xlu1 %9005  ;;  %v5698_v51 = vsel %vm17275_vm1, %v8842_v45, %v8843_v54  ;;  %vm17276_vm5 = vmmov %vm17275_vm1  ;;  %v17301_v45 = vld [vmem:[#allocation125_spill] sm:$0xff]  ;;  %v17303_v41 = vld [vmem:[#allocation96_spill] sm:$0xff]  ;;  %v17306_v52 = vunpack.i.h.bf16 %v17305_v1 }
 0xfe2   :  { %6043 = vmatpush.msrb.mxu2 %v5708_v12  ;;  %6148 = vmatpush.msrb.mxu3 %v5849_v63  ;;  %v9008_v42 = vunpack.i.h.bf16 %v15348_v56  ;;  %v9007_v24 = vunpack.i.l.bf16 %v15348_v56  ;;  %v5699_v2 = vsel %vm17276_vm5, %v8843_v54, %v8938_v25  ;;  %vm17278_vm7 = vmmov %vm17275_vm1  ;;  %v17300_v54 = vld [vmem:[#allocation116_spill] sm:$0xff]  ;;  %v17307_v12 = vunpack.i.l.bf16 %v17305_v1  ;;  %v17309_v63 = vld [vmem:[#allocation59_spill] sm:$0xff] }
 0xfe3   :  { %6004 = vmatpush.msra.mxu0 %v5702_v43  ;;  %6024 = vmatpush.msrb.mxu1 %v5703_v53  ;;  %v5700_v20 = vsel %vm17278_vm7, %v8938_v25, %v8892_v40  ;;  %vm17280_vm3 = vmmov %vm17275_vm1  ;;  %v17284_v40 = vunpack.i.l.bf16 %v17282_v15  ;;  %v17302_v25 = vld [vmem:[#allocation53_spill] sm:$0xff]  ;;  %v17310_v43 = vunpack.i.h.bf16 %v17309_v63  ;;  %v17311_v53 = vunpack.i.l.bf16 %v17309_v63 }
 0xfe4   :  { %6044 = vmatpush.msrb.mxu2 %v5704_v46  ;;  %6149 = vmatpush.msrb.mxu3 %v5845_v7  ;;  %v5841_v38 = vsel %vm17277_vm14, %v9007_v24, %v9008_v42  ;;  %v5694_v57 = vsel %vm17280_vm3, %v8752_v44, %v17279_v10  ;;  %vm17285_vm6 = vmmov %vm17275_vm1  ;;  %v8802_v33 = vunpack.i.l.bf16 %v17302_v25  ;;  %v17304_v44 = vld [vmem:[#allocation124_spill] sm:$0xff]  ;;  %vm17312_vm5 = vcmask 588800   ;;  %v17314_v46 = vld [vmem:[#allocation95_spill] sm:$0xff] }
 0xfe5   :  { %6005 = vmatpush.msra.mxu0 %v5698_v51  ;;  %6025 = vmatpush.msrb.mxu1 %v5699_v2  ;;  %v5696_v3 = vsel %vm17285_vm6, %v17284_v40, %v17283_v26  ;;  %vm17286_vm13 = vmmov %vm17275_vm1  ;;  %v5674_v42 = vsel %vm17275_vm1, %v17311_v53, %v17310_v43  ;;  %v17315_v7 = vunpack.i.h.bf16 %v17314_v46  ;;  %v17318_v2 = vld [vmem:[#allocation104_spill] sm:$0xff]  ;;  %vm17319_vm7 = vcmask 908288   ;;  %v17329_v26 = vld [vmem:[#allocation99_spill] sm:$0xff]  ;;  %v9026_v40 = vpop.permute.xlu2 %9025 }
 0xfe6   :  { %6045 = vmatpush.msrb.mxu2 %v5700_v20  ;;  %6150 = vmatpush.msrb.mxu3 %v5841_v38  ;;  %v5690_v23 = vsel %vm17286_vm13, %v8763_v16, %v8922_v30  ;;  %vm17288_vm9 = vmmov %vm17275_vm1  ;;  %v5417_v38 = vsel %vm17319_vm7, %v8518_v55, %v17318_v2  ;;  %v8988_v20 = vunpack.i.h.bf16 %v15299_v47  ;;  %v8987_v10 = vunpack.i.l.bf16 %v15299_v47  ;;  %v17336_v48 = vld [vmem:[#allocation101_spill] sm:$0xff] }
 0xfe7   :  { %6006 = vmatpush.msra.mxu0 %v5694_v57  ;;  %6026 = vmatpush.msrb.mxu1 %v17281_v21  ;;  %v5691_v39 = vsel %vm17288_vm9, %v8922_v30, %v17287_v8  ;;  %vm17290_vm8 = vmmov %vm17275_vm1  ;;  %v17316_v30 = vunpack.i.l.bf16 %v17314_v46  ;;  %v17322_v57 = vunpack.i.h.bf16 %v17302_v25  ;;  %v9002_v15 = vunpack.i.l.bf16 %v15360_v28  ;;  %v17332_v8 = vld [vmem:[#allocation150_spill] sm:$0xff]  ;;  %v17351_v46 = vld [vmem:[#allocation127_spill] sm:$0xff] }
 0xfe8   :  { %6046 = vmatpush.msrb.mxu2 %v5696_v3  ;;  %v5686_v58 = vsel %vm17290_vm8, %v8747_v27, %v8748_v6  ;;  %vm17291_vm12 = vmmov %vm17275_vm1  ;;  %v17325_v27 = vld [vmem:[#allocation142_spill] sm:$0xff] }
 0xfe9   :  { %6007 = vmatpush.msra.mxu0 %v5690_v23  ;;  %6027 = vmatpush.msrb.mxu1 %v5691_v39  ;;  %v15388_v62 = vpop.permute.xlu1 %9020  ;;  %v5687_v60 = vsel %vm17291_vm12, %v8748_v6, %v8777_v17  ;;  %vm17293_vm10 = vmmov %vm17275_vm1  ;;  %v8857_v6 = vunpack.i.l.bf16 %v15151_v13  ;;  %v17326_v16 = vunpack.i.h.bf16 %v17325_v27  ;;  %v17327_v47 = vunpack.i.l.bf16 %v17325_v27  ;;  %v17330_v3 = vld [vmem:[#allocation102_spill] sm:$0xff]  ;;  %v17331_v23 = vld [vmem:[#allocation120_spill] sm:$0xff] }
 0xfea   :  { %6047 = vmatpush.msrb.mxu2 %v17289_v9  ;;  %v9023_v29 = vunpack.i.h.bf16 %v15388_v62  ;;  %v9022_v61 = vunpack.i.l.bf16 %v15388_v62  ;;  %v5688_v0 = vsel %vm17293_vm10, %v8777_v17, %v17292_v4  ;;  %vm17297_vm11 = vmmov %vm17275_vm1  ;;  %v17333_v39 = vunpack.i.h.bf16 %v17332_v8  ;;  %v17344_v13 = vld [vmem:[#allocation42_spill] sm:$0xff] }
 0xfeb   :  { %6008 = vmatpush.msra.mxu0 %v5686_v58  ;;  %6028 = vmatpush.msrb.mxu1 %v5687_v60  ;;  %v5683_v5 = vsel %vm17297_vm11, %v17296_v36, %v17295_v19  ;;  %vm17298_vm4 = vmmov %vm17277_vm14  ;;  %v17334_v9 = vunpack.i.l.bf16 %v17332_v8  ;;  %v8998_v60 = vunpack.i.h.bf16 %v15319_v22  ;;  %v9012_v4 = vunpack.i.l.bf16 %v15398_v18  ;;  %v17338_v36 = vld [vmem:[#allocation54_spill] sm:$0xff] }
 0xfec   :  { %6048 = vmatpush.msrb.mxu2 %v5688_v0  ;;  %v5837_v14 = vsel %vm17298_vm4, %v9022_v61, %v9023_v29  ;;  %vm17308_vm15 = vmmov %vm17275_vm1  ;;  %v9013_v29 = vunpack.i.h.bf16 %v15398_v18  ;;  %v17335_v0 = vld [vmem:[#allocation121_spill] sm:$0xff]  ;;  %v9017_v18 = vunpack.i.l.bf16 %v15410_v35  ;;  %v17348_v43 = vunpack.i.h.bf16 %v17338_v36  ;;  %v17378_v62 = vld [vmem:[#allocation86_spill] sm:$0xff] }
 0xfed   :  { %6009 = vmatpush.msra.mxu0 %v17300_v54  ;;  %6029 = vmatpush.msrb.mxu1 %v5683_v5  ;;  %v5680_v59 = vsel %vm17308_vm15, %v17307_v12, %v17306_v52  ;;  %vm17317_vm14 = vmmov %vm17275_vm1  ;;  %v5379_v58 = vsel %vm121_vm0, %v17334_v9, %v17333_v39  ;;  %v8897_v5 = vunpack.i.l.bf16 %v17338_v36  ;;  %v5854_v25 = vsel %vm17298_vm4, %v8998_v60, %v9002_v15  ;;  %v17371_v9 = vld [vmem:[#allocation83_spill] sm:$0xff] }
 0xfee   :  { %6049 = vmatpush.msrb.mxu2 %v17301_v45  ;;  %6151 = vmatpush.msrb.mxu3 %v5837_v14  ;;  %v5676_v51 = vsel %vm17317_vm14, %v17316_v30, %v17315_v7  ;;  %vm17320_vm3 = vmmov %vm17312_vm5  ;;  %v9031_v14 = vpop.permute.xlu0 %9030  ;;  %v9027_v45 = vunpack.i.l.bf16 %v9026_v40  ;;  %v8992_v12 = vunpack.i.l.bf16 %v15296_v37  ;;  %v17352_v7 = vld [vmem:[#allocation112_spill] sm:$0xff]  ;;  %v17384_v36 = vld [vmem:[#allocation63_spill] sm:$0xff] }
 0xfef   :  { %6010 = vmatpush.msra.mxu0 %v17303_v41  ;;  %6030 = vmatpush.msrb.mxu1 %v17304_v44  ;;  %vm17321_vm6 = vmmov %vm17320_vm3  ;;  %v17341_v41 = vld [vmem:[#allocation128_spill] sm:$0xff]  ;;  %v17342_v44 = vunpack.i.h.bf16 %v15123_v31  ;;  %v9032_v52 = vunpack.i.l.bf16 %v9031_v14  ;;  %v9028_v31 = vunpack.i.h.bf16 %v9026_v40  ;;  %v17353_v30 = vunpack.i.h.bf16 %v17352_v7  ;;  %v17363_v40 = vld [vmem:[#allocation107_spill] sm:$0xff] }
 0xff0   :  { %6050 = vmatpush.msrb.mxu2 %v5680_v59  ;;  %6303 = vmatmul.msk.f32.vlgmr.msrb.gmra.mxu3 %vm17312_vm5, %v15196_v34  ;;  %vm17323_vm13 = vmmov %vm17298_vm4  ;;  %v17346_v59 = vld [vmem:[#allocation151_spill] sm:$0xff]  ;;  %v9033_v2 = vunpack.i.h.bf16 %v9031_v14  ;;  %v17386_v14 = vunpack.i.l.bf16 %v17384_v36 }
 0xff1   :  { %6011 = vmatpush.msra.mxu0 %v5674_v42  ;;  %6031 = vmatpush.msrb.mxu1 %v17313_v50  ;;  %v5866_v17 = vsel %vm17323_vm13, %v8802_v33, %v17322_v57  ;;  %vm17324_vm9 = vmmov %vm17320_vm3  ;;  %v9036_v33 = vpop.permute.xlu1 %9035 }
 0xff2   :  { %6051 = vmatpush.msrb.mxu2 %v5676_v51  ;;  %6223 = vmatpush.msra.mxu3 %v5417_v38  ;;  %vm17328_vm8 = vmmov %vm17298_vm4  ;;  %v9037_v42 = vunpack.i.l.bf16 %v9036_v33  ;;  %v9038_v38 = vunpack.i.h.bf16 %v9036_v33 }
 0xff3   :  { %6296 = vmatmul.msk.f32.vlgmr.msra.gmra.mxu0 %vm17320_vm3, %v15196_v34  ;;  %6297 = vmatmul.msk.f32.vlgmr.msrb.gmra.mxu1 %vm17321_vm6, %v15196_v34  ;;  %v5868_v21 = vsel %vm17328_vm8, %v17327_v47, %v17326_v16  ;;  %vm17337_vm12 = vmmov %vm17298_vm4  ;;  %v9003_v16 = vunpack.i.h.bf16 %v15360_v28 }
 0xff4   :  { %6298 = vmatmul.msk.f32.vlgmr.msrb.gmra.mxu2 %vm17324_vm9, %v15196_v34  ;;  %6083 = vmatpush.msrb.mxu0 %v5866_v17  ;;  %v5858_v19 = vsel %vm17337_vm12, %v8987_v10, %v8988_v20  ;;  %vm17339_vm10 = vmmov %vm17298_vm4  ;;  %v17356_v10 = vld [vmem:[#allocation55_spill] sm:$0xff] }
 0xff5   :  { %6103 = vmatpush.msra.mxu1 %v17329_v26  ;;  %6123 = vmatpush.msra.mxu2 %v5868_v21  ;;  %v5859_v54 = vsel %vm17339_vm10, %v8988_v20, %v8857_v6  ;;  %vm17340_vm11 = vmmov %vm17298_vm4  ;;  %v17355_v20 = vld [vmem:[#allocation114_spill] sm:$0xff]  ;;  %v17357_v57 = vunpack.i.h.bf16 %v17356_v10  ;;  %v17358_v17 = vunpack.i.l.bf16 %v17356_v10  ;;  %v9018_v26 = vunpack.i.h.bf16 %v15410_v35 }
 0xff6   :  { %6224 = vmatpush.msra.mxu3 %v17330_v3  ;;  %6084 = vmatpush.msrb.mxu0 %v17331_v23  ;;  %v5860_v22 = vsel %vm17340_vm11, %v8857_v6, %v8858_v49  ;;  %vm17343_vm15 = vmmov %vm17298_vm4  ;;  %v17366_v23 = vld [vmem:[#allocation129_spill] sm:$0xff]  ;;  %v17411_v10 = vld [vmem:[#allocation74_spill] sm:$0xff] }
 0xff7   :  { %6104 = vmatpush.msra.mxu1 %v17335_v0  ;;  %6124 = vmatpush.msra.mxu2 %v17336_v48  ;;  %v5855_v1 = vsel %vm17343_vm15, %v9002_v15, %v17342_v44  ;;  %vm17345_vm1 = vmmov %vm17298_vm4  ;;  %v5345_v6 = vsel %vm181_vm2, %v17358_v17, %v17357_v57  ;;  %v8447_v8 = vunpack.i.l.bf16 %v17366_v23  ;;  %v17376_v56 = vunpack.i.h.bf16 %v17366_v23  ;;  %v17393_v44 = vld [vmem:[#allocation109_spill] sm:$0xff]  ;;  %v17412_v57 = vld [vmem:[#allocation91_spill] sm:$0xff] }
 0xff8   :  { %6225 = vmatpush.msra.mxu3 %v5379_v58  ;;  %6085 = vmatpush.msrb.mxu0 %v5858_v19  ;;  %v5850_v49 = vsel %vm17345_vm1, %v9012_v4, %v9013_v29  ;;  %vm17347_vm5 = vmmov %vm17345_vm1  ;;  %v8537_v58 = vunpack.i.l.bf16 %v17371_v9  ;;  %v17382_v0 = vunpack.i.h.bf16 %v17371_v9  ;;  %v17383_v19 = vld [vmem:[#allocation103_spill] sm:$0xff]  ;;  %v17413_v17 = vld [vmem:[#allocation61_spill] sm:$0xff] }
 0xff9   :  { %6105 = vmatpush.msra.mxu1 %v5859_v54  ;;  %6125 = vmatpush.msra.mxu2 %v5860_v22  ;;  %v5851_v63 = vsel %vm17347_vm5, %v9013_v29, %v8897_v5  ;;  %vm17349_vm14 = vmmov %vm17345_vm1  ;;  %v17381_v29 = vld [vmem:[#allocation100_spill] sm:$0xff] }
 0xffa   :  { %6226 = vmatpush.msra.mxu3 %v17341_v41  ;;  %6086 = vmatpush.msrb.mxu0 %v5854_v25  ;;  %v5852_v53 = vsel %vm17349_vm14, %v8897_v5, %v17348_v43  ;;  %vm17350_vm7 = vmmov %vm17345_vm1  ;;  %v8612_v4 = vunpack.i.l.bf16 %v17381_v29  ;;  %v5392_v48 = vsel %vm121_vm0, %v8537_v58, %v17382_v0  ;;  %v17385_v5 = vunpack.i.h.bf16 %v17384_v36  ;;  %v17391_v25 = vld [vmem:[#allocation79_spill] sm:$0xff] }
 0xffb   :  { %6106 = vmatpush.msra.mxu1 %v5855_v1  ;;  %6126 = vmatpush.msra.mxu2 %v17344_v13  ;;  %v5846_v50 = vsel %vm17350_vm7, %v9017_v18, %v9027_v45  ;;  %vm17354_vm3 = vmmov %vm17345_vm1  ;;  %v17392_v33 = vunpack.i.h.bf16 %v17381_v29  ;;  %v17394_v1 = vld [vmem:[#allocation98_spill] sm:$0xff]  ;;  %v17400_v43 = vld [vmem:[#allocation123_spill] sm:$0xff] }
 0xffc   :  { %6227 = vmatpush.msra.mxu3 %v17346_v59  ;;  %6087 = vmatpush.msrb.mxu0 %v5850_v49  ;;  %v5847_v51 = vsel %vm17354_vm3, %v9027_v45, %v17353_v30  ;;  %vm17359_vm6 = vmmov %vm17345_vm1  ;;  %vm17377_vm3 = vcmask 908288   ;;  %v5394_v54 = vsel %vm121_vm0, %v17386_v14, %v17385_v5  ;;  %v17396_v13 = vunpack.i.l.bf16 %v17394_v1  ;;  %v17398_v59 = vld [vmem:[#allocation93_spill] sm:$0xff]  ;;  %v17406_v30 = vld [vmem:[#allocation122_spill] sm:$0xff] }
 0xffd   :  { %6107 = vmatpush.msra.mxu1 %v5851_v63  ;;  %6127 = vmatpush.msra.mxu2 %v5852_v53  ;;  %v5842_v27 = vsel %vm17359_vm6, %v9028_v31, %v9032_v52  ;;  %vm17360_vm13 = vmmov %vm17345_vm1  ;;  %v5358_v41 = vsel %vm181_vm2, %v8612_v4, %v17392_v33  ;;  %v17399_v63 = vld [vmem:[#allocation152_spill] sm:$0xff]  ;;  %v17401_v53 = vld [vmem:[#allocation87_spill] sm:$0xff] }
 0xffe   :  { %6228 = vmatpush.msra.mxu3 %v17351_v46  ;;  %6088 = vmatpush.msrb.mxu0 %v5846_v50  ;;  %v5843_v47 = vsel %vm17360_vm13, %v9032_v52, %v8992_v12  ;;  %vm17361_vm9 = vmmov %vm17345_vm1  ;;  %v17395_v52 = vunpack.i.h.bf16 %v17394_v1  ;;  %v17402_v31 = vld [vmem:[#allocation80_spill] sm:$0xff] }
 0xfff   :  { %6108 = vmatpush.msra.mxu1 %v5847_v51  ;;  %6128 = vmatpush.msra.mxu2 %v17355_v20  ;;  %v5844_v21 = vsel %vm17361_vm9, %v8992_v12, %v8993_v32  ;;  %vm17362_vm8 = vmmov %vm17345_vm1  ;;  %v17368_v32 = vld [vmem:[#allocation60_spill] sm:$0xff]  ;;  %v17397_v12 = vld [vmem:[#allocation90_spill] sm:$0xff] }
0x1000   :  { %6229 = vmatpush.msra.mxu3 %v5345_v6  ;;  %6089 = vmatpush.msrb.mxu0 %v5842_v27  ;;  %v5838_v15 = vsel %vm17362_vm8, %v9033_v2, %v9037_v42  ;;  %vm17364_vm12 = vmmov %vm17345_vm1  ;;  %v5360_v49 = vsel %vm181_vm2, %v17396_v13, %v17395_v52  ;;  %v17407_v51 = vld [vmem:[#allocation58_spill] sm:$0xff]  ;;  %v17408_v2 = vld [vmem:[#allocation89_spill] sm:$0xff]  ;;  %v5911_v6 = vpop.permute.xlu2 %5910 }
0x1001   :  { %6109 = vmatpush.msra.mxu1 %v5843_v47  ;;  %6129 = vmatpush.msra.mxu2 %v5844_v21  ;;  %v5839_v3 = vsel %vm17364_vm12, %v9037_v42, %v9003_v16  ;;  %vm17365_vm10 = vmmov %vm17345_vm1  ;;  %v17403_v42 = vld [vmem:[#allocation71_spill] sm:$0xff]  ;;  %v17410_v20 = vld [vmem:[#allocation76_spill] sm:$0xff] }
0x1002   :  { %6230 = vmatpush.msra.mxu3 %v17363_v40  ;;  %6090 = vmatpush.msrb.mxu0 %v5838_v15  ;;  %v5840_v28 = vsel %vm17365_vm10, %v9003_v16, %v9007_v24  ;;  %vm17367_vm11 = vmmov %vm17345_vm1  ;;  %v5414_v24 = vsel %vm17377_vm3, %v8447_v8, %v17376_v56  ;;  %v17404_v50 = vunpack.i.h.bf16 %v17403_v42  ;;  %v17405_v46 = vunpack.i.l.bf16 %v17403_v42 }
0x1003   :  { %6110 = vmatpush.msra.mxu1 %v5839_v3  ;;  %6130 = vmatpush.msra.mxu2 %v5840_v28  ;;  %v5834_v37 = vsel %vm17367_vm11, %v9017_v18, %v9038_v38  ;;  %vm17369_vm4 = vmmov %vm17345_vm1  ;;  %v17390_v18 = vld [vmem:[#allocation56_spill] sm:$0xff] }
0x1004   :  { %6231 = vmatpush.msra.mxu3 %v17368_v32  ;;  %6091 = vmatpush.msrb.mxu0 %v5834_v37  ;;  %v5835_v35 = vsel %vm17369_vm4, %v9038_v38, %v9018_v26  ;;  %vm17370_vm15 = vmmov %vm17345_vm1  ;;  %vm17372_vm1 = vcmask 588800   ;;  %v5343_v7 = vsel %vm181_vm2, %v17405_v46, %v17404_v50  ;;  %v17409_v38 = vld [vmem:[#allocation111_spill] sm:$0xff] }
0x1005   :  { %v5836_v39 = vsel %vm17370_vm15, %v9018_v26, %v9022_v61  ;;  %6111 = vmatpush.msra.mxu1 %v5835_v35  ;;  %6307 = vmatmul.msk.f32.vlgmr.msra.gmra.mxu3 %vm17372_vm1, %v15196_v34  ;;  %vm17373_vm5 = vmmov %vm17372_vm1  ;;  %v17379_v61 = vunpack.i.l.bf16 %v17299_v11  ;;  %v17387_v11 = vld [vmem:[#allocation51_spill] sm:$0xff] }
0x1006   :  { %6131 = vmatpush.msra.mxu2 %v5836_v39  ;;  %6300 = vmatmul.msk.f32.vlgmr.msrb.gmra.mxu0 %vm17373_vm5, %v15196_v34  ;;  %vm17374_vm14 = vmmov %vm17372_vm1  ;;  %v17388_v22 = vunpack.i.h.bf16 %v17387_v11 }
0x1007   :  { %6301 = vmatmul.msk.f32.vlgmr.msra.gmra.mxu1 %vm17374_vm14, %v15196_v34  ;;  %vm17375_vm7 = vmmov %vm17372_vm1  ;;  %6163 = vmatpush.msra.mxu0 %v5414_v24 }
0x1008   :  { %6302 = vmatmul.msk.f32.vlgmr.msra.gmra.mxu2 %vm17375_vm7, %v15196_v34  ;;  %6183 = vmatpush.msrb.mxu1 %v17378_v62  ;;  %vm17380_vm6 = vmmov %vm17377_vm3 }
0x1009   :  { %v5416_v60 = vsel %vm17380_vm6, %v17379_v61, %v8518_v55  ;;  %6164 = vmatpush.msra.mxu0 %v5392_v48  ;;  %v17389_v55 = vunpack.i.l.bf16 %v17387_v11 }
0x100a   :  { %6203 = vmatpush.msrb.mxu2 %v5416_v60  ;;  %6184 = vmatpush.msrb.mxu1 %v17383_v19 }
0x100b   :  { %v5377_v45 = vsel %vm121_vm0, %v17389_v55, %v17388_v22  ;;  %6165 = vmatpush.msra.mxu0 %v17390_v18  ;;  %vm17414_vm0 = vmmov %vm17372_vm1 }
0x100c   :  { %6204 = vmatpush.msrb.mxu2 %v5394_v54  ;;  %6185 = vmatpush.msrb.mxu1 %v5377_v45  ;;  %vm17415_vm2 = vmmov %vm17414_vm0 }
0x100d   :  { %6166 = vmatpush.msra.mxu0 %v5358_v41  ;;  %vm17416_vm13 = vmmov %vm17414_vm0 }
0x100e   :  { %6205 = vmatpush.msrb.mxu2 %v17391_v25  ;;  %6186 = vmatpush.msrb.mxu1 %v17393_v44 }
0x100f   :  { %6167 = vmatpush.msra.mxu0 %v17397_v12 }
0x1010   :  { %6206 = vmatpush.msrb.mxu2 %v5360_v49  ;;  %6187 = vmatpush.msrb.mxu1 %v17398_v59 }
0x1011   :  { %6168 = vmatpush.msra.mxu0 %v17400_v43 }
0x1012   :  { %6207 = vmatpush.msrb.mxu2 %v17399_v63  ;;  %6188 = vmatpush.msrb.mxu1 %v17401_v53 }
0x1013   :  { %6169 = vmatpush.msra.mxu0 %v17406_v30 }
0x1014   :  { %6208 = vmatpush.msrb.mxu2 %v17402_v31  ;;  %6189 = vmatpush.msrb.mxu1 %v5343_v7 }
0x1015   :  { %6170 = vmatpush.msra.mxu0 %v17408_v2 }
0x1016   :  { %6209 = vmatpush.msrb.mxu2 %v17407_v51  ;;  %6190 = vmatpush.msrb.mxu1 %v17409_v38 }
0x1017   :  { %6171 = vmatpush.msra.mxu0 %v17411_v10 }
0x1018   :  { %6210 = vmatpush.msrb.mxu2 %v17410_v20  ;;  %6191 = vmatpush.msrb.mxu1 %v17412_v57 }
0x1019   :  { %6304 = vmatmul.msk.f32.vlgmr.msra.gmra.mxu0 %vm17414_vm0, %v15196_v34  ;;  %6305 = vmatmul.msk.f32.vlgmr.msrb.gmra.mxu1 %vm17415_vm2, %v15196_v34 }
0x101a   :  { %6211 = vmatpush.msrb.mxu2 %v17413_v17 }
0x101b   :  { %6306 = vmatmul.msk.f32.vlgmr.msrb.gmra.mxu2 %vm17416_vm13, %v15196_v34 }
0x103b   :  { %v5993_v27 = vpop.f32.mrf.mxu3 }
0x103c   :  { %v5994_v16 = vadd.f32 %v5993_v27, %v5911_v6 }
0x103e   :  { %6239 = vst [vmem:[%s15653_s16 + $0x18] sm:$0xff] %v5994_v16 }
0x1058   :  { %v6073_v47 = vpop.f32.mrf.mxu3 }
0x1059   :  { %v6074_v21 = vadd.f32 %v6073_v47, %v5911_v6 }
0x105b   :  { %6243 = vst [vmem:[%s15653_s16 + $0x38] sm:$0xff] %v6074_v21 }
0x105c   :  { %v5933_v15 = vpop.f32.mrf.mxu0 }
0x105d   :  { %v5934_v26 = vadd.f32 %v5933_v15, %v5911_v6  ;;  %v5953_v40 = vpop.f32.mrf.mxu1 }
0x105e   :  { %v5954_v3 = vadd.f32 %v5953_v40, %v5911_v6 }
0x105f   :  { %6236 = vst [vmem:[%s15653_s16] sm:$0xff] %v5934_v26 }
0x1060   :  { %6237 = vst [vmem:[%s15653_s16 + $0x8] sm:$0xff] %v5954_v3 }
0x1063   :  { %v5973_v34 = vpop.f32.mrf.mxu2 }
0x1064   :  { %v5974_v28 = vadd.f32 %v5973_v34, %v5911_v6 }
0x1066   :  { %6238 = vst [vmem:[%s15653_s16 + $0x10] sm:$0xff] %v5974_v28 }
0x1070   :  { %v6013_v23 = vpop.f32.mrf.mxu0  ;;  %v6033_v8 = vpop.f32.mrf.mxu1 }
0x1071   :  { %v6014_v37 = vadd.f32 %v6013_v23, %v5911_v6  ;;  %v6034_v32 = vadd.f32 %v6033_v8, %v5911_v6 }
0x1073   :  { %6240 = vst [vmem:[%s15653_s16 + $0x20] sm:$0xff] %v6014_v37  ;;  %v6153_v35 = vpop.f32.mrf.mxu3 }
0x1074   :  { %6241 = vst [vmem:[%s15653_s16 + $0x28] sm:$0xff] %v6034_v32  ;;  %v6154_v39 = vadd.f32 %v6153_v35, %v5911_v6 }
0x1076   :  { %6247 = vst [vmem:[%s15653_s16 + $0x58] sm:$0xff] %v6154_v39 }
0x1077   :  { %v6053_v9 = vpop.f32.mrf.mxu2 }
0x1078   :  { %v6054_v58 = vadd.f32 %v6053_v9, %v5911_v6 }
0x107a   :  { %6242 = vst [vmem:[%s15653_s16 + $0x30] sm:$0xff] %v6054_v58 }
0x1083   :  { %v6093_v56 = vpop.f32.mrf.mxu0 }
0x1084   :  { %v6094_v24 = vadd.f32 %v6093_v56, %v5911_v6  ;;  %v6113_v62 = vpop.f32.mrf.mxu1 }
0x1085   :  { %v6114_v61 = vadd.f32 %v6113_v62, %v5911_v6 }
0x1086   :  { %6244 = vst [vmem:[%s15653_s16 + $0x40] sm:$0xff] %v6094_v24 }
0x1087   :  { %6245 = vst [vmem:[%s15653_s16 + $0x48] sm:$0xff] %v6114_v61 }
0x1088   :  { %v6233_v60 = vpop.f32.mrf.mxu3 }
0x1089   :  { %v6234_v29 = vadd.f32 %v6233_v60, %v5911_v6 }
0x108b   :  { %v6133_v4 = vpop.f32.mrf.mxu2  ;;  %6251 = vst [vmem:[%s15653_s16 + $0x78] sm:$0xff] %v6234_v29 }
0x108c   :  { %v6134_v0 = vadd.f32 %v6133_v4, %v5911_v6 }
0x108e   :  { %6246 = vst [vmem:[%s15653_s16 + $0x50] sm:$0xff] %v6134_v0 }
0x1096   :  { %v6173_v48 = vpop.f32.mrf.mxu0  ;;  %v6193_v36 = vpop.f32.mrf.mxu1 }
0x1097   :  { %v6174_v19 = vadd.f32 %v6173_v48, %v5911_v6  ;;  %v6194_v5 = vadd.f32 %v6193_v36, %v5911_v6 }
0x1099   :  { %6248 = vst [vmem:[%s15653_s16 + $0x60] sm:$0xff] %v6174_v19 }
0x109a   :  { %6249 = vst [vmem:[%s15653_s16 + $0x68] sm:$0xff] %v6194_v5 }
0x109e   :  { %v6213_v14 = vpop.f32.mrf.mxu2 }
0x109f   :  { %v6214_v54 = vadd.f32 %v6213_v14, %v5911_v6 }
0x10a1   :  { %6250 = vst [vmem:[%s15653_s16 + $0x70] sm:$0xff] %v6214_v54 }

</bundles_post_ra>
